<compile_context>
chip_gen: v7x
topology: tpu7x:2x2x1
jax: 0.10.0
libtpu: 0.0.40
codegen_flags: <defaults>
</compile_context>

<pallas_src>
import jax
import jax.numpy as jnp
from jax.experimental import pallas as pl
from jax.experimental.pallas import tpu as pltpu

C_PAD = 128       # channel / class padding (lane width)
K1_PAD = 32       # conv1 im2col contraction size (25 -> 32)


# --------------------------- fused Pallas kernel ---------------------------

def _fused_net_kernel(pat_ref, w1_ref, b1_ref, s1_ref, g_ref, w2_ref, b2_ref,
                      s2_ref, fc1w_ref, fc1b_ref, fc2w_ref, fc2b_ref, out_ref):
    f32, bf16 = jnp.float32, jnp.bfloat16

    # ---- conv1 as one im2col matmul (MXU), bias + ReLU fused ---------------
    out1 = jnp.dot(pat_ref[0], w1_ref[...], preferred_element_type=f32)
    out1 = jnp.maximum(out1 + b1_ref[...], 0.0).astype(bf16)        # (576,128), row = oh*24+ow

    # ---- pool1: 2x2/2 max pool = 4 selector matmuls + elementwise max ------
    p00 = jnp.dot(s1_ref[0], out1, preferred_element_type=f32)
    p01 = jnp.dot(s1_ref[1], out1, preferred_element_type=f32)
    p10 = jnp.dot(s1_ref[2], out1, preferred_element_type=f32)
    p11 = jnp.dot(s1_ref[3], out1, preferred_element_type=f32)
    act1 = jnp.maximum(jnp.maximum(p00, p01),
                       jnp.maximum(p10, p11)).astype(bf16)          # (144,128), row = h*12+w

    # ---- conv2: gather all 25 taps with ONE selector matmul, then a single
    #      K=3200 contraction against the (tap,cin)-flattened weight ---------
    shifted = jnp.dot(g_ref[...], act1, preferred_element_type=f32).astype(bf16)  # (1600,128)
    lhs = jnp.concatenate([shifted[k * 64:(k + 1) * 64, :] for k in range(25)],
                          axis=1)                                    # (64,3200), lane = k*128+ci
    out2 = jnp.dot(lhs, w2_ref[...], preferred_element_type=f32)
    out2 = jnp.maximum(out2 + b2_ref[...], 0.0).astype(bf16)        # (64,128), row = oh*8+ow

    # ---- pool2: 4 selector matmuls + elementwise max ------------------------
    q00 = jnp.dot(s2_ref[0], out2, preferred_element_type=f32)
    q01 = jnp.dot(s2_ref[1], out2, preferred_element_type=f32)
    q10 = jnp.dot(s2_ref[2], out2, preferred_element_type=f32)
    q11 = jnp.dot(s2_ref[3], out2, preferred_element_type=f32)
    act2 = jnp.maximum(jnp.maximum(q00, q01),
                       jnp.maximum(q10, q11)).astype(bf16)          # (16,128), row = h*4+w

    # ---- fc1 (+ReLU): contract over (pixel, channel) as 16 accumulated MXU
    #      dots against the (pixel, cin, out) weight -- no flatten relayout ---
    h1 = fc1b_ref[...]                                               # (1,512) f32
    for p in range(16):
        h1 = h1 + jnp.dot(act2[p:p + 1, :], fc1w_ref[p],
                          preferred_element_type=f32)
    h1 = jnp.maximum(h1, 0.0).astype(bf16)

    # ---- fc2 + masked log_softmax over the 10 real classes ------------------
    h2 = jnp.dot(h1, fc2w_ref[...], preferred_element_type=f32) + fc2b_ref[...]
    lane = jax.lax.broadcasted_iota(jnp.int32, h2.shape, 1)
    valid = lane < 10
    z = jnp.where(valid, h2, -1e30)
    m = jnp.max(z, axis=-1, keepdims=True)
    e = jnp.where(valid, jnp.exp(z - m), 0.0)
    lse = jnp.log(jnp.sum(e, axis=-1, keepdims=True))
    out_ref[0] = z - m - lse                                         # (1,128), [:, :10] real


# ----------------------- host-side constant builders -----------------------

def _pool_selectors(h, dtype):
    # (4, (h/2)^2, h*h) 0/1 matrices: pooled pixel (qh,qw) -> row qh*(h/2)+qw;
    # selector (dy,dx) picks conv-output row (2qh+dy)*h + (2qw+dx).
    q = h // 2
    rows = jnp.arange(q * q)
    qh, qw = rows // q, rows % q
    cols = jnp.arange(h * h)
    sels = []
    for dy in (0, 1):
        for dx in (0, 1):
            src = (2 * qh + dy) * h + (2 * qw + dx)
            sels.append((cols[None, :] == src[:, None]).astype(dtype))
    return jnp.stack(sels)


def _conv2_gather_selector(dtype):
    # (25*64, 144) 0/1 matrix: block k=kh*5+kw, row r=oh*8+ow picks act1 row
    # (oh+kh)*12 + (ow+kw).
    r = jnp.arange(64)
    oh, ow = r // 8, r % 8
    cols = jnp.arange(144)
    blocks = []
    for kh in range(5):
        for kw in range(5):
            src = (oh + kh) * 12 + (ow + kw)
            blocks.append((cols[None, :] == src[:, None]).astype(dtype))
    return jnp.concatenate(blocks, axis=0)


def prepare_params(p):
    # Pad/transpose weights to MXU-friendly bf16 layouts and build selector
    # matrices.  Call ONCE outside jit; pass the returned tuple to net_forward.
    f32, bf16 = jnp.float32, jnp.bfloat16

    w1 = p["conv1_w"].reshape(20, 25).T                              # (k, co)
    w1p = jnp.zeros((K1_PAD, C_PAD), f32).at[:25, :20].set(w1).astype(bf16)
    b1p = jnp.zeros((1, C_PAD), f32).at[0, :20].set(p["conv1_b"])

    w2 = p["conv2_w"].transpose(2, 3, 1, 0).reshape(25, 20, 50)      # (k, ci, co)
    w2p = (jnp.zeros((25, C_PAD, C_PAD), f32).at[:, :20, :50].set(w2)
           .astype(bf16).reshape(25 * C_PAD, C_PAD))                 # (3200,128), row = k*128+ci
    b2p = jnp.zeros((1, C_PAD), f32).at[0, :50].set(p["conv2_b"])

    fc1 = p["fc1_w"].reshape(50, 16, 500).transpose(1, 0, 2)         # (pixel, cin, out)
    fc1p = jnp.zeros((16, C_PAD, 512), f32).at[:, :50, :500].set(fc1).astype(bf16)
    fc1b = jnp.zeros((1, 512), f32).at[0, :500].set(p["fc1_b"])

    fc2p = jnp.zeros((512, C_PAD), f32).at[:500, :10].set(p["fc2_w"]).astype(bf16)
    fc2b = jnp.zeros((1, C_PAD), f32).at[0, :10].set(p["fc2_b"])

    s1 = _pool_selectors(24, bf16)                                   # (4,144,576)
    s2 = _pool_selectors(8, bf16)                                    # (4,16,64)
    g = _conv2_gather_selector(bf16)                                 # (1600,144)

    return (w1p, b1p, s1, g, w2p, b2p, s2, fc1p, fc1b, fc2p, fc2b)


def _conv1_patches(x):
    # (N,1,28,28) -> (N,576,32) bf16 im2col; col = kh*5+kw, K padded 25->32.
    # TODO(synk): conv1's tiny patch build (Cin=1, ~6 KB/image) stays as
    # wrapper-side XLA glue; an in-kernel shifted-matmul gains nothing here.
    n = x.shape[0]
    xs = x[:, 0]
    cols = [xs[:, kh:kh + 24, kw:kw + 24].reshape(n, 576, 1)
            for kh in range(5) for kw in range(5)]
    pat = jnp.concatenate(cols, axis=2)
    pat = jnp.pad(pat, ((0, 0), (0, 0), (0, K1_PAD - 25)))
    return pat.astype(jnp.bfloat16)


# ------------------------------ forward wrapper -----------------------------

def _const_spec(shape):
    nd = len(shape)
    return pl.BlockSpec(shape, lambda i, _nd=nd: (0,) * _nd)   # VMEM-resident


def net_forward(prep, x, unused):
    del unused   # second input is accepted but never used, like the PyTorch module
    n = x.shape[0]
    pat = _conv1_patches(x)
    in_specs = ([pl.BlockSpec((1, 576, K1_PAD), lambda i: (i, 0, 0))]
                + [_const_spec(a.shape) for a in prep])
    out = pl.pallas_call(
        _fused_net_kernel,
        out_shape=jax.ShapeDtypeStruct((n, 1, C_PAD), jnp.float32),
        grid_spec=pltpu.PrefetchScalarGridSpec(
            num_scalar_prefetch=0,
            grid=(n,),
            in_specs=in_specs,
            out_specs=pl.BlockSpec((1, 1, C_PAD), lambda i: (i, 0, 0))),
        compiler_params=pltpu.CompilerParams(
            dimension_semantics=("parallel",),
            vmem_limit_bytes=32 * 1024 * 1024),
        cost_estimate=pl.CostEstimate(flops=n * 240_000_000,
                                      transcendentals=n * C_PAD,
                                      bytes_accessed=5_000_000),
    )(pat, *prep)
    return out.reshape(n, C_PAD)[:, :10]


# --------------------- pure-JAX reference (f32, XLA) -----------------------

def net_reference(params, x, unused):
    del unused
    dn = ("NCHW", "OIHW", "NCHW")
    y = jax.lax.conv_general_dilated(x, params["conv1_w"], (1, 1), "VALID",
                                     dimension_numbers=dn)
    y = jax.nn.relu(y + params["conv1_b"][None, :, None, None])
    y = jax.lax.reduce_window(y, -jnp.inf, jax.lax.max, (1, 1, 2, 2),
                              (1, 1, 2, 2), "VALID")
    y = jax.lax.conv_general_dilated(y, params["conv2_w"], (1, 1), "VALID",
                                     dimension_numbers=dn)
    y = jax.nn.relu(y + params["conv2_b"][None, :, None, None])
    y = jax.lax.reduce_window(y, -jnp.inf, jax.lax.max, (1, 1, 2, 2),
                              (1, 1, 2, 2), "VALID")
    y = y.reshape(y.shape[0], -1)                   # (N, 800) in (c, h, w) order
    y = jax.nn.relu(y @ params["fc1_w"] + params["fc1_b"])
    y = y @ params["fc2_w"] + params["fc2_b"]
    return jax.nn.log_softmax(y, axis=-1)


# ----------------- parameters (deterministic, synthetic) -------------------

def init_params(key):
    ks = jax.random.split(key, 8)

    def u(k, shape, fan_in):
        bound = 1.0 / jnp.sqrt(jnp.float32(fan_in))
        return jax.random.uniform(k, shape, jnp.float32, -bound, bound)

    return {
        "conv1_w": u(ks[0], (20, 1, 5, 5), 1 * 5 * 5),
        "conv1_b": u(ks[1], (20,), 1 * 5 * 5),
        "conv2_w": u(ks[2], (50, 20, 5, 5), 20 * 5 * 5),
        "conv2_b": u(ks[3], (50,), 20 * 5 * 5),
        "fc1_w": u(ks[4], (800, 500), 800),   # stored (in, out); in = c*16 + h*4 + w
        "fc1_b": u(ks[5], (500,), 800),
        "fc2_w": u(ks[6], (500, 10), 500),
        "fc2_b": u(ks[7], (10,), 500),
    }


if __name__ == "__main__":
    key = jax.random.PRNGKey(0)
    kp, kx, ku = jax.random.split(key, 3)
    params = init_params(kp)
    # Spatial size must be 28x28 so the flatten to 4*4*50 matches the module.
    x = jax.random.normal(kx, (2, 1, 28, 28), jnp.float32)
    unused = jax.random.normal(ku, (2, 1, 28, 28), jnp.float32)

    # Weight preparation runs once, outside the jitted forward path.
    prep = jax.block_until_ready(prepare_params(params))
    fwd = jax.jit(net_forward)
    out = jax.block_until_ready(fwd(prep, x, unused))

    assert out.shape == (2, 10), out.shape
    assert bool(jnp.all(jnp.isfinite(out)))
    # log_softmax rows must exponentiate to probability distributions
    assert bool(jnp.allclose(jnp.sum(jnp.exp(out), axis=1), 1.0, atol=1e-3))

    # Compare against a pure-JAX f32 reference (kernel uses bf16 MXU inputs,
    # so allow a generous absolute tolerance).
    ref = jax.block_until_ready(jax.jit(net_reference)(params, x, unused))
    max_err = float(jnp.max(jnp.abs(out - ref)))
    assert max_err < 0.15, f"max abs err vs f32 reference: {max_err}"

    print("KERNEL_OK")
</pallas_src>

<mosaic_0001>
module attributes {stable_mosaic.version = 11 : i64} {
  func.func @_fused_net_kernel(%arg0: i32, %arg1: memref<1x576x32xbf16, #tpu.memory_space<vmem>>, %arg2: memref<32x128xbf16, #tpu.memory_space<vmem>>, %arg3: memref<1x128xf32, #tpu.memory_space<vmem>>, %arg4: memref<4x144x576xbf16, #tpu.memory_space<vmem>>, %arg5: memref<1600x144xbf16, #tpu.memory_space<vmem>>, %arg6: memref<3200x128xbf16, #tpu.memory_space<vmem>>, %arg7: memref<1x128xf32, #tpu.memory_space<vmem>>, %arg8: memref<4x16x64xbf16, #tpu.memory_space<vmem>>, %arg9: memref<16x128x512xbf16, #tpu.memory_space<vmem>>, %arg10: memref<1x512xf32, #tpu.memory_space<vmem>>, %arg11: memref<512x128xbf16, #tpu.memory_space<vmem>>, %arg12: memref<1x128xf32, #tpu.memory_space<vmem>>, %arg13: memref<1x1x128xf32, #tpu.memory_space<vmem>>) attributes {dimension_semantics = [#tpu.dimension_semantics<parallel>], iteration_bounds = array<i64: 2>, scalar_prefetch = 0 : i64, scratch_operands = 0 : i64, tpu.core_type = #tpu.core_type<tc>, window_params = [{transform_indices = @transform_0, window_bounds = array<i64: 1, 576, 32>}, {pipeline_mode = #tpu.pipeline_mode<synchronous>, transform_indices = @transform_1, window_bounds = array<i64: 32, 128>}, {pipeline_mode = #tpu.pipeline_mode<synchronous>, transform_indices = @transform_2, window_bounds = array<i64: 1, 128>}, {pipeline_mode = #tpu.pipeline_mode<synchronous>, transform_indices = @transform_3, window_bounds = array<i64: 4, 144, 576>}, {pipeline_mode = #tpu.pipeline_mode<synchronous>, transform_indices = @transform_4, window_bounds = array<i64: 1600, 144>}, {pipeline_mode = #tpu.pipeline_mode<synchronous>, transform_indices = @transform_5, window_bounds = array<i64: 3200, 128>}, {pipeline_mode = #tpu.pipeline_mode<synchronous>, transform_indices = @transform_6, window_bounds = array<i64: 1, 128>}, {pipeline_mode = #tpu.pipeline_mode<synchronous>, transform_indices = @transform_7, window_bounds = array<i64: 4, 16, 64>}, {pipeline_mode = #tpu.pipeline_mode<synchronous>, transform_indices = @transform_8, window_bounds = array<i64: 16, 128, 512>}, {pipeline_mode = #tpu.pipeline_mode<synchronous>, transform_indices = @transform_9, window_bounds = array<i64: 1, 512>}, {pipeline_mode = #tpu.pipeline_mode<synchronous>, transform_indices = @transform_10, window_bounds = array<i64: 512, 128>}, {pipeline_mode = #tpu.pipeline_mode<synchronous>, transform_indices = @transform_11, window_bounds = array<i64: 1, 128>}, {transform_indices = @transform_12, window_bounds = array<i64: 1, 1, 128>}]} {
    %c0 = arith.constant 0 : index
    %c0_0 = arith.constant 0 : index
    %c0_1 = arith.constant 0 : index
    %0 = vector.load %arg1[%c0, %c0_0, %c0_1] : memref<1x576x32xbf16, #tpu.memory_space<vmem>>, vector<1x576x32xbf16>
    %1 = vector.shape_cast %0 : vector<1x576x32xbf16> to vector<576x32xbf16>
    %c0_2 = arith.constant 0 : index
    %c0_3 = arith.constant 0 : index
    %2 = vector.load %arg2[%c0_2, %c0_3] : memref<32x128xbf16, #tpu.memory_space<vmem>>, vector<32x128xbf16>
    %cst = arith.constant dense<0.000000e+00> : vector<576x128xf32>
    %3 = tpu.matmul %1, %2, %cst {dimension_numbers = #tpu.dot_dimension_numbers<[1], [0], [0], [1], [0, 0, 1, 1], [], []>} : vector<576x32xbf16>, vector<32x128xbf16>, vector<576x128xf32> -> vector<576x128xf32>
    %c0_4 = arith.constant 0 : index
    %c0_5 = arith.constant 0 : index
    %4 = vector.load %arg3[%c0_4, %c0_5] : memref<1x128xf32, #tpu.memory_space<vmem>>, vector<1x128xf32>
    %5 = vector.broadcast %4 : vector<1x128xf32> to vector<576x128xf32>
    %6 = arith.addf %3, %5 : vector<576x128xf32>
    %cst_6 = arith.constant 0.000000e+00 : f32
    %7 = vector.broadcast %cst_6 : f32 to vector<576x128xf32>
    %8 = arith.maximumf %6, %7 : vector<576x128xf32>
    %9 = arith.truncf %8 : vector<576x128xf32> to vector<576x128xbf16>
    %c0_7 = arith.constant 0 : index
    %c0_8 = arith.constant 0 : index
    %c0_9 = arith.constant 0 : index
    %10 = vector.load %arg4[%c0_7, %c0_8, %c0_9] : memref<4x144x576xbf16, #tpu.memory_space<vmem>>, vector<1x144x576xbf16>
    %11 = vector.shape_cast %10 : vector<1x144x576xbf16> to vector<144x576xbf16>
    %cst_10 = arith.constant dense<0.000000e+00> : vector<144x128xf32>
    %12 = tpu.matmul %11, %9, %cst_10 {dimension_numbers = #tpu.dot_dimension_numbers<[1], [0], [0], [1], [0, 0, 1, 1], [], []>} : vector<144x576xbf16>, vector<576x128xbf16>, vector<144x128xf32> -> vector<144x128xf32>
    %c1 = arith.constant 1 : index
    %c0_11 = arith.constant 0 : index
    %c0_12 = arith.constant 0 : index
    %13 = vector.load %arg4[%c1, %c0_11, %c0_12] : memref<4x144x576xbf16, #tpu.memory_space<vmem>>, vector<1x144x576xbf16>
    %14 = vector.shape_cast %13 : vector<1x144x576xbf16> to vector<144x576xbf16>
    %cst_13 = arith.constant dense<0.000000e+00> : vector<144x128xf32>
    %15 = tpu.matmul %14, %9, %cst_13 {dimension_numbers = #tpu.dot_dimension_numbers<[1], [0], [0], [1], [0, 0, 1, 1], [], []>} : vector<144x576xbf16>, vector<576x128xbf16>, vector<144x128xf32> -> vector<144x128xf32>
    %c2 = arith.constant 2 : index
    %c0_14 = arith.constant 0 : index
    %c0_15 = arith.constant 0 : index
    %16 = vector.load %arg4[%c2, %c0_14, %c0_15] : memref<4x144x576xbf16, #tpu.memory_space<vmem>>, vector<1x144x576xbf16>
    %17 = vector.shape_cast %16 : vector<1x144x576xbf16> to vector<144x576xbf16>
    %cst_16 = arith.constant dense<0.000000e+00> : vector<144x128xf32>
    %18 = tpu.matmul %17, %9, %cst_16 {dimension_numbers = #tpu.dot_dimension_numbers<[1], [0], [0], [1], [0, 0, 1, 1], [], []>} : vector<144x576xbf16>, vector<576x128xbf16>, vector<144x128xf32> -> vector<144x128xf32>
    %c3 = arith.constant 3 : index
    %c0_17 = arith.constant 0 : index
    %c0_18 = arith.constant 0 : index
    %19 = vector.load %arg4[%c3, %c0_17, %c0_18] : memref<4x144x576xbf16, #tpu.memory_space<vmem>>, vector<1x144x576xbf16>
    %20 = vector.shape_cast %19 : vector<1x144x576xbf16> to vector<144x576xbf16>
    %cst_19 = arith.constant dense<0.000000e+00> : vector<144x128xf32>
    %21 = tpu.matmul %20, %9, %cst_19 {dimension_numbers = #tpu.dot_dimension_numbers<[1], [0], [0], [1], [0, 0, 1, 1], [], []>} : vector<144x576xbf16>, vector<576x128xbf16>, vector<144x128xf32> -> vector<144x128xf32>
    %22 = arith.maximumf %12, %15 : vector<144x128xf32>
    %23 = arith.maximumf %18, %21 : vector<144x128xf32>
    %24 = arith.maximumf %22, %23 : vector<144x128xf32>
    %25 = arith.truncf %24 : vector<144x128xf32> to vector<144x128xbf16>
    %c0_20 = arith.constant 0 : index
    %c0_21 = arith.constant 0 : index
    %26 = vector.load %arg5[%c0_20, %c0_21] : memref<1600x144xbf16, #tpu.memory_space<vmem>>, vector<1600x144xbf16>
    %cst_22 = arith.constant dense<0.000000e+00> : vector<1600x128xf32>
    %27 = tpu.matmul %26, %25, %cst_22 {dimension_numbers = #tpu.dot_dimension_numbers<[1], [0], [0], [1], [0, 0, 1, 1], [], []>} : vector<1600x144xbf16>, vector<144x128xbf16>, vector<1600x128xf32> -> vector<1600x128xf32>
    %28 = arith.truncf %27 : vector<1600x128xf32> to vector<1600x128xbf16>
    %29 = vector.extract_strided_slice %28 {offsets = [0, 0], sizes = [64, 128], strides = [1, 1]} : vector<1600x128xbf16> to vector<64x128xbf16>
    %30 = vector.extract_strided_slice %28 {offsets = [64, 0], sizes = [64, 128], strides = [1, 1]} : vector<1600x128xbf16> to vector<64x128xbf16>
    %31 = vector.extract_strided_slice %28 {offsets = [128, 0], sizes = [64, 128], strides = [1, 1]} : vector<1600x128xbf16> to vector<64x128xbf16>
    %32 = vector.extract_strided_slice %28 {offsets = [192, 0], sizes = [64, 128], strides = [1, 1]} : vector<1600x128xbf16> to vector<64x128xbf16>
    %33 = vector.extract_strided_slice %28 {offsets = [256, 0], sizes = [64, 128], strides = [1, 1]} : vector<1600x128xbf16> to vector<64x128xbf16>
    %34 = vector.extract_strided_slice %28 {offsets = [320, 0], sizes = [64, 128], strides = [1, 1]} : vector<1600x128xbf16> to vector<64x128xbf16>
    %35 = vector.extract_strided_slice %28 {offsets = [384, 0], sizes = [64, 128], strides = [1, 1]} : vector<1600x128xbf16> to vector<64x128xbf16>
    %36 = vector.extract_strided_slice %28 {offsets = [448, 0], sizes = [64, 128], strides = [1, 1]} : vector<1600x128xbf16> to vector<64x128xbf16>
    %37 = vector.extract_strided_slice %28 {offsets = [512, 0], sizes = [64, 128], strides = [1, 1]} : vector<1600x128xbf16> to vector<64x128xbf16>
    %38 = vector.extract_strided_slice %28 {offsets = [576, 0], sizes = [64, 128], strides = [1, 1]} : vector<1600x128xbf16> to vector<64x128xbf16>
    %39 = vector.extract_strided_slice %28 {offsets = [640, 0], sizes = [64, 128], strides = [1, 1]} : vector<1600x128xbf16> to vector<64x128xbf16>
    %40 = vector.extract_strided_slice %28 {offsets = [704, 0], sizes = [64, 128], strides = [1, 1]} : vector<1600x128xbf16> to vector<64x128xbf16>
    %41 = vector.extract_strided_slice %28 {offsets = [768, 0], sizes = [64, 128], strides = [1, 1]} : vector<1600x128xbf16> to vector<64x128xbf16>
    %42 = vector.extract_strided_slice %28 {offsets = [832, 0], sizes = [64, 128], strides = [1, 1]} : vector<1600x128xbf16> to vector<64x128xbf16>
    %43 = vector.extract_strided_slice %28 {offsets = [896, 0], sizes = [64, 128], strides = [1, 1]} : vector<1600x128xbf16> to vector<64x128xbf16>
    %44 = vector.extract_strided_slice %28 {offsets = [960, 0], sizes = [64, 128], strides = [1, 1]} : vector<1600x128xbf16> to vector<64x128xbf16>
    %45 = vector.extract_strided_slice %28 {offsets = [1024, 0], sizes = [64, 128], strides = [1, 1]} : vector<1600x128xbf16> to vector<64x128xbf16>
    %46 = vector.extract_strided_slice %28 {offsets = [1088, 0], sizes = [64, 128], strides = [1, 1]} : vector<1600x128xbf16> to vector<64x128xbf16>
    %47 = vector.extract_strided_slice %28 {offsets = [1152, 0], sizes = [64, 128], strides = [1, 1]} : vector<1600x128xbf16> to vector<64x128xbf16>
    %48 = vector.extract_strided_slice %28 {offsets = [1216, 0], sizes = [64, 128], strides = [1, 1]} : vector<1600x128xbf16> to vector<64x128xbf16>
    %49 = vector.extract_strided_slice %28 {offsets = [1280, 0], sizes = [64, 128], strides = [1, 1]} : vector<1600x128xbf16> to vector<64x128xbf16>
    %50 = vector.extract_strided_slice %28 {offsets = [1344, 0], sizes = [64, 128], strides = [1, 1]} : vector<1600x128xbf16> to vector<64x128xbf16>
    %51 = vector.extract_strided_slice %28 {offsets = [1408, 0], sizes = [64, 128], strides = [1, 1]} : vector<1600x128xbf16> to vector<64x128xbf16>
    %52 = vector.extract_strided_slice %28 {offsets = [1472, 0], sizes = [64, 128], strides = [1, 1]} : vector<1600x128xbf16> to vector<64x128xbf16>
    %53 = vector.extract_strided_slice %28 {offsets = [1536, 0], sizes = [64, 128], strides = [1, 1]} : vector<1600x128xbf16> to vector<64x128xbf16>
    %54 = tpu.concatenate %29, %30, %31, %32, %33, %34, %35, %36, %37, %38, %39, %40, %41, %42, %43, %44 in 1 : vector<64x128xbf16>, vector<64x128xbf16>, vector<64x128xbf16>, vector<64x128xbf16>, vector<64x128xbf16>, vector<64x128xbf16>, vector<64x128xbf16>, vector<64x128xbf16>, vector<64x128xbf16>, vector<64x128xbf16>, vector<64x128xbf16>, vector<64x128xbf16>, vector<64x128xbf16>, vector<64x128xbf16>, vector<64x128xbf16>, vector<64x128xbf16> -> vector<64x2048xbf16>
    %55 = tpu.concatenate %45, %46, %47, %48, %49, %50, %51, %52, %53 in 1 : vector<64x128xbf16>, vector<64x128xbf16>, vector<64x128xbf16>, vector<64x128xbf16>, vector<64x128xbf16>, vector<64x128xbf16>, vector<64x128xbf16>, vector<64x128xbf16>, vector<64x128xbf16> -> vector<64x1152xbf16>
    %56 = tpu.concatenate %54, %55 in 1 : vector<64x2048xbf16>, vector<64x1152xbf16> -> vector<64x3200xbf16>
    %c0_23 = arith.constant 0 : index
    %c0_24 = arith.constant 0 : index
    %57 = vector.load %arg6[%c0_23, %c0_24] : memref<3200x128xbf16, #tpu.memory_space<vmem>>, vector<3200x128xbf16>
    %cst_25 = arith.constant dense<0.000000e+00> : vector<64x128xf32>
    %58 = tpu.matmul %56, %57, %cst_25 {dimension_numbers = #tpu.dot_dimension_numbers<[1], [0], [0], [1], [0, 0, 1, 1], [], []>} : vector<64x3200xbf16>, vector<3200x128xbf16>, vector<64x128xf32> -> vector<64x128xf32>
    %c0_26 = arith.constant 0 : index
    %c0_27 = arith.constant 0 : index
    %59 = vector.load %arg7[%c0_26, %c0_27] : memref<1x128xf32, #tpu.memory_space<vmem>>, vector<1x128xf32>
    %60 = vector.broadcast %59 : vector<1x128xf32> to vector<64x128xf32>
    %61 = arith.addf %58, %60 : vector<64x128xf32>
    %cst_28 = arith.constant 0.000000e+00 : f32
    %62 = vector.broadcast %cst_28 : f32 to vector<64x128xf32>
    %63 = arith.maximumf %61, %62 : vector<64x128xf32>
    %64 = arith.truncf %63 : vector<64x128xf32> to vector<64x128xbf16>
    %c0_29 = arith.constant 0 : index
    %c0_30 = arith.constant 0 : index
    %c0_31 = arith.constant 0 : index
    %65 = vector.load %arg8[%c0_29, %c0_30, %c0_31] : memref<4x16x64xbf16, #tpu.memory_space<vmem>>, vector<1x16x64xbf16>
    %66 = vector.shape_cast %65 : vector<1x16x64xbf16> to vector<16x64xbf16>
    %cst_32 = arith.constant dense<0.000000e+00> : vector<16x128xf32>
    %67 = tpu.matmul %66, %64, %cst_32 {dimension_numbers = #tpu.dot_dimension_numbers<[1], [0], [0], [1], [0, 0, 1, 1], [], []>} : vector<16x64xbf16>, vector<64x128xbf16>, vector<16x128xf32> -> vector<16x128xf32>
    %c1_33 = arith.constant 1 : index
    %c0_34 = arith.constant 0 : index
    %c0_35 = arith.constant 0 : index
    %68 = vector.load %arg8[%c1_33, %c0_34, %c0_35] : memref<4x16x64xbf16, #tpu.memory_space<vmem>>, vector<1x16x64xbf16>
    %69 = vector.shape_cast %68 : vector<1x16x64xbf16> to vector<16x64xbf16>
    %cst_36 = arith.constant dense<0.000000e+00> : vector<16x128xf32>
    %70 = tpu.matmul %69, %64, %cst_36 {dimension_numbers = #tpu.dot_dimension_numbers<[1], [0], [0], [1], [0, 0, 1, 1], [], []>} : vector<16x64xbf16>, vector<64x128xbf16>, vector<16x128xf32> -> vector<16x128xf32>
    %c2_37 = arith.constant 2 : index
    %c0_38 = arith.constant 0 : index
    %c0_39 = arith.constant 0 : index
    %71 = vector.load %arg8[%c2_37, %c0_38, %c0_39] : memref<4x16x64xbf16, #tpu.memory_space<vmem>>, vector<1x16x64xbf16>
    %72 = vector.shape_cast %71 : vector<1x16x64xbf16> to vector<16x64xbf16>
    %cst_40 = arith.constant dense<0.000000e+00> : vector<16x128xf32>
    %73 = tpu.matmul %72, %64, %cst_40 {dimension_numbers = #tpu.dot_dimension_numbers<[1], [0], [0], [1], [0, 0, 1, 1], [], []>} : vector<16x64xbf16>, vector<64x128xbf16>, vector<16x128xf32> -> vector<16x128xf32>
    %c3_41 = arith.constant 3 : index
    %c0_42 = arith.constant 0 : index
    %c0_43 = arith.constant 0 : index
    %74 = vector.load %arg8[%c3_41, %c0_42, %c0_43] : memref<4x16x64xbf16, #tpu.memory_space<vmem>>, vector<1x16x64xbf16>
    %75 = vector.shape_cast %74 : vector<1x16x64xbf16> to vector<16x64xbf16>
    %cst_44 = arith.constant dense<0.000000e+00> : vector<16x128xf32>
    %76 = tpu.matmul %75, %64, %cst_44 {dimension_numbers = #tpu.dot_dimension_numbers<[1], [0], [0], [1], [0, 0, 1, 1], [], []>} : vector<16x64xbf16>, vector<64x128xbf16>, vector<16x128xf32> -> vector<16x128xf32>
    %77 = arith.maximumf %67, %70 : vector<16x128xf32>
    %78 = arith.maximumf %73, %76 : vector<16x128xf32>
    %79 = arith.maximumf %77, %78 : vector<16x128xf32>
    %80 = arith.truncf %79 : vector<16x128xf32> to vector<16x128xbf16>
    %c0_45 = arith.constant 0 : index
    %c0_46 = arith.constant 0 : index
    %81 = vector.load %arg10[%c0_45, %c0_46] : memref<1x512xf32, #tpu.memory_space<vmem>>, vector<1x512xf32>
    %82 = vector.extract_strided_slice %80 {offsets = [0, 0], sizes = [1, 128], strides = [1, 1]} : vector<16x128xbf16> to vector<1x128xbf16>
    %c0_47 = arith.constant 0 : index
    %c0_48 = arith.constant 0 : index
    %c0_49 = arith.constant 0 : index
    %83 = vector.load %arg9[%c0_47, %c0_48, %c0_49] : memref<16x128x512xbf16, #tpu.memory_space<vmem>>, vector<1x128x512xbf16>
    %84 = vector.shape_cast %83 : vector<1x128x512xbf16> to vector<128x512xbf16>
    %cst_50 = arith.constant dense<0.000000e+00> : vector<1x512xf32>
    %85 = tpu.matmul %82, %84, %cst_50 {dimension_numbers = #tpu.dot_dimension_numbers<[1], [0], [0], [1], [0, 0, 1, 1], [], []>} : vector<1x128xbf16>, vector<128x512xbf16>, vector<1x512xf32> -> vector<1x512xf32>
    %86 = arith.addf %81, %85 : vector<1x512xf32>
    %87 = vector.extract_strided_slice %80 {offsets = [1, 0], sizes = [1, 128], strides = [1, 1]} : vector<16x128xbf16> to vector<1x128xbf16>
    %c1_51 = arith.constant 1 : index
    %c0_52 = arith.constant 0 : index
    %c0_53 = arith.constant 0 : index
    %88 = vector.load %arg9[%c1_51, %c0_52, %c0_53] : memref<16x128x512xbf16, #tpu.memory_space<vmem>>, vector<1x128x512xbf16>
    %89 = vector.shape_cast %88 : vector<1x128x512xbf16> to vector<128x512xbf16>
    %cst_54 = arith.constant dense<0.000000e+00> : vector<1x512xf32>
    %90 = tpu.matmul %87, %89, %cst_54 {dimension_numbers = #tpu.dot_dimension_numbers<[1], [0], [0], [1], [0, 0, 1, 1], [], []>} : vector<1x128xbf16>, vector<128x512xbf16>, vector<1x512xf32> -> vector<1x512xf32>
    %91 = arith.addf %86, %90 : vector<1x512xf32>
    %92 = vector.extract_strided_slice %80 {offsets = [2, 0], sizes = [1, 128], strides = [1, 1]} : vector<16x128xbf16> to vector<1x128xbf16>
    %c2_55 = arith.constant 2 : index
    %c0_56 = arith.constant 0 : index
    %c0_57 = arith.constant 0 : index
    %93 = vector.load %arg9[%c2_55, %c0_56, %c0_57] : memref<16x128x512xbf16, #tpu.memory_space<vmem>>, vector<1x128x512xbf16>
    %94 = vector.shape_cast %93 : vector<1x128x512xbf16> to vector<128x512xbf16>
    %cst_58 = arith.constant dense<0.000000e+00> : vector<1x512xf32>
    %95 = tpu.matmul %92, %94, %cst_58 {dimension_numbers = #tpu.dot_dimension_numbers<[1], [0], [0], [1], [0, 0, 1, 1], [], []>} : vector<1x128xbf16>, vector<128x512xbf16>, vector<1x512xf32> -> vector<1x512xf32>
    %96 = arith.addf %91, %95 : vector<1x512xf32>
    %97 = vector.extract_strided_slice %80 {offsets = [3, 0], sizes = [1, 128], strides = [1, 1]} : vector<16x128xbf16> to vector<1x128xbf16>
    %c3_59 = arith.constant 3 : index
    %c0_60 = arith.constant 0 : index
    %c0_61 = arith.constant 0 : index
    %98 = vector.load %arg9[%c3_59, %c0_60, %c0_61] : memref<16x128x512xbf16, #tpu.memory_space<vmem>>, vector<1x128x512xbf16>
    %99 = vector.shape_cast %98 : vector<1x128x512xbf16> to vector<128x512xbf16>
    %cst_62 = arith.constant dense<0.000000e+00> : vector<1x512xf32>
    %100 = tpu.matmul %97, %99, %cst_62 {dimension_numbers = #tpu.dot_dimension_numbers<[1], [0], [0], [1], [0, 0, 1, 1], [], []>} : vector<1x128xbf16>, vector<128x512xbf16>, vector<1x512xf32> -> vector<1x512xf32>
    %101 = arith.addf %96, %100 : vector<1x512xf32>
    %102 = vector.extract_strided_slice %80 {offsets = [4, 0], sizes = [1, 128], strides = [1, 1]} : vector<16x128xbf16> to vector<1x128xbf16>
    %c4 = arith.constant 4 : index
    %c0_63 = arith.constant 0 : index
    %c0_64 = arith.constant 0 : index
    %103 = vector.load %arg9[%c4, %c0_63, %c0_64] : memref<16x128x512xbf16, #tpu.memory_space<vmem>>, vector<1x128x512xbf16>
    %104 = vector.shape_cast %103 : vector<1x128x512xbf16> to vector<128x512xbf16>
    %cst_65 = arith.constant dense<0.000000e+00> : vector<1x512xf32>
    %105 = tpu.matmul %102, %104, %cst_65 {dimension_numbers = #tpu.dot_dimension_numbers<[1], [0], [0], [1], [0, 0, 1, 1], [], []>} : vector<1x128xbf16>, vector<128x512xbf16>, vector<1x512xf32> -> vector<1x512xf32>
    %106 = arith.addf %101, %105 : vector<1x512xf32>
    %107 = vector.extract_strided_slice %80 {offsets = [5, 0], sizes = [1, 128], strides = [1, 1]} : vector<16x128xbf16> to vector<1x128xbf16>
    %c5 = arith.constant 5 : index
    %c0_66 = arith.constant 0 : index
    %c0_67 = arith.constant 0 : index
    %108 = vector.load %arg9[%c5, %c0_66, %c0_67] : memref<16x128x512xbf16, #tpu.memory_space<vmem>>, vector<1x128x512xbf16>
    %109 = vector.shape_cast %108 : vector<1x128x512xbf16> to vector<128x512xbf16>
    %cst_68 = arith.constant dense<0.000000e+00> : vector<1x512xf32>
    %110 = tpu.matmul %107, %109, %cst_68 {dimension_numbers = #tpu.dot_dimension_numbers<[1], [0], [0], [1], [0, 0, 1, 1], [], []>} : vector<1x128xbf16>, vector<128x512xbf16>, vector<1x512xf32> -> vector<1x512xf32>
    %111 = arith.addf %106, %110 : vector<1x512xf32>
    %112 = vector.extract_strided_slice %80 {offsets = [6, 0], sizes = [1, 128], strides = [1, 1]} : vector<16x128xbf16> to vector<1x128xbf16>
    %c6 = arith.constant 6 : index
    %c0_69 = arith.constant 0 : index
    %c0_70 = arith.constant 0 : index
    %113 = vector.load %arg9[%c6, %c0_69, %c0_70] : memref<16x128x512xbf16, #tpu.memory_space<vmem>>, vector<1x128x512xbf16>
    %114 = vector.shape_cast %113 : vector<1x128x512xbf16> to vector<128x512xbf16>
    %cst_71 = arith.constant dense<0.000000e+00> : vector<1x512xf32>
    %115 = tpu.matmul %112, %114, %cst_71 {dimension_numbers = #tpu.dot_dimension_numbers<[1], [0], [0], [1], [0, 0, 1, 1], [], []>} : vector<1x128xbf16>, vector<128x512xbf16>, vector<1x512xf32> -> vector<1x512xf32>
    %116 = arith.addf %111, %115 : vector<1x512xf32>
    %117 = vector.extract_strided_slice %80 {offsets = [7, 0], sizes = [1, 128], strides = [1, 1]} : vector<16x128xbf16> to vector<1x128xbf16>
    %c7 = arith.constant 7 : index
    %c0_72 = arith.constant 0 : index
    %c0_73 = arith.constant 0 : index
    %118 = vector.load %arg9[%c7, %c0_72, %c0_73] : memref<16x128x512xbf16, #tpu.memory_space<vmem>>, vector<1x128x512xbf16>
    %119 = vector.shape_cast %118 : vector<1x128x512xbf16> to vector<128x512xbf16>
    %cst_74 = arith.constant dense<0.000000e+00> : vector<1x512xf32>
    %120 = tpu.matmul %117, %119, %cst_74 {dimension_numbers = #tpu.dot_dimension_numbers<[1], [0], [0], [1], [0, 0, 1, 1], [], []>} : vector<1x128xbf16>, vector<128x512xbf16>, vector<1x512xf32> -> vector<1x512xf32>
    %121 = arith.addf %116, %120 : vector<1x512xf32>
    %122 = vector.extract_strided_slice %80 {offsets = [8, 0], sizes = [1, 128], strides = [1, 1]} : vector<16x128xbf16> to vector<1x128xbf16>
    %c8 = arith.constant 8 : index
    %c0_75 = arith.constant 0 : index
    %c0_76 = arith.constant 0 : index
    %123 = vector.load %arg9[%c8, %c0_75, %c0_76] : memref<16x128x512xbf16, #tpu.memory_space<vmem>>, vector<1x128x512xbf16>
    %124 = vector.shape_cast %123 : vector<1x128x512xbf16> to vector<128x512xbf16>
    %cst_77 = arith.constant dense<0.000000e+00> : vector<1x512xf32>
    %125 = tpu.matmul %122, %124, %cst_77 {dimension_numbers = #tpu.dot_dimension_numbers<[1], [0], [0], [1], [0, 0, 1, 1], [], []>} : vector<1x128xbf16>, vector<128x512xbf16>, vector<1x512xf32> -> vector<1x512xf32>
    %126 = arith.addf %121, %125 : vector<1x512xf32>
    %127 = vector.extract_strided_slice %80 {offsets = [9, 0], sizes = [1, 128], strides = [1, 1]} : vector<16x128xbf16> to vector<1x128xbf16>
    %c9 = arith.constant 9 : index
    %c0_78 = arith.constant 0 : index
    %c0_79 = arith.constant 0 : index
    %128 = vector.load %arg9[%c9, %c0_78, %c0_79] : memref<16x128x512xbf16, #tpu.memory_space<vmem>>, vector<1x128x512xbf16>
    %129 = vector.shape_cast %128 : vector<1x128x512xbf16> to vector<128x512xbf16>
    %cst_80 = arith.constant dense<0.000000e+00> : vector<1x512xf32>
    %130 = tpu.matmul %127, %129, %cst_80 {dimension_numbers = #tpu.dot_dimension_numbers<[1], [0], [0], [1], [0, 0, 1, 1], [], []>} : vector<1x128xbf16>, vector<128x512xbf16>, vector<1x512xf32> -> vector<1x512xf32>
    %131 = arith.addf %126, %130 : vector<1x512xf32>
    %132 = vector.extract_strided_slice %80 {offsets = [10, 0], sizes = [1, 128], strides = [1, 1]} : vector<16x128xbf16> to vector<1x128xbf16>
    %c10 = arith.constant 10 : index
    %c0_81 = arith.constant 0 : index
    %c0_82 = arith.constant 0 : index
    %133 = vector.load %arg9[%c10, %c0_81, %c0_82] : memref<16x128x512xbf16, #tpu.memory_space<vmem>>, vector<1x128x512xbf16>
    %134 = vector.shape_cast %133 : vector<1x128x512xbf16> to vector<128x512xbf16>
    %cst_83 = arith.constant dense<0.000000e+00> : vector<1x512xf32>
    %135 = tpu.matmul %132, %134, %cst_83 {dimension_numbers = #tpu.dot_dimension_numbers<[1], [0], [0], [1], [0, 0, 1, 1], [], []>} : vector<1x128xbf16>, vector<128x512xbf16>, vector<1x512xf32> -> vector<1x512xf32>
    %136 = arith.addf %131, %135 : vector<1x512xf32>
    %137 = vector.extract_strided_slice %80 {offsets = [11, 0], sizes = [1, 128], strides = [1, 1]} : vector<16x128xbf16> to vector<1x128xbf16>
    %c11 = arith.constant 11 : index
    %c0_84 = arith.constant 0 : index
    %c0_85 = arith.constant 0 : index
    %138 = vector.load %arg9[%c11, %c0_84, %c0_85] : memref<16x128x512xbf16, #tpu.memory_space<vmem>>, vector<1x128x512xbf16>
    %139 = vector.shape_cast %138 : vector<1x128x512xbf16> to vector<128x512xbf16>
    %cst_86 = arith.constant dense<0.000000e+00> : vector<1x512xf32>
    %140 = tpu.matmul %137, %139, %cst_86 {dimension_numbers = #tpu.dot_dimension_numbers<[1], [0], [0], [1], [0, 0, 1, 1], [], []>} : vector<1x128xbf16>, vector<128x512xbf16>, vector<1x512xf32> -> vector<1x512xf32>
    %141 = arith.addf %136, %140 : vector<1x512xf32>
    %142 = vector.extract_strided_slice %80 {offsets = [12, 0], sizes = [1, 128], strides = [1, 1]} : vector<16x128xbf16> to vector<1x128xbf16>
    %c12 = arith.constant 12 : index
    %c0_87 = arith.constant 0 : index
    %c0_88 = arith.constant 0 : index
    %143 = vector.load %arg9[%c12, %c0_87, %c0_88] : memref<16x128x512xbf16, #tpu.memory_space<vmem>>, vector<1x128x512xbf16>
    %144 = vector.shape_cast %143 : vector<1x128x512xbf16> to vector<128x512xbf16>
    %cst_89 = arith.constant dense<0.000000e+00> : vector<1x512xf32>
    %145 = tpu.matmul %142, %144, %cst_89 {dimension_numbers = #tpu.dot_dimension_numbers<[1], [0], [0], [1], [0, 0, 1, 1], [], []>} : vector<1x128xbf16>, vector<128x512xbf16>, vector<1x512xf32> -> vector<1x512xf32>
    %146 = arith.addf %141, %145 : vector<1x512xf32>
    %147 = vector.extract_strided_slice %80 {offsets = [13, 0], sizes = [1, 128], strides = [1, 1]} : vector<16x128xbf16> to vector<1x128xbf16>
    %c13 = arith.constant 13 : index
    %c0_90 = arith.constant 0 : index
    %c0_91 = arith.constant 0 : index
    %148 = vector.load %arg9[%c13, %c0_90, %c0_91] : memref<16x128x512xbf16, #tpu.memory_space<vmem>>, vector<1x128x512xbf16>
    %149 = vector.shape_cast %148 : vector<1x128x512xbf16> to vector<128x512xbf16>
    %cst_92 = arith.constant dense<0.000000e+00> : vector<1x512xf32>
    %150 = tpu.matmul %147, %149, %cst_92 {dimension_numbers = #tpu.dot_dimension_numbers<[1], [0], [0], [1], [0, 0, 1, 1], [], []>} : vector<1x128xbf16>, vector<128x512xbf16>, vector<1x512xf32> -> vector<1x512xf32>
    %151 = arith.addf %146, %150 : vector<1x512xf32>
    %152 = vector.extract_strided_slice %80 {offsets = [14, 0], sizes = [1, 128], strides = [1, 1]} : vector<16x128xbf16> to vector<1x128xbf16>
    %c14 = arith.constant 14 : index
    %c0_93 = arith.constant 0 : index
    %c0_94 = arith.constant 0 : index
    %153 = vector.load %arg9[%c14, %c0_93, %c0_94] : memref<16x128x512xbf16, #tpu.memory_space<vmem>>, vector<1x128x512xbf16>
    %154 = vector.shape_cast %153 : vector<1x128x512xbf16> to vector<128x512xbf16>
    %cst_95 = arith.constant dense<0.000000e+00> : vector<1x512xf32>
    %155 = tpu.matmul %152, %154, %cst_95 {dimension_numbers = #tpu.dot_dimension_numbers<[1], [0], [0], [1], [0, 0, 1, 1], [], []>} : vector<1x128xbf16>, vector<128x512xbf16>, vector<1x512xf32> -> vector<1x512xf32>
    %156 = arith.addf %151, %155 : vector<1x512xf32>
    %157 = vector.extract_strided_slice %80 {offsets = [15, 0], sizes = [1, 128], strides = [1, 1]} : vector<16x128xbf16> to vector<1x128xbf16>
    %c15 = arith.constant 15 : index
    %c0_96 = arith.constant 0 : index
    %c0_97 = arith.constant 0 : index
    %158 = vector.load %arg9[%c15, %c0_96, %c0_97] : memref<16x128x512xbf16, #tpu.memory_space<vmem>>, vector<1x128x512xbf16>
    %159 = vector.shape_cast %158 : vector<1x128x512xbf16> to vector<128x512xbf16>
    %cst_98 = arith.constant dense<0.000000e+00> : vector<1x512xf32>
    %160 = tpu.matmul %157, %159, %cst_98 {dimension_numbers = #tpu.dot_dimension_numbers<[1], [0], [0], [1], [0, 0, 1, 1], [], []>} : vector<1x128xbf16>, vector<128x512xbf16>, vector<1x512xf32> -> vector<1x512xf32>
    %161 = arith.addf %156, %160 : vector<1x512xf32>
    %cst_99 = arith.constant 0.000000e+00 : f32
    %162 = vector.broadcast %cst_99 : f32 to vector<1x512xf32>
    %163 = arith.maximumf %161, %162 : vector<1x512xf32>
    %164 = arith.truncf %163 : vector<1x512xf32> to vector<1x512xbf16>
    %c0_100 = arith.constant 0 : index
    %c0_101 = arith.constant 0 : index
    %165 = vector.load %arg11[%c0_100, %c0_101] : memref<512x128xbf16, #tpu.memory_space<vmem>>, vector<512x128xbf16>
    %cst_102 = arith.constant dense<0.000000e+00> : vector<1x128xf32>
    %166 = tpu.matmul %164, %165, %cst_102 {dimension_numbers = #tpu.dot_dimension_numbers<[1], [0], [0], [1], [0, 0, 1, 1], [], []>} : vector<1x512xbf16>, vector<512x128xbf16>, vector<1x128xf32> -> vector<1x128xf32>
    %c0_103 = arith.constant 0 : index
    %c0_104 = arith.constant 0 : index
    %167 = vector.load %arg12[%c0_103, %c0_104] : memref<1x128xf32, #tpu.memory_space<vmem>>, vector<1x128xf32>
    %168 = arith.addf %166, %167 : vector<1x128xf32>
    %169 = tpu.iota {dimensions = array<i32: 1>} : vector<1x128xi32>
    %c10_i32 = arith.constant 10 : i32
    %170 = vector.broadcast %c10_i32 : i32 to vector<1x128xi32>
    %171 = arith.cmpi slt, %169, %170 : vector<1x128xi32>
    %cst_105 = arith.constant -1.000000e+30 : f32
    %172 = vector.broadcast %cst_105 : f32 to vector<1x128xf32>
    %173 = arith.select %171, %168, %172 : vector<1x128xi1>, vector<1x128xf32>
    %cst_106 = arith.constant dense<0xFF800000> : vector<1xf32>
    %174 = vector.multi_reduction <maximumf>, %173, %cst_106 [1] : vector<1x128xf32> to vector<1xf32>
    %175 = vector.shape_cast %174 : vector<1xf32> to vector<1x1xf32>
    %176 = vector.broadcast %175 : vector<1x1xf32> to vector<1x128xf32>
    %177 = arith.subf %173, %176 : vector<1x128xf32>
    %178 = math.exp %177 : vector<1x128xf32>
    %cst_107 = arith.constant 0.000000e+00 : f32
    %179 = vector.broadcast %cst_107 : f32 to vector<1x128xf32>
    %180 = arith.select %171, %178, %179 : vector<1x128xi1>, vector<1x128xf32>
    %cst_108 = arith.constant dense<0.000000e+00> : vector<1xf32>
    %181 = vector.multi_reduction <add>, %180, %cst_108 [1] : vector<1x128xf32> to vector<1xf32>
    %182 = vector.shape_cast %181 : vector<1xf32> to vector<1x1xf32>
    %183 = math.log %182 : vector<1x1xf32>
    %184 = vector.broadcast %175 : vector<1x1xf32> to vector<1x128xf32>
    %185 = arith.subf %173, %184 : vector<1x128xf32>
    %186 = vector.broadcast %183 : vector<1x1xf32> to vector<1x128xf32>
    %187 = arith.subf %185, %186 : vector<1x128xf32>
    %c0_109 = arith.constant 0 : index
    %c0_110 = arith.constant 0 : index
    %c0_111 = arith.constant 0 : index
    %188 = vector.load %arg13[%c0_109, %c0_110, %c0_111] : memref<1x1x128xf32, #tpu.memory_space<vmem>>, vector<1x1x128xf32>
    %189 = vector.shape_cast %188 : vector<1x1x128xf32> to vector<1x128xf32>
    %190 = vector.shape_cast %187 : vector<1x128xf32> to vector<1x1x128xf32>
    tpu.vector_store %arg13[%c0_109, %c0_110, %c0_111], %190 {strides = array<i32>} : memref<1x1x128xf32, #tpu.memory_space<vmem>>, vector<1x1x128xf32>,
    return
  }
  func.func @transform_0(%arg0: i32) -> (i32, i32, i32) {
    %c0_i32 = arith.constant 0 : i32
    %c0_i32_0 = arith.constant 0 : i32
    %c0_i32_1 = arith.constant 0 : i32
    return %arg0, %c0_i32, %c0_i32_0 : i32, i32, i32
  }
  func.func @transform_1(%arg0: i32) -> (i32, i32) {
    %c0_i32 = arith.constant 0 : i32
    %c0_i32_0 = arith.constant 0 : i32
    %c0_i32_1 = arith.constant 0 : i32
    return %c0_i32, %c0_i32_0 : i32, i32
  }
  func.func @transform_2(%arg0: i32) -> (i32, i32) {
    %c0_i32 = arith.constant 0 : i32
    %c0_i32_0 = arith.constant 0 : i32
    %c0_i32_1 = arith.constant 0 : i32
    return %c0_i32, %c0_i32_0 : i32, i32
  }
  func.func @transform_3(%arg0: i32) -> (i32, i32, i32) {
    %c0_i32 = arith.constant 0 : i32
    %c0_i32_0 = arith.constant 0 : i32
    %c0_i32_1 = arith.constant 0 : i32
    %c0_i32_2 = arith.constant 0 : i32
    return %c0_i32, %c0_i32_0, %c0_i32_1 : i32, i32, i32
  }
  func.func @transform_4(%arg0: i32) -> (i32, i32) {
    %c0_i32 = arith.constant 0 : i32
    %c0_i32_0 = arith.constant 0 : i32
    %c0_i32_1 = arith.constant 0 : i32
    return %c0_i32, %c0_i32_0 : i32, i32
  }
  func.func @transform_5(%arg0: i32) -> (i32, i32) {
    %c0_i32 = arith.constant 0 : i32
    %c0_i32_0 = arith.constant 0 : i32
    %c0_i32_1 = arith.constant 0 : i32
    return %c0_i32, %c0_i32_0 : i32, i32
  }
  func.func @transform_6(%arg0: i32) -> (i32, i32) {
    %c0_i32 = arith.constant 0 : i32
    %c0_i32_0 = arith.constant 0 : i32
    %c0_i32_1 = arith.constant 0 : i32
    return %c0_i32, %c0_i32_0 : i32, i32
  }
  func.func @transform_7(%arg0: i32) -> (i32, i32, i32) {
    %c0_i32 = arith.constant 0 : i32
    %c0_i32_0 = arith.constant 0 : i32
    %c0_i32_1 = arith.constant 0 : i32
    %c0_i32_2 = arith.constant 0 : i32
    return %c0_i32, %c0_i32_0, %c0_i32_1 : i32, i32, i32
  }
  func.func @transform_8(%arg0: i32) -> (i32, i32, i32) {
    %c0_i32 = arith.constant 0 : i32
    %c0_i32_0 = arith.constant 0 : i32
    %c0_i32_1 = arith.constant 0 : i32
    %c0_i32_2 = arith.constant 0 : i32
    return %c0_i32, %c0_i32_0, %c0_i32_1 : i32, i32, i32
  }
  func.func @transform_9(%arg0: i32) -> (i32, i32) {
    %c0_i32 = arith.constant 0 : i32
    %c0_i32_0 = arith.constant 0 : i32
    %c0_i32_1 = arith.constant 0 : i32
    return %c0_i32, %c0_i32_0 : i32, i32
  }
  func.func @transform_10(%arg0: i32) -> (i32, i32) {
    %c0_i32 = arith.constant 0 : i32
    %c0_i32_0 = arith.constant 0 : i32
    %c0_i32_1 = arith.constant 0 : i32
    return %c0_i32, %c0_i32_0 : i32, i32
  }
  func.func @transform_11(%arg0: i32) -> (i32, i32) {
    %c0_i32 = arith.constant 0 : i32
    %c0_i32_0 = arith.constant 0 : i32
    %c0_i32_1 = arith.constant 0 : i32
    return %c0_i32, %c0_i32_0 : i32, i32
  }
  func.func @transform_12(%arg0: i32) -> (i32, i32, i32) {
    %c0_i32 = arith.constant 0 : i32
    %c0_i32_0 = arith.constant 0 : i32
    %c0_i32_1 = arith.constant 0 : i32
    return %arg0, %c0_i32, %c0_i32_0 : i32, i32, i32
  }
}

</mosaic_0001>

<bundles_post_ra>
// kernel: net_forward.1
= control target key start
LH: loop header
LB: loop body
LE: loop exit
PB: predicated region body
PF: predicated region fallthrough
CT: control target
= control target key end

     0   :  { %s24778_s0 = inlined_call_operand.vmem [shape: bf16[2,576,32], index: 0, kind: input, shape index: {}]   ;;  %s24779_s1 = inlined_call_operand.vmem [shape: bf16[32,128], index: 1, kind: input, shape index: {}]   ;;  %s24780_s2 = inlined_call_operand.vmem [shape: f32[1,128], index: 2, kind: input, shape index: {}]   ;;  %s24781_s3 = inlined_call_operand.vmem [shape: bf16[4,144,576], index: 3, kind: input, shape index: {}]   ;;  %s24782_s4 = inlined_call_operand.vmem [shape: bf16[1600,144], index: 4, kind: input, shape index: {}]   ;;  %s24783_s5 = inlined_call_operand.vmem [shape: bf16[3200,128], index: 5, kind: input, shape index: {}]   ;;  %s24784_s6 = inlined_call_operand.vmem [shape: f32[1,128], index: 6, kind: input, shape index: {}]   ;;  %s24785_s7 = inlined_call_operand.vmem [shape: bf16[4,16,64], index: 7, kind: input, shape index: {}]   ;;  %s24786_s8 = inlined_call_operand.vmem [shape: bf16[16,128,512], index: 8, kind: input, shape index: {}]   ;;  %s24787_s9 = inlined_call_operand.vmem [shape: f32[1,512], index: 9, kind: input, shape index: {}]   ;;  %s24788_s10 = inlined_call_operand.vmem [shape: bf16[512,128], index: 10, kind: input, shape index: {}]   ;;  %s24789_s11 = inlined_call_operand.vmem [shape: f32[1,128], index: 11, kind: input, shape index: {}]   ;;  %s24790_s12 = inlined_call_operand.hbm [shape: f32[2,1,128], index: 12, kind: output, shape index: {}]  }
   0x1   :  { %24815 = sst [smem:[#allocation32_spill]] %s24778_s0 }
   0x2   :  { %24816 = sst [smem:[#allocation33_spill]] %s24779_s1 }
   0x3   :  { %24817 = sst [smem:[#allocation34_spill]] %s24780_s2 }
   0x4   :  { %17 = vsyncpa [#allocation3], 0 }
   0x5   :  { %19 = vsyncpa [#allocation3 + $0x1], 0  ;;  %s19458_s21 = smov 0   ;;  %s19460_s22 = smov 0  }
   0x6   :  { %s19462_s23 = smov 0   ;;  %s19464_s24 = smov 0  }
   0x7 LB: > { %s19479_s25 = sadd.s32 4294967295, %s19386_s24   ;;  %s14151_s26 = sadd.s32 4294967294, %s19386_s24   ;;  %s19386_s24 = sphi %s19464_s24, %s24905_s24   ;;  %s19382_s23 = sphi %s19462_s23, %s24904_s23   ;;  %s19378_s22 = sphi %s19460_s22, %s24903_s22   ;;  %s19374_s21 = sphi %s19458_s21, %s24902_s21  }
   0x8   : > { %s19483_s27 = sadd.s32 1, %s19386_s24   ;;  %s289_s28 = sadd.s32 1, %s19382_s23 }
   0x9   : > { %s286_s29 = ssub.s32 %s19386_s24, %s19483_s27  ;;  %p299_p0 = scmp.ne.s32.totalorder %s19382_s23, %s19378_s22 }
   0xa   : > { %p287_p1 = scmp.eq.s32.totalorder %s286_s29, 0  ;;  %p300_p2 = scmp.eq.s32.totalorder %s19479_s25, 1 }
   0xb   : > { %p305_p3 = scmp.ne.s32.totalorder %s19378_s22, %s19374_s21  ;;  %p306_p4 = scmp.eq.s32.totalorder %s14151_s26, 1 }
   0xc   : > { %s19494_s30 = scalar_select %p287_p1, %s19382_s23, %s289_s28  }
   0xd   : > { %p19496_p5 = por %p300_p2, %p299_p0  ;;  %p19500_p6 = por %p306_p4, %p305_p3 }
   0xe   : > { %p14154_p7 = scmp.ge.s32.totalorder %s19386_s24, 1  ;;  %p365_p8 = scmp.lt.s32.totalorder %s19386_s24, 3 }
  0x10   : > { %p366_p9 = pnand %p14154_p7, %p365_p8 }
  0x12   : > { %369 = sbr.rel (%p366_p9) target bundleno = 3971 (0xf83), region = 68 }
  0x19   : > { %s24820_s1 = sld [smem:[#allocation33_spill]]  ;;  %p406_p10 = scmp.lt.s32.totalorder %s19479_s25, 1  ;;  %vm687_vm0 = vcmask 261120   ;;  %v17765_v38 = vld [vmem:[%s24781_s3 + $0x4] ss:$20 sps:$4 sm:$0xff]   ;;  %v24791_v57 = vmov 0.0  }
  0x1a   : > { %s24821_s0 = sld [smem:[#allocation32_spill]]  ;;  %1564 = vmatprep.mubr.bf16.mxu1 %v17765_v38  ;;  %s24822_s2 = sld [smem:[#allocation34_spill]]  ;;  %vm19389_vm1 = vmmov 0   ;;  %vm1504_vm2 = vcmask 523264   ;;  %vm4876_vm3 = vcmask 130048   ;;  %vm14068_vm5 = vcmask 1040384  }
  0x1b   : > { %s407_s19 = scalar_select %p406_p10, %s19479_s25, 1 }
  0x1d   : > { %s17681_s20 = smul.u32 288, %s407_s19 }
  0x1f   : > { %v17725_v0 = vld [vmem:[%s24820_s1] sm:$0xff]   ;;  %v17726_v1 = vld [vmem:[%s24820_s1 + $0x8] sm:$0xff]   ;;  %s404_s1 = sand.u32 1, %s19378_s22  }
  0x20   : > { %17357 = vmatprep.subr.bf16.mxu0 %v17725_v0  ;;  %s19517_s29 = scalar_lea.vmem %s24821_s0, %s17681_s20  ;;  %v19597_v39 = vld [vmem:[%s24822_s2] ss:$0 sm:$0xff]  ;;  %s405_s17 = scalar_lea.vmem [#allocation2], %s404_s1 }
  0x21   : > { %17358 = vmatpush3.bf16.msra.mxu0 %v17725_v0  ;;  %v17727_v2 = vld [vmem:[%s19517_s29] sm:$0xff]   ;;  %v17728_v3 = vld [vmem:[%s19517_s29 + $0x8] sm:$0xff]   ;;  %v17729_v4 = vld [vmem:[%s19517_s29 + $0x10] sm:$0xff]   ;;  %s14096_s18 = sshll.u32 %s405_s17, 4  ;;  %s14084_s26 = scalar_lea.sflag [#allocation3], %s404_s1  ;;  %s24738_s18 = int_to_ptr.vmem [resolvable:$true] %s14096_s18 }
  0x22   : > { %17359 = vmatprep.subr.bf16.mxu0 %v17726_v1  ;;  %17361 = vmatprep.mubr.msk.bf16.mxu0 %vm687_vm0, %v17727_v2  ;;  %v17730_v5 = vld [vmem:[%s19517_s29 + $0x18] sm:$0xff]   ;;  %v17731_v6 = vld [vmem:[%s19517_s29 + $0x20] sm:$0xff]   ;;  %v17732_v7 = vld [vmem:[%s19517_s29 + $0x28] sm:$0xff]   ;;  %s19324_s28 = scalar_lea.vmem %s24738_s18, 16 }
  0x23   : > { %v17733_v8 = vld [vmem:[%s19517_s29 + $0x30] sm:$0xff]   ;;  %v17734_v9 = vld [vmem:[%s19517_s29 + $0x38] sm:$0xff]   ;;  %v17735_v10 = vld [vmem:[%s19517_s29 + $0x40] sm:$0xff]   ;;  %p19325_p11 = scmp.ne.s32.totalorder %s24738_s18, %s19324_s28 }
  0x24   : > { %v17736_v11 = vld [vmem:[%s19517_s29 + $0x48] sm:$0xff]   ;;  %v17737_v12 = vld [vmem:[%s19517_s29 + $0x50] sm:$0xff]   ;;  %v17738_v13 = vld [vmem:[%s19517_s29 + $0x58] sm:$0xff]  }
  0x25   : > { %17360 = vmatpush3.bf16.msra.mxu0 %v17726_v1  ;;  %v17739_v14 = vld [vmem:[%s19517_s29 + $0x60] sm:$0xff]   ;;  %v17740_v15 = vld [vmem:[%s19517_s29 + $0x68] sm:$0xff]   ;;  %v17741_v16 = vld [vmem:[%s19517_s29 + $0x70] sm:$0xff]   ;;  %p19326_p12 = pnand %p19325_p11, %p19496_p5 }
  0x26   : > { %v17742_v17 = vld [vmem:[%s19517_s29 + $0x78] sm:$0xff]   ;;  %v17743_v18 = vld [vmem:[%s19517_s29 + $0x80] sm:$0xff]   ;;  %v17744_v19 = vld [vmem:[%s19517_s29 + $0x88] sm:$0xff]   ;;  %17433 = vmatprep.subr.bf16.mxu0 %v24791_v57 }
  0x27   : > { %v17745_v20 = vld [vmem:[%s19517_s29 + $0x90] sm:$0xff]   ;;  %v17746_v21 = vld [vmem:[%s19517_s29 + $0x98] sm:$0xff]   ;;  %v17747_v22 = vld [vmem:[%s19517_s29 + $0xa0] sm:$0xff]   ;;  %p19327_p13 = pneg %p19326_p12 }
  0x28   : > { %17362 = vmatmul.mubr.msk.bf16.vlgmr.msra.gmra.mrb[0].mxu0 %vm687_vm0, %v17728_v3  ;;  %v17748_v23 = vld [vmem:[%s19517_s29 + $0xa8] sm:$0xff]   ;;  %v17749_v24 = vld [vmem:[%s19517_s29 + $0xb0] sm:$0xff]   ;;  %v17750_v25 = vld [vmem:[%s19517_s29 + $0xb8] sm:$0xff]  }
  0x29   : > { %17365 = vmatprep.mubr.msk.bf16.mxu0 %vm687_vm0, %v17729_v4  ;;  %v17751_v26 = vld [vmem:[%s19517_s29 + $0xc0] sm:$0xff]   ;;  %v17752_v27 = vld [vmem:[%s19517_s29 + $0xc8] sm:$0xff]   ;;  %v17753_v28 = vld [vmem:[%s19517_s29 + $0xd0] sm:$0xff]  }
  0x2a   : > { %v17754_v29 = vld [vmem:[%s19517_s29 + $0xd8] sm:$0xff]   ;;  %v17755_v30 = vld [vmem:[%s19517_s29 + $0xe0] sm:$0xff]   ;;  %v17756_v31 = vld [vmem:[%s19517_s29 + $0xe8] sm:$0xff]  }
  0x2b   : > { %v17757_v32 = vld [vmem:[%s19517_s29 + $0xf0] sm:$0xff]   ;;  %v17758_v33 = vld [vmem:[%s19517_s29 + $0xf8] sm:$0xff]   ;;  %v17759_v34 = vld [vmem:[%s19517_s29 + $0x100] sm:$0xff]  }
  0x2c   : > { %v17760_v35 = vld [vmem:[%s19517_s29 + $0x108] sm:$0xff]   ;;  %v17761_v36 = vld [vmem:[%s19517_s29 + $0x110] sm:$0xff]   ;;  %v17762_v37 = vld [vmem:[%s19517_s29 + $0x118] sm:$0xff]  }
  0x30   : > { %17366 = vmatmul.mubr.msk.bf16.gmra.mrb[4].mxu0 %vm687_vm0, %v17730_v5 }
  0x31   : > { %17369 = vmatprep.mubr.msk.bf16.mxu0 %vm687_vm0, %v17731_v6 }
  0x38   : > { %17370 = vmatmul.mubr.msk.bf16.gmra.mrb[8].mxu0 %vm687_vm0, %v17732_v7 }
  0x39   : > { %17373 = vmatprep.mubr.msk.bf16.mxu0 %vm687_vm0, %v17733_v8 }
  0x40   : > { %17374 = vmatmul.mubr.msk.bf16.gmra.mrb[12].mxu0 %vm687_vm0, %v17734_v9 }
  0x41   : > { %17377 = vmatprep.mubr.msk.bf16.mxu0 %vm687_vm0, %v17735_v10 }
  0x48   : > { %17378 = vmatmul.mubr.msk.bf16.gmra.mrb[16].mxu0 %vm687_vm0, %v17736_v11 }
  0x49   : > { %17381 = vmatprep.mubr.msk.bf16.mxu0 %vm687_vm0, %v17737_v12 }
  0x50   : > { %17382 = vmatmul.mubr.msk.bf16.gmra.mrb[20].mxu0 %vm687_vm0, %v17738_v13 }
  0x51   : > { %17385 = vmatprep.mubr.msk.bf16.mxu0 %vm687_vm0, %v17739_v14 }
  0x58   : > { %17386 = vmatmul.mubr.msk.bf16.gmra.mrb[24].mxu0 %vm687_vm0, %v17740_v15 }
  0x59   : > { %17389 = vmatprep.mubr.msk.bf16.mxu0 %vm687_vm0, %v17741_v16 }
  0x60   : > { %17390 = vmatmul.mubr.msk.bf16.gmra.mrb[28].mxu0 %vm687_vm0, %v17742_v17 }
  0x61   : > { %17393 = vmatprep.mubr.msk.bf16.mxu0 %vm687_vm0, %v17743_v18 }
  0x68   : > { %17394 = vmatmul.mubr.msk.bf16.gmra.mrb[32].mxu0 %vm687_vm0, %v17744_v19 }
  0x69   : > { %17397 = vmatprep.mubr.msk.bf16.mxu0 %vm687_vm0, %v17745_v20 }
  0x70   : > { %17398 = vmatmul.mubr.msk.bf16.gmra.mrb[36].mxu0 %vm687_vm0, %v17746_v21 }
  0x71   : > { %17401 = vmatprep.mubr.msk.bf16.mxu0 %vm687_vm0, %v17747_v22 }
  0x78   : > { %17402 = vmatmul.mubr.msk.bf16.gmra.mrb[40].mxu0 %vm687_vm0, %v17748_v23 }
  0x79   : > { %17405 = vmatprep.mubr.msk.bf16.mxu0 %vm687_vm0, %v17749_v24 }
  0x80   : > { %17406 = vmatmul.mubr.msk.bf16.gmra.mrb[44].mxu0 %vm687_vm0, %v17750_v25 }
  0x81   : > { %17409 = vmatprep.mubr.msk.bf16.mxu0 %vm687_vm0, %v17751_v26 }
  0x88   : > { %17410 = vmatmul.mubr.msk.bf16.gmra.mrb[48].mxu0 %vm687_vm0, %v17752_v27 }
  0x89   : > { %17413 = vmatprep.mubr.msk.bf16.mxu0 %vm687_vm0, %v17753_v28 }
  0x90   : > { %17414 = vmatmul.mubr.msk.bf16.gmra.mrb[52].mxu0 %vm687_vm0, %v17754_v29 }
  0x91   : > { %17417 = vmatprep.mubr.msk.bf16.mxu0 %vm687_vm0, %v17755_v30 }
  0x98   : > { %17418 = vmatmul.mubr.msk.bf16.gmra.mrb[56].mxu0 %vm687_vm0, %v17756_v31 }
  0x99   : > { %17421 = vmatprep.mubr.msk.bf16.mxu0 %vm687_vm0, %v17757_v32 }
  0xa0   : > { %17422 = vmatmul.mubr.msk.bf16.gmra.mrb[60].mxu0 %vm687_vm0, %v17758_v33 }
  0xa1   : > { %17425 = vmatprep.mubr.msk.bf16.mxu0 %vm687_vm0, %v17759_v34 }
  0xa8   : > { %17426 = vmatmul.mubr.msk.bf16.gmra.mrb[64].mxu0 %vm687_vm0, %v17760_v35 }
  0xa9   : > { %17429 = vmatprep.mubr.msk.bf16.mxu0 %vm687_vm0, %v17761_v36 }
  0xb0   : > { %17430 = vmatmul.mubr.msk.bf16.gmra.mrb[68].mxu0 %vm687_vm0, %v17762_v37 }
  0xb1   : > { %17441 = vmatprep.mubr.msk.bf16.mxu0 %vm19389_vm1, %v24791_v57 }
  0xfb   : > { %v17363_v40 = vpop.f32.mrb[0].mxu0 }
  0xfc   : > { %v839_v41 = vadd.f32 %v17363_v40, %v19597_v39  ;;  %v830_v42 = vpop.f32.mrb[1].mxu0 }
  0xfd   : > { %v831_v43 = vadd.f32 %v19597_v39, %v830_v42  ;;  %v17364_v44 = vpop.f32.mrb[2].mxu0 }
  0xfe   : > { %v1119_v45 = vmax.f32 %v839_v41, 0.0  ;;  %v842_v46 = vadd.f32 %v17364_v44, %v19597_v39  ;;  %v833_v47 = vpop.f32.mrb[3].mxu0 }
  0xff   : > { %v1117_v48 = vmax.f32 %v831_v43, 0.0  ;;  %v834_v49 = vadd.f32 %v19597_v39, %v833_v47 }
 0x100   : > { %v1120_v50 = vmax.f32 %v842_v46, 0.0 }
 0x101   : > { %v1118_v51 = vmax.f32 %v834_v49, 0.0 }
 0x102   : > { %v19603_v52 = vpack.c.bf16 %v1120_v50, %v1119_v45 }
 0x103   : > { %v19605_v53 = vpack.c.bf16 %v1118_v51, %v1117_v48  ;;  %v17367_v54 = vpop.f32.mrb[4].mxu0 }
 0x104   : > { %v855_v55 = vadd.f32 %v17367_v54, %v19597_v39  ;;  %v846_v56 = vpop.f32.mrb[5].mxu0 }
 0x105   : > { %v847_v58 = vadd.f32 %v19597_v39, %v846_v56  ;;  %v17368_v59 = vpop.f32.mrb[6].mxu0 }
 0x106   : > { %v1123_v60 = vmax.f32 %v855_v55, 0.0  ;;  %v858_v61 = vadd.f32 %v17368_v59, %v19597_v39  ;;  %v849_v62 = vpop.f32.mrb[7].mxu0 }
 0x107   : > { %v1121_v63 = vmax.f32 %v847_v58, 0.0  ;;  %v850_v0 = vadd.f32 %v19597_v39, %v849_v62 }
 0x108   : > { %v1124_v1 = vmax.f32 %v858_v61, 0.0 }
 0x109   : > { %v1122_v2 = vmax.f32 %v850_v0, 0.0 }
 0x10a   : > { %v19612_v3 = vpack.c.bf16 %v1124_v1, %v1123_v60 }
 0x10b   : > { %v19614_v4 = vpack.c.bf16 %v1122_v2, %v1121_v63  ;;  %v17371_v5 = vpop.f32.mrb[8].mxu0 }
 0x10c   : > { %v871_v6 = vadd.f32 %v17371_v5, %v19597_v39  ;;  %v862_v7 = vpop.f32.mrb[9].mxu0 }
 0x10d   : > { %v863_v8 = vadd.f32 %v19597_v39, %v862_v7  ;;  %v17372_v9 = vpop.f32.mrb[10].mxu0 }
 0x10e   : > { %v1127_v10 = vmax.f32 %v871_v6, 0.0  ;;  %v874_v11 = vadd.f32 %v17372_v9, %v19597_v39  ;;  %v865_v12 = vpop.f32.mrb[11].mxu0 }
 0x10f   : > { %v1125_v13 = vmax.f32 %v863_v8, 0.0  ;;  %v866_v14 = vadd.f32 %v19597_v39, %v865_v12 }
 0x110   : > { %v1128_v15 = vmax.f32 %v874_v11, 0.0 }
 0x111   : > { %v1126_v16 = vmax.f32 %v866_v14, 0.0 }
 0x112   : > { %v19620_v17 = vpack.c.bf16 %v1128_v15, %v1127_v10 }
 0x113   : > { %v19622_v18 = vpack.c.bf16 %v1126_v16, %v1125_v13  ;;  %v17375_v19 = vpop.f32.mrb[12].mxu0 }
 0x114   : > { %v887_v20 = vadd.f32 %v17375_v19, %v19597_v39  ;;  %v878_v21 = vpop.f32.mrb[13].mxu0 }
 0x115   : > { %v879_v22 = vadd.f32 %v19597_v39, %v878_v21  ;;  %v17376_v23 = vpop.f32.mrb[14].mxu0 }
 0x116   : > { %v890_v24 = vadd.f32 %v17376_v23, %v19597_v39  ;;  %v881_v25 = vpop.f32.mrb[15].mxu0  ;;  %v1131_v26 = vmax.f32 %v887_v20, 0.0 }
 0x117   : > { %v1129_v27 = vmax.f32 %v879_v22, 0.0  ;;  %v882_v28 = vadd.f32 %v19597_v39, %v881_v25 }
 0x118   : > { %v1132_v29 = vmax.f32 %v890_v24, 0.0 }
 0x119   : > { %v1130_v30 = vmax.f32 %v882_v28, 0.0 }
 0x11a   : > { %v19630_v31 = vpack.c.bf16 %v1132_v29, %v1131_v26 }
 0x11b   : > { %v19632_v32 = vpack.c.bf16 %v1130_v30, %v1129_v27  ;;  %v17379_v33 = vpop.f32.mrb[16].mxu0 }
 0x11c   : > { %v903_v34 = vadd.f32 %v17379_v33, %v19597_v39  ;;  %v894_v35 = vpop.f32.mrb[17].mxu0 }
 0x11d   : > { %v895_v36 = vadd.f32 %v19597_v39, %v894_v35  ;;  %v17380_v37 = vpop.f32.mrb[18].mxu0 }
 0x11e   : > { %v1135_v38 = vmax.f32 %v903_v34, 0.0  ;;  %v906_v40 = vadd.f32 %v17380_v37, %v19597_v39  ;;  %v897_v41 = vpop.f32.mrb[19].mxu0 }
 0x11f   : > { %v1133_v42 = vmax.f32 %v895_v36, 0.0  ;;  %v898_v43 = vadd.f32 %v19597_v39, %v897_v41 }
 0x120   : > { %v1136_v44 = vmax.f32 %v906_v40, 0.0 }
 0x121   : > { %v1134_v45 = vmax.f32 %v898_v43, 0.0 }
 0x122   : > { %v19638_v46 = vpack.c.bf16 %v1136_v44, %v1135_v38 }
 0x123   : > { %v19640_v47 = vpack.c.bf16 %v1134_v45, %v1133_v42  ;;  %v17383_v48 = vpop.f32.mrb[20].mxu0 }
 0x124   : > { %v919_v49 = vadd.f32 %v17383_v48, %v19597_v39  ;;  %v910_v50 = vpop.f32.mrb[21].mxu0  ;;  %v17763_v48 = vld [vmem:[%s24781_s3] ss:$20 sps:$4 sm:$0xff]  }
 0x125   : > { %v911_v51 = vadd.f32 %v19597_v39, %v910_v50  ;;  %v17384_v54 = vpop.f32.mrb[22].mxu0  ;;  %16189 = vmatprep.subr.bf16.mxu1 %v19640_v47  ;;  %v17766_v50 = vld [vmem:[%s24781_s3 + $0x2c] ss:$20 sps:$4 sm:$0xff]  }
 0x126   : > { %v1139_v55 = vmax.f32 %v919_v49, 0.0  ;;  %v922_v56 = vadd.f32 %v17384_v54, %v19597_v39  ;;  %v913_v58 = vpop.f32.mrb[23].mxu0  ;;  %16190 = vmatpush3.bf16.msra.mxu1 %v19605_v53 }
 0x127   : > { %v1137_v59 = vmax.f32 %v911_v51, 0.0  ;;  %v914_v60 = vadd.f32 %v19597_v39, %v913_v58  ;;  %16191 = vmatprep.subr.bf16.mxu1 %v19638_v46 }
 0x128   : > { %v1140_v61 = vmax.f32 %v922_v56, 0.0 }
 0x129   : > { %v1138_v62 = vmax.f32 %v914_v60, 0.0 }
 0x12a   : > { %v19649_v63 = vpack.c.bf16 %v1140_v61, %v1139_v55  ;;  %16192 = vmatpush3.bf16.msra.mxu1 %v19603_v52 }
 0x12b   : > { %v19652_v0 = vpack.c.bf16 %v1138_v62, %v1137_v59  ;;  %v17387_v1 = vpop.f32.mrb[24].mxu0 }
 0x12c   : > { %v935_v2 = vadd.f32 %v17387_v1, %v19597_v39  ;;  %v926_v5 = vpop.f32.mrb[25].mxu0 }
 0x12d   : > { %v927_v6 = vadd.f32 %v19597_v39, %v926_v5  ;;  %v17388_v7 = vpop.f32.mrb[26].mxu0  ;;  %16193 = vmatprep.subr.bf16.mxu1 %v19652_v0 }
 0x12e   : > { %v1143_v8 = vmax.f32 %v935_v2, 0.0  ;;  %v938_v9 = vadd.f32 %v17388_v7, %v19597_v39  ;;  %v929_v10 = vpop.f32.mrb[27].mxu0  ;;  %16194 = vmatpush3.bf16.msra.mxu1 %v19614_v4  ;;  %v17768_v7 = vld [vmem:[%s24781_s3 + $0x28] ss:$20 sps:$4 sm:$0xff]  }
 0x12f   : > { %v1141_v11 = vmax.f32 %v927_v6, 0.0  ;;  %v930_v12 = vadd.f32 %v19597_v39, %v929_v10  ;;  %16195 = vmatprep.subr.bf16.mxu1 %v19649_v63 }
 0x130   : > { %v1144_v13 = vmax.f32 %v938_v9, 0.0  ;;  %v17769_v9 = vld [vmem:[%s24781_s3 + $0x54] ss:$20 sps:$4 sm:$0xff]  }
 0x131   : > { %v1142_v14 = vmax.f32 %v930_v12, 0.0 }
 0x132   : > { %v19661_v15 = vpack.c.bf16 %v1144_v13, %v1143_v8  ;;  %16196 = vmatpush3.bf16.msra.mxu1 %v19612_v3 }
 0x133   : > { %v19664_v16 = vpack.c.bf16 %v1142_v14, %v1141_v11  ;;  %v17391_v19 = vpop.f32.mrb[28].mxu0 }
 0x134   : > { %v951_v20 = vadd.f32 %v17391_v19, %v19597_v39  ;;  %v942_v21 = vpop.f32.mrb[29].mxu0 }
 0x135   : > { %v943_v22 = vadd.f32 %v19597_v39, %v942_v21  ;;  %v17392_v23 = vpop.f32.mrb[30].mxu0  ;;  %16197 = vmatprep.subr.bf16.mxu1 %v19664_v16 }
 0x136   : > { %v1147_v24 = vmax.f32 %v951_v20, 0.0  ;;  %v954_v25 = vadd.f32 %v17392_v23, %v19597_v39  ;;  %v945_v26 = vpop.f32.mrb[31].mxu0  ;;  %16198 = vmatpush3.bf16.msra.mxu1 %v19622_v18 }
 0x137   : > { %v1145_v27 = vmax.f32 %v943_v22, 0.0  ;;  %v946_v28 = vadd.f32 %v19597_v39, %v945_v26  ;;  %16199 = vmatprep.subr.bf16.mxu1 %v19661_v15 }
 0x138   : > { %v1148_v29 = vmax.f32 %v954_v25, 0.0 }
 0x139   : > { %v1146_v30 = vmax.f32 %v946_v28, 0.0 }
 0x13a   : > { %v19673_v33 = vpack.c.bf16 %v1148_v29, %v1147_v24  ;;  %16200 = vmatpush3.bf16.msra.mxu1 %v19620_v17  ;;  %v17772_v29 = vld [vmem:[%s24781_s3 + $0x7c] ss:$20 sps:$4 sm:$0xff]  }
 0x13b   : > { %v19676_v34 = vpack.c.bf16 %v1146_v30, %v1145_v27  ;;  %v17395_v35 = vpop.f32.mrb[32].mxu0  ;;  %v17771_v27 = vld [vmem:[%s24781_s3 + $0x50] ss:$20 sps:$4 sm:$0xff]  }
 0x13c   : > { %v967_v36 = vadd.f32 %v17395_v35, %v19597_v39  ;;  %v958_v37 = vpop.f32.mrb[33].mxu0 }
 0x13d   : > { %v959_v38 = vadd.f32 %v19597_v39, %v958_v37  ;;  %v17396_v40 = vpop.f32.mrb[34].mxu0  ;;  %16201 = vmatprep.subr.bf16.mxu1 %v19676_v34 }
 0x13e   : > { %v1151_v41 = vmax.f32 %v967_v36, 0.0  ;;  %v970_v42 = vadd.f32 %v17396_v40, %v19597_v39  ;;  %v961_v43 = vpop.f32.mrb[35].mxu0  ;;  %16202 = vmatpush3.bf16.msra.mxu1 %v19632_v32 }
 0x13f   : > { %v1149_v44 = vmax.f32 %v959_v38, 0.0  ;;  %v962_v45 = vadd.f32 %v19597_v39, %v961_v43  ;;  %16203 = vmatprep.subr.bf16.mxu1 %v19673_v33 }
 0x140   : > { %v1152_v49 = vmax.f32 %v970_v42, 0.0 }
 0x141   : > { %v1150_v51 = vmax.f32 %v962_v45, 0.0 }
 0x142   : > { %v19691_v54 = vpack.c.bf16 %v1152_v49, %v1151_v41  ;;  %16204 = vmatpush3.bf16.msra.mxu1 %v19630_v31 }
 0x143   : > { %v19694_v55 = vpack.c.bf16 %v1150_v51, %v1149_v44  ;;  %v17399_v56 = vpop.f32.mrb[36].mxu0 }
 0x144   : > { %v983_v58 = vadd.f32 %v17399_v56, %v19597_v39  ;;  %v974_v59 = vpop.f32.mrb[37].mxu0 }
 0x145   : > { %v975_v60 = vadd.f32 %v19597_v39, %v974_v59  ;;  %v17400_v61 = vpop.f32.mrb[38].mxu0  ;;  %1565 = vmatmul.mubr.bf16.vlgmr.msra.gmra.mrb[0].mxu1 %v17763_v48  ;;  %v17775_v59 = vld [vmem:[%s24781_s3 + $0xa4] ss:$20 sps:$4 sm:$0xff]  }
 0x146   : > { %v1155_v62 = vmax.f32 %v983_v58, 0.0  ;;  %v986_v1 = vadd.f32 %v17400_v61, %v19597_v39  ;;  %v977_v2 = vpop.f32.mrb[39].mxu0  ;;  %1572 = vmatprep.mubr.bf16.mxu1 %v17766_v50  ;;  %v17774_v50 = vld [vmem:[%s24781_s3 + $0x78] ss:$20 sps:$4 sm:$0xff]  }
 0x147   : > { %v1153_v5 = vmax.f32 %v975_v60, 0.0  ;;  %v978_v6 = vadd.f32 %v19597_v39, %v977_v2 }
 0x148   : > { %v1156_v8 = vmax.f32 %v986_v1, 0.0 }
 0x149   : > { %v1154_v10 = vmax.f32 %v978_v6, 0.0 }
 0x14a   : > { %v19706_v11 = vpack.c.bf16 %v1156_v8, %v1155_v62 }
 0x14b   : > { %v19708_v12 = vpack.c.bf16 %v1154_v10, %v1153_v5  ;;  %v17403_v13 = vpop.f32.mrb[40].mxu0 }
 0x14c   : > { %v999_v14 = vadd.f32 %v17403_v13, %v19597_v39  ;;  %v990_v19 = vpop.f32.mrb[41].mxu0  ;;  %v17777_v13 = vld [vmem:[%s24781_s3 + $0xa0] ss:$20 sps:$4 sm:$0xff]  }
 0x14d   : > { %v991_v20 = vadd.f32 %v19597_v39, %v990_v19  ;;  %v17404_v21 = vpop.f32.mrb[42].mxu0  ;;  %1573 = vmatmul.mubr.bf16.gmra.mrb[4].mxu1 %v17768_v7 }
 0x14e   : > { %v1159_v22 = vmax.f32 %v999_v14, 0.0  ;;  %v1002_v23 = vadd.f32 %v17404_v21, %v19597_v39  ;;  %v993_v24 = vpop.f32.mrb[43].mxu0  ;;  %1580 = vmatprep.mubr.bf16.mxu1 %v17769_v9  ;;  %v17778_v21 = vld [vmem:[%s24781_s3 + $0xcc] ss:$20 sps:$4 sm:$0xff]  }
 0x14f   : > { %v1157_v25 = vmax.f32 %v991_v20, 0.0  ;;  %v994_v26 = vadd.f32 %v19597_v39, %v993_v24 }
 0x150   : > { %v1160_v28 = vmax.f32 %v1002_v23, 0.0 }
 0x151   : > { %v1158_v30 = vmax.f32 %v994_v26, 0.0 }
 0x152   : > { %v19720_v35 = vpack.c.bf16 %v1160_v28, %v1159_v22 }
 0x153   : > { %v19722_v36 = vpack.c.bf16 %v1158_v30, %v1157_v25  ;;  %v17407_v37 = vpop.f32.mrb[44].mxu0 }
 0x154   : > { %v1015_v38 = vadd.f32 %v17407_v37, %v19597_v39  ;;  %v1006_v40 = vpop.f32.mrb[45].mxu0 }
 0x155   : > { %v1007_v41 = vadd.f32 %v19597_v39, %v1006_v40  ;;  %v17408_v42 = vpop.f32.mrb[46].mxu0  ;;  %1581 = vmatmul.mubr.bf16.gmra.mrb[8].mxu1 %v17771_v27 }
 0x156   : > { %v1163_v43 = vmax.f32 %v1015_v38, 0.0  ;;  %v1018_v44 = vadd.f32 %v17408_v42, %v19597_v39  ;;  %v1009_v45 = vpop.f32.mrb[47].mxu0  ;;  %1588 = vmatprep.mubr.bf16.mxu1 %v17772_v29  ;;  %v19760_v38 = vld [vmem:[%s24822_s2] ss:$0 sm:$0xff]  ;;  %s16148_s2 = sshll.u32 %s19479_s25, 4  ;;  %s19392_s25 = smov [#allocation2]  }
 0x157   : > { %v1161_v48 = vmax.f32 %v1007_v41, 0.0  ;;  %v1010_v49 = vadd.f32 %v19597_v39, %v1009_v45  ;;  %v17780_v41 = vld [vmem:[%s24781_s3 + $0xc8] ss:$20 sps:$4 sm:$0xff]   ;;  %s24736_s0 = scalar_lea.hbm %s24790_s12, %s16148_s2  ;;  %s19328_s29 = sshll.u32 %s19392_s25, 4  ;;  %s19329_s29 = int_to_ptr.vmem [resolvable:$false] %s19328_s29 }
 0x158   : > { %v1164_v51 = vmax.f32 %v1018_v44, 0.0  ;;  %v17781_v44 = vld [vmem:[%s24781_s3 + $0xf4] ss:$20 sps:$4 sm:$0xff]   ;;  %s19330_s15 = scalar_lea.vmem %s19329_s29, 32  ;;  %p19331_p0 = scmp.lt.s32.totalorder %s24738_s18, %s19329_s29 }
 0x159   : > { %v1162_v56 = vmax.f32 %v1010_v49, 0.0  ;;  %p19332_p1 = scmp.lt.s32.totalorder %s19330_s15, %s19324_s28 }
 0x15a   : > { %v19731_v58 = vpack.c.bf16 %v1164_v51, %v1163_v43 }
 0x15b   : > { %v19736_v60 = vpack.c.bf16 %v1162_v56, %v1161_v48  ;;  %v17411_v61 = vpop.f32.mrb[48].mxu0  ;;  %p19333_p2 = por %p19332_p1, %p19331_p0 }
 0x15c   : > { %v1031_v62 = vadd.f32 %v17411_v61, %v19597_v39  ;;  %v1022_v1 = vpop.f32.mrb[49].mxu0 }
 0x15d   : > { %v1023_v2 = vadd.f32 %v19597_v39, %v1022_v1  ;;  %v17412_v5 = vpop.f32.mrb[50].mxu0  ;;  %1589 = vmatmul.mubr.bf16.gmra.mrb[12].mxu1 %v17774_v50  ;;  %p19334_p3 = pnand %p19333_p2, %p19327_p13 }
 0x15e   : > { %v1167_v6 = vmax.f32 %v1031_v62, 0.0  ;;  %v1034_v7 = vadd.f32 %v17412_v5, %v19597_v39  ;;  %v1025_v8 = vpop.f32.mrb[51].mxu0  ;;  %1596 = vmatprep.mubr.bf16.mxu1 %v17775_v59  ;;  %v17783_v5 = vld [vmem:[%s24781_s3 + $0xf0] ss:$20 sps:$4 sm:$0xff]  }
 0x15f   : > { %v1165_v9 = vmax.f32 %v1023_v2, 0.0  ;;  %v1026_v10 = vadd.f32 %v19597_v39, %v1025_v8 }
 0x160   : > { %v1168_v14 = vmax.f32 %v1034_v7, 0.0 }
 0x161   : > { %v1166_v19 = vmax.f32 %v1026_v10, 0.0 }
 0x162   : > { %v19745_v20 = vpack.c.bf16 %v1168_v14, %v1167_v6 }
 0x163   : > { %v19750_v22 = vpack.c.bf16 %v1166_v19, %v1165_v9  ;;  %v17415_v23 = vpop.f32.mrb[52].mxu0  ;;  %v17784_v9 = vld [vmem:[%s24781_s3 + $0x11c] ss:$20 sps:$4 sm:$0xff]  }
 0x164   : > { %v1047_v24 = vadd.f32 %v17415_v23, %v19597_v39  ;;  %v1038_v25 = vpop.f32.mrb[53].mxu0 }
 0x165   : > { %v1039_v26 = vadd.f32 %v19597_v39, %v1038_v25  ;;  %v17416_v27 = vpop.f32.mrb[54].mxu0  ;;  %1597 = vmatmul.mubr.bf16.gmra.mrb[16].mxu1 %v17777_v13  ;;  %16259 = vmatprep.subr.bf16.mxu1 %v19750_v22 }
 0x166   : > { %v1171_v28 = vmax.f32 %v1047_v24, 0.0  ;;  %v1050_v29 = vadd.f32 %v17416_v27, %v19597_v39  ;;  %v1041_v30 = vpop.f32.mrb[55].mxu0  ;;  %16260 = vmatpush3.bf16.msra.mxu1 %v19694_v55  ;;  %1604 = vmatprep.mubr.bf16.mxu1 %v17778_v21 }
 0x167   : > { %v1169_v37 = vmax.f32 %v1039_v26, 0.0  ;;  %v1042_v40 = vadd.f32 %v19760_v38, %v1041_v30  ;;  %16261 = vmatprep.subr.bf16.mxu1 %v19745_v20 }
 0x168   : > { %v1172_v42 = vmax.f32 %v1050_v29, 0.0 }
 0x169   : > { %v1170_v39 = vmax.f32 %v1042_v40, 0.0 }
 0x16a   : > { %v19767_v43 = vpack.c.bf16 %v1172_v42, %v1171_v28  ;;  %16262 = vmatpush3.bf16.msra.mxu1 %v19691_v54 }
 0x16b   : > { %v19773_v45 = vpack.c.bf16 %v1170_v39, %v1169_v37  ;;  %v17419_v48 = vpop.f32.mrb[56].mxu0  ;;  %v17786_v37 = vld [vmem:[%s24781_s3 + $0x118] ss:$20 sps:$4 sm:$0xff]  }
 0x16c   : > { %v1063_v49 = vadd.f32 %v19760_v38, %v17419_v48  ;;  %v1054_v50 = vpop.f32.mrb[57].mxu0 }
 0x16d   : > { %v1055_v51 = vadd.f32 %v19760_v38, %v1054_v50  ;;  %v17420_v56 = vpop.f32.mrb[58].mxu0  ;;  %1605 = vmatmul.mubr.bf16.gmra.mrb[20].mxu1 %v17780_v41  ;;  %16263 = vmatprep.subr.bf16.mxu1 %v19773_v45  ;;  %v17787_v41 = vld [vmem:[%s24781_s3 + $0x144] ss:$20 sps:$4 sm:$0xff]  }
 0x16e   : > { %v1175_v59 = vmax.f32 %v1063_v49, 0.0  ;;  %v1066_v61 = vadd.f32 %v19760_v38, %v17420_v56  ;;  %v1057_v62 = vpop.f32.mrb[59].mxu0  ;;  %16264 = vmatpush3.bf16.msra.mxu1 %v19708_v12  ;;  %1612 = vmatprep.mubr.bf16.mxu1 %v17781_v44 }
 0x16f   : > { %v1173_v1 = vmax.f32 %v1055_v51, 0.0  ;;  %v1058_v2 = vadd.f32 %v19760_v38, %v1057_v62  ;;  %16265 = vmatprep.subr.bf16.mxu1 %v19767_v43 }
 0x170   : > { %v1176_v6 = vmax.f32 %v1066_v61, 0.0 }
 0x171   : > { %v1174_v7 = vmax.f32 %v1058_v2, 0.0 }
 0x172   : > { %v19785_v8 = vpack.c.bf16 %v1176_v6, %v1175_v59  ;;  %16266 = vmatpush3.bf16.msra.mxu1 %v19706_v11 }
 0x173   : > { %v19791_v10 = vpack.c.bf16 %v1174_v7, %v1173_v1  ;;  %v17423_v13 = vpop.f32.mrb[60].mxu0  ;;  %v17789_v1 = vld [vmem:[%s24781_s3 + $0x140] ss:$20 sps:$4 sm:$0xff]  }
 0x174   : > { %v1079_v14 = vadd.f32 %v19760_v38, %v17423_v13  ;;  %v1070_v19 = vpop.f32.mrb[61].mxu0 }
 0x175   : > { %v1071_v21 = vadd.f32 %v19760_v38, %v1070_v19  ;;  %v17424_v23 = vpop.f32.mrb[62].mxu0  ;;  %1613 = vmatmul.mubr.bf16.gmra.mrb[24].mxu1 %v17783_v5  ;;  %16267 = vmatprep.subr.bf16.mxu1 %v19791_v10  ;;  %v17792_v5 = vld [vmem:[%s24781_s3 + $0xc] ss:$20 sps:$4 sm:$0xff]  }
 0x176   : > { %v1179_v24 = vmax.f32 %v1079_v14, 0.0  ;;  %v1082_v25 = vadd.f32 %v19760_v38, %v17424_v23  ;;  %v1073_v26 = vpop.f32.mrb[63].mxu0  ;;  %16268 = vmatpush3.bf16.msra.mxu1 %v19722_v36  ;;  %1620 = vmatprep.mubr.bf16.mxu1 %v17784_v9 }
 0x177   : > { %v1177_v27 = vmax.f32 %v1071_v21, 0.0  ;;  %v1074_v28 = vadd.f32 %v19760_v38, %v1073_v26  ;;  %16269 = vmatprep.subr.bf16.mxu1 %v19785_v8 }
 0x178   : > { %v1180_v29 = vmax.f32 %v1082_v25, 0.0 }
 0x179   : > { %v1178_v30 = vmax.f32 %v1074_v28, 0.0 }
 0x17a   : > { %v19803_v40 = vpack.c.bf16 %v1180_v29, %v1179_v24  ;;  %16270 = vmatpush3.bf16.msra.mxu1 %v19720_v35  ;;  %v17790_v29 = vld [vmem:[%s24781_s3 + $0x8] ss:$20 sps:$4 sm:$0xff]  }
 0x17b   : > { %v19809_v42 = vpack.c.bf16 %v1178_v30, %v1177_v27  ;;  %v17427_v39 = vpop.f32.mrb[64].mxu0 }
 0x17c   : > { %v1095_v44 = vadd.f32 %v19760_v38, %v17427_v39  ;;  %v1086_v48 = vpop.f32.mrb[65].mxu0 }
 0x17d   : > { %v1087_v49 = vadd.f32 %v19760_v38, %v1086_v48  ;;  %v17428_v50 = vpop.f32.mrb[66].mxu0  ;;  %1621 = vmatmul.mubr.bf16.gmra.mrb[28].mxu1 %v17786_v37  ;;  %16271 = vmatprep.subr.bf16.mxu1 %v19809_v42  ;;  %v17796_v48 = vld [vmem:[%s24781_s3 + $0x30] ss:$20 sps:$4 sm:$0xff]  }
 0x17e   : > { %v1183_v51 = vmax.f32 %v1095_v44, 0.0  ;;  %v1098_v56 = vadd.f32 %v19760_v38, %v17428_v50  ;;  %v1089_v59 = vpop.f32.mrb[67].mxu0  ;;  %16272 = vmatpush3.bf16.msra.mxu1 %v19736_v60  ;;  %1628 = vmatprep.mubr.bf16.mxu1 %v17787_v41  ;;  %v17793_v41 = vld [vmem:[%s24781_s3 + $0x34] ss:$20 sps:$4 sm:$0xff]   ;;  %v17799_v50 = vld [vmem:[%s24781_s3 + $0x38] ss:$20 sps:$4 sm:$0xff]  }
 0x17f   : > { %v1181_v61 = vmax.f32 %v1087_v49, 0.0  ;;  %v1090_v62 = vadd.f32 %v19760_v38, %v1089_v59  ;;  %16273 = vmatprep.subr.bf16.mxu1 %v19803_v40  ;;  %v17797_v49 = vld [vmem:[%s24781_s3 + $0x5c] ss:$20 sps:$4 sm:$0xff]   ;;  %v17803_v59 = vld [vmem:[%s24781_s3 + $0x60] ss:$20 sps:$4 sm:$0xff]  }
 0x180   : > { %v1184_v2 = vmax.f32 %v1098_v56, 0.0  ;;  %v17801_v56 = vld [vmem:[%s24781_s3 + $0x84] ss:$20 sps:$4 sm:$0xff]  }
 0x181   : > { %v1182_v6 = vmax.f32 %v1090_v62, 0.0  ;;  %v17805_v62 = vld [vmem:[%s24781_s3 + $0xac] ss:$20 sps:$4 sm:$0xff]  }
 0x182   : > { %v19824_v7 = vpack.c.bf16 %v1184_v2, %v1183_v51  ;;  %16274 = vmatpush3.bf16.msra.mxu1 %v19731_v58  ;;  %v17800_v51 = vld [vmem:[%s24781_s3 + $0x58] ss:$20 sps:$4 sm:$0xff]   ;;  %v17808_v2 = vld [vmem:[%s24781_s3 + $0xa8] ss:$20 sps:$4 sm:$0xff]  }
 0x183   : > { %v19827_v9 = vpack.c.bf16 %v1182_v6, %v1181_v61  ;;  %v17431_v13 = vpop.f32.mrb[68].mxu0  ;;  %16342 = vmatprep.subr.bf16.mxu1 %v19640_v47  ;;  %v17804_v61 = vld [vmem:[%s24781_s3 + $0x80] ss:$20 sps:$4 sm:$0xff]   ;;  %v17811_v6 = vld [vmem:[%s24781_s3 + $0xb0] ss:$20 sps:$4 sm:$0xff]  }
 0x184   : > { %v1111_v14 = vadd.f32 %v19760_v38, %v17431_v13  ;;  %v1102_v19 = vpop.f32.mrb[69].mxu0  ;;  %v17812_v13 = vld [vmem:[%s24781_s3 + $0xd0] ss:$20 sps:$4 sm:$0xff]  }
 0x185   : > { %v1103_v21 = vadd.f32 %v19760_v38, %v1102_v19  ;;  %v17432_v23 = vpop.f32.mrb[70].mxu0  ;;  %1629 = vmatmul.mubr.bf16.gmra.mrb[32].mxu1 %v17789_v1  ;;  %17434 = vmatpush3.bf16.msra.mxu0 %v19827_v9  ;;  %v17807_v1 = vld [vmem:[%s24781_s3 + $0x88] ss:$20 sps:$4 sm:$0xff]   ;;  %v17815_v19 = vld [vmem:[%s24781_s3 + $0xd8] ss:$20 sps:$4 sm:$0xff]  }
 0x186   : > { %v1187_v24 = vmax.f32 %v1111_v14, 0.0  ;;  %v1114_v25 = vadd.f32 %v19760_v38, %v17432_v23  ;;  %v1105_v26 = vpop.f32.mrb[71].mxu0  ;;  %17435 = vmatprep.subr.bf16.mxu0 %v24791_v57  ;;  %1669 = vmatprep.mubr.bf16.mxu1 %v17792_v5  ;;  %v17809_v5 = vld [vmem:[%s24781_s3 + $0xd4] ss:$20 sps:$4 sm:$0xff]   ;;  %v17813_v14 = vld [vmem:[%s24781_s3 + $0xfc] ss:$20 sps:$4 sm:$0xff]  }
 0x187   : > { %v1185_v27 = vmax.f32 %v1103_v21, 0.0  ;;  %v1106_v28 = vadd.f32 %v19760_v38, %v1105_v26  ;;  %v17795_v38 = vld [vmem:[%s24781_s3 + $0x10] ss:$20 sps:$4 sm:$0xff]   ;;  %v17816_v21 = vld [vmem:[%s24781_s3 + $0xf8] ss:$20 sps:$4 sm:$0xff]  }
 0x188   : > { %v1188_v30 = vmax.f32 %v1114_v25, 0.0  ;;  %v17817_v23 = vld [vmem:[%s24781_s3 + $0x124] ss:$20 sps:$4 sm:$0xff]   ;;  %v17820_v25 = vld [vmem:[%s24781_s3 + $0x120] ss:$20 sps:$4 sm:$0xff]  }
 0x189   : > { %v1186_v37 = vmax.f32 %v1106_v28, 0.0  ;;  %17436 = vmatpush3.bf16.msra.mxu0 %v19824_v7  ;;  %v17821_v26 = vld [vmem:[%s24781_s3 + $0x14c] ss:$20 sps:$4 sm:$0xff]   ;;  %v17824_v28 = vld [vmem:[%s24781_s3 + $0x148] ss:$20 sps:$4 sm:$0xff]  }
 0x18a   : > { %v19843_v39 = vpack.c.bf16 %v1188_v30, %v1187_v24  ;;  %17437 = vmatprep.subr.bf16.mxu0 %v24791_v57  ;;  %v17819_v24 = vld [vmem:[%s24781_s3 + $0x100] ss:$20 sps:$4 sm:$0xff]   ;;  %v17825_v30 = vld [vmem:[%s24781_s3 + $0x150] ss:$20 sps:$4 sm:$0xff]  }
 0x18b   : > { %v19846_v44 = vpack.c.bf16 %v1186_v37, %v1185_v27  ;;  %v17823_v27 = vld [vmem:[%s24781_s3 + $0x128] ss:$20 sps:$4 sm:$0xff]  }
 0x18c   : > { %24823 = vst [vmem:[#allocation5_spill] sm:$0xff] %v19843_v39  ;;  %v17826_v37 = vld [vmem:[%s24781_s3 + $0x168] ss:$20 sps:$4 sm:$0xff]  }
 0x18d   : > { %24824 = vst [vmem:[#allocation6_spill] sm:$0xff] %v19846_v44  ;;  %1670 = vmatmul.mubr.bf16.vlgmr.msra.gmra.mrb[36].mxu1 %v17790_v29  ;;  %17438 = vmatpush3.bf16.msra.mxu0 %v19846_v44  ;;  %v17828_v29 = vld [vmem:[%s24781_s3 + $0x16c] ss:$20 sps:$4 sm:$0xff]  }
 0x18e   : > { %16343 = vmatpush3.bf16.msra.mxu1 %v19605_v53  ;;  %17439 = vmatprep.subr.bf16.mxu0 %v24791_v57 }
 0x18f   : > { %16344 = vmatprep.subr.bf16.mxu1 %v19638_v46  ;;  %1677 = vmatprep.mubr.bf16.mxu1 %v17793_v41  ;;  %v17831_v41 = vld [vmem:[%s24781_s3 + $0x174] ss:$20 sps:$4 sm:$0xff]  }
 0x191   : > { %17440 = vmatpush3.bf16.msra.mxu0 %v19843_v39 }
 0x192   : > { %16345 = vmatpush3.bf16.msra.mxu1 %v19603_v52  ;;  %16412 = vmatprep.subr.bf16.mxu0 %v19750_v22 }
 0x193   : > { %16346 = vmatprep.subr.bf16.mxu1 %v19652_v0 }
 0x194   : > { %17442 = vmatmul.mubr.msk.bf16.vlgmr.msra.gmra.mrb[72].mxu0 %vm1504_vm2, %v17795_v38  ;;  %v17832_v38 = vld [vmem:[%s24781_s3 + $0x194] ss:$20 sps:$4 sm:$0xff]  }
 0x195   : > { %1678 = vmatmul.mubr.bf16.gmra.mrb[40].mxu1 %v17796_v48  ;;  %16413 = vmatpush3.bf16.msra.mxu0 %v19694_v55  ;;  %v17829_v48 = vld [vmem:[%s24781_s3 + $0x170] ss:$20 sps:$4 sm:$0xff]  }
 0x196   : > { %16347 = vmatpush3.bf16.msra.mxu1 %v19614_v4  ;;  %16414 = vmatprep.subr.bf16.mxu0 %v19745_v20 }
 0x197   : > { %16348 = vmatprep.subr.bf16.mxu1 %v19649_v63  ;;  %17445 = vmatprep.mubr.msk.bf16.mxu0 %vm19389_vm1, %v24791_v57 }
 0x198   : > { %1685 = vmatprep.mubr.bf16.mxu1 %v17797_v49  ;;  %v17834_v49 = vld [vmem:[%s24781_s3 + $0x190] ss:$20 sps:$4 sm:$0xff]  }
 0x199   : > { %16415 = vmatpush3.bf16.msra.mxu0 %v19691_v54 }
 0x19a   : > { %16349 = vmatpush3.bf16.msra.mxu1 %v19612_v3  ;;  %16416 = vmatprep.subr.bf16.mxu0 %v19773_v45 }
 0x19b   : > { %16350 = vmatprep.subr.bf16.mxu1 %v19664_v16 }
 0x19c   : > { %17446 = vmatmul.mubr.msk.bf16.gmra.mrb[76].mxu0 %vm1504_vm2, %v17799_v50  ;;  %v17835_v50 = vld [vmem:[%s24781_s3 + $0x19c] ss:$20 sps:$4 sm:$0xff]  }
 0x19d   : > { %1686 = vmatmul.mubr.bf16.gmra.mrb[44].mxu1 %v17800_v51  ;;  %16417 = vmatpush3.bf16.msra.mxu0 %v19708_v12  ;;  %v17837_v51 = vld [vmem:[%s24781_s3 + $0x1bc] ss:$20 sps:$4 sm:$0xff]  }
 0x19e   : > { %16351 = vmatpush3.bf16.msra.mxu1 %v19622_v18  ;;  %16418 = vmatprep.subr.bf16.mxu0 %v19767_v43 }
 0x19f   : > { %16352 = vmatprep.subr.bf16.mxu1 %v19661_v15  ;;  %17449 = vmatprep.mubr.msk.bf16.mxu0 %vm19389_vm1, %v24791_v57 }
 0x1a0   : > { %1693 = vmatprep.mubr.bf16.mxu1 %v17801_v56  ;;  %v17839_v56 = vld [vmem:[%s24781_s3 + $0x198] ss:$20 sps:$4 sm:$0xff]  }
 0x1a1   : > { %16419 = vmatpush3.bf16.msra.mxu0 %v19706_v11 }
 0x1a2   : > { %16353 = vmatpush3.bf16.msra.mxu1 %v19620_v17  ;;  %16420 = vmatprep.subr.bf16.mxu0 %v19791_v10 }
 0x1a3   : > { %16354 = vmatprep.subr.bf16.mxu1 %v19676_v34 }
 0x1a4   : > { %17450 = vmatmul.mubr.msk.bf16.gmra.mrb[80].mxu0 %vm1504_vm2, %v17803_v59  ;;  %v17840_v59 = vld [vmem:[%s24781_s3 + $0x1b8] ss:$20 sps:$4 sm:$0xff]  }
 0x1a5   : > { %1694 = vmatmul.mubr.bf16.gmra.mrb[48].mxu1 %v17804_v61  ;;  %16421 = vmatpush3.bf16.msra.mxu0 %v19722_v36  ;;  %v17841_v61 = vld [vmem:[%s24781_s3 + $0x1c4] ss:$20 sps:$4 sm:$0xff]  }
 0x1a6   : > { %16355 = vmatpush3.bf16.msra.mxu1 %v19632_v32  ;;  %16422 = vmatprep.subr.bf16.mxu0 %v19785_v8 }
 0x1a7   : > { %16356 = vmatprep.subr.bf16.mxu1 %v19673_v33  ;;  %17453 = vmatprep.mubr.msk.bf16.mxu0 %vm19389_vm1, %v24791_v57 }
 0x1a8   : > { %1701 = vmatprep.mubr.bf16.mxu1 %v17805_v62  ;;  %v17843_v62 = vld [vmem:[%s24781_s3 + $0x1e4] ss:$20 sps:$4 sm:$0xff]  }
 0x1a9   : > { %16423 = vmatpush3.bf16.msra.mxu0 %v19720_v35 }
 0x1aa   : > { %16357 = vmatpush3.bf16.msra.mxu1 %v19630_v31  ;;  %16424 = vmatprep.subr.bf16.mxu0 %v19809_v42 }
 0x1ab   : > { %17477 = vmatprep.subr.bf16.mxu1 %v24791_v57 }
 0x1ac   : > { %17454 = vmatmul.mubr.msk.bf16.gmra.mrb[84].mxu0 %vm1504_vm2, %v17807_v1  ;;  %v17845_v1 = vld [vmem:[%s24781_s3 + $0x1c0] ss:$20 sps:$4 sm:$0xff]  }
 0x1ad   : > { %1702 = vmatmul.mubr.bf16.gmra.mrb[52].mxu1 %v17808_v2  ;;  %16425 = vmatpush3.bf16.msra.mxu0 %v19736_v60  ;;  %v17846_v2 = vld [vmem:[%s24781_s3 + $0x1e0] ss:$20 sps:$4 sm:$0xff]  }
 0x1ae   : > { %16426 = vmatprep.subr.bf16.mxu0 %v19803_v40  ;;  %17457 = vmatprep.mubr.msk.bf16.mxu0 %vm19389_vm1, %v24791_v57 }
 0x1af   : > { %1709 = vmatprep.mubr.bf16.mxu1 %v17809_v5  ;;  %v17847_v5 = vld [vmem:[%s24781_s3 + $0x1ec] ss:$20 sps:$4 sm:$0xff]  }
 0x1b1   : > { %16427 = vmatpush3.bf16.msra.mxu0 %v19731_v58 }
 0x1b2   : > { %16495 = vmatprep.subr.bf16.mxu0 %v19640_v47 }
 0x1b4   : > { %17458 = vmatmul.mubr.msk.bf16.gmra.mrb[88].mxu0 %vm1504_vm2, %v17811_v6  ;;  %v17849_v6 = vld [vmem:[%s24781_s3 + $0x20c] ss:$20 sps:$4 sm:$0xff]  }
 0x1b5   : > { %1710 = vmatmul.mubr.bf16.gmra.mrb[56].mxu1 %v17812_v13  ;;  %17461 = vmatprep.mubr.msk.bf16.mxu0 %vm19389_vm1, %v24791_v57  ;;  %v17851_v13 = vld [vmem:[%s24781_s3 + $0x1e8] ss:$20 sps:$4 sm:$0xff]  }
 0x1b6   : > { %1717 = vmatprep.mubr.bf16.mxu1 %v17813_v14  ;;  %v17852_v14 = vld [vmem:[%s24781_s3 + $0x208] ss:$20 sps:$4 sm:$0xff]  }
 0x1bc   : > { %17462 = vmatmul.mubr.msk.bf16.gmra.mrb[92].mxu0 %vm1504_vm2, %v17815_v19  ;;  %v17853_v19 = vld [vmem:[%s24781_s3 + $0x214] ss:$20 sps:$4 sm:$0xff]  }
 0x1bd   : > { %1718 = vmatmul.mubr.bf16.gmra.mrb[60].mxu1 %v17816_v21  ;;  %17465 = vmatprep.mubr.msk.bf16.mxu0 %vm19389_vm1, %v24791_v57  ;;  %v17855_v21 = vld [vmem:[%s24781_s3 + $0x234] ss:$20 sps:$4 sm:$0xff]  }
 0x1be   : > { %1725 = vmatprep.mubr.bf16.mxu1 %v17817_v23  ;;  %v17857_v23 = vld [vmem:[%s24781_s3 + $0x210] ss:$20 sps:$4 sm:$0xff]  }
 0x1c4   : > { %17466 = vmatmul.mubr.msk.bf16.gmra.mrb[96].mxu0 %vm1504_vm2, %v17819_v24  ;;  %v17858_v24 = vld [vmem:[%s24781_s3 + $0x230] ss:$20 sps:$4 sm:$0xff]  }
 0x1c5   : > { %1726 = vmatmul.mubr.bf16.gmra.mrb[64].mxu1 %v17820_v25  ;;  %17469 = vmatprep.mubr.msk.bf16.mxu0 %vm19389_vm1, %v24791_v57  ;;  %v17859_v25 = vld [vmem:[%s24781_s3 + $0x23c] ss:$20 sps:$4 sm:$0xff]  }
 0x1c6   : > { %1733 = vmatprep.mubr.bf16.mxu1 %v17821_v26  ;;  %v17861_v26 = vld [vmem:[%s24781_s3 + $0x25c] ss:$20 sps:$4 sm:$0xff]  }
 0x1cc   : > { %17470 = vmatmul.mubr.msk.bf16.gmra.mrb[100].mxu0 %vm1504_vm2, %v17823_v27  ;;  %v17863_v27 = vld [vmem:[%s24781_s3 + $0x238] ss:$20 sps:$4 sm:$0xff]  }
 0x1cd   : > { %1734 = vmatmul.mubr.bf16.gmra.mrb[68].mxu1 %v17824_v28  ;;  %17473 = vmatprep.mubr.msk.bf16.mxu0 %vm19389_vm1, %v24791_v57  ;;  %v17864_v28 = vld [vmem:[%s24781_s3 + $0x258] ss:$20 sps:$4 sm:$0xff]  }
 0x1ce   : > { %2186 = vmatprep.mubr.bf16.mxu1 %v17828_v29  ;;  %v17865_v29 = vld [vmem:[%s24781_s3 + $0x264] ss:$20 sps:$4 sm:$0xff]  }
 0x1d4   : > { %17474 = vmatmul.mubr.msk.bf16.gmra.mrb[104].mxu0 %vm1504_vm2, %v17825_v30  ;;  %v17867_v30 = vld [vmem:[%s24781_s3 + $0x284] ss:$20 sps:$4 sm:$0xff]  }
 0x1d5   : > { %2187 = vmatmul.mubr.bf16.vlgmr.msra.gmra.mrb[72].mxu1 %v17826_v37  ;;  %2291 = vmatprep.mubr.bf16.mxu0 %v17831_v41  ;;  %v17869_v37 = vld [vmem:[%s24781_s3 + $0x260] ss:$20 sps:$4 sm:$0xff]  }
 0x1d6   : > { %17478 = vmatpush3.bf16.msra.mxu1 %v19827_v9  ;;  %2194 = vmatprep.mubr.bf16.mxu1 %v17832_v38  ;;  %v17870_v41 = vld [vmem:[%s24781_s3 + $0x280] ss:$20 sps:$4 sm:$0xff]  }
 0x1d7   : > { %17479 = vmatprep.subr.bf16.mxu1 %v24791_v57  ;;  %v17871_v38 = vld [vmem:[%s24781_s3 + $0x28c] ss:$20 sps:$4 sm:$0xff]  }
 0x1da   : > { %17480 = vmatpush3.bf16.msra.mxu1 %v19824_v7 }
 0x1db   : > { %17481 = vmatprep.subr.bf16.mxu1 %v24791_v57 }
 0x1dc   : > { %2292 = vmatmul.mubr.bf16.vlgmr.msra.gmra.mrb[108].mxu0 %v17829_v48  ;;  %v17873_v48 = vld [vmem:[%s24781_s3 + $0x2ac] ss:$20 sps:$4 sm:$0xff]  }
 0x1dd   : > { %16496 = vmatpush3.bf16.msra.mxu0 %v19605_v53  ;;  %2195 = vmatmul.mubr.bf16.gmra.mrb[76].mxu1 %v17834_v49  ;;  %v17875_v49 = vld [vmem:[%s24781_s3 + $0x288] ss:$20 sps:$4 sm:$0xff]  }
 0x1de   : > { %17482 = vmatpush3.bf16.msra.mxu1 %v19846_v44  ;;  %16497 = vmatprep.subr.bf16.mxu0 %v19638_v46 }
 0x1df   : > { %17483 = vmatprep.subr.bf16.mxu1 %v24791_v57  ;;  %2299 = vmatprep.mubr.bf16.mxu0 %v17835_v50  ;;  %v17876_v50 = vld [vmem:[%s24781_s3 + $0x2a8] ss:$20 sps:$4 sm:$0xff]  }
 0x1e0   : > { %2202 = vmatprep.mubr.bf16.mxu1 %v17837_v51  ;;  %v17877_v51 = vld [vmem:[%s24781_s3 + $0x2b4] ss:$20 sps:$4 sm:$0xff]  }
 0x1e1   : > { %16498 = vmatpush3.bf16.msra.mxu0 %v19603_v52 }
 0x1e2   : > { %17484 = vmatpush3.bf16.msra.mxu1 %v19843_v39  ;;  %16499 = vmatprep.subr.bf16.mxu0 %v19652_v0 }
 0x1e3   : > { %16565 = vmatprep.subr.bf16.mxu1 %v19750_v22 }
 0x1e4   : > { %2300 = vmatmul.mubr.bf16.gmra.mrb[112].mxu0 %v17839_v56  ;;  %v17879_v56 = vld [vmem:[%s24781_s3 + $0x2b0] ss:$20 sps:$4 sm:$0xff]  }
 0x1e5   : > { %16500 = vmatpush3.bf16.msra.mxu0 %v19614_v4  ;;  %2203 = vmatmul.mubr.bf16.gmra.mrb[80].mxu1 %v17840_v59  ;;  %v17880_v59 = vld [vmem:[%s24781_s3 + $0x178] ss:$20 sps:$4 sm:$0xff]  }
 0x1e6   : > { %16501 = vmatprep.subr.bf16.mxu0 %v19649_v63  ;;  %2307 = vmatprep.mubr.bf16.mxu0 %v17841_v61  ;;  %v17883_v61 = vld [vmem:[%s24781_s3 + $0x2d4] ss:$20 sps:$4 sm:$0xff]  }
 0x1e7   : > { %2210 = vmatprep.mubr.bf16.mxu1 %v17843_v62 }
 0x1e9   : > { %16502 = vmatpush3.bf16.msra.mxu0 %v19612_v3 }
 0x1ea   : > { %16503 = vmatprep.subr.bf16.mxu0 %v19664_v16 }
 0x1ec   : > { %2308 = vmatmul.mubr.bf16.gmra.mrb[116].mxu0 %v17845_v1 }
 0x1ed   : > { %16504 = vmatpush3.bf16.msra.mxu0 %v19622_v18  ;;  %2211 = vmatmul.mubr.bf16.gmra.mrb[84].mxu1 %v17846_v2 }
 0x1ee   : > { %16505 = vmatprep.subr.bf16.mxu0 %v19661_v15  ;;  %2315 = vmatprep.mubr.bf16.mxu0 %v17847_v5 }
 0x1ef   : > { %2218 = vmatprep.mubr.bf16.mxu1 %v17849_v6 }
 0x1f1   : > { %16506 = vmatpush3.bf16.msra.mxu0 %v19620_v17 }
 0x1f2   : > { %16507 = vmatprep.subr.bf16.mxu0 %v19676_v34 }
 0x1f4   : > { %2316 = vmatmul.mubr.bf16.gmra.mrb[120].mxu0 %v17851_v13 }
 0x1f5   : > { %16508 = vmatpush3.bf16.msra.mxu0 %v19632_v32  ;;  %2219 = vmatmul.mubr.bf16.gmra.mrb[88].mxu1 %v17852_v14  ;;  %v17881_v14 = vld [vmem:[%s24781_s3 + $0x2d0] ss:$20 sps:$4 sm:$0xff]  }
 0x1f6   : > { %16509 = vmatprep.subr.bf16.mxu0 %v19673_v33  ;;  %2323 = vmatprep.mubr.bf16.mxu0 %v17853_v19  ;;  %v17884_v19 = vld [vmem:[%s24781_s3 + $0x1a0] ss:$20 sps:$4 sm:$0xff]  }
 0x1f7   : > { %2226 = vmatprep.mubr.bf16.mxu1 %v17855_v21 }
 0x1f9   : > { %16510 = vmatpush3.bf16.msra.mxu0 %v19630_v31 }
 0x1fa   : > { %17521 = vmatprep.subr.bf16.mxu0 %v24791_v57 }
 0x1fc   : > { %2324 = vmatmul.mubr.bf16.gmra.mrb[124].mxu0 %v17857_v23 }
 0x1fd   : > { %2227 = vmatmul.mubr.bf16.gmra.mrb[92].mxu1 %v17858_v24  ;;  %2331 = vmatprep.mubr.bf16.mxu0 %v17859_v25 }
 0x1fe   : > { %2234 = vmatprep.mubr.bf16.mxu1 %v17861_v26  ;;  %v17885_v26 = vld [vmem:[%s24781_s3 + $0x2fc] ss:$20 sps:$4 sm:$0xff]  }
 0x204   : > { %2332 = vmatmul.mubr.bf16.gmra.mrb[128].mxu0 %v17863_v27 }
 0x205   : > { %2235 = vmatmul.mubr.bf16.gmra.mrb[96].mxu1 %v17864_v28  ;;  %2339 = vmatprep.mubr.bf16.mxu0 %v17865_v29  ;;  %v17887_v29 = vld [vmem:[%s24781_s3 + $0x2f8] ss:$20 sps:$4 sm:$0xff]  }
 0x206   : > { %2242 = vmatprep.mubr.bf16.mxu1 %v17867_v30  ;;  %v17888_v30 = vld [vmem:[%s24781_s3 + $0x1c8] ss:$20 sps:$4 sm:$0xff]  }
 0x20c   : > { %2340 = vmatmul.mubr.bf16.gmra.mrb[132].mxu0 %v17869_v37 }
 0x20d   : > { %2243 = vmatmul.mubr.bf16.gmra.mrb[100].mxu1 %v17870_v41  ;;  %2347 = vmatprep.mubr.bf16.mxu0 %v17871_v38 }
 0x20e   : > { %2250 = vmatprep.mubr.bf16.mxu1 %v17873_v48 }
 0x214   : > { %2348 = vmatmul.mubr.bf16.gmra.mrb[136].mxu0 %v17875_v49  ;;  %v17889_v49 = vld [vmem:[%s24781_s3 + $0x324] ss:$20 sps:$4 sm:$0xff]  }
 0x215   : > { %2251 = vmatmul.mubr.bf16.gmra.mrb[104].mxu1 %v17876_v50  ;;  %2355 = vmatprep.mubr.bf16.mxu0 %v17877_v51 }
 0x216   : > { %17485 = vmatprep.mubr.msk.bf16.mxu1 %vm19389_vm1, %v24791_v57 }
 0x218   : > { %v16205_v62 = vpop.f32.mrb[0].mxu1 }
 0x219   : > { %v16206_v1 = vpop.f32.mrb[1].mxu1 }
 0x21a   : > { %v20121_v2 = vadd.f32 %v16206_v1, %v16205_v62  ;;  %v16208_v5 = vpop.f32.mrb[2].mxu1 }
 0x21b   : > { %v16209_v6 = vpop.f32.mrb[3].mxu1 }
 0x21c   : > { %2356 = vmatmul.mubr.bf16.gmra.mrb[140].mxu0 %v17879_v56  ;;  %v20123_v13 = vadd.f32 %v16209_v6, %v16208_v5  ;;  %v17891_v56 = vld [vmem:[%s24781_s3 + $0x320] ss:$20 sps:$4 sm:$0xff]  }
 0x21d   : > { %17486 = vmatmul.mubr.msk.bf16.vlgmr.msra.gmra.mrb[108].mxu1 %vm1504_vm2, %v17880_v59  ;;  %2808 = vmatprep.mubr.bf16.mxu0 %v17883_v61  ;;  %v17892_v59 = vld [vmem:[%s24781_s3 + $0x1f0] ss:$20 sps:$4 sm:$0xff]   ;;  %v17893_v61 = vld [vmem:[%s24781_s3 + $0x34c] ss:$20 sps:$4 sm:$0xff]  }
 0x21e   : > { %16566 = vmatpush3.bf16.msra.mxu1 %v19694_v55  ;;  %17489 = vmatprep.mubr.msk.bf16.mxu1 %vm19389_vm1, %v24791_v57 }
 0x21f   : > { %16567 = vmatprep.subr.bf16.mxu1 %v19745_v20 }
 0x220   : > { %v16211_v21 = vpop.f32.mrb[4].mxu1 }
 0x221   : > { %v16212_v23 = vpop.f32.mrb[5].mxu1 }
 0x222   : > { %16568 = vmatpush3.bf16.msra.mxu1 %v19691_v54  ;;  %v20137_v24 = vadd.f32 %v16212_v23, %v16211_v21  ;;  %v16214_v25 = vpop.f32.mrb[6].mxu1  ;;  %v17896_v21 = vld [vmem:[%s24781_s3 + $0x218] ss:$20 sps:$4 sm:$0xff]   ;;  %v17897_v23 = vld [vmem:[%s24781_s3 + $0x374] ss:$20 sps:$4 sm:$0xff]  }
 0x223   : > { %16569 = vmatprep.subr.bf16.mxu1 %v19773_v45  ;;  %v16215_v27 = vpop.f32.mrb[7].mxu1 }
 0x224   : > { %2809 = vmatmul.mubr.bf16.vlgmr.msra.gmra.mrb[144].mxu0 %v17881_v14  ;;  %v20143_v28 = vadd.f32 %v16215_v27, %v16214_v25 }
 0x225   : > { %17522 = vmatpush3.bf16.msra.mxu0 %v19827_v9  ;;  %17490 = vmatmul.mubr.msk.bf16.gmra.mrb[112].mxu1 %vm1504_vm2, %v17884_v19 }
 0x226   : > { %16570 = vmatpush3.bf16.msra.mxu1 %v19708_v12  ;;  %17523 = vmatprep.subr.bf16.mxu0 %v24791_v57 }
 0x227   : > { %16571 = vmatprep.subr.bf16.mxu1 %v19767_v43  ;;  %2816 = vmatprep.mubr.bf16.mxu0 %v17885_v26 }
 0x228   : > { %17493 = vmatprep.mubr.msk.bf16.mxu1 %vm19389_vm1, %v24791_v57  ;;  %v16217_v37 = vpop.f32.mrb[8].mxu1 }
 0x229   : > { %17524 = vmatpush3.bf16.msra.mxu0 %v19824_v7  ;;  %v16218_v41 = vpop.f32.mrb[9].mxu1 }
 0x22a   : > { %16572 = vmatpush3.bf16.msra.mxu1 %v19706_v11  ;;  %17525 = vmatprep.subr.bf16.mxu0 %v24791_v57  ;;  %v20161_v38 = vadd.f32 %v16218_v41, %v16217_v37  ;;  %v16220_v48 = vpop.f32.mrb[10].mxu1  ;;  %v17899_v41 = vld [vmem:[%s24781_s3 + $0x370] ss:$20 sps:$4 sm:$0xff]  }
 0x22b   : > { %16573 = vmatprep.subr.bf16.mxu1 %v19791_v10  ;;  %v16221_v50 = vpop.f32.mrb[11].mxu1 }
 0x22c   : > { %2817 = vmatmul.mubr.bf16.gmra.mrb[148].mxu0 %v17887_v29  ;;  %v20167_v51 = vadd.f32 %v16221_v50, %v16220_v48  ;;  %v17900_v48 = vld [vmem:[%s24781_s3 + $0x240] ss:$20 sps:$4 sm:$0xff]  }
 0x22d   : > { %17526 = vmatpush3.bf16.msra.mxu0 %v19846_v44  ;;  %17494 = vmatmul.mubr.msk.bf16.gmra.mrb[116].mxu1 %vm1504_vm2, %v17888_v30 }
 0x22e   : > { %16574 = vmatpush3.bf16.msra.mxu1 %v19722_v36  ;;  %17527 = vmatprep.subr.bf16.mxu0 %v24791_v57 }
 0x22f   : > { %16575 = vmatprep.subr.bf16.mxu1 %v19785_v8  ;;  %2824 = vmatprep.mubr.bf16.mxu0 %v17889_v49 }
 0x230   : > { %17497 = vmatprep.mubr.msk.bf16.mxu1 %vm19389_vm1, %v24791_v57  ;;  %v16223_v62 = vpop.f32.mrb[12].mxu1 }
 0x231   : > { %17528 = vmatpush3.bf16.msra.mxu0 %v19843_v39  ;;  %v16224_v1 = vpop.f32.mrb[13].mxu1 }
 0x232   : > { %16576 = vmatpush3.bf16.msra.mxu1 %v19720_v35  ;;  %16718 = vmatprep.subr.bf16.mxu0 %v19750_v22  ;;  %v20188_v5 = vadd.f32 %v16224_v1, %v16223_v62  ;;  %v16226_v6 = vpop.f32.mrb[14].mxu1  ;;  %v17895_v22 = vld [vmem:[%s24781_s3 + $0x348] ss:$20 sps:$4 sm:$0xff]   ;;  %v17903_v1 = vld [vmem:[%s24781_s3 + $0x398] ss:$20 sps:$4 sm:$0xff]  }
 0x233   : > { %16577 = vmatprep.subr.bf16.mxu1 %v19809_v42  ;;  %v16227_v14 = vpop.f32.mrb[15].mxu1 }
 0x234   : > { %2825 = vmatmul.mubr.bf16.gmra.mrb[152].mxu0 %v17891_v56  ;;  %v20191_v19 = vadd.f32 %v16227_v14, %v16226_v6  ;;  %v17904_v6 = vld [vmem:[%s24781_s3 + $0x268] ss:$20 sps:$4 sm:$0xff]   ;;  %v17905_v14 = vld [vmem:[%s24781_s3 + $0x3c4] ss:$20 sps:$4 sm:$0xff]  }
 0x235   : > { %17498 = vmatmul.mubr.msk.bf16.gmra.mrb[120].mxu1 %vm1504_vm2, %v17892_v59  ;;  %2832 = vmatprep.mubr.bf16.mxu0 %v17893_v61 }
 0x236   : > { %16578 = vmatpush3.bf16.msra.mxu1 %v19736_v60  ;;  %17501 = vmatprep.mubr.msk.bf16.mxu1 %vm19389_vm1, %v24791_v57 }
 0x237   : > { %16579 = vmatprep.subr.bf16.mxu1 %v19803_v40 }
 0x238   : > { %v16229_v25 = vpop.f32.mrb[16].mxu1 }
 0x239   : > { %v16230_v26 = vpop.f32.mrb[17].mxu1 }
 0x23a   : > { %16580 = vmatpush3.bf16.msra.mxu1 %v19731_v58  ;;  %v20208_v27 = vadd.f32 %v16230_v26, %v16229_v25  ;;  %v16232_v29 = vpop.f32.mrb[18].mxu1 }
 0x23b   : > { %16648 = vmatprep.subr.bf16.mxu1 %v19640_v47  ;;  %v16233_v30 = vpop.f32.mrb[19].mxu1  ;;  %v17901_v47 = vld [vmem:[%s24781_s3 + $0x39c] ss:$20 sps:$4 sm:$0xff]  }
 0x23c   : > { %2833 = vmatmul.mubr.bf16.gmra.mrb[156].mxu0 %v17895_v22  ;;  %v20211_v37 = vadd.f32 %v16233_v30, %v16232_v29  ;;  %v17907_v30 = vld [vmem:[%s24781_s3 + $0x3c0] ss:$20 sps:$4 sm:$0xff]  }
 0x23d   : > { %17502 = vmatmul.mubr.msk.bf16.gmra.mrb[124].mxu1 %vm1504_vm2, %v17896_v21  ;;  %2840 = vmatprep.mubr.bf16.mxu0 %v17897_v23 }
 0x23e   : > { %17505 = vmatprep.mubr.msk.bf16.mxu1 %vm19389_vm1, %v24791_v57 }
 0x240   : > { %v16235_v49 = vpop.f32.mrb[20].mxu1 }
 0x241   : > { %v16236_v50 = vpop.f32.mrb[21].mxu1 }
 0x242   : > { %v20225_v56 = vadd.f32 %v16236_v50, %v16235_v49  ;;  %v16238_v59 = vpop.f32.mrb[22].mxu1 }
 0x243   : > { %v16239_v61 = vpop.f32.mrb[23].mxu1 }
 0x244   : > { %2841 = vmatmul.mubr.bf16.gmra.mrb[160].mxu0 %v17899_v41  ;;  %v20227_v62 = vadd.f32 %v16239_v61, %v16238_v59  ;;  %v17908_v41 = vld [vmem:[%s24781_s3 + $0x290] ss:$20 sps:$4 sm:$0xff]  }
 0x245   : > { %17506 = vmatmul.mubr.msk.bf16.gmra.mrb[128].mxu1 %vm1504_vm2, %v17900_v48  ;;  %2848 = vmatprep.mubr.bf16.mxu0 %v17901_v47  ;;  %v17909_v48 = vld [vmem:[%s24781_s3 + $0x3ec] ss:$20 sps:$4 sm:$0xff]  }
 0x246   : > { %17509 = vmatprep.mubr.msk.bf16.mxu1 %vm19389_vm1, %v24791_v57 }
 0x248   : > { %v16241_v22 = vpop.f32.mrb[24].mxu1 }
 0x249   : > { %v16242_v21 = vpop.f32.mrb[25].mxu1 }
 0x24a   : > { %v20241_v23 = vadd.f32 %v16242_v21, %v16241_v22  ;;  %v16244_v25 = vpop.f32.mrb[26].mxu1  ;;  %v17912_v21 = vld [vmem:[%s24781_s3 + $0x2b8] ss:$20 sps:$4 sm:$0xff]  }
 0x24b   : > { %v16245_v26 = vpop.f32.mrb[27].mxu1 }
 0x24c   : > { %2849 = vmatmul.mubr.bf16.gmra.mrb[164].mxu0 %v17903_v1  ;;  %v20243_v29 = vadd.f32 %v16245_v26, %v16244_v25  ;;  %v17913_v25 = vld [vmem:[%s24781_s3 + $0x414] ss:$20 sps:$4 sm:$0xff]  }
 0x24d   : > { %17510 = vmatmul.mubr.msk.bf16.gmra.mrb[132].mxu1 %vm1504_vm2, %v17904_v6  ;;  %2856 = vmatprep.mubr.bf16.mxu0 %v17905_v14  ;;  %v17911_v14 = vld [vmem:[%s24781_s3 + $0x3e8] ss:$20 sps:$4 sm:$0xff]  }
 0x24e   : > { %17513 = vmatprep.mubr.msk.bf16.mxu1 %vm19389_vm1, %v24791_v57 }
 0x250   : > { %v16247_v47 = vpop.f32.mrb[28].mxu1 }
 0x251   : > { %v16248_v49 = vpop.f32.mrb[29].mxu1 }
 0x252   : > { %v20257_v50 = vadd.f32 %v16248_v49, %v16247_v47  ;;  %v16250_v59 = vpop.f32.mrb[30].mxu1 }
 0x253   : > { %v16251_v61 = vpop.f32.mrb[31].mxu1 }
 0x254   : > { %2857 = vmatmul.mubr.bf16.gmra.mrb[168].mxu0 %v17907_v30  ;;  %v20259_v1 = vadd.f32 %v16251_v61, %v16250_v59  ;;  %v17915_v59 = vld [vmem:[%s24781_s3 + $0x410] ss:$20 sps:$4 sm:$0xff]  }
 0x255   : > { %17514 = vmatmul.mubr.msk.bf16.gmra.mrb[136].mxu1 %vm1504_vm2, %v17908_v41  ;;  %2864 = vmatprep.mubr.bf16.mxu0 %v17909_v48  ;;  %v17918_v41 = vld [vmem:[%s24781_s3 + $0x2dc] ss:$20 sps:$4 sm:$0xff]  }
 0x256   : > { %17517 = vmatprep.mubr.msk.bf16.mxu1 %vm19389_vm1, %v24791_v57 }
 0x258   : > { %v16253_v6 = vpop.f32.mrb[32].mxu1 }
 0x259   : > { %v16254_v22 = vpop.f32.mrb[33].mxu1 }
 0x25a   : > { %v20273_v26 = vadd.f32 %v16254_v22, %v16253_v6  ;;  %v16256_v30 = vpop.f32.mrb[34].mxu1  ;;  %v17916_v6 = vld [vmem:[%s24781_s3 + $0x2d8] ss:$20 sps:$4 sm:$0xff]  }
 0x25b   : > { %v16257_v48 = vpop.f32.mrb[35].mxu1 }
 0x25c   : > { %2865 = vmatmul.mubr.bf16.gmra.mrb[172].mxu0 %v17911_v14  ;;  %v20278_v47 = vadd.f32 %v16257_v48, %v16256_v30  ;;  %v17919_v14 = vld [vmem:[%s24781_s3 + $0x304] ss:$20 sps:$4 sm:$0xff]  }
 0x25d   : > { %17518 = vmatmul.mubr.msk.bf16.gmra.mrb[140].mxu1 %vm1504_vm2, %v17912_v21  ;;  %2872 = vmatprep.mubr.bf16.mxu0 %v17913_v25 }
 0x25e   : > { %2913 = vmatprep.mubr.bf16.mxu1 %v17918_v41  ;;  %v24825_v41 = vmov 0.0  }
 0x260   : > { %v16275_v49 = vpop.f32.mrb[36].mxu1 }
 0x261   : > { %v16276_v61 = vpop.f32.mrb[37].mxu1 }
 0x262   : > { %v16277_v22 = vadd.f32 %v16276_v61, %v16275_v49  ;;  %v16278_v57 = vpop.f32.mrb[38].mxu1 }
 0x263   : > { %v16279_v30 = vpop.f32.mrb[39].mxu1 }
 0x264   : > { %v16280_v21 = vadd.f32 %v16279_v30, %v16278_v57  ;;  %2873 = vmatmul.mubr.bf16.gmra.mrb[176].mxu0 %v17915_v59  ;;  %v1672_v25 = vadd.f32 %v16277_v22, %v20121_v2  ;;  %v17921_v57 = vld [vmem:[%s24781_s3 + $0x2e0] ss:$20 sps:$4 sm:$0xff]  }
 0x265   : > { %2914 = vmatmul.mubr.bf16.vlgmr.msra.gmra.mrb[144].mxu1 %v17916_v6  ;;  %17529 = vmatprep.mubr.msk.bf16.mxu0 %vm19389_vm1, %v24825_v41 }
 0x266   : > { %16649 = vmatpush3.bf16.msra.mxu1 %v19605_v53  ;;  %v1675_v48 = vadd.f32 %v16280_v21, %v20123_v13  ;;  %2921 = vmatprep.mubr.bf16.mxu1 %v17919_v14  ;;  %v17922_v53 = vld [vmem:[%s24781_s3 + $0x300] ss:$20 sps:$4 sm:$0xff]  }
 0x267   : > { %16650 = vmatprep.subr.bf16.mxu1 %v19638_v46  ;;  %v1776_v49 = vpop.f32.mrb[72].mxu0  ;;  %v17923_v14 = vld [vmem:[%s24781_s3 + $0x32c] ss:$20 sps:$4 sm:$0xff]  }
 0x268   : > { %v20296_v61 = vadd.f32 %v1776_v49, %v1672_v25  ;;  %v16281_v39 = vpop.f32.mrb[40].mxu1  ;;  %v17443_v44 = vpop.f32.mrb[73].mxu0 }
 0x269   : > { %v16282_v2 = vpop.f32.mrb[41].mxu1  ;;  %v1779_v59 = vpop.f32.mrb[74].mxu0 }
 0x26a   : > { %v16283_v6 = vadd.f32 %v16282_v2, %v16281_v39  ;;  %v20304_v13 = vadd.f32 %v1779_v59, %v1675_v48  ;;  %16651 = vmatpush3.bf16.msra.mxu1 %v19603_v52  ;;  %v16284_v46 = vpop.f32.mrb[42].mxu1  ;;  %v17444_v22 = vpop.f32.mrb[75].mxu0 }
 0x26b   : > { %16652 = vmatprep.subr.bf16.mxu1 %v19652_v0  ;;  %v16285_v44 = vpop.f32.mrb[43].mxu1 }
 0x26c   : > { %v16286_v30 = vadd.f32 %v16285_v44, %v16284_v46  ;;  %17530 = vmatmul.mubr.msk.bf16.vlgmr.msra.gmra.mrb[180].mxu0 %vm1504_vm2, %v17921_v57  ;;  %v1680_v21 = vadd.f32 %v16283_v6, %v20137_v24 }
 0x26d   : > { %16719 = vmatpush3.bf16.msra.mxu0 %v19694_v55  ;;  %2922 = vmatmul.mubr.bf16.gmra.mrb[148].mxu1 %v17922_v53  ;;  %v17944_v55 = vld [vmem:[%s24781_s3 + $0x308] ss:$20 sps:$4 sm:$0xff]  }
 0x26e   : > { %16653 = vmatpush3.bf16.msra.mxu1 %v19614_v4  ;;  %16720 = vmatprep.subr.bf16.mxu0 %v19745_v20  ;;  %v1683_v52 = vadd.f32 %v16286_v30, %v20143_v28 }
 0x26f   : > { %16654 = vmatprep.subr.bf16.mxu1 %v19649_v63  ;;  %v1784_v0 = vpop.f32.mrb[76].mxu0  ;;  %2929 = vmatprep.mubr.bf16.mxu1 %v17923_v14  ;;  %v17925_v63 = vld [vmem:[%s24781_s3 + $0x328] ss:$20 sps:$4 sm:$0xff]  }
 0x270   : > { %v20318_v39 = vadd.f32 %v1784_v0, %v1680_v21  ;;  %v16287_v25 = vpop.f32.mrb[44].mxu1  ;;  %v17447_v48 = vpop.f32.mrb[77].mxu0  ;;  %17533 = vmatprep.mubr.msk.bf16.mxu0 %vm19389_vm1, %v24825_v41 }
 0x271   : > { %16721 = vmatpush3.bf16.msra.mxu0 %v19691_v54  ;;  %v16288_v4 = vpop.f32.mrb[45].mxu1  ;;  %v1787_v20 = vpop.f32.mrb[78].mxu0  ;;  %v17926_v54 = vld [vmem:[%s24781_s3 + $0x354] ss:$20 sps:$4 sm:$0xff]  }
 0x272   : > { %v16289_v24 = vadd.f32 %v16288_v4, %v16287_v25  ;;  %v20329_v28 = vadd.f32 %v1787_v20, %v1683_v52  ;;  %16655 = vmatpush3.bf16.msra.mxu1 %v19612_v3  ;;  %16722 = vmatprep.subr.bf16.mxu0 %v19773_v45  ;;  %v16290_v49 = vpop.f32.mrb[46].mxu1  ;;  %v17448_v57 = vpop.f32.mrb[79].mxu0 }
 0x273   : > { %16656 = vmatprep.subr.bf16.mxu1 %v19664_v16  ;;  %v16291_v2 = vpop.f32.mrb[47].mxu1 }
 0x274   : > { %v16292_v59 = vadd.f32 %v16291_v2, %v16290_v49  ;;  %v1688_v53 = vadd.f32 %v16289_v24, %v20161_v38  ;;  %17534 = vmatmul.mubr.msk.bf16.gmra.mrb[184].mxu0 %vm1504_vm2, %v17944_v55  ;;  %v17932_v55 = vld [vmem:[%s24781_s3 + $0x3a4] ss:$20 sps:$4 sm:$0xff]  }
 0x275   : > { %16723 = vmatpush3.bf16.msra.mxu0 %v19708_v12  ;;  %2930 = vmatmul.mubr.bf16.gmra.mrb[152].mxu1 %v17925_v63  ;;  %v17948_v12 = vld [vmem:[%s24781_s3 + $0x330] ss:$20 sps:$4 sm:$0xff]  }
 0x276   : > { %16657 = vmatpush3.bf16.msra.mxu1 %v19622_v18  ;;  %16724 = vmatprep.subr.bf16.mxu0 %v19767_v43  ;;  %v1691_v3 = vadd.f32 %v16292_v59, %v20167_v51 }
 0x277   : > { %16658 = vmatprep.subr.bf16.mxu1 %v19661_v15  ;;  %v1792_v16 = vpop.f32.mrb[80].mxu0  ;;  %2937 = vmatprep.mubr.bf16.mxu1 %v17926_v54  ;;  %v17928_v15 = vld [vmem:[%s24781_s3 + $0x350] ss:$20 sps:$4 sm:$0xff]  }
 0x278   : > { %v20344_v45 = vadd.f32 %v1792_v16, %v1688_v53  ;;  %v16293_v6 = vpop.f32.mrb[48].mxu1  ;;  %v17451_v46 = vpop.f32.mrb[81].mxu0  ;;  %17537 = vmatprep.mubr.msk.bf16.mxu0 %vm19389_vm1, %v24825_v41  ;;  %v17935_v53 = vld [vmem:[%s24781_s3 + $0x3cc] ss:$20 sps:$4 sm:$0xff]  }
 0x279   : > { %16725 = vmatpush3.bf16.msra.mxu0 %v19706_v11  ;;  %v16294_v18 = vpop.f32.mrb[49].mxu1  ;;  %v1795_v43 = vpop.f32.mrb[82].mxu0  ;;  %v17929_v11 = vld [vmem:[%s24781_s3 + $0x37c] ss:$20 sps:$4 sm:$0xff]  }
 0x27a   : > { %v16295_v38 = vadd.f32 %v16294_v18, %v16293_v6  ;;  %v20355_v51 = vadd.f32 %v1795_v43, %v1691_v3  ;;  %16659 = vmatpush3.bf16.msra.mxu1 %v19620_v17  ;;  %16726 = vmatprep.subr.bf16.mxu0 %v19791_v10  ;;  %v16296_v22 = vpop.f32.mrb[50].mxu1  ;;  %v17452_v44 = vpop.f32.mrb[83].mxu0 }
 0x27b   : > { %16660 = vmatprep.subr.bf16.mxu1 %v19676_v34  ;;  %v16297_v14 = vpop.f32.mrb[51].mxu1 }
 0x27c   : > { %v16298_v30 = vadd.f32 %v16297_v14, %v16296_v22  ;;  %v1696_v21 = vadd.f32 %v16295_v38, %v20188_v5  ;;  %17538 = vmatmul.mubr.msk.bf16.gmra.mrb[188].mxu0 %vm1504_vm2, %v17948_v12  ;;  %v17937_v22 = vld [vmem:[%s24781_s3 + $0x3c8] ss:$20 sps:$4 sm:$0xff]  }
 0x27d   : > { %16727 = vmatpush3.bf16.msra.mxu0 %v19722_v36  ;;  %2938 = vmatmul.mubr.bf16.gmra.mrb[156].mxu1 %v17928_v15  ;;  %v17952_v36 = vld [vmem:[%s24781_s3 + $0x358] ss:$20 sps:$4 sm:$0xff]   ;;  %v17960_v15 = vld [vmem:[%s24781_s3 + $0x3a8] ss:$20 sps:$4 sm:$0xff]  }
 0x27e   : > { %16661 = vmatpush3.bf16.msra.mxu1 %v19632_v32  ;;  %16728 = vmatprep.subr.bf16.mxu0 %v19785_v8  ;;  %v1699_v17 = vadd.f32 %v16298_v30, %v20191_v19  ;;  %v17938_v30 = vld [vmem:[%s24781_s3 + $0x3f4] ss:$20 sps:$4 sm:$0xff]  }
 0x27f   : > { %16662 = vmatprep.subr.bf16.mxu1 %v19673_v33  ;;  %v1800_v34 = vpop.f32.mrb[84].mxu0  ;;  %2945 = vmatprep.mubr.bf16.mxu1 %v17929_v11  ;;  %v17931_v33 = vld [vmem:[%s24781_s3 + $0x378] ss:$20 sps:$4 sm:$0xff]  }
 0x280   : > { %v20370_v10 = vadd.f32 %v1800_v34, %v1696_v21  ;;  %v16299_v52 = vpop.f32.mrb[52].mxu1  ;;  %v17455_v0 = vpop.f32.mrb[85].mxu0  ;;  %17541 = vmatprep.mubr.msk.bf16.mxu0 %vm19389_vm1, %v24825_v41 }
 0x281   : > { %16729 = vmatpush3.bf16.msra.mxu0 %v19720_v35  ;;  %v16300_v32 = vpop.f32.mrb[53].mxu1  ;;  %v1803_v8 = vpop.f32.mrb[86].mxu0 }
 0x282   : > { %v16301_v5 = vadd.f32 %v16300_v32, %v16299_v52  ;;  %v20381_v19 = vadd.f32 %v1803_v8, %v1699_v17  ;;  %16663 = vmatpush3.bf16.msra.mxu1 %v19630_v31  ;;  %16730 = vmatprep.subr.bf16.mxu0 %v19809_v42  ;;  %v16302_v25 = vpop.f32.mrb[54].mxu1  ;;  %v17456_v48 = vpop.f32.mrb[87].mxu0 }
 0x283   : > { %v16303_v35 = vpop.f32.mrb[55].mxu1  ;;  %17565 = vmatprep.subr.bf16.mxu1 %v24825_v41 }
 0x284   : > { %v16304_v4 = vadd.f32 %v16303_v35, %v16302_v25  ;;  %v1704_v20 = vadd.f32 %v16301_v5, %v20208_v27  ;;  %17542 = vmatmul.mubr.msk.bf16.gmra.mrb[192].mxu0 %vm1504_vm2, %v17952_v36  ;;  %v17956_v27 = vld [vmem:[%s24781_s3 + $0x380] ss:$20 sps:$4 sm:$0xff]   ;;  %v17940_v25 = vld [vmem:[%s24781_s3 + $0x3f0] ss:$20 sps:$4 sm:$0xff]  }
 0x285   : > { %16731 = vmatpush3.bf16.msra.mxu0 %v19736_v60  ;;  %2946 = vmatmul.mubr.bf16.gmra.mrb[160].mxu1 %v17931_v33  ;;  %v17964_v33 = vld [vmem:[%s24781_s3 + $0x3d0] ss:$20 sps:$4 sm:$0xff]  }
 0x286   : > { %16732 = vmatprep.subr.bf16.mxu0 %v19803_v40  ;;  %v1707_v31 = vadd.f32 %v16304_v4, %v20211_v37  ;;  %2953 = vmatprep.mubr.bf16.mxu1 %v17932_v55  ;;  %v17934_v40 = vld [vmem:[%s24781_s3 + $0x3a0] ss:$20 sps:$4 sm:$0xff]   ;;  %v17941_v4 = vld [vmem:[%s24781_s3 + $0x41c] ss:$20 sps:$4 sm:$0xff]  }
 0x287   : > { %v1808_v42 = vpop.f32.mrb[88].mxu0  ;;  %17545 = vmatprep.mubr.msk.bf16.mxu0 %vm19389_vm1, %v24825_v41 }
 0x288   : > { %v20396_v63 = vadd.f32 %v1808_v42, %v1704_v20  ;;  %v16305_v24 = vpop.f32.mrb[56].mxu1  ;;  %v17459_v49 = vpop.f32.mrb[89].mxu0 }
 0x289   : > { %16733 = vmatpush3.bf16.msra.mxu0 %v19731_v58  ;;  %v16306_v60 = vpop.f32.mrb[57].mxu1  ;;  %v1811_v57 = vpop.f32.mrb[90].mxu0 }
 0x28a   : > { %v16307_v37 = vadd.f32 %v16306_v60, %v16305_v24  ;;  %v20405_v2 = vadd.f32 %v1811_v57, %v1707_v31  ;;  %v16308_v54 = vpop.f32.mrb[58].mxu1  ;;  %v17460_v59 = vpop.f32.mrb[91].mxu0 }
 0x28b   : > { %v16309_v3 = vpop.f32.mrb[59].mxu1 }
 0x28c   : > { %v16310_v16 = vadd.f32 %v16309_v3, %v16308_v54  ;;  %v1712_v6 = vadd.f32 %v16307_v37, %v20225_v56  ;;  %17546 = vmatmul.mubr.msk.bf16.gmra.mrb[196].mxu0 %vm1504_vm2, %v17956_v27  ;;  %v17943_v54 = vld [vmem:[%s24781_s3 + $0x418] ss:$20 sps:$4 sm:$0xff]  }
 0x28d   : > { %2954 = vmatmul.mubr.bf16.gmra.mrb[164].mxu1 %v17934_v40  ;;  %17549 = vmatprep.mubr.msk.bf16.mxu0 %vm19389_vm1, %v24825_v41  ;;  %v17968_v40 = vld [vmem:[%s24781_s3 + $0x3f8] ss:$20 sps:$4 sm:$0xff]  }
 0x28e   : > { %v1715_v58 = vadd.f32 %v16310_v16, %v20227_v62  ;;  %2961 = vmatprep.mubr.bf16.mxu1 %v17935_v53  ;;  %v17947_v16 = vld [vmem:[%s24781_s3 + $0x43c] ss:$20 sps:$4 sm:$0xff]  }
 0x28f   : > { %v1816_v46 = vpop.f32.mrb[92].mxu0 }
 0x290   : > { %v20415_v12 = vadd.f32 %v1816_v46, %v1712_v6  ;;  %v16311_v18 = vpop.f32.mrb[60].mxu1  ;;  %v17463_v43 = vpop.f32.mrb[93].mxu0 }
 0x291   : > { %v16312_v38 = vpop.f32.mrb[61].mxu1  ;;  %v1819_v56 = vpop.f32.mrb[94].mxu0 }
 0x292   : > { %24826 = vst [vmem:[#allocation7_spill] sm:$0xff] %v20415_v12  ;;  %v16313_v44 = vadd.f32 %v16312_v38, %v16311_v18  ;;  %v20423_v14 = vadd.f32 %v1819_v56, %v1715_v58  ;;  %v16314_v62 = vpop.f32.mrb[62].mxu1  ;;  %v17464_v11 = vpop.f32.mrb[95].mxu0 }
 0x293   : > { %v16315_v21 = vpop.f32.mrb[63].mxu1 }
 0x294   : > { %24827 = vst [vmem:[#allocation8_spill] sm:$0xff] %v20423_v14  ;;  %v16316_v17 = vadd.f32 %v16315_v21, %v16314_v62  ;;  %v1720_v34 = vadd.f32 %v16313_v44, %v20241_v23  ;;  %17550 = vmatmul.mubr.msk.bf16.gmra.mrb[200].mxu0 %vm1504_vm2, %v17960_v15 }
 0x295   : > { %2962 = vmatmul.mubr.bf16.gmra.mrb[168].mxu1 %v17937_v22  ;;  %17553 = vmatprep.mubr.msk.bf16.mxu0 %vm19389_vm1, %v24825_v41  ;;  %v17972_v22 = vld [vmem:[%s24781_s3 + $0x420] ss:$20 sps:$4 sm:$0xff]  }
 0x296   : > { %v1723_v52 = vadd.f32 %v16316_v17, %v20243_v29  ;;  %2969 = vmatprep.mubr.bf16.mxu1 %v17938_v30  ;;  %v17949_v30 = vld [vmem:[%s24781_s3 + $0x464] ss:$20 sps:$4 sm:$0xff]  }
 0x297   : > { %v1824_v0 = vpop.f32.mrb[96].mxu0 }
 0x298   : > { %v20433_v36 = vadd.f32 %v1824_v0, %v1720_v34  ;;  %v16317_v32 = vpop.f32.mrb[64].mxu1  ;;  %v17467_v8 = vpop.f32.mrb[97].mxu0 }
 0x299   : > { %v16318_v5 = vpop.f32.mrb[65].mxu1  ;;  %v1827_v23 = vpop.f32.mrb[98].mxu0 }
 0x29a   : > { %24828 = vst [vmem:[#allocation9_spill] sm:$0xff] %v20433_v36  ;;  %v16319_v48 = vadd.f32 %v16318_v5, %v16317_v32  ;;  %v20441_v55 = vadd.f32 %v1827_v23, %v1723_v52  ;;  %v16320_v29 = vpop.f32.mrb[66].mxu1  ;;  %v17468_v35 = vpop.f32.mrb[99].mxu0  ;;  %v17976_v5 = vld [vmem:[%s24781_s3 + $0x440] ss:$20 sps:$4 sm:$0xff]  }
 0x29b   : > { %v16321_v20 = vpop.f32.mrb[67].mxu1  ;;  %v17951_v23 = vld [vmem:[%s24781_s3 + $0x460] ss:$20 sps:$4 sm:$0xff]  }
 0x29c   : > { %24829 = vst [vmem:[#allocation10_spill] sm:$0xff] %v20441_v55  ;;  %v16322_v31 = vadd.f32 %v16321_v20, %v16320_v29  ;;  %v1728_v42 = vadd.f32 %v16319_v48, %v20257_v50  ;;  %17554 = vmatmul.mubr.msk.bf16.gmra.mrb[204].mxu0 %vm1504_vm2, %v17964_v33  ;;  %v17953_v35 = vld [vmem:[%s24781_s3 + $0x48c] ss:$20 sps:$4 sm:$0xff]  }
 0x29d   : > { %2970 = vmatmul.mubr.bf16.gmra.mrb[172].mxu1 %v17940_v25  ;;  %17557 = vmatprep.mubr.msk.bf16.mxu0 %vm19389_vm1, %v24825_v41 }
 0x29e   : > { %v1731_v24 = vadd.f32 %v16322_v31, %v20259_v1  ;;  %2977 = vmatprep.mubr.bf16.mxu1 %v17941_v4 }
 0x29f   : > { %v1832_v49 = vpop.f32.mrb[100].mxu0 }
 0x2a0   : > { %v20451_v27 = vadd.f32 %v1832_v49, %v1728_v42  ;;  %v16323_v60 = vpop.f32.mrb[68].mxu1  ;;  %v17471_v57 = vpop.f32.mrb[101].mxu0 }
 0x2a1   : > { %v16324_v37 = vpop.f32.mrb[69].mxu1  ;;  %v1835_v50 = vpop.f32.mrb[102].mxu0 }
 0x2a2   : > { %24830 = vst [vmem:[#allocation11_spill] sm:$0xff] %v20451_v27  ;;  %v16325_v59 = vadd.f32 %v16324_v37, %v16323_v60  ;;  %v20459_v53 = vadd.f32 %v1835_v50, %v1731_v24  ;;  %v16326_v1 = vpop.f32.mrb[70].mxu1  ;;  %v17472_v3 = vpop.f32.mrb[103].mxu0 }
 0x2a3   : > { %v16327_v6 = vpop.f32.mrb[71].mxu1 }
 0x2a4   : > { %24831 = vst [vmem:[#allocation12_spill] sm:$0xff] %v20459_v53  ;;  %v16328_v58 = vadd.f32 %v16327_v6, %v16326_v1  ;;  %v1736_v46 = vadd.f32 %v16325_v59, %v20273_v26  ;;  %17558 = vmatmul.mubr.msk.bf16.gmra.mrb[208].mxu0 %vm1504_vm2, %v17968_v40  ;;  %v17945_v26 = vld [vmem:[%s24781_s3 + $0x438] ss:$20 sps:$4 sm:$0xff]   ;;  %v17955_v59 = vld [vmem:[%s24781_s3 + $0x488] ss:$20 sps:$4 sm:$0xff]  }
 0x2a5   : > { %2978 = vmatmul.mubr.bf16.gmra.mrb[176].mxu1 %v17943_v54  ;;  %17561 = vmatprep.mubr.msk.bf16.mxu0 %vm19389_vm1, %v24825_v41  ;;  %v17984_v54 = vld [vmem:[%s24781_s3 + $0x468] ss:$20 sps:$4 sm:$0xff]  }
 0x2a6   : > { %v1739_v18 = vadd.f32 %v16328_v58, %v20278_v47  ;;  %3430 = vmatprep.mubr.bf16.mxu1 %v17947_v16  ;;  %v17978_v47 = vld [vmem:[%s24781_s3 + $0x444] ss:$20 sps:$4 sm:$0xff]   ;;  %v17986_v6 = vld [vmem:[%s24781_s3 + $0x494] ss:$20 sps:$4 sm:$0xff]  }
 0x2a7   : > { %v1840_v43 = vpop.f32.mrb[104].mxu0  ;;  %v24835_v58 = vld [vmem:[#allocation5_spill] sm:$0xff] }
 0x2a8   : > { %v20469_v15 = vadd.f32 %v1840_v43, %v1736_v46  ;;  %v17475_v38 = vpop.f32.mrb[105].mxu0  ;;  %v16358_v56 = vpop.f32.mrb[72].mxu1  ;;  %v17957_v46 = vld [vmem:[%s24781_s3 + $0x4b4] ss:$20 sps:$4 sm:$0xff]  }
 0x2a9   : > { %v1843_v44 = vpop.f32.mrb[106].mxu0  ;;  %v16359_v62 = vpop.f32.mrb[73].mxu1 }
 0x2aa   : > { %24832 = vst [vmem:[#allocation13_spill] sm:$0xff] %v20469_v15  ;;  %v20480_v11 = vadd.f32 %v1843_v44, %v1739_v18  ;;  %v16360_v21 = vadd.f32 %v16359_v62, %v16358_v56  ;;  %v16361_v17 = vpop.f32.mrb[74].mxu1  ;;  %v17476_v34 = vpop.f32.mrb[107].mxu0 }
 0x2ab   : > { %v16362_v52 = vpop.f32.mrb[75].mxu1  ;;  %v17959_v34 = vld [vmem:[%s24781_s3 + $0x4b0] ss:$20 sps:$4 sm:$0xff]  }
 0x2ac   : > { %24833 = vst [vmem:[#allocation14_spill] sm:$0xff] %v20480_v11  ;;  %v16363_v0 = vadd.f32 %v16362_v52, %v16361_v17  ;;  %17562 = vmatmul.mubr.msk.bf16.gmra.mrb[212].mxu0 %vm1504_vm2, %v17972_v22  ;;  %v17988_v17 = vld [vmem:[%s24781_s3 + $0x490] ss:$20 sps:$4 sm:$0xff]  }
 0x2ad   : > { %3431 = vmatmul.mubr.bf16.vlgmr.msra.gmra.mrb[180].mxu1 %v17945_v26  ;;  %3535 = vmatprep.mubr.bf16.mxu0 %v17978_v47 }
 0x2ae   : > { %17566 = vmatpush3.bf16.msra.mxu1 %v19827_v9  ;;  %3438 = vmatprep.mubr.bf16.mxu1 %v17949_v30  ;;  %v17982_v9 = vld [vmem:[%s24781_s3 + $0x46c] ss:$20 sps:$4 sm:$0xff]  }
 0x2af   : > { %17567 = vmatprep.subr.bf16.mxu1 %v24825_v41  ;;  %v16428_v32 = vpop.f32.mrb[108].mxu0 }
 0x2b0   : > { %v16364_v8 = vpop.f32.mrb[76].mxu1  ;;  %v16429_v33 = vpop.f32.mrb[109].mxu0 }
 0x2b1   : > { %v16365_v25 = vpop.f32.mrb[77].mxu1  ;;  %v16430_v48 = vadd.f32 %v16429_v33, %v16428_v32  ;;  %v16431_v29 = vpop.f32.mrb[110].mxu0  ;;  %v17961_v33 = vld [vmem:[%s24781_s3 + $0x4dc] ss:$20 sps:$4 sm:$0xff]  }
 0x2b2   : > { %17568 = vmatpush3.bf16.msra.mxu1 %v19824_v7  ;;  %v16366_v4 = vadd.f32 %v16365_v25, %v16364_v8  ;;  %v16367_v20 = vpop.f32.mrb[78].mxu1  ;;  %v16432_v31 = vpop.f32.mrb[111].mxu0  ;;  %v24834_v7 = vld [vmem:[#allocation6_spill] sm:$0xff] }
 0x2b3   : > { %17569 = vmatprep.subr.bf16.mxu1 %v24825_v41  ;;  %v16368_v42 = vpop.f32.mrb[79].mxu1  ;;  %v16433_v24 = vadd.f32 %v16432_v31, %v16431_v29  ;;  %v20502_v49 = vadd.f32 %v16430_v48, %v16360_v21  ;;  %v17990_v8 = vld [vmem:[%s24781_s3 + $0x4bc] ss:$20 sps:$4 sm:$0xff]  }
 0x2b4   : > { %v16369_v60 = vadd.f32 %v16368_v42, %v16367_v20  ;;  %3536 = vmatmul.mubr.bf16.vlgmr.msra.gmra.mrb[216].mxu0 %v17976_v5 }
 0x2b5   : > { %3439 = vmatmul.mubr.bf16.gmra.mrb[184].mxu1 %v17951_v23  ;;  %3543 = vmatprep.mubr.bf16.mxu0 %v17982_v9  ;;  %v20504_v57 = vadd.f32 %v16433_v24, %v16363_v0  ;;  %v17992_v24 = vld [vmem:[%s24781_s3 + $0x4b8] ss:$20 sps:$4 sm:$0xff]  }
 0x2b6   : > { %17570 = vmatpush3.bf16.msra.mxu1 %v24834_v7  ;;  %3446 = vmatprep.mubr.bf16.mxu1 %v17953_v35 }
 0x2b7   : > { %17571 = vmatprep.subr.bf16.mxu1 %v24825_v41  ;;  %v16434_v40 = vpop.f32.mrb[112].mxu0 }
 0x2b8   : > { %v16370_v37 = vpop.f32.mrb[80].mxu1  ;;  %v16435_v50 = vpop.f32.mrb[113].mxu0 }
 0x2b9   : > { %v16371_v1 = vpop.f32.mrb[81].mxu1  ;;  %v16436_v3 = vadd.f32 %v16435_v50, %v16434_v40  ;;  %v16437_v16 = vpop.f32.mrb[114].mxu0  ;;  %v17994_v50 = vld [vmem:[%s24781_s3 + $0x4e4] ss:$20 sps:$4 sm:$0xff]  }
 0x2ba   : > { %17572 = vmatpush3.bf16.msra.mxu1 %v24835_v58  ;;  %v16372_v18 = vadd.f32 %v16371_v1, %v16370_v37  ;;  %v16373_v43 = vpop.f32.mrb[82].mxu1  ;;  %v16438_v38 = vpop.f32.mrb[115].mxu0 }
 0x2bb   : > { %v16374_v56 = vpop.f32.mrb[83].mxu1  ;;  %v16439_v22 = vadd.f32 %v16438_v38, %v16437_v16  ;;  %v20521_v44 = vadd.f32 %v16436_v3, %v16366_v4 }
 0x2bc   : > { %v16375_v26 = vadd.f32 %v16374_v56, %v16373_v43  ;;  %3544 = vmatmul.mubr.bf16.gmra.mrb[220].mxu0 %v17984_v54  ;;  %v17965_v54 = vld [vmem:[%s24781_s3 + $0x504] ss:$20 sps:$4 sm:$0xff]  }
 0x2bd   : > { %3447 = vmatmul.mubr.bf16.gmra.mrb[188].mxu1 %v17955_v59  ;;  %3551 = vmatprep.mubr.bf16.mxu0 %v17986_v6  ;;  %v20523_v62 = vadd.f32 %v16439_v22, %v16369_v60  ;;  %v17963_v60 = vld [vmem:[%s24781_s3 + $0x4d8] ss:$20 sps:$4 sm:$0xff]   ;;  %v17996_v22 = vld [vmem:[%s24781_s3 + $0x4e0] ss:$20 sps:$4 sm:$0xff]  }
 0x2be   : > { %3454 = vmatprep.mubr.bf16.mxu1 %v17957_v46 }
 0x2bf   : > { %v16440_v47 = vpop.f32.mrb[116].mxu0 }
 0x2c0   : > { %v16376_v30 = vpop.f32.mrb[84].mxu1  ;;  %v16441_v21 = vpop.f32.mrb[117].mxu0 }
 0x2c1   : > { %v16377_v52 = vpop.f32.mrb[85].mxu1  ;;  %v16442_v0 = vadd.f32 %v16441_v21, %v16440_v47  ;;  %v16443_v32 = vpop.f32.mrb[118].mxu0 }
 0x2c2   : > { %v16378_v5 = vadd.f32 %v16377_v52, %v16376_v30  ;;  %v16379_v23 = vpop.f32.mrb[86].mxu1  ;;  %v16444_v25 = vpop.f32.mrb[119].mxu0 }
 0x2c3   : > { %v16380_v48 = vpop.f32.mrb[87].mxu1  ;;  %v16445_v29 = vadd.f32 %v16444_v25, %v16443_v32  ;;  %v20537_v9 = vadd.f32 %v16442_v0, %v16372_v18 }
 0x2c4   : > { %v16381_v35 = vadd.f32 %v16380_v48, %v16379_v23  ;;  %3552 = vmatmul.mubr.bf16.gmra.mrb[224].mxu0 %v17988_v17  ;;  %v17998_v17 = vld [vmem:[%s24781_s3 + $0x50c] ss:$20 sps:$4 sm:$0xff]  }
 0x2c5   : > { %3455 = vmatmul.mubr.bf16.gmra.mrb[192].mxu1 %v17959_v34  ;;  %3559 = vmatprep.mubr.bf16.mxu0 %v17990_v8  ;;  %v20539_v4 = vadd.f32 %v16445_v29, %v16375_v26  ;;  %v17967_v26 = vld [vmem:[%s24781_s3 + $0x500] ss:$20 sps:$4 sm:$0xff]  }
 0x2c6   : > { %3462 = vmatprep.mubr.bf16.mxu1 %v17961_v33  ;;  %v17969_v34 = vld [vmem:[%s24781_s3 + $0x52c] ss:$20 sps:$4 sm:$0xff]  }
 0x2c7   : > { %v16446_v20 = vpop.f32.mrb[120].mxu0 }
 0x2c8   : > { %v16382_v31 = vpop.f32.mrb[88].mxu1  ;;  %v16447_v42 = vpop.f32.mrb[121].mxu0 }
 0x2c9   : > { %v16383_v7 = vpop.f32.mrb[89].mxu1  ;;  %v16448_v40 = vadd.f32 %v16447_v42, %v16446_v20  ;;  %v16449_v37 = vpop.f32.mrb[122].mxu0  ;;  %v18000_v20 = vld [vmem:[%s24781_s3 + $0x508] ss:$20 sps:$4 sm:$0xff]  }
 0x2ca   : > { %v16384_v59 = vadd.f32 %v16383_v7, %v16382_v31  ;;  %v16385_v1 = vpop.f32.mrb[90].mxu1  ;;  %v16450_v3 = vpop.f32.mrb[123].mxu0  ;;  %v17971_v31 = vld [vmem:[%s24781_s3 + $0x528] ss:$20 sps:$4 sm:$0xff]  }
 0x2cb   : > { %v16386_v16 = vpop.f32.mrb[91].mxu1  ;;  %v16451_v6 = vadd.f32 %v16450_v3, %v16449_v37  ;;  %v20553_v58 = vadd.f32 %v16448_v40, %v16378_v5  ;;  %v18002_v7 = vld [vmem:[%s24781_s3 + $0x534] ss:$20 sps:$4 sm:$0xff]  }
 0x2cc   : > { %v16387_v46 = vadd.f32 %v16386_v16, %v16385_v1  ;;  %3560 = vmatmul.mubr.bf16.gmra.mrb[228].mxu0 %v17992_v24  ;;  %v17973_v40 = vld [vmem:[%s24781_s3 + $0x554] ss:$20 sps:$4 sm:$0xff]  }
 0x2cd   : > { %3463 = vmatmul.mubr.bf16.gmra.mrb[196].mxu1 %v17963_v60  ;;  %3567 = vmatprep.mubr.bf16.mxu0 %v17994_v50  ;;  %v20555_v18 = vadd.f32 %v16451_v6, %v16381_v35 }
 0x2ce   : > { %3470 = vmatprep.mubr.bf16.mxu1 %v17965_v54 }
 0x2cf   : > { %v16452_v43 = vpop.f32.mrb[124].mxu0 }
 0x2d0   : > { %v16388_v38 = vpop.f32.mrb[92].mxu1  ;;  %v16453_v56 = vpop.f32.mrb[125].mxu0 }
 0x2d1   : > { %v16389_v47 = vpop.f32.mrb[93].mxu1  ;;  %v16454_v30 = vadd.f32 %v16453_v56, %v16452_v43  ;;  %v16455_v21 = vpop.f32.mrb[126].mxu0  ;;  %v18004_v56 = vld [vmem:[%s24781_s3 + $0x530] ss:$20 sps:$4 sm:$0xff]  }
 0x2d2   : > { %v16390_v52 = vadd.f32 %v16389_v47, %v16388_v38  ;;  %v16391_v0 = vpop.f32.mrb[94].mxu1  ;;  %v16456_v32 = vpop.f32.mrb[127].mxu0 }
 0x2d3   : > { %v16392_v8 = vpop.f32.mrb[95].mxu1  ;;  %v16457_v33 = vadd.f32 %v16456_v32, %v16455_v21  ;;  %v20569_v5 = vadd.f32 %v16454_v30, %v16384_v59  ;;  %v18006_v21 = vld [vmem:[%s24781_s3 + $0x55c] ss:$20 sps:$4 sm:$0xff]  }
 0x2d4   : > { %v16393_v23 = vadd.f32 %v16392_v8, %v16391_v0  ;;  %3568 = vmatmul.mubr.bf16.gmra.mrb[232].mxu0 %v17996_v22  ;;  %v17975_v22 = vld [vmem:[%s24781_s3 + $0x550] ss:$20 sps:$4 sm:$0xff]  }
 0x2d5   : > { %3471 = vmatmul.mubr.bf16.gmra.mrb[200].mxu1 %v17967_v26  ;;  %3575 = vmatprep.mubr.bf16.mxu0 %v17998_v17  ;;  %v20571_v25 = vadd.f32 %v16457_v33, %v16387_v46 }
 0x2d6   : > { %3478 = vmatprep.mubr.bf16.mxu1 %v17969_v34 }
 0x2d7   : > { %v16458_v48 = vpop.f32.mrb[128].mxu0 }
 0x2d8   : > { %v16394_v29 = vpop.f32.mrb[96].mxu1  ;;  %v16459_v35 = vpop.f32.mrb[129].mxu0 }
 0x2d9   : > { %v16395_v42 = vpop.f32.mrb[97].mxu1  ;;  %v16460_v24 = vadd.f32 %v16459_v35, %v16458_v48  ;;  %v16461_v60 = vpop.f32.mrb[130].mxu0 }
 0x2da   : > { %v16396_v37 = vadd.f32 %v16395_v42, %v16394_v29  ;;  %v16397_v50 = vpop.f32.mrb[98].mxu1  ;;  %v16462_v54 = vpop.f32.mrb[131].mxu0 }
 0x2db   : > { %v16398_v59 = vpop.f32.mrb[99].mxu1  ;;  %v16463_v1 = vadd.f32 %v16462_v54, %v16461_v60  ;;  %v20585_v3 = vadd.f32 %v16460_v24, %v16390_v52  ;;  %v17979_v52 = vld [vmem:[%s24781_s3 + $0x57c] ss:$20 sps:$4 sm:$0xff]   ;;  %v17981_v24 = vld [vmem:[%s24781_s3 + $0x578] ss:$20 sps:$4 sm:$0xff]  }
 0x2dc   : > { %v16399_v16 = vadd.f32 %v16398_v59, %v16397_v50  ;;  %3576 = vmatmul.mubr.bf16.gmra.mrb[236].mxu0 %v18000_v20 }
 0x2dd   : > { %3479 = vmatmul.mubr.bf16.gmra.mrb[204].mxu1 %v17971_v31  ;;  %3583 = vmatprep.mubr.bf16.mxu0 %v18002_v7  ;;  %v20587_v6 = vadd.f32 %v16463_v1, %v16393_v23  ;;  %v18008_v31 = vld [vmem:[%s24781_s3 + $0x558] ss:$20 sps:$4 sm:$0xff]  }
 0x2de   : > { %3486 = vmatprep.mubr.bf16.mxu1 %v17973_v40  ;;  %v18010_v40 = vld [vmem:[%s24781_s3 + $0x584] ss:$20 sps:$4 sm:$0xff]  }
 0x2df   : > { %v16464_v46 = vpop.f32.mrb[132].mxu0 }
 0x2e0   : > { %v16400_v43 = vpop.f32.mrb[100].mxu1  ;;  %v16465_v38 = vpop.f32.mrb[133].mxu0 }
 0x2e1   : > { %v16401_v26 = vpop.f32.mrb[101].mxu1  ;;  %v16466_v47 = vadd.f32 %v16465_v38, %v16464_v46  ;;  %v16467_v30 = vpop.f32.mrb[134].mxu0 }
 0x2e2   : > { %v16402_v17 = vadd.f32 %v16401_v26, %v16400_v43  ;;  %v16403_v34 = vpop.f32.mrb[102].mxu1  ;;  %v16468_v0 = vpop.f32.mrb[135].mxu0  ;;  %v18012_v26 = vld [vmem:[%s24781_s3 + $0x580] ss:$20 sps:$4 sm:$0xff]  }
 0x2e3   : > { %v16404_v32 = vpop.f32.mrb[103].mxu1  ;;  %v16469_v8 = vadd.f32 %v16468_v0, %v16467_v30  ;;  %v20601_v33 = vadd.f32 %v16466_v47, %v16396_v37 }
 0x2e4   : > { %v16405_v23 = vadd.f32 %v16404_v32, %v16403_v34  ;;  %3584 = vmatmul.mubr.bf16.gmra.mrb[240].mxu0 %v18004_v56 }
 0x2e5   : > { %3487 = vmatmul.mubr.bf16.gmra.mrb[208].mxu1 %v17975_v22  ;;  %3591 = vmatprep.mubr.bf16.mxu0 %v18006_v21  ;;  %v20603_v48 = vadd.f32 %v16469_v8, %v16399_v16  ;;  %v17985_v21 = vld [vmem:[%s24781_s3 + $0x448] ss:$20 sps:$4 sm:$0xff]  }
 0x2e6   : > { %3494 = vmatprep.mubr.bf16.mxu1 %v17979_v52 }
 0x2e7   : > { %v16470_v29 = vpop.f32.mrb[136].mxu0 }
 0x2e8   : > { %v16406_v35 = vpop.f32.mrb[104].mxu1  ;;  %v16471_v20 = vpop.f32.mrb[137].mxu0 }
 0x2e9   : > { %v16407_v42 = vpop.f32.mrb[105].mxu1  ;;  %v16472_v60 = vadd.f32 %v16471_v20, %v16470_v29  ;;  %v16473_v7 = vpop.f32.mrb[138].mxu0 }
 0x2ea   : > { %v16408_v37 = vadd.f32 %v16407_v42, %v16406_v35  ;;  %v16409_v50 = vpop.f32.mrb[106].mxu1  ;;  %v16474_v54 = vpop.f32.mrb[139].mxu0 }
 0x2eb   : > { %v16410_v59 = vpop.f32.mrb[107].mxu1  ;;  %v16475_v1 = vadd.f32 %v16474_v54, %v16473_v7  ;;  %v20614_v16 = vadd.f32 %v16472_v60, %v16402_v17  ;;  %v17989_v7 = vld [vmem:[%s24781_s3 + $0x470] ss:$20 sps:$4 sm:$0xff]  }
 0x2ec   : > { %v16411_v46 = vadd.f32 %v16410_v59, %v16409_v50  ;;  %3592 = vmatmul.mubr.bf16.gmra.mrb[244].mxu0 %v18008_v31 }
 0x2ed   : > { %3495 = vmatmul.mubr.bf16.gmra.mrb[212].mxu1 %v17981_v24  ;;  %3599 = vmatprep.mubr.bf16.mxu0 %v18010_v40  ;;  %v20616_v43 = vadd.f32 %v16475_v1, %v16405_v23 }
 0x2ee   : > { %17573 = vmatprep.mubr.msk.bf16.mxu1 %vm19389_vm1, %v24825_v41 }
 0x2ef   : > { %v16476_v38 = vpop.f32.mrb[140].mxu0 }
 0x2f0   : > { %v2398_v56 = vpop.f32.mrb[108].mxu1  ;;  %v16477_v22 = vpop.f32.mrb[141].mxu0 }
 0x2f1   : > { %v20624_v47 = vadd.f32 %v2398_v56, %v20502_v49  ;;  %v17487_v30 = vpop.f32.mrb[109].mxu1  ;;  %v16478_v17 = vadd.f32 %v16477_v22, %v16476_v38  ;;  %v16479_v34 = vpop.f32.mrb[142].mxu0 }
 0x2f2   : > { %v2401_v52 = vpop.f32.mrb[110].mxu1  ;;  %v16480_v0 = vpop.f32.mrb[143].mxu0 }
 0x2f3   : > { %v20632_v8 = vadd.f32 %v2401_v52, %v20504_v57  ;;  %v17488_v23 = vpop.f32.mrb[111].mxu1  ;;  %v16481_v29 = vadd.f32 %v16480_v0, %v16479_v34  ;;  %v20634_v35 = vadd.f32 %v16478_v17, %v16408_v37 }
 0x2f4   : > { %3600 = vmatmul.mubr.bf16.gmra.mrb[248].mxu0 %v18012_v26 }
 0x2f5   : > { %17574 = vmatmul.mubr.msk.bf16.vlgmr.msra.gmra.mrb[216].mxu1 %vm1504_vm2, %v17985_v21  ;;  %v20639_v20 = vadd.f32 %v16481_v29, %v16411_v46 }
 0x2f6   : > { %17577 = vmatprep.mubr.msk.bf16.mxu1 %vm19389_vm1, %v24825_v41 }
 0x2f7   : > { %v16511_v31 = vpop.f32.mrb[144].mxu0 }
 0x2f8   : > { %v2406_v42 = vpop.f32.mrb[112].mxu1  ;;  %v16512_v24 = vpop.f32.mrb[145].mxu0 }
 0x2f9   : > { %v20644_v57 = vadd.f32 %v2406_v42, %v20521_v44  ;;  %v17491_v60 = vpop.f32.mrb[113].mxu1  ;;  %v20649_v40 = vadd.f32 %v16512_v24, %v16511_v31  ;;  %v16514_v37 = vpop.f32.mrb[146].mxu0 }
 0x2fa   : > { %v2409_v50 = vpop.f32.mrb[114].mxu1  ;;  %v16515_v54 = vpop.f32.mrb[147].mxu0 }
 0x2fb   : > { %v20654_v1 = vadd.f32 %v2409_v50, %v20523_v62  ;;  %v17492_v46 = vpop.f32.mrb[115].mxu1  ;;  %v20656_v38 = vadd.f32 %v16515_v54, %v16514_v37  ;;  %v17993_v62 = vld [vmem:[%s24781_s3 + $0x498] ss:$20 sps:$4 sm:$0xff]  }
 0x2fd   : > { %17578 = vmatmul.mubr.msk.bf16.gmra.mrb[220].mxu1 %vm1504_vm2, %v17989_v7 }
 0x2fe   : > { %17581 = vmatprep.mubr.msk.bf16.mxu1 %vm19389_vm1, %v24825_v41 }
 0x2ff   : > { %v16517_v56 = vpop.f32.mrb[148].mxu0 }
 0x300   : > { %v2414_v22 = vpop.f32.mrb[116].mxu1  ;;  %v16518_v26 = vpop.f32.mrb[149].mxu0 }
 0x301   : > { %v20664_v30 = vadd.f32 %v2414_v22, %v20537_v9  ;;  %v17495_v21 = vpop.f32.mrb[117].mxu1  ;;  %v20669_v17 = vadd.f32 %v16518_v26, %v16517_v56  ;;  %v16520_v34 = vpop.f32.mrb[150].mxu0 }
 0x302   : > { %v2417_v52 = vpop.f32.mrb[118].mxu1  ;;  %v16521_v0 = vpop.f32.mrb[151].mxu0 }
 0x303   : > { %v20674_v29 = vadd.f32 %v2417_v52, %v20539_v4  ;;  %v17496_v31 = vpop.f32.mrb[119].mxu1  ;;  %v20676_v42 = vadd.f32 %v16521_v0, %v16520_v34  ;;  %v17997_v4 = vld [vmem:[%s24781_s3 + $0x4c0] ss:$20 sps:$4 sm:$0xff]  }
 0x305   : > { %17582 = vmatmul.mubr.msk.bf16.gmra.mrb[224].mxu1 %vm1504_vm2, %v17993_v62 }
 0x306   : > { %17585 = vmatprep.mubr.msk.bf16.mxu1 %vm19389_vm1, %v24825_v41 }
 0x307   : > { %v16523_v24 = vpop.f32.mrb[152].mxu0 }
 0x308   : > { %v2422_v60 = vpop.f32.mrb[120].mxu1  ;;  %v16524_v7 = vpop.f32.mrb[153].mxu0 }
 0x309   : > { %v20684_v37 = vadd.f32 %v2422_v60, %v20553_v58  ;;  %v17499_v50 = vpop.f32.mrb[121].mxu1  ;;  %v20689_v54 = vadd.f32 %v16524_v7, %v16523_v24  ;;  %v16526_v46 = vpop.f32.mrb[154].mxu0 }
 0x30a   : > { %v2425_v56 = vpop.f32.mrb[122].mxu1  ;;  %v16527_v22 = vpop.f32.mrb[155].mxu0 }
 0x30b   : > { %v20694_v21 = vadd.f32 %v2425_v56, %v20555_v18  ;;  %v17500_v62 = vpop.f32.mrb[123].mxu1  ;;  %v20696_v34 = vadd.f32 %v16527_v22, %v16526_v46  ;;  %v18001_v18 = vld [vmem:[%s24781_s3 + $0x4e8] ss:$20 sps:$4 sm:$0xff]  }
 0x30d   : > { %17586 = vmatmul.mubr.msk.bf16.gmra.mrb[228].mxu1 %vm1504_vm2, %v17997_v4 }
 0x30e   : > { %17589 = vmatprep.mubr.msk.bf16.mxu1 %vm19389_vm1, %v24825_v41 }
 0x30f   : > { %v16529_v52 = vpop.f32.mrb[156].mxu0 }
 0x310   : > { %v2430_v0 = vpop.f32.mrb[124].mxu1  ;;  %v16530_v31 = vpop.f32.mrb[157].mxu0 }
 0x311   : > { %v20704_v24 = vadd.f32 %v2430_v0, %v20569_v5  ;;  %v17503_v60 = vpop.f32.mrb[125].mxu1  ;;  %v20709_v7 = vadd.f32 %v16530_v31, %v16529_v52  ;;  %v16532_v50 = vpop.f32.mrb[158].mxu0 }
 0x312   : > { %v2433_v46 = vpop.f32.mrb[126].mxu1  ;;  %v16533_v56 = vpop.f32.mrb[159].mxu0 }
 0x313   : > { %v20714_v22 = vadd.f32 %v2433_v46, %v20571_v25  ;;  %v17504_v62 = vpop.f32.mrb[127].mxu1  ;;  %v20716_v58 = vadd.f32 %v16533_v56, %v16532_v50  ;;  %v18005_v25 = vld [vmem:[%s24781_s3 + $0x510] ss:$20 sps:$4 sm:$0xff]  }
 0x315   : > { %24836 = vst [vmem:[#allocation6_spill] sm:$0xff] %v20714_v22  ;;  %17590 = vmatmul.mubr.msk.bf16.gmra.mrb[232].mxu1 %vm1504_vm2, %v18001_v18 }
 0x316   : > { %17593 = vmatprep.mubr.msk.bf16.mxu1 %vm19389_vm1, %v24825_v41 }
 0x317   : > { %v16535_v52 = vpop.f32.mrb[160].mxu0 }
 0x318   : > { %v2438_v0 = vpop.f32.mrb[128].mxu1  ;;  %v16536_v31 = vpop.f32.mrb[161].mxu0 }
 0x319   : > { %v20724_v60 = vadd.f32 %v2438_v0, %v20585_v3  ;;  %v17507_v4 = vpop.f32.mrb[129].mxu1  ;;  %v20729_v50 = vadd.f32 %v16536_v31, %v16535_v52  ;;  %v16538_v46 = vpop.f32.mrb[162].mxu0 }
 0x31a   : > { %v2441_v56 = vpop.f32.mrb[130].mxu1  ;;  %v16539_v62 = vpop.f32.mrb[163].mxu0 }
 0x31b   : > { %24837 = vst [vmem:[#allocation5_spill] sm:$0xff] %v20724_v60  ;;  %v20734_v5 = vadd.f32 %v2441_v56, %v20587_v6  ;;  %v17508_v26 = vpop.f32.mrb[131].mxu1  ;;  %v20736_v9 = vadd.f32 %v16539_v62, %v16538_v46  ;;  %v18009_v6 = vld [vmem:[%s24781_s3 + $0x538] ss:$20 sps:$4 sm:$0xff]  }
 0x31d   : > { %24838 = vst [vmem:[#allocation15_spill] sm:$0xff] %v20734_v5  ;;  %17594 = vmatmul.mubr.msk.bf16.gmra.mrb[236].mxu1 %vm1504_vm2, %v18005_v25 }
 0x31e   : > { %17597 = vmatprep.mubr.msk.bf16.mxu1 %vm19389_vm1, %v24825_v41 }
 0x31f   : > { %v16541_v4 = vpop.f32.mrb[164].mxu0 }
 0x320   : > { %v2446_v52 = vpop.f32.mrb[132].mxu1  ;;  %v16542_v0 = vpop.f32.mrb[165].mxu0 }
 0x321   : > { %v20744_v31 = vadd.f32 %v2446_v52, %v20601_v33  ;;  %v17511_v18 = vpop.f32.mrb[133].mxu1  ;;  %v20749_v26 = vadd.f32 %v16542_v0, %v16541_v4  ;;  %v16544_v46 = vpop.f32.mrb[166].mxu0 }
 0x322   : > { %v2449_v56 = vpop.f32.mrb[134].mxu1  ;;  %v16545_v62 = vpop.f32.mrb[167].mxu0 }
 0x323   : > { %24839 = vst [vmem:[#allocation16_spill] sm:$0xff] %v20744_v31  ;;  %v20754_v3 = vadd.f32 %v2449_v56, %v20603_v48  ;;  %v17512_v23 = vpop.f32.mrb[135].mxu1  ;;  %v20756_v44 = vadd.f32 %v16545_v62, %v16544_v46  ;;  %v18013_v48 = vld [vmem:[%s24781_s3 + $0x560] ss:$20 sps:$4 sm:$0xff]  }
 0x325   : > { %24840 = vst [vmem:[#allocation17_spill] sm:$0xff] %v20754_v3  ;;  %17598 = vmatmul.mubr.msk.bf16.gmra.mrb[240].mxu1 %vm1504_vm2, %v18009_v6 }
 0x326   : > { %17601 = vmatprep.mubr.msk.bf16.mxu1 %vm19389_vm1, %v24825_v41 }
 0x327   : > { %v16547_v18 = vpop.f32.mrb[168].mxu0 }
 0x328   : > { %v2454_v4 = vpop.f32.mrb[136].mxu1  ;;  %v16548_v52 = vpop.f32.mrb[169].mxu0 }
 0x329   : > { %v20764_v0 = vadd.f32 %v2454_v4, %v20614_v16  ;;  %v17515_v25 = vpop.f32.mrb[137].mxu1  ;;  %v20769_v23 = vadd.f32 %v16548_v52, %v16547_v18  ;;  %v16550_v46 = vpop.f32.mrb[170].mxu0 }
 0x32a   : > { %v2457_v56 = vpop.f32.mrb[138].mxu1  ;;  %v16551_v62 = vpop.f32.mrb[171].mxu0 }
 0x32b   : > { %24841 = vst [vmem:[#allocation18_spill] sm:$0xff] %v20764_v0  ;;  %v20774_v33 = vadd.f32 %v2457_v56, %v20616_v43  ;;  %v17516_v59 = vpop.f32.mrb[139].mxu1  ;;  %v20776_v49 = vadd.f32 %v16551_v62, %v16550_v46  ;;  %v18014_v43 = vld [vmem:[%s24781_s3 + $0x588] ss:$20 sps:$4 sm:$0xff]  }
 0x32d   : > { %24842 = vst [vmem:[#allocation19_spill] sm:$0xff] %v20774_v33  ;;  %17602 = vmatmul.mubr.msk.bf16.gmra.mrb[244].mxu1 %vm1504_vm2, %v18013_v48 }
 0x32e   : > { %17605 = vmatprep.mubr.msk.bf16.mxu1 %vm19389_vm1, %v24825_v41 }
 0x32f   : > { %v16553_v25 = vpop.f32.mrb[172].mxu0 }
 0x330   : > { %v2462_v18 = vpop.f32.mrb[140].mxu1  ;;  %v16554_v4 = vpop.f32.mrb[173].mxu0 }
 0x331   : > { %v20784_v52 = vadd.f32 %v2462_v18, %v20634_v35  ;;  %v17519_v6 = vpop.f32.mrb[141].mxu1  ;;  %v20789_v59 = vadd.f32 %v16554_v4, %v16553_v25  ;;  %v16556_v46 = vpop.f32.mrb[174].mxu0 }
 0x332   : > { %v2465_v56 = vpop.f32.mrb[142].mxu1  ;;  %v16557_v62 = vpop.f32.mrb[175].mxu0 }
 0x333   : > { %24843 = vst [vmem:[#allocation20_spill] sm:$0xff] %v20784_v52  ;;  %v20794_v16 = vadd.f32 %v2465_v56, %v20639_v20  ;;  %v17520_v32 = vpop.f32.mrb[143].mxu1  ;;  %v20796_v41 = vadd.f32 %v16557_v62, %v16556_v46 }
 0x335   : > { %24844 = vst [vmem:[#allocation21_spill] sm:$0xff] %v20794_v16  ;;  %17606 = vmatmul.mubr.msk.bf16.gmra.mrb[248].mxu1 %vm1504_vm2, %v18014_v43 }
 0x337   : > { %v16559_v6 = vpop.f32.mrb[176].mxu0 }
 0x338   : > { %v16581_v25 = vpop.f32.mrb[144].mxu1  ;;  %v16560_v18 = vpop.f32.mrb[177].mxu0 }
 0x339   : > { %v16582_v4 = vpop.f32.mrb[145].mxu1  ;;  %v20801_v33 = vadd.f32 %v16560_v18, %v16559_v6  ;;  %v16562_v53 = vpop.f32.mrb[178].mxu0 }
 0x33a   : > { %v16583_v0 = vadd.f32 %v16582_v4, %v16581_v25  ;;  %v16584_v48 = vpop.f32.mrb[146].mxu1  ;;  %v16563_v52 = vpop.f32.mrb[179].mxu0 }
 0x33b   : > { %v16585_v20 = vpop.f32.mrb[147].mxu1  ;;  %v20803_v56 = vadd.f32 %v16563_v52, %v16562_v53 }
 0x33c   : > { %v16586_v32 = vadd.f32 %v16585_v20, %v16584_v48  ;;  %v2916_v46 = vadd.f32 %v16583_v0, %v20649_v40 }
 0x33e   : > { %v2919_v62 = vadd.f32 %v16586_v32, %v20656_v38 }
 0x33f   : > { %v3020_v35 = vpop.f32.mrb[180].mxu0 }
 0x340   : > { %v20807_v43 = vadd.f32 %v3020_v35, %v2916_v46  ;;  %v17531_v16 = vpop.f32.mrb[181].mxu0  ;;  %v16587_v11 = vpop.f32.mrb[148].mxu1 }
 0x341   : > { %v3023_v15 = vpop.f32.mrb[182].mxu0  ;;  %v16588_v6 = vpop.f32.mrb[149].mxu1 }
 0x342   : > { %v20809_v18 = vadd.f32 %v3023_v15, %v2919_v62  ;;  %v16589_v25 = vadd.f32 %v16588_v6, %v16587_v11  ;;  %v16590_v4 = vpop.f32.mrb[150].mxu1  ;;  %v17532_v27 = vpop.f32.mrb[183].mxu0 }
 0x343   : > { %v16591_v3 = vpop.f32.mrb[151].mxu1 }
 0x344   : > { %v16592_v53 = vadd.f32 %v16591_v3, %v16590_v4  ;;  %v2924_v52 = vadd.f32 %v16589_v25, %v20669_v17 }
 0x346   : > { %v2927_v40 = vadd.f32 %v16592_v53, %v20676_v42 }
 0x347   : > { %v3028_v0 = vpop.f32.mrb[184].mxu0 }
 0x348   : > { %v20813_v38 = vadd.f32 %v3028_v0, %v2924_v52  ;;  %v17535_v48 = vpop.f32.mrb[185].mxu0  ;;  %v16593_v35 = vpop.f32.mrb[152].mxu1 }
 0x349   : > { %v3031_v16 = vpop.f32.mrb[186].mxu0  ;;  %v16594_v20 = vpop.f32.mrb[153].mxu1 }
 0x34a   : > { %v20815_v32 = vadd.f32 %v3031_v16, %v2927_v40  ;;  %v16595_v15 = vadd.f32 %v16594_v20, %v16593_v35  ;;  %v16596_v46 = vpop.f32.mrb[154].mxu1  ;;  %v17536_v11 = vpop.f32.mrb[187].mxu0  ;;  %v24805_v20 = vmov 0  }
 0x34b   : > { %v16597_v62 = vpop.f32.mrb[155].mxu1  ;;  %5177 = vmatprep.subr.bf16.mxu0 %v24805_v20 }
 0x34c   : > { %v16598_v27 = vadd.f32 %v16597_v62, %v16596_v46  ;;  %v2932_v3 = vadd.f32 %v16595_v15, %v20689_v54 }
 0x34e   : > { %v2935_v17 = vadd.f32 %v16598_v27, %v20696_v34 }
 0x34f   : > { %v3036_v6 = vpop.f32.mrb[188].mxu0 }
 0x350   : > { %v20819_v42 = vadd.f32 %v3036_v6, %v2932_v3  ;;  %v17539_v25 = vpop.f32.mrb[189].mxu0  ;;  %v16599_v4 = vpop.f32.mrb[156].mxu1 }
 0x351   : > { %v3039_v53 = vpop.f32.mrb[190].mxu0  ;;  %v16600_v52 = vpop.f32.mrb[157].mxu1 }
 0x352   : > { %v20821_v0 = vadd.f32 %v3039_v53, %v2935_v17  ;;  %v16601_v40 = vadd.f32 %v16600_v52, %v16599_v4  ;;  %v16602_v48 = vpop.f32.mrb[158].mxu1  ;;  %v17540_v35 = vpop.f32.mrb[191].mxu0 }
 0x353   : > { %v16603_v16 = vpop.f32.mrb[159].mxu1 }
 0x354   : > { %v16604_v46 = vadd.f32 %v16603_v16, %v16602_v48  ;;  %v2940_v54 = vadd.f32 %v16601_v40, %v20709_v7 }
 0x356   : > { %v2943_v34 = vadd.f32 %v16604_v46, %v20716_v58 }
 0x357   : > { %v3044_v15 = vpop.f32.mrb[192].mxu0 }
 0x358   : > { %v20826_v11 = vadd.f32 %v3044_v15, %v2940_v54  ;;  %v17543_v62 = vpop.f32.mrb[193].mxu0  ;;  %v16605_v27 = vpop.f32.mrb[160].mxu1 }
 0x359   : > { %v3047_v3 = vpop.f32.mrb[194].mxu0  ;;  %v16606_v17 = vpop.f32.mrb[161].mxu1 }
 0x35a   : > { %v20828_v6 = vadd.f32 %v3047_v3, %v2943_v34  ;;  %v16607_v25 = vadd.f32 %v16606_v17, %v16605_v27  ;;  %v16608_v4 = vpop.f32.mrb[162].mxu1  ;;  %v17544_v53 = vpop.f32.mrb[195].mxu0 }
 0x35b   : > { %v16609_v52 = vpop.f32.mrb[163].mxu1 }
 0x35c   : > { %v16610_v35 = vadd.f32 %v16609_v52, %v16608_v4  ;;  %v2948_v48 = vadd.f32 %v16607_v25, %v20729_v50 }
 0x35e   : > { %v2951_v7 = vadd.f32 %v16610_v35, %v20736_v9 }
 0x35f   : > { %v3052_v40 = vpop.f32.mrb[196].mxu0 }
 0x360   : > { %v16611_v58 = vpop.f32.mrb[164].mxu1  ;;  %v20832_v16 = vadd.f32 %v3052_v40, %v2948_v48  ;;  %v17547_v46 = vpop.f32.mrb[197].mxu0 }
 0x361   : > { %v16612_v54 = vpop.f32.mrb[165].mxu1  ;;  %v3055_v15 = vpop.f32.mrb[198].mxu0 }
 0x362   : > { %v16613_v62 = vadd.f32 %v16612_v54, %v16611_v58  ;;  %v16614_v20 = vpop.f32.mrb[166].mxu1  ;;  %v20834_v34 = vadd.f32 %v3055_v15, %v2951_v7  ;;  %v17548_v27 = vpop.f32.mrb[199].mxu0 }
 0x363   : > { %v16615_v3 = vpop.f32.mrb[167].mxu1 }
 0x364   : > { %v16616_v17 = vadd.f32 %v16615_v3, %v16614_v20  ;;  %v2956_v4 = vadd.f32 %v16613_v62, %v20749_v26 }
 0x366   : > { %v2959_v50 = vadd.f32 %v16616_v17, %v20756_v44 }
 0x367   : > { %v3060_v25 = vpop.f32.mrb[200].mxu0 }
 0x368   : > { %v16617_v9 = vpop.f32.mrb[168].mxu1  ;;  %v20838_v53 = vadd.f32 %v3060_v25, %v2956_v4  ;;  %v17551_v52 = vpop.f32.mrb[201].mxu0 }
 0x369   : > { %v16618_v35 = vpop.f32.mrb[169].mxu1  ;;  %v3063_v48 = vpop.f32.mrb[202].mxu0 }
 0x36a   : > { %24845 = vst [vmem:[#allocation22_spill] sm:$0xff] %v20838_v53  ;;  %v16619_v40 = vadd.f32 %v16618_v35, %v16617_v9  ;;  %v16620_v46 = vpop.f32.mrb[170].mxu1  ;;  %v20840_v58 = vadd.f32 %v3063_v48, %v2959_v50  ;;  %v17552_v7 = vpop.f32.mrb[203].mxu0 }
 0x36b   : > { %v16621_v54 = vpop.f32.mrb[171].mxu1 }
 0x36c   : > { %24846 = vst [vmem:[#allocation23_spill] sm:$0xff] %v20840_v58  ;;  %v16622_v15 = vadd.f32 %v16621_v54, %v16620_v46  ;;  %v2964_v20 = vadd.f32 %v16619_v40, %v20769_v23 }
 0x36e   : > { %v2967_v26 = vadd.f32 %v16622_v15, %v20776_v49 }
 0x36f   : > { %v3068_v62 = vpop.f32.mrb[204].mxu0 }
 0x370   : > { %v16623_v44 = vpop.f32.mrb[172].mxu1  ;;  %v20844_v27 = vadd.f32 %v3068_v62, %v2964_v20  ;;  %v17555_v3 = vpop.f32.mrb[205].mxu0 }
 0x371   : > { %v16624_v17 = vpop.f32.mrb[173].mxu1  ;;  %v3071_v4 = vpop.f32.mrb[206].mxu0 }
 0x372   : > { %24847 = vst [vmem:[#allocation24_spill] sm:$0xff] %v20844_v27  ;;  %v16625_v25 = vadd.f32 %v16624_v17, %v16623_v44  ;;  %v16626_v52 = vpop.f32.mrb[174].mxu1  ;;  %v20846_v9 = vadd.f32 %v3071_v4, %v2967_v26  ;;  %v17556_v50 = vpop.f32.mrb[207].mxu0 }
 0x373   : > { %v16627_v35 = vpop.f32.mrb[175].mxu1 }
 0x374   : > { %24848 = vst [vmem:[#allocation25_spill] sm:$0xff] %v20846_v9  ;;  %v16628_v48 = vadd.f32 %v16627_v35, %v16626_v52  ;;  %v2972_v46 = vadd.f32 %v16625_v25, %v20789_v59 }
 0x376   : > { %v2975_v23 = vadd.f32 %v16628_v48, %v20796_v41 }
 0x377   : > { %v3076_v40 = vpop.f32.mrb[208].mxu0 }
 0x378   : > { %v16629_v49 = vpop.f32.mrb[176].mxu1  ;;  %v20850_v7 = vadd.f32 %v3076_v40, %v2972_v46  ;;  %v17559_v54 = vpop.f32.mrb[209].mxu0 }
 0x379   : > { %v16630_v15 = vpop.f32.mrb[177].mxu1  ;;  %v3079_v20 = vpop.f32.mrb[210].mxu0 }
 0x37a   : > { %24849 = vst [vmem:[#allocation26_spill] sm:$0xff] %v20850_v7  ;;  %v16631_v62 = vadd.f32 %v16630_v15, %v16629_v49  ;;  %v16632_v3 = vpop.f32.mrb[178].mxu1  ;;  %v20852_v44 = vadd.f32 %v3079_v20, %v2975_v23  ;;  %v17560_v26 = vpop.f32.mrb[211].mxu0 }
 0x37b   : > { %v16633_v17 = vpop.f32.mrb[179].mxu1 }
 0x37c   : > { %24850 = vst [vmem:[#allocation27_spill] sm:$0xff] %v20852_v44  ;;  %v16634_v4 = vadd.f32 %v16633_v17, %v16632_v3  ;;  %v2980_v52 = vadd.f32 %v16631_v62, %v20801_v33 }
 0x37e   : > { %v2983_v59 = vadd.f32 %v16634_v4, %v20803_v56 }
 0x37f   : > { %v3084_v25 = vpop.f32.mrb[212].mxu0 }
 0x380   : > { %v16664_v41 = vpop.f32.mrb[180].mxu1  ;;  %v20856_v50 = vadd.f32 %v3084_v25, %v2980_v52  ;;  %v17563_v35 = vpop.f32.mrb[213].mxu0 }
 0x381   : > { %v16665_v48 = vpop.f32.mrb[181].mxu1  ;;  %v3087_v46 = vpop.f32.mrb[214].mxu0 }
 0x382   : > { %24851 = vst [vmem:[#allocation28_spill] sm:$0xff] %v20856_v50  ;;  %v16666_v40 = vadd.f32 %v16665_v48, %v16664_v41  ;;  %v16667_v54 = vpop.f32.mrb[182].mxu1  ;;  %v20858_v49 = vadd.f32 %v3087_v46, %v2983_v59  ;;  %v17564_v23 = vpop.f32.mrb[215].mxu0 }
 0x383   : > { %v16668_v15 = vpop.f32.mrb[183].mxu1 }
 0x384   : > { %24852 = vst [vmem:[#allocation29_spill] sm:$0xff] %v20858_v49  ;;  %v16669_v20 = vadd.f32 %v16668_v15, %v16667_v54 }
 0x387   : > { %v16734_v26 = vpop.f32.mrb[216].mxu0 }
 0x388   : > { %v16670_v3 = vpop.f32.mrb[184].mxu1  ;;  %v16735_v17 = vpop.f32.mrb[217].mxu0 }
 0x389   : > { %v16671_v33 = vpop.f32.mrb[185].mxu1  ;;  %v16736_v62 = vadd.f32 %v16735_v17, %v16734_v26  ;;  %v16737_v56 = vpop.f32.mrb[218].mxu0 }
 0x38a   : > { %v16672_v4 = vadd.f32 %v16671_v33, %v16670_v3  ;;  %v16673_v44 = vpop.f32.mrb[186].mxu1  ;;  %v16738_v52 = vpop.f32.mrb[219].mxu0 }
 0x38b   : > { %v16674_v25 = vpop.f32.mrb[187].mxu1  ;;  %v16739_v35 = vadd.f32 %v16738_v52, %v16737_v56  ;;  %v20860_v50 = vadd.f32 %v16736_v62, %v16666_v40  ;;  %v18017_v40 = vld [vmem:[%s24782_s4 + $0x4] ss:$8 sps:$4 sm:$0xff]  }
 0x38c   : > { %v16675_v41 = vadd.f32 %v16674_v25, %v16673_v44  ;;  %14809 = vmatprep.mubr.msk.bf16.mxu0 %vm4876_vm3, %v18017_v40 }
 0x38d   : > { %v20862_v48 = vadd.f32 %v16739_v35, %v16669_v20 }
 0x38f   : > { %v16740_v59 = vpop.f32.mrb[220].mxu0 }
 0x390   : > { %v16676_v46 = vpop.f32.mrb[188].mxu1  ;;  %v16741_v23 = vpop.f32.mrb[221].mxu0 }
 0x391   : > { %v16677_v54 = vpop.f32.mrb[189].mxu1  ;;  %v16742_v15 = vadd.f32 %v16741_v23, %v16740_v59  ;;  %v16743_v49 = vpop.f32.mrb[222].mxu0 }
 0x392   : > { %v16678_v7 = vadd.f32 %v16677_v54, %v16676_v46  ;;  %v16679_v55 = vpop.f32.mrb[190].mxu1  ;;  %v16744_v26 = vpop.f32.mrb[223].mxu0 }
 0x393   : > { %v16680_v17 = vpop.f32.mrb[191].mxu1  ;;  %v16745_v3 = vadd.f32 %v16744_v26, %v16743_v49  ;;  %v20864_v33 = vadd.f32 %v16742_v15, %v16672_v4 }
 0x394   : > { %v16681_v44 = vadd.f32 %v16680_v17, %v16679_v55 }
 0x395   : > { %v20869_v20 = vadd.f32 %v16745_v3, %v16675_v41 }
 0x397   : > { %v16746_v62 = vpop.f32.mrb[224].mxu0 }
 0x398   : > { %v16682_v56 = vpop.f32.mrb[192].mxu1  ;;  %v16747_v52 = vpop.f32.mrb[225].mxu0 }
 0x399   : > { %v16683_v25 = vpop.f32.mrb[193].mxu1  ;;  %v16748_v35 = vadd.f32 %v16747_v52, %v16746_v62  ;;  %v16749_v59 = vpop.f32.mrb[226].mxu0 }
 0x39a   : > { %v16684_v46 = vadd.f32 %v16683_v25, %v16682_v56  ;;  %v16685_v49 = vpop.f32.mrb[194].mxu1  ;;  %v16750_v4 = vpop.f32.mrb[227].mxu0 }
 0x39b   : > { %v16686_v23 = vpop.f32.mrb[195].mxu1  ;;  %v16751_v54 = vadd.f32 %v16750_v4, %v16749_v59  ;;  %v20872_v15 = vadd.f32 %v16748_v35, %v16678_v7 }
 0x39c   : > { %v16687_v26 = vadd.f32 %v16686_v23, %v16685_v49 }
 0x39d   : > { %v20874_v9 = vadd.f32 %v16751_v54, %v16681_v44 }
 0x39f   : > { %v16752_v55 = vpop.f32.mrb[228].mxu0 }
 0x3a0   : > { %v16688_v41 = vpop.f32.mrb[196].mxu1  ;;  %v16753_v17 = vpop.f32.mrb[229].mxu0 }
 0x3a1   : > { %v16689_v3 = vpop.f32.mrb[197].mxu1  ;;  %v16754_v40 = vadd.f32 %v16753_v17, %v16752_v55  ;;  %v16755_v31 = vpop.f32.mrb[230].mxu0 }
 0x3a2   : > { %v16690_v36 = vadd.f32 %v16689_v3, %v16688_v41  ;;  %v16691_v27 = vpop.f32.mrb[198].mxu1  ;;  %v16756_v62 = vpop.f32.mrb[231].mxu0 }
 0x3a3   : > { %v16692_v52 = vpop.f32.mrb[199].mxu1  ;;  %v16757_v56 = vadd.f32 %v16756_v62, %v16755_v31  ;;  %v20876_v25 = vadd.f32 %v16754_v40, %v16684_v46 }
 0x3a4   : > { %v16693_v5 = vadd.f32 %v16692_v52, %v16691_v27 }
 0x3a5   : > { %v20878_v59 = vadd.f32 %v16757_v56, %v16687_v26 }
 0x3a7   : > { %v16758_v7 = vpop.f32.mrb[232].mxu0 }
 0x3a8   : > { %v16694_v35 = vpop.f32.mrb[200].mxu1  ;;  %v16759_v44 = vpop.f32.mrb[233].mxu0 }
 0x3a9   : > { %v16695_v49 = vpop.f32.mrb[201].mxu1  ;;  %v16760_v4 = vadd.f32 %v16759_v44, %v16758_v7  ;;  %v16761_v23 = vpop.f32.mrb[234].mxu0 }
 0x3aa   : > { %v16696_v54 = vadd.f32 %v16695_v49, %v16694_v35  ;;  %v16697_v14 = vpop.f32.mrb[202].mxu1  ;;  %v16762_v55 = vpop.f32.mrb[235].mxu0 }
 0x3ab   : > { %v16698_v17 = vpop.f32.mrb[203].mxu1  ;;  %v16763_v41 = vadd.f32 %v16762_v55, %v16761_v23  ;;  %v20880_v3 = vadd.f32 %v16760_v4, %v16690_v36 }
 0x3ac   : > { %v16699_v58 = vadd.f32 %v16698_v17, %v16697_v14 }
 0x3ad   : > { %v20882_v31 = vadd.f32 %v16763_v41, %v16693_v5 }
 0x3af   : > { %v16764_v46 = vpop.f32.mrb[236].mxu0 }
 0x3b0   : > { %v16700_v27 = vpop.f32.mrb[204].mxu1  ;;  %v16765_v26 = vpop.f32.mrb[237].mxu0 }
 0x3b1   : > { %v16701_v40 = vpop.f32.mrb[205].mxu1  ;;  %v16766_v62 = vadd.f32 %v16765_v26, %v16764_v46  ;;  %v16767_v52 = vpop.f32.mrb[238].mxu0 }
 0x3b2   : > { %v16702_v56 = vadd.f32 %v16701_v40, %v16700_v27  ;;  %v16703_v60 = vpop.f32.mrb[206].mxu1  ;;  %v16768_v7 = vpop.f32.mrb[239].mxu0 }
 0x3b3   : > { %v16704_v44 = vpop.f32.mrb[207].mxu1  ;;  %v16769_v35 = vadd.f32 %v16768_v7, %v16767_v52  ;;  %v20884_v49 = vadd.f32 %v16766_v62, %v16696_v54 }
 0x3b4   : > { %v16705_v12 = vadd.f32 %v16704_v44, %v16703_v60 }
 0x3b5   : > { %24853 = vst [vmem:[#allocation30_spill] sm:$0xff] %v20884_v49  ;;  %v20886_v23 = vadd.f32 %v16769_v35, %v16699_v58 }
 0x3b7   : > { %24854 = vst [vmem:[#allocation31_spill] sm:$0xff] %v20886_v23  ;;  %v16770_v36 = vpop.f32.mrb[240].mxu0 }
 0x3b8   : > { %v16706_v14 = vpop.f32.mrb[208].mxu1  ;;  %v16771_v5 = vpop.f32.mrb[241].mxu0 }
 0x3b9   : > { %v16707_v4 = vpop.f32.mrb[209].mxu1  ;;  %v16772_v55 = vadd.f32 %v16771_v5, %v16770_v36  ;;  %v16773_v17 = vpop.f32.mrb[242].mxu0 }
 0x3ba   : > { %v16708_v41 = vadd.f32 %v16707_v4, %v16706_v14  ;;  %v16709_v53 = vpop.f32.mrb[210].mxu1  ;;  %v16774_v46 = vpop.f32.mrb[243].mxu0 }
 0x3bb   : > { %v16710_v26 = vpop.f32.mrb[211].mxu1  ;;  %v16775_v27 = vadd.f32 %v16774_v46, %v16773_v17  ;;  %v20888_v40 = vadd.f32 %v16772_v55, %v16702_v56 }
 0x3bc   : > { %v16711_v22 = vadd.f32 %v16710_v26, %v16709_v53 }
 0x3bd   : > { %v20890_v52 = vadd.f32 %v16775_v27, %v16705_v12 }
 0x3bf   : > { %v16776_v54 = vpop.f32.mrb[244].mxu0 }
 0x3c0   : > { %v16712_v60 = vpop.f32.mrb[212].mxu1  ;;  %v16777_v58 = vpop.f32.mrb[245].mxu0 }
 0x3c1   : > { %v16713_v62 = vpop.f32.mrb[213].mxu1  ;;  %v16778_v7 = vadd.f32 %v16777_v58, %v16776_v54  ;;  %v16779_v44 = vpop.f32.mrb[246].mxu0 }
 0x3c2   : > { %v16714_v35 = vadd.f32 %v16713_v62, %v16712_v60  ;;  %v16715_v23 = vpop.f32.mrb[214].mxu1  ;;  %v16780_v36 = vpop.f32.mrb[247].mxu0 }
 0x3c3   : > { %v16716_v5 = vpop.f32.mrb[215].mxu1  ;;  %v16781_v14 = vadd.f32 %v16780_v36, %v16779_v44  ;;  %v20892_v4 = vadd.f32 %v16778_v7, %v16708_v41 }
 0x3c4   : > { %v16717_v49 = vadd.f32 %v16716_v5, %v16715_v23  ;;  %v24856_v5 = vmax.f32 %v20304_v13, %v20632_v8  ;;  %v24859_v8 = vmax.f32 %v20329_v28, %v20654_v1  ;;  %v24861_v1 = vmax.f32 %v20355_v51, %v20674_v29 }
 0x3c5   : > { %v20894_v17 = vadd.f32 %v16781_v14, %v16711_v22  ;;  %v24855_v22 = vmax.f32 %v20296_v61, %v20624_v47  ;;  %v24857_v47 = vmov 0   ;;  %v24863_v29 = vmax.f32 %v20381_v19, %v20694_v21  ;;  %v24865_v21 = vld [vmem:[#allocation6_spill] sm:$0xff] }
 0x3c7   : > { %v16782_v56 = vpop.f32.mrb[248].mxu0 }
 0x3c8   : > { %v3642_v53 = vpop.f32.mrb[216].mxu1  ;;  %v16783_v12 = vpop.f32.mrb[249].mxu0 }
 0x3c9   : > { %v3643_v55 = vadd.f32 %v3642_v53, %v20860_v50  ;;  %v17575_v46 = vpop.f32.mrb[217].mxu1  ;;  %v16784_v26 = vadd.f32 %v16783_v12, %v16782_v56  ;;  %v16785_v27 = vpop.f32.mrb[250].mxu0 }
 0x3ca   : > { %v3645_v54 = vpop.f32.mrb[218].mxu1  ;;  %v16786_v58 = vpop.f32.mrb[251].mxu0 }
 0x3cb   : > { %v3731_v60 = vmax.f32 %v20807_v43, %v3643_v55  ;;  %v3646_v62 = vadd.f32 %v3645_v54, %v20862_v48  ;;  %v17576_v44 = vpop.f32.mrb[219].mxu1  ;;  %v16787_v41 = vadd.f32 %v16786_v58, %v16785_v27  ;;  %v20899_v7 = vadd.f32 %v16784_v26, %v16714_v35 }
 0x3cd   : > { %v3749_v23 = vmax.f32 %v24855_v22, %v3731_v60  ;;  %v3732_v36 = vmax.f32 %v20809_v18, %v3646_v62  ;;  %v20905_v50 = vadd.f32 %v16787_v41, %v16717_v49  ;;  %v24858_v18 = vmax.f32 %v20318_v39, %v20644_v57 }
 0x3ce   : > { %v24860_v39 = vmax.f32 %v20344_v45, %v20664_v30  ;;  %v24862_v45 = vmax.f32 %v20370_v10, %v20684_v37  ;;  %v24864_v10 = vmax.f32 %v20396_v63, %v20704_v24  ;;  %v24870_v63 = vld [vmem:[#allocation7_spill] sm:$0xff]  ;;  %v24871_v24 = vld [vmem:[#allocation5_spill] sm:$0xff] }
 0x3cf   : > { %v3750_v14 = vmax.f32 %v24856_v5, %v3732_v36 }
 0x3d0   : > { %v3650_v56 = vpop.f32.mrb[220].mxu1 }
 0x3d1   : > { %v3651_v43 = vadd.f32 %v3650_v56, %v20864_v33  ;;  %v17579_v48 = vpop.f32.mrb[221].mxu1  ;;  %v3767_v53 = vpack.c.bf16 %v3750_v14, %v3749_v23 }
 0x3d2   : > { %v3653_v12 = vpop.f32.mrb[222].mxu1 }
 0x3d3   : > { %v3733_v35 = vmax.f32 %v20813_v38, %v3651_v43  ;;  %v3654_v55 = vadd.f32 %v3653_v12, %v20869_v20  ;;  %5178 = vmatpush1.bf16.msra.mxu0 %v3767_v53  ;;  %v17580_v61 = vpop.f32.mrb[223].mxu1  ;;  %v24867_v53 = vld [vmem:[#allocation30_spill] sm:$0xff] }
 0x3d4   : > { %5179 = vmatprep.subr.bf16.mxu0 %v24857_v47 }
 0x3d5   : > { %v3751_v49 = vmax.f32 %v24858_v18, %v3733_v35  ;;  %v3734_v13 = vmax.f32 %v20815_v32, %v3654_v55  ;;  %v24868_v55 = vld [vmem:[#allocation22_spill] sm:$0xff]  ;;  %v24869_v18 = vld [vmem:[#allocation31_spill] sm:$0xff] }
 0x3d7   : > { %v3752_v33 = vmax.f32 %v24859_v8, %v3734_v13 }
 0x3d8   : > { %v3658_v46 = vpop.f32.mrb[224].mxu1 }
 0x3d9   : > { %v3659_v26 = vadd.f32 %v3658_v46, %v20872_v15  ;;  %v17583_v38 = vpop.f32.mrb[225].mxu1  ;;  %v3768_v27 = vpack.c.bf16 %v3752_v33, %v3751_v49  ;;  %v24874_v46 = vld [vmem:[#allocation8_spill] sm:$0xff] }
 0x3da   : > { %v3661_v20 = vpop.f32.mrb[226].mxu1 }
 0x3db   : > { %v3735_v54 = vmax.f32 %v20819_v42, %v3659_v26  ;;  %v3662_v58 = vadd.f32 %v3661_v20, %v20874_v9  ;;  %5180 = vmatpush1.bf16.msra.mxu0 %v3768_v27  ;;  %v17584_v60 = vpop.f32.mrb[227].mxu1  ;;  %v24875_v26 = vld [vmem:[#allocation15_spill] sm:$0xff] }
 0x3dc   : > { %5181 = vmatprep.subr.bf16.mxu0 %v24857_v47  ;;  %v24876_v38 = vmax.f32 %v24874_v46, %v24875_v26  ;;  %v18015_v46 = vld [vmem:[%s24782_s4] ss:$8 sps:$4 sm:$0xff]   ;;  %v18018_v26 = vld [vmem:[%s24782_s4 + $0x10] ss:$8 sps:$4 sm:$0xff]  }
 0x3dd   : > { %v3753_v57 = vmax.f32 %v24860_v39, %v3735_v54  ;;  %v3736_v28 = vmax.f32 %v20821_v0, %v3662_v58 }
 0x3df   : > { %v3754_v32 = vmax.f32 %v24861_v1, %v3736_v28 }
 0x3e0   : > { %v3666_v15 = vpop.f32.mrb[228].mxu1 }
 0x3e1   : > { %v3667_v62 = vadd.f32 %v3666_v15, %v20876_v25  ;;  %v17587_v42 = vpop.f32.mrb[229].mxu1  ;;  %v3769_v44 = vpack.c.bf16 %v3754_v32, %v3753_v57  ;;  %v24877_v57 = vld [vmem:[#allocation24_spill] sm:$0xff]  ;;  %v24878_v15 = vld [vmem:[#allocation9_spill] sm:$0xff] }
 0x3e2   : > { %v3669_v9 = vpop.f32.mrb[230].mxu1 }
 0x3e3   : > { %v3737_v41 = vmax.f32 %v20826_v11, %v3667_v62  ;;  %v3670_v22 = vadd.f32 %v3669_v9, %v20878_v59  ;;  %5182 = vmatpush1.bf16.msra.mxu0 %v3769_v44  ;;  %v17588_v23 = vpop.f32.mrb[231].mxu1  ;;  %v24879_v62 = vld [vmem:[#allocation16_spill] sm:$0xff]  ;;  %v24881_v9 = vld [vmem:[#allocation25_spill] sm:$0xff] }
 0x3e4   : > { %5183 = vmatprep.subr.bf16.mxu0 %v24857_v47  ;;  %v24880_v42 = vmax.f32 %v24878_v15, %v24879_v62  ;;  %v24883_v23 = vld [vmem:[#allocation17_spill] sm:$0xff]  ;;  %v18036_v15 = vld [vmem:[%s24782_s4 + $0x70] ss:$8 sps:$4 sm:$0xff]  }
 0x3e5   : > { %v3755_v30 = vmax.f32 %v24862_v45, %v3737_v41  ;;  %v3738_v51 = vmax.f32 %v20828_v6, %v3670_v22  ;;  %v24866_v6 = vmax.f32 %v20405_v2, %v24865_v21  ;;  %v24873_v2 = vld [vmem:[#allocation23_spill] sm:$0xff]  ;;  %v24882_v22 = vld [vmem:[#allocation10_spill] sm:$0xff] }
 0x3e6   : > { %v24891_v21 = vld [vmem:[#allocation19_spill] sm:$0xff]  ;;  %v18041_v62 = vld [vmem:[%s24782_s4 + $0x84] ss:$8 sps:$4 sm:$0xff]  }
 0x3e7   : > { %v3756_v0 = vmax.f32 %v24863_v29, %v3738_v51 }
 0x3e8   : > { %v3674_v25 = vpop.f32.mrb[232].mxu1 }
 0x3e9   : > { %v3675_v36 = vadd.f32 %v3674_v25, %v20880_v3  ;;  %v17591_v11 = vpop.f32.mrb[233].mxu1  ;;  %v3770_v5 = vpack.c.bf16 %v3756_v0, %v3755_v30  ;;  %v24885_v25 = vld [vmem:[#allocation26_spill] sm:$0xff] }
 0x3ea   : > { %v3677_v59 = vpop.f32.mrb[234].mxu1 }
 0x3eb   : > { %v3739_v14 = vmax.f32 %v20832_v16, %v3675_v36  ;;  %v3678_v56 = vadd.f32 %v3677_v59, %v20882_v31  ;;  %5184 = vmatpush1.bf16.msra.mxu0 %v3770_v5  ;;  %v17592_v43 = vpop.f32.mrb[235].mxu1  ;;  %v24886_v59 = vld [vmem:[#allocation11_spill] sm:$0xff] }
 0x3ec   : > { %5185 = vmatprep.subr.bf16.mxu0 %v24857_v47 }
 0x3ed   : > { %v3757_v37 = vmax.f32 %v24864_v10, %v3739_v14  ;;  %v3740_v19 = vmax.f32 %v20834_v34, %v3678_v56  ;;  %v24872_v34 = vmax.f32 %v24870_v63, %v24871_v24  ;;  %v24887_v14 = vld [vmem:[#allocation18_spill] sm:$0xff]  ;;  %v24889_v10 = vld [vmem:[#allocation27_spill] sm:$0xff]  ;;  %v24897_v63 = vld [vmem:[#allocation29_spill] sm:$0xff] }
 0x3ee   : > { %v24888_v56 = vmax.f32 %v24886_v59, %v24887_v14  ;;  %v18120_v59 = vld [vmem:[%s24783_s5 + $0x58] sm:$0xff]   ;;  %v18059_v14 = vld [vmem:[%s24782_s4 + $0xe4] ss:$8 sps:$4 sm:$0xff]  }
 0x3ef   : > { %v3758_v3 = vmax.f32 %v24866_v6, %v3740_v19  ;;  %v24890_v19 = vld [vmem:[#allocation12_spill] sm:$0xff] }
 0x3f0   : > { %v3682_v48 = vpop.f32.mrb[236].mxu1 }
 0x3f1   : > { %v3683_v12 = vadd.f32 %v3682_v48, %v24867_v53  ;;  %v17595_v16 = vpop.f32.mrb[237].mxu1  ;;  %v3771_v35 = vpack.c.bf16 %v3758_v3, %v3757_v37 }
 0x3f2   : > { %v3685_v31 = vpop.f32.mrb[238].mxu1  ;;  %v24893_v16 = vld [vmem:[#allocation28_spill] sm:$0xff] }
 0x3f3   : > { %v3741_v61 = vmax.f32 %v24868_v55, %v3683_v12  ;;  %v3686_v49 = vadd.f32 %v3685_v31, %v24869_v18  ;;  %5186 = vmatpush1.bf16.msra.mxu0 %v3771_v35  ;;  %v17596_v13 = vpop.f32.mrb[239].mxu1  ;;  %v24895_v18 = vld [vmem:[#allocation20_spill] sm:$0xff] }
 0x3f4   : > { %5187 = vmatprep.subr.bf16.mxu0 %v24857_v47 }
 0x3f5   : > { %v3759_v8 = vmax.f32 %v24872_v34, %v3741_v61  ;;  %v3742_v33 = vmax.f32 %v24873_v2, %v3686_v49  ;;  %v24894_v61 = vld [vmem:[#allocation13_spill] sm:$0xff]  ;;  %v24898_v34 = vld [vmem:[#allocation14_spill] sm:$0xff] }
 0x3f6   : > { %v24896_v49 = vmax.f32 %v24894_v61, %v24895_v18  ;;  %v18069_v61 = vld [vmem:[%s24782_s4 + $0x120] ss:$8 sps:$4 sm:$0xff]   ;;  %v18074_v18 = vld [vmem:[%s24782_s4 + $0x134] ss:$8 sps:$4 sm:$0xff]  }
 0x3f7   : > { %v3760_v27 = vmax.f32 %v24876_v38, %v3742_v33  ;;  %v18023_v38 = vld [vmem:[%s24782_s4 + $0x24] ss:$8 sps:$4 sm:$0xff]  }
 0x3f8   : > { %v3690_v20 = vpop.f32.mrb[240].mxu1 }
 0x3f9   : > { %v3691_v54 = vadd.f32 %v3690_v20, %v20888_v40  ;;  %v17599_v58 = vpop.f32.mrb[241].mxu1  ;;  %v3772_v60 = vpack.c.bf16 %v3760_v27, %v3759_v8  ;;  %v24884_v40 = vmax.f32 %v24882_v22, %v24883_v23  ;;  %v24899_v8 = vld [vmem:[#allocation21_spill] sm:$0xff]  ;;  %v18026_v20 = vld [vmem:[%s24782_s4 + $0x34] ss:$8 sps:$4 sm:$0xff]  }
 0x3fa   : > { %v3693_v39 = vpop.f32.mrb[242].mxu1  ;;  %v18021_v27 = vld [vmem:[%s24782_s4 + $0x20] ss:$8 sps:$4 sm:$0xff]   ;;  %v18029_v58 = vld [vmem:[%s24782_s4 + $0x44] ss:$8 sps:$4 sm:$0xff]  }
 0x3fb   : > { %v3743_v28 = vmax.f32 %v24877_v57, %v3691_v54  ;;  %v3694_v1 = vadd.f32 %v3693_v39, %v20890_v52  ;;  %5188 = vmatpush1.bf16.msra.mxu0 %v3772_v60  ;;  %v17600_v32 = vpop.f32.mrb[243].mxu1  ;;  %v18024_v54 = vld [vmem:[%s24782_s4 + $0x30] ss:$8 sps:$4 sm:$0xff]   ;;  %v18027_v60 = vld [vmem:[%s24782_s4 + $0x40] ss:$8 sps:$4 sm:$0xff]  }
 0x3fc   : > { %5189 = vmatprep.subr.bf16.mxu0 %v24857_v47  ;;  %v18032_v39 = vld [vmem:[%s24782_s4 + $0x54] ss:$8 sps:$4 sm:$0xff]   ;;  %v18030_v57 = vld [vmem:[%s24782_s4 + $0x50] ss:$8 sps:$4 sm:$0xff]   ;;  %v18045_v22 = vld [vmem:[%s24782_s4 + $0xa0] ss:$8 sps:$4 sm:$0xff]  }
 0x3fd   : > { %v3761_v44 = vmax.f32 %v24880_v42, %v3743_v28  ;;  %v3744_v41 = vmax.f32 %v24881_v9, %v3694_v1  ;;  %v18035_v28 = vld [vmem:[%s24782_s4 + $0x64] ss:$8 sps:$4 sm:$0xff]   ;;  %v18033_v1 = vld [vmem:[%s24782_s4 + $0x60] ss:$8 sps:$4 sm:$0xff]   ;;  %v18038_v32 = vld [vmem:[%s24782_s4 + $0x74] ss:$8 sps:$4 sm:$0xff]  }
 0x3fe   : > { %v18039_v42 = vld [vmem:[%s24782_s4 + $0x80] ss:$8 sps:$4 sm:$0xff]   ;;  %v18042_v9 = vld [vmem:[%s24782_s4 + $0x90] ss:$8 sps:$4 sm:$0xff]   ;;  %v18050_v23 = vld [vmem:[%s24782_s4 + $0xb4] ss:$8 sps:$4 sm:$0xff]  }
 0x3ff   : > { %v3762_v45 = vmax.f32 %v24884_v40, %v3744_v41  ;;  %v18047_v41 = vld [vmem:[%s24782_s4 + $0xa4] ss:$8 sps:$4 sm:$0xff]   ;;  %v18048_v40 = vld [vmem:[%s24782_s4 + $0xb0] ss:$8 sps:$4 sm:$0xff]  }
 0x400   : > { %v3698_v30 = vpop.f32.mrb[244].mxu1 }
 0x401   : > { %v3699_v51 = vadd.f32 %v3698_v30, %v20892_v4  ;;  %v17603_v29 = vpop.f32.mrb[245].mxu1  ;;  %v3773_v0 = vpack.c.bf16 %v3762_v45, %v3761_v44  ;;  %v24892_v4 = vmax.f32 %v24890_v19, %v24891_v21  ;;  %v18044_v44 = vld [vmem:[%s24782_s4 + $0x94] ss:$8 sps:$4 sm:$0xff]   ;;  %v18053_v45 = vld [vmem:[%s24782_s4 + $0xc4] ss:$8 sps:$4 sm:$0xff]  }
 0x402   : > { %v3701_v52 = vpop.f32.mrb[246].mxu1  ;;  %v18111_v30 = vld [vmem:[%s24783_s5 + $0x40] sm:$0xff]   ;;  %v18127_v19 = vld [vmem:[%s24783_s5 + $0x68] sm:$0xff]   ;;  %v18062_v21 = vld [vmem:[%s24782_s4 + $0xf4] ss:$8 sps:$4 sm:$0xff]  }
 0x403   : > { %v3745_v36 = vmax.f32 %v24885_v25, %v3699_v51  ;;  %v3702_v11 = vadd.f32 %v3701_v52, %v20894_v17  ;;  %5190 = vmatpush1.bf16.msra.mxu0 %v3773_v0  ;;  %v17604_v5 = vpop.f32.mrb[247].mxu1  ;;  %v18112_v51 = vld [vmem:[%s24783_s5] sm:$0xff]   ;;  %16801 = vmatprep.subr.bf16.mxu1 %v18111_v30  ;;  %v18113_v0 = vld [vmem:[%s24783_s5 + $0x48] sm:$0xff]   ;;  %v18056_v52 = vld [vmem:[%s24782_s4 + $0xd4] ss:$8 sps:$4 sm:$0xff]  }
 0x404   : > { %5191 = vmatprep.subr.bf16.mxu0 %v24857_v47  ;;  %16802 = vmatpush3.bf16.msra.mxu1 %v18112_v51  ;;  %v18051_v29 = vld [vmem:[%s24782_s4 + $0xc0] ss:$8 sps:$4 sm:$0xff]   ;;  %v18054_v5 = vld [vmem:[%s24782_s4 + $0xd0] ss:$8 sps:$4 sm:$0xff]   ;;  %v18107_v51 = vld [vmem:[%s24782_s4 + $0x1e4] ss:$8 sps:$4 sm:$0xff]  }
 0x405   : > { %v3763_v43 = vmax.f32 %v24888_v56, %v3745_v36  ;;  %v3746_v37 = vmax.f32 %v24889_v10, %v3702_v11  ;;  %v18114_v25 = vld [vmem:[%s24783_s5 + $0x8] sm:$0xff]   ;;  %16803 = vmatprep.subr.bf16.mxu1 %v18113_v0  ;;  %v18118_v36 = vld [vmem:[%s24783_s5 + $0x50] sm:$0xff]   ;;  %v18121_v56 = vld [vmem:[%s24783_s5 + $0x18] sm:$0xff]  }
 0x406   : > { %v18119_v11 = vld [vmem:[%s24783_s5 + $0x10] sm:$0xff]   ;;  %v18126_v10 = vld [vmem:[%s24783_s5 + $0x20] sm:$0xff]  }
 0x407   : > { %v3764_v6 = vmax.f32 %v24892_v4, %v3746_v37  ;;  %v18057_v37 = vld [vmem:[%s24782_s4 + $0xe0] ss:$8 sps:$4 sm:$0xff]  }
 0x408   : > { %v3706_v3 = vpop.f32.mrb[248].mxu1  ;;  %16804 = vmatpush3.bf16.msra.mxu1 %v18114_v25  ;;  %v18128_v4 = vld [vmem:[%s24783_s5 + $0x28] sm:$0xff]  }
 0x409   : > { %v3707_v48 = vadd.f32 %v3706_v3, %v20899_v7  ;;  %v17607_v53 = vpop.f32.mrb[249].mxu1  ;;  %v3774_v12 = vpack.c.bf16 %v3764_v6, %v3763_v43  ;;  %v24900_v7 = vmax.f32 %v24898_v34, %v24899_v8  ;;  %16805 = vmatprep.subr.bf16.mxu1 %v18118_v36  ;;  %v18125_v43 = vld [vmem:[%s24783_s5 + $0x60] sm:$0xff]   ;;  %v18132_v6 = vld [vmem:[%s24783_s5 + $0x70] sm:$0xff]  }
 0x40a   : > { %v3709_v17 = vpop.f32.mrb[250].mxu1  ;;  %v18133_v3 = vld [vmem:[%s24783_s5 + $0x30] sm:$0xff]   ;;  %v18134_v53 = vld [vmem:[%s24783_s5 + $0x78] sm:$0xff]   ;;  %v18105_v36 = vld [vmem:[%s24782_s4 + $0x1e0] ss:$8 sps:$4 sm:$0xff]  }
 0x40b   : > { %v3747_v35 = vmax.f32 %v24893_v16, %v3707_v48  ;;  %v3710_v31 = vadd.f32 %v3709_v17, %v20905_v50  ;;  %5192 = vmatpush1.bf16.msra.mxu0 %v3774_v12  ;;  %v17608_v55 = vpop.f32.mrb[251].mxu1  ;;  %v18020_v50 = vld [vmem:[%s24782_s4 + $0x14] ss:$8 sps:$4 sm:$0xff]   ;;  %v18060_v48 = vld [vmem:[%s24782_s4 + $0xf0] ss:$8 sps:$4 sm:$0xff]  }
 0x40c   : > { %5193 = vmatprep.subr.bf16.mxu0 %v24857_v47  ;;  %16806 = vmatpush3.bf16.msra.mxu1 %v18119_v11  ;;  %v18065_v12 = vld [vmem:[%s24782_s4 + $0x104] ss:$8 sps:$4 sm:$0xff]   ;;  %v18135_v17 = vld [vmem:[%s24783_s5 + $0x38] sm:$0xff]   ;;  %v18063_v16 = vld [vmem:[%s24782_s4 + $0x100] ss:$8 sps:$4 sm:$0xff]  }
 0x40d   : > { %v3765_v13 = vmax.f32 %v24896_v49, %v3747_v35  ;;  %v3748_v24 = vmax.f32 %v24897_v63, %v3710_v31  ;;  %16807 = vmatprep.subr.bf16.mxu1 %v18120_v59  ;;  %v18068_v35 = vld [vmem:[%s24782_s4 + $0x114] ss:$8 sps:$4 sm:$0xff]   ;;  %v18066_v31 = vld [vmem:[%s24782_s4 + $0x110] ss:$8 sps:$4 sm:$0xff]   ;;  %v18071_v55 = vld [vmem:[%s24782_s4 + $0x124] ss:$8 sps:$4 sm:$0xff]  }
 0x40e   : > { %v18072_v49 = vld [vmem:[%s24782_s4 + $0x130] ss:$8 sps:$4 sm:$0xff]   ;;  %v18139_v63 = vld [vmem:[%s24783_s5 + $0xc0] sm:$0xff]   ;;  %v18080_v34 = vld [vmem:[%s24782_s4 + $0x154] ss:$8 sps:$4 sm:$0xff]  }
 0x40f   : > { %v3766_v2 = vmax.f32 %v24900_v7, %v3748_v24  ;;  %v18075_v24 = vld [vmem:[%s24782_s4 + $0x140] ss:$8 sps:$4 sm:$0xff]   ;;  %v18078_v8 = vld [vmem:[%s24782_s4 + $0x150] ss:$8 sps:$4 sm:$0xff]   ;;  %v18083_v7 = vld [vmem:[%s24782_s4 + $0x164] ss:$8 sps:$4 sm:$0xff]  }
 0x410   : > { %16808 = vmatpush3.bf16.msra.mxu1 %v18121_v56 }
 0x411   : > { %v3775_v33 = vpack.c.bf16 %v3766_v2, %v3765_v13  ;;  %16809 = vmatprep.subr.bf16.mxu1 %v18125_v43  ;;  %v18077_v13 = vld [vmem:[%s24782_s4 + $0x144] ss:$8 sps:$4 sm:$0xff]   ;;  %v18081_v2 = vld [vmem:[%s24782_s4 + $0x160] ss:$8 sps:$4 sm:$0xff]  }
 0x413   : > { %5194 = vmatpush1.bf16.msra.mxu0 %v3775_v33  ;;  %v18086_v33 = vld [vmem:[%s24782_s4 + $0x174] ss:$8 sps:$4 sm:$0xff]  }
 0x414   : > { %16810 = vmatpush3.bf16.msra.mxu1 %v18126_v10  ;;  %v18108_v10 = vld [vmem:[%s24782_s4 + $0x1f0] ss:$8 sps:$4 sm:$0xff]  }
 0x415   : > { %16811 = vmatprep.subr.bf16.mxu1 %v18127_v19  ;;  %v18117_v19 = vld [vmem:[%s24782_s4 + $0x204] ss:$8 sps:$4 sm:$0xff]  }
 0x416   : > { %5210 = vmatmul.mubr.bf16.vlgmr.msra.gmra.mrb[252].mxu0 %v18015_v46  ;;  %v18084_v46 = vld [vmem:[%s24782_s4 + $0x170] ss:$8 sps:$4 sm:$0xff]  }
 0x417   : > { %14810 = vmatprep.mubr.msk.bf16.mxu0 %vm4876_vm3, %v18020_v50  ;;  %v18089_v50 = vld [vmem:[%s24782_s4 + $0x184] ss:$8 sps:$4 sm:$0xff]  }
 0x418   : > { %16812 = vmatpush3.bf16.msra.mxu1 %v18128_v4 }
 0x419   : > { %16813 = vmatprep.subr.bf16.mxu1 %v18132_v6 }
 0x41c   : > { %16814 = vmatpush3.bf16.msra.mxu1 %v18133_v3  ;;  %v18140_v3 = vld [vmem:[%s24783_s5 + $0x80] sm:$0xff]  }
 0x41d   : > { %16815 = vmatprep.subr.bf16.mxu1 %v18134_v53  ;;  %v18142_v53 = vld [vmem:[%s24783_s5 + $0x88] sm:$0xff]  }
 0x41e   : > { %5218 = vmatmul.mubr.bf16.gmra.mrb[0].mxu0 %v18018_v26  ;;  %v18087_v26 = vld [vmem:[%s24782_s4 + $0x180] ss:$8 sps:$4 sm:$0xff]  }
 0x41f   : > { %14811 = vmatprep.mubr.msk.bf16.mxu0 %vm4876_vm3, %v18023_v38  ;;  %v18092_v38 = vld [vmem:[%s24782_s4 + $0x194] ss:$8 sps:$4 sm:$0xff]  }
 0x420   : > { %16816 = vmatpush3.bf16.msra.mxu1 %v18135_v17  ;;  %v18146_v17 = vld [vmem:[%s24783_s5 + $0xd0] sm:$0xff]  }
 0x421   : > { %16841 = vmatprep.subr.bf16.mxu1 %v18139_v63  ;;  %v18149_v63 = vld [vmem:[%s24783_s5 + $0x98] sm:$0xff]  }
 0x426   : > { %5226 = vmatmul.mubr.bf16.gmra.mrb[4].mxu0 %v18021_v27  ;;  %v18090_v27 = vld [vmem:[%s24782_s4 + $0x190] ss:$8 sps:$4 sm:$0xff]  }
 0x427   : > { %14812 = vmatprep.mubr.msk.bf16.mxu0 %vm4876_vm3, %v18026_v20  ;;  %v18095_v20 = vld [vmem:[%s24782_s4 + $0x1a4] ss:$8 sps:$4 sm:$0xff]  }
 0x42e   : > { %5234 = vmatmul.mubr.bf16.gmra.mrb[8].mxu0 %v18024_v54  ;;  %v18093_v54 = vld [vmem:[%s24782_s4 + $0x1a0] ss:$8 sps:$4 sm:$0xff]  }
 0x42f   : > { %14813 = vmatprep.mubr.msk.bf16.mxu0 %vm4876_vm3, %v18029_v58  ;;  %v18098_v58 = vld [vmem:[%s24782_s4 + $0x1b4] ss:$8 sps:$4 sm:$0xff]  }
 0x436   : > { %5242 = vmatmul.mubr.bf16.gmra.mrb[12].mxu0 %v18027_v60 }
 0x437   : > { %14814 = vmatprep.mubr.msk.bf16.mxu0 %vm4876_vm3, %v18032_v39  ;;  %v18096_v39 = vld [vmem:[%s24782_s4 + $0x1b0] ss:$8 sps:$4 sm:$0xff]  }
 0x43e   : > { %5250 = vmatmul.mubr.bf16.gmra.mrb[16].mxu0 %v18030_v57 }
 0x43f   : > { %14815 = vmatprep.mubr.msk.bf16.mxu0 %vm4876_vm3, %v18035_v28  ;;  %v18101_v28 = vld [vmem:[%s24782_s4 + $0x1c4] ss:$8 sps:$4 sm:$0xff]  }
 0x446   : > { %5258 = vmatmul.mubr.bf16.gmra.mrb[20].mxu0 %v18033_v1 }
 0x447   : > { %14816 = vmatprep.mubr.msk.bf16.mxu0 %vm4876_vm3, %v18038_v32 }
 0x44e   : > { %5266 = vmatmul.mubr.bf16.gmra.mrb[24].mxu0 %v18036_v15 }
 0x44f   : > { %14817 = vmatprep.mubr.msk.bf16.mxu0 %vm4876_vm3, %v18041_v62 }
 0x456   : > { %5274 = vmatmul.mubr.bf16.gmra.mrb[28].mxu0 %v18039_v42  ;;  %v18099_v42 = vld [vmem:[%s24782_s4 + $0x1c0] ss:$8 sps:$4 sm:$0xff]  }
 0x457   : > { %14818 = vmatprep.mubr.msk.bf16.mxu0 %vm4876_vm3, %v18044_v44 }
 0x45e   : > { %5282 = vmatmul.mubr.bf16.gmra.mrb[32].mxu0 %v18042_v9  ;;  %v18104_v9 = vld [vmem:[%s24782_s4 + $0x1d4] ss:$8 sps:$4 sm:$0xff]  }
 0x45f   : > { %14819 = vmatprep.mubr.msk.bf16.mxu0 %vm4876_vm3, %v18047_v41 }
 0x466   : > { %5290 = vmatmul.mubr.bf16.gmra.mrb[36].mxu0 %v18045_v22 }
 0x467   : > { %14820 = vmatprep.mubr.msk.bf16.mxu0 %vm4876_vm3, %v18050_v23 }
 0x46e   : > { %5298 = vmatmul.mubr.bf16.gmra.mrb[40].mxu0 %v18048_v40 }
 0x46f   : > { %14821 = vmatprep.mubr.msk.bf16.mxu0 %vm4876_vm3, %v18053_v45  ;;  %v18102_v45 = vld [vmem:[%s24782_s4 + $0x1d0] ss:$8 sps:$4 sm:$0xff]  }
 0x476   : > { %5306 = vmatmul.mubr.bf16.gmra.mrb[44].mxu0 %v18051_v29 }
 0x477   : > { %14822 = vmatprep.mubr.msk.bf16.mxu0 %vm4876_vm3, %v18056_v52 }
 0x47e   : > { %5314 = vmatmul.mubr.bf16.gmra.mrb[48].mxu0 %v18054_v5  ;;  %v18110_v5 = vld [vmem:[%s24782_s4 + $0x1f4] ss:$8 sps:$4 sm:$0xff]  }
 0x47f   : > { %14823 = vmatprep.mubr.msk.bf16.mxu0 %vm4876_vm3, %v18059_v14 }
 0x486   : > { %5322 = vmatmul.mubr.bf16.gmra.mrb[52].mxu0 %v18057_v37 }
 0x487   : > { %14824 = vmatprep.mubr.msk.bf16.mxu0 %vm4876_vm3, %v18062_v21 }
 0x48e   : > { %5330 = vmatmul.mubr.bf16.gmra.mrb[56].mxu0 %v18060_v48  ;;  %v18141_v48 = vld [vmem:[%s24783_s5 + $0xc8] sm:$0xff]  }
 0x48f   : > { %14825 = vmatprep.mubr.msk.bf16.mxu0 %vm4876_vm3, %v18065_v12 }
 0x496   : > { %5338 = vmatmul.mubr.bf16.gmra.mrb[60].mxu0 %v18063_v16  ;;  %v18115_v16 = vld [vmem:[%s24782_s4 + $0x200] ss:$8 sps:$4 sm:$0xff]  }
 0x497   : > { %14826 = vmatprep.mubr.msk.bf16.mxu0 %vm4876_vm3, %v18068_v35 }
 0x49e   : > { %5346 = vmatmul.mubr.bf16.gmra.mrb[64].mxu0 %v18066_v31  ;;  %v18124_v31 = vld [vmem:[%s24782_s4 + $0x214] ss:$8 sps:$4 sm:$0xff]  }
 0x49f   : > { %14827 = vmatprep.mubr.msk.bf16.mxu0 %vm4876_vm3, %v18071_v55 }
 0x4a6   : > { %5354 = vmatmul.mubr.bf16.gmra.mrb[68].mxu0 %v18069_v61 }
 0x4a7   : > { %14828 = vmatprep.mubr.msk.bf16.mxu0 %vm4876_vm3, %v18074_v18 }
 0x4ae   : > { %5362 = vmatmul.mubr.bf16.gmra.mrb[72].mxu0 %v18072_v49  ;;  %v18147_v49 = vld [vmem:[%s24783_s5 + $0x90] sm:$0xff]  }
 0x4af   : > { %14829 = vmatprep.mubr.msk.bf16.mxu0 %vm4876_vm3, %v18077_v13  ;;  %v18148_v13 = vld [vmem:[%s24783_s5 + $0xd8] sm:$0xff]  }
 0x4b6   : > { %5370 = vmatmul.mubr.bf16.gmra.mrb[76].mxu0 %v18075_v24 }
 0x4b7   : > { %14830 = vmatprep.mubr.msk.bf16.mxu0 %vm4876_vm3, %v18080_v34  ;;  %v18153_v34 = vld [vmem:[%s24783_s5 + $0xe0] sm:$0xff]  }
 0x4be   : > { %5378 = vmatmul.mubr.bf16.gmra.mrb[80].mxu0 %v18078_v8  ;;  %v18122_v8 = vld [vmem:[%s24782_s4 + $0x210] ss:$8 sps:$4 sm:$0xff]  }
 0x4bf   : > { %14831 = vmatprep.mubr.msk.bf16.mxu0 %vm4876_vm3, %v18083_v7 }
 0x4c6   : > { %5386 = vmatmul.mubr.bf16.gmra.mrb[84].mxu0 %v18081_v2  ;;  %v18131_v2 = vld [vmem:[%s24782_s4 + $0x224] ss:$8 sps:$4 sm:$0xff]  }
 0x4c7   : > { %14832 = vmatprep.mubr.msk.bf16.mxu0 %vm4876_vm3, %v18086_v33 }
 0x4ce   : > { %5394 = vmatmul.mubr.bf16.gmra.mrb[88].mxu0 %v18084_v46 }
 0x4cf   : > { %14833 = vmatprep.mubr.msk.bf16.mxu0 %vm4876_vm3, %v18089_v50 }
 0x4d6   : > { %5402 = vmatmul.mubr.bf16.gmra.mrb[92].mxu0 %v18087_v26  ;;  %v18154_v26 = vld [vmem:[%s24783_s5 + $0xa0] sm:$0xff]  }
 0x4d7   : > { %14834 = vmatprep.mubr.msk.bf16.mxu0 %vm4876_vm3, %v18092_v38  ;;  %v18155_v38 = vld [vmem:[%s24783_s5 + $0xe8] sm:$0xff]  }
 0x4de   : > { %5410 = vmatmul.mubr.bf16.gmra.mrb[96].mxu0 %v18090_v27  ;;  %v18156_v27 = vld [vmem:[%s24783_s5 + $0xa8] sm:$0xff]  }
 0x4df   : > { %14835 = vmatprep.mubr.msk.bf16.mxu0 %vm4876_vm3, %v18095_v20 }
 0x4e6   : > { %5418 = vmatmul.mubr.bf16.gmra.mrb[100].mxu0 %v18093_v54  ;;  %v18160_v54 = vld [vmem:[%s24783_s5 + $0xf0] sm:$0xff]  }
 0x4e7   : > { %14836 = vmatprep.mubr.msk.bf16.mxu0 %vm4876_vm3, %v18098_v58  ;;  %v18129_v58 = vld [vmem:[%s24782_s4 + $0x220] ss:$8 sps:$4 sm:$0xff]  }
 0x4e9   : > { %v5211_v60 = vpop.f32.mrb[252].mxu0 }
 0x4ea   : > { %v5213_v57 = vpop.f32.mrb[253].mxu0 }
 0x4eb   : > { %v5214_v1 = vpop.f32.mrb[254].mxu0 }
 0x4ec   : > { %v6010_v32 = vpack.c.bf16 %v5214_v1, %v5211_v60  ;;  %v5216_v15 = vpop.f32.mrb[255].mxu0 }
 0x4ed   : > { %v18162_v15 = vld [vmem:[%s24783_s5 + $0xf8] sm:$0xff]  }
 0x4ee   : > { %5426 = vmatmul.mubr.bf16.gmra.mrb[104].mxu0 %v18096_v39  ;;  %v18138_v39 = vld [vmem:[%s24782_s4 + $0x234] ss:$8 sps:$4 sm:$0xff]  }
 0x4ef   : > { %14837 = vmatprep.mubr.msk.bf16.mxu0 %vm4876_vm3, %v18101_v28 }
 0x4f1   : > { %v5219_v62 = vpop.f32.mrb[0].mxu0 }
 0x4f2   : > { %v5221_v44 = vpop.f32.mrb[1].mxu0 }
 0x4f3   : > { %v5222_v41 = vpop.f32.mrb[2].mxu0  ;;  %v18179_v44 = vld [vmem:[%s24783_s5 + $0x140] sm:$0xff]  }
 0x4f4   : > { %v6011_v22 = vpack.c.bf16 %v5222_v41, %v5219_v62  ;;  %v5224_v23 = vpop.f32.mrb[3].mxu0  ;;  %v18163_v62 = vld [vmem:[%s24783_s5 + $0xb8] sm:$0xff]  }
 0x4f6   : > { %5434 = vmatmul.mubr.bf16.gmra.mrb[108].mxu0 %v18099_v42 }
 0x4f7   : > { %14838 = vmatprep.mubr.msk.bf16.mxu0 %vm4876_vm3, %v18104_v9  ;;  %v18136_v9 = vld [vmem:[%s24782_s4 + $0x230] ss:$8 sps:$4 sm:$0xff]  }
 0x4f9   : > { %v21252_v40 = vpop.f32.mrb[4].mxu0 }
 0x4fa   : > { %v5229_v30 = vpop.f32.mrb[5].mxu0 }
 0x4fb   : > { %v21260_v29 = vpop.f32.mrb[6].mxu0 }
 0x4fc   : > { %v6012_v0 = vpack.c.bf16 %v21260_v29, %v21252_v40  ;;  %v5232_v52 = vpop.f32.mrb[7].mxu0 }
 0x4fe   : > { %5442 = vmatmul.mubr.bf16.gmra.mrb[112].mxu0 %v18102_v45 }
 0x4ff   : > { %14839 = vmatprep.mubr.msk.bf16.mxu0 %vm4876_vm3, %v18107_v51  ;;  %v18143_v51 = vld [vmem:[%s24782_s4 + $0x240] ss:$8 sps:$4 sm:$0xff]  }
 0x501   : > { %v21265_v25 = vpop.f32.mrb[8].mxu0 }
 0x502   : > { %v5237_v11 = vpop.f32.mrb[9].mxu0 }
 0x503   : > { %v21273_v59 = vpop.f32.mrb[10].mxu0 }
 0x504   : > { %v6013_v14 = vpack.c.bf16 %v21273_v59, %v21265_v25  ;;  %v5240_v56 = vpop.f32.mrb[11].mxu0 }
 0x505   : > { %v18159_v56 = vld [vmem:[%s24782_s4 + $0x264] ss:$8 sps:$4 sm:$0xff]  }
 0x506   : > { %5450 = vmatmul.mubr.bf16.gmra.mrb[116].mxu0 %v18105_v36 }
 0x507   : > { %14840 = vmatprep.mubr.msk.bf16.mxu0 %vm4876_vm3, %v18110_v5  ;;  %v18150_v5 = vld [vmem:[%s24782_s4 + $0x250] ss:$8 sps:$4 sm:$0xff]  }
 0x509   : > { %v5243_v43 = vpop.f32.mrb[12].mxu0 }
 0x50a   : > { %v5245_v37 = vpop.f32.mrb[13].mxu0 }
 0x50b   : > { %v5246_v21 = vpop.f32.mrb[14].mxu0 }
 0x50c   : > { %v6014_v4 = vpack.c.bf16 %v5246_v21, %v5243_v43  ;;  %v5248_v6 = vpop.f32.mrb[15].mxu0 }
 0x50d   : > { %v18166_v6 = vld [vmem:[%s24782_s4 + $0x274] ss:$8 sps:$4 sm:$0xff]  }
 0x50e   : > { %5458 = vmatmul.mubr.bf16.gmra.mrb[120].mxu0 %v18108_v10  ;;  %7749 = vmatprep.mubr.bf16.mxu1 %v6014_v4 }
 0x50f   : > { %14841 = vmatprep.mubr.msk.bf16.mxu0 %vm4876_vm3, %v18117_v19  ;;  %7750 = vmatmul.mubr.bf16.vlgmr.msra.gmra.mrb[252].mxu1 %v6010_v32  ;;  %v18161_v32 = vld [vmem:[%s24783_s5 + $0xb0] sm:$0xff]   ;;  %v18157_v19 = vld [vmem:[%s24782_s4 + $0x260] ss:$8 sps:$4 sm:$0xff]  }
 0x510   : > { %16842 = vmatpush3.bf16.msra.mxu1 %v18140_v3 }
 0x511   : > { %v5251_v12 = vpop.f32.mrb[16].mxu0  ;;  %16843 = vmatprep.subr.bf16.mxu1 %v18141_v48 }
 0x512   : > { %v5253_v35 = vpop.f32.mrb[17].mxu0 }
 0x513   : > { %v5254_v55 = vpop.f32.mrb[18].mxu0  ;;  %v18169_v35 = vld [vmem:[%s24782_s4 + $0x284] ss:$8 sps:$4 sm:$0xff]  }
 0x514   : > { %v6015_v61 = vpack.c.bf16 %v5254_v55, %v5251_v12  ;;  %v5256_v18 = vpop.f32.mrb[19].mxu0  ;;  %16844 = vmatpush3.bf16.msra.mxu1 %v18142_v53 }
 0x515   : > { %16845 = vmatprep.subr.bf16.mxu1 %v18146_v17  ;;  %v18164_v17 = vld [vmem:[%s24782_s4 + $0x270] ss:$8 sps:$4 sm:$0xff]   ;;  %v18181_v18 = vld [vmem:[%s24783_s5 + $0x148] sm:$0xff]  }
 0x516   : > { %5466 = vmatmul.mubr.bf16.gmra.mrb[124].mxu0 %v18115_v16  ;;  %7757 = vmatprep.mubr.bf16.mxu1 %v6015_v61  ;;  %v18180_v61 = vld [vmem:[%s24783_s5 + $0x100] sm:$0xff]  }
 0x517   : > { %14842 = vmatprep.mubr.msk.bf16.mxu0 %vm4876_vm3, %v18124_v31  ;;  %7758 = vmatmul.mubr.bf16.gmra.mrb[0].mxu1 %v6011_v22  ;;  %v18145_v22 = vld [vmem:[%s24782_s4 + $0x244] ss:$8 sps:$4 sm:$0xff]  }
 0x518   : > { %16846 = vmatpush3.bf16.msra.mxu1 %v18147_v49  ;;  %v18182_v49 = vld [vmem:[%s24783_s5 + $0x108] sm:$0xff]  }
 0x519   : > { %v5259_v24 = vpop.f32.mrb[20].mxu0  ;;  %16847 = vmatprep.subr.bf16.mxu1 %v18148_v13 }
 0x51a   : > { %v5261_v7 = vpop.f32.mrb[21].mxu0 }
 0x51b   : > { %v5262_v33 = vpop.f32.mrb[22].mxu0  ;;  %v18172_v7 = vld [vmem:[%s24782_s4 + $0x294] ss:$8 sps:$4 sm:$0xff]  }
 0x51c   : > { %v6016_v46 = vpack.c.bf16 %v5262_v33, %v5259_v24  ;;  %v5264_v50 = vpop.f32.mrb[23].mxu0  ;;  %16848 = vmatpush3.bf16.msra.mxu1 %v18149_v63  ;;  %v18186_v63 = vld [vmem:[%s24783_s5 + $0x150] sm:$0xff]  }
 0x51d   : > { %16849 = vmatprep.subr.bf16.mxu1 %v18153_v34  ;;  %v18167_v34 = vld [vmem:[%s24782_s4 + $0x280] ss:$8 sps:$4 sm:$0xff]   ;;  %v18188_v50 = vld [vmem:[%s24783_s5 + $0x158] sm:$0xff]  }
 0x51e   : > { %5474 = vmatmul.mubr.bf16.gmra.mrb[128].mxu0 %v18122_v8  ;;  %7765 = vmatprep.mubr.bf16.mxu1 %v6016_v46  ;;  %v18187_v46 = vld [vmem:[%s24783_s5 + $0x110] sm:$0xff]  }
 0x51f   : > { %14843 = vmatprep.mubr.msk.bf16.mxu0 %vm4876_vm3, %v18131_v2  ;;  %7766 = vmatmul.mubr.bf16.gmra.mrb[4].mxu1 %v6012_v0  ;;  %v18152_v0 = vld [vmem:[%s24782_s4 + $0x254] ss:$8 sps:$4 sm:$0xff]  }
 0x520   : > { %16850 = vmatpush3.bf16.msra.mxu1 %v18154_v26  ;;  %v18189_v26 = vld [vmem:[%s24783_s5 + $0x118] sm:$0xff]  }
 0x521   : > { %v5267_v20 = vpop.f32.mrb[24].mxu0  ;;  %16851 = vmatprep.subr.bf16.mxu1 %v18155_v38 }
 0x522   : > { %v5269_v60 = vpop.f32.mrb[25].mxu0 }
 0x523   : > { %v5270_v57 = vpop.f32.mrb[26].mxu0  ;;  %v18175_v60 = vld [vmem:[%s24782_s4 + $0x2a4] ss:$8 sps:$4 sm:$0xff]  }
 0x524   : > { %v6017_v28 = vpack.c.bf16 %v5270_v57, %v5267_v20  ;;  %v5272_v1 = vpop.f32.mrb[27].mxu0  ;;  %16852 = vmatpush3.bf16.msra.mxu1 %v18156_v27  ;;  %v18193_v27 = vld [vmem:[%s24783_s5 + $0x160] sm:$0xff]  }
 0x525   : > { %16853 = vmatprep.subr.bf16.mxu1 %v18160_v54  ;;  %v18170_v54 = vld [vmem:[%s24782_s4 + $0x290] ss:$8 sps:$4 sm:$0xff]   ;;  %v18195_v1 = vld [vmem:[%s24783_s5 + $0x168] sm:$0xff]  }
 0x526   : > { %5482 = vmatmul.mubr.bf16.gmra.mrb[132].mxu0 %v18129_v58  ;;  %7773 = vmatprep.mubr.bf16.mxu1 %v6017_v28  ;;  %v18194_v28 = vld [vmem:[%s24783_s5 + $0x120] sm:$0xff]  }
 0x527   : > { %14844 = vmatprep.mubr.msk.bf16.mxu0 %vm4876_vm3, %v18138_v39  ;;  %7774 = vmatmul.mubr.bf16.gmra.mrb[8].mxu1 %v6013_v14 }
 0x528   : > { %16854 = vmatpush3.bf16.msra.mxu1 %v18161_v32  ;;  %v18196_v32 = vld [vmem:[%s24783_s5 + $0x128] sm:$0xff]  }
 0x529   : > { %v5275_v42 = vpop.f32.mrb[28].mxu0  ;;  %16855 = vmatprep.subr.bf16.mxu1 %v18162_v15 }
 0x52a   : > { %v5277_v41 = vpop.f32.mrb[29].mxu0 }
 0x52b   : > { %v5278_v23 = vpop.f32.mrb[30].mxu0  ;;  %v18178_v41 = vld [vmem:[%s24782_s4 + $0x2b4] ss:$8 sps:$4 sm:$0xff]  }
 0x52c   : > { %v6018_v40 = vpack.c.bf16 %v5278_v23, %v5275_v42  ;;  %v5280_v45 = vpop.f32.mrb[31].mxu0  ;;  %16856 = vmatpush3.bf16.msra.mxu1 %v18163_v62  ;;  %v18200_v62 = vld [vmem:[%s24783_s5 + $0x170] sm:$0xff]  }
 0x52d   : > { %16881 = vmatprep.subr.bf16.mxu1 %v18179_v44  ;;  %v18173_v44 = vld [vmem:[%s24782_s4 + $0x2a0] ss:$8 sps:$4 sm:$0xff]   ;;  %v18202_v45 = vld [vmem:[%s24783_s5 + $0x178] sm:$0xff]  }
 0x52e   : > { %5490 = vmatmul.mubr.bf16.gmra.mrb[136].mxu0 %v18136_v9 }
 0x52f   : > { %14845 = vmatprep.mubr.msk.bf16.mxu0 %vm4876_vm3, %v18145_v22 }
 0x531   : > { %v5283_v30 = vpop.f32.mrb[32].mxu0 }
 0x532   : > { %v5285_v29 = vpop.f32.mrb[33].mxu0 }
 0x533   : > { %v5286_v52 = vpop.f32.mrb[34].mxu0  ;;  %v18219_v29 = vld [vmem:[%s24783_s5 + $0x1c0] sm:$0xff]  }
 0x534   : > { %v6019_v25 = vpack.c.bf16 %v5286_v52, %v5283_v30  ;;  %v5288_v36 = vpop.f32.mrb[35].mxu0  ;;  %v18203_v30 = vld [vmem:[%s24783_s5 + $0x138] sm:$0xff]  }
 0x536   : > { %5498 = vmatmul.mubr.bf16.gmra.mrb[140].mxu0 %v18143_v51 }
 0x537   : > { %14846 = vmatprep.mubr.msk.bf16.mxu0 %vm4876_vm3, %v18152_v0  ;;  %v18176_v0 = vld [vmem:[%s24782_s4 + $0x2b0] ss:$8 sps:$4 sm:$0xff]  }
 0x539   : > { %v21374_v11 = vpop.f32.mrb[36].mxu0 }
 0x53a   : > { %v5293_v59 = vpop.f32.mrb[37].mxu0 }
 0x53b   : > { %v21379_v14 = vpop.f32.mrb[38].mxu0 }
 0x53c   : > { %v6020_v43 = vpack.c.bf16 %v21379_v14, %v21374_v11  ;;  %v5296_v10 = vpop.f32.mrb[39].mxu0  ;;  %v18183_v14 = vld [vmem:[%s24782_s4 + $0x2c0] ss:$8 sps:$4 sm:$0xff]  }
 0x53e   : > { %5506 = vmatmul.mubr.bf16.gmra.mrb[144].mxu0 %v18150_v5 }
 0x53f   : > { %14847 = vmatprep.mubr.msk.bf16.mxu0 %vm4876_vm3, %v18159_v56 }
 0x541   : > { %v21387_v37 = vpop.f32.mrb[40].mxu0 }
 0x542   : > { %v5301_v21 = vpop.f32.mrb[41].mxu0 }
 0x543   : > { %v21392_v4 = vpop.f32.mrb[42].mxu0 }
 0x544   : > { %v6021_v3 = vpack.c.bf16 %v21392_v4, %v21387_v37  ;;  %v5304_v48 = vpop.f32.mrb[43].mxu0  ;;  %v18190_v4 = vld [vmem:[%s24782_s4 + $0x2d0] ss:$8 sps:$4 sm:$0xff]  }
 0x545   : > { %v18199_v48 = vld [vmem:[%s24782_s4 + $0x2e4] ss:$8 sps:$4 sm:$0xff]  }
 0x546   : > { %5514 = vmatmul.mubr.bf16.gmra.mrb[148].mxu0 %v18157_v19 }
 0x547   : > { %14848 = vmatprep.mubr.msk.bf16.mxu0 %vm4876_vm3, %v18166_v6 }
 0x549   : > { %v5307_v53 = vpop.f32.mrb[44].mxu0 }
 0x54a   : > { %v5309_v12 = vpop.f32.mrb[45].mxu0 }
 0x54b   : > { %v5310_v16 = vpop.f32.mrb[46].mxu0 }
 0x54c   : > { %v6022_v31 = vpack.c.bf16 %v5310_v16, %v5307_v53  ;;  %v5312_v55 = vpop.f32.mrb[47].mxu0  ;;  %v18197_v16 = vld [vmem:[%s24782_s4 + $0x2e0] ss:$8 sps:$4 sm:$0xff]  }
 0x54d   : > { %v18206_v55 = vld [vmem:[%s24782_s4 + $0x2f4] ss:$8 sps:$4 sm:$0xff]  }
 0x54e   : > { %5522 = vmatmul.mubr.bf16.gmra.mrb[152].mxu0 %v18164_v17  ;;  %7814 = vmatprep.mubr.bf16.mxu1 %v6022_v31 }
 0x54f   : > { %7815 = vmatmul.mubr.bf16.vlgmr.msra.gmra.mrb[12].mxu1 %v6018_v40  ;;  %14849 = vmatprep.mubr.msk.bf16.mxu0 %vm4876_vm3, %v18169_v35  ;;  %v18201_v40 = vld [vmem:[%s24783_s5 + $0x130] sm:$0xff]  }
 0x550   : > { %16882 = vmatpush3.bf16.msra.mxu1 %v18180_v61 }
 0x551   : > { %v5315_v13 = vpop.f32.mrb[48].mxu0  ;;  %16883 = vmatprep.subr.bf16.mxu1 %v18181_v18 }
 0x552   : > { %v5317_v24 = vpop.f32.mrb[49].mxu0 }
 0x553   : > { %v5318_v8 = vpop.f32.mrb[50].mxu0 }
 0x554   : > { %v6023_v2 = vpack.c.bf16 %v5318_v8, %v5315_v13  ;;  %v5320_v33 = vpop.f32.mrb[51].mxu0  ;;  %16884 = vmatpush3.bf16.msra.mxu1 %v18182_v49 }
 0x555   : > { %16885 = vmatprep.subr.bf16.mxu1 %v18186_v63  ;;  %v18204_v63 = vld [vmem:[%s24782_s4 + $0x2f0] ss:$8 sps:$4 sm:$0xff]   ;;  %v18221_v33 = vld [vmem:[%s24783_s5 + $0x1c8] sm:$0xff]  }
 0x556   : > { %5530 = vmatmul.mubr.bf16.gmra.mrb[156].mxu0 %v18167_v34  ;;  %7822 = vmatprep.mubr.bf16.mxu1 %v6023_v2  ;;  %v18209_v34 = vld [vmem:[%s24782_s4 + $0x304] ss:$8 sps:$4 sm:$0xff]  }
 0x557   : > { %7823 = vmatmul.mubr.bf16.gmra.mrb[16].mxu1 %v6019_v25  ;;  %14850 = vmatprep.mubr.msk.bf16.mxu0 %vm4876_vm3, %v18172_v7  ;;  %v18185_v25 = vld [vmem:[%s24782_s4 + $0x2c4] ss:$8 sps:$4 sm:$0xff]  }
 0x558   : > { %16886 = vmatpush3.bf16.msra.mxu1 %v18187_v46  ;;  %v18220_v2 = vld [vmem:[%s24783_s5 + $0x180] sm:$0xff]   ;;  %v18222_v46 = vld [vmem:[%s24783_s5 + $0x188] sm:$0xff]  }
 0x559   : > { %v5323_v38 = vpop.f32.mrb[52].mxu0  ;;  %16887 = vmatprep.subr.bf16.mxu1 %v18188_v50 }
 0x55a   : > { %v5325_v20 = vpop.f32.mrb[53].mxu0 }
 0x55b   : > { %v5326_v58 = vpop.f32.mrb[54].mxu0 }
 0x55c   : > { %v6024_v39 = vpack.c.bf16 %v5326_v58, %v5323_v38  ;;  %v5328_v57 = vpop.f32.mrb[55].mxu0  ;;  %16888 = vmatpush3.bf16.msra.mxu1 %v18189_v26  ;;  %v18226_v26 = vld [vmem:[%s24783_s5 + $0x1d0] sm:$0xff]  }
 0x55d   : > { %16889 = vmatprep.subr.bf16.mxu1 %v18193_v27  ;;  %v18207_v27 = vld [vmem:[%s24782_s4 + $0x300] ss:$8 sps:$4 sm:$0xff]   ;;  %v18228_v57 = vld [vmem:[%s24783_s5 + $0x1d8] sm:$0xff]  }
 0x55e   : > { %5538 = vmatmul.mubr.bf16.gmra.mrb[160].mxu0 %v18170_v54  ;;  %7830 = vmatprep.mubr.bf16.mxu1 %v6024_v39  ;;  %v18212_v54 = vld [vmem:[%s24782_s4 + $0x314] ss:$8 sps:$4 sm:$0xff]  }
 0x55f   : > { %7831 = vmatmul.mubr.bf16.gmra.mrb[20].mxu1 %v6020_v43  ;;  %14851 = vmatprep.mubr.msk.bf16.mxu0 %vm4876_vm3, %v18175_v60  ;;  %v18192_v43 = vld [vmem:[%s24782_s4 + $0x2d4] ss:$8 sps:$4 sm:$0xff]  }
 0x560   : > { %16890 = vmatpush3.bf16.msra.mxu1 %v18194_v28  ;;  %v18227_v39 = vld [vmem:[%s24783_s5 + $0x190] sm:$0xff]   ;;  %v18229_v28 = vld [vmem:[%s24783_s5 + $0x198] sm:$0xff]  }
 0x561   : > { %v5331_v15 = vpop.f32.mrb[56].mxu0  ;;  %16891 = vmatprep.subr.bf16.mxu1 %v18195_v1 }
 0x562   : > { %v5333_v42 = vpop.f32.mrb[57].mxu0 }
 0x563   : > { %v5334_v9 = vpop.f32.mrb[58].mxu0 }
 0x564   : > { %v6025_v22 = vpack.c.bf16 %v5334_v9, %v5331_v15  ;;  %v5336_v23 = vpop.f32.mrb[59].mxu0  ;;  %16892 = vmatpush3.bf16.msra.mxu1 %v18196_v32  ;;  %v18233_v32 = vld [vmem:[%s24783_s5 + $0x1e0] sm:$0xff]  }
 0x565   : > { %16893 = vmatprep.subr.bf16.mxu1 %v18200_v62  ;;  %v18210_v62 = vld [vmem:[%s24782_s4 + $0x310] ss:$8 sps:$4 sm:$0xff]   ;;  %v18235_v23 = vld [vmem:[%s24783_s5 + $0x1e8] sm:$0xff]  }
 0x566   : > { %5546 = vmatmul.mubr.bf16.gmra.mrb[164].mxu0 %v18173_v44  ;;  %7838 = vmatprep.mubr.bf16.mxu1 %v6025_v22  ;;  %v18215_v44 = vld [vmem:[%s24782_s4 + $0x324] ss:$8 sps:$4 sm:$0xff]  }
 0x567   : > { %7839 = vmatmul.mubr.bf16.gmra.mrb[24].mxu1 %v6021_v3  ;;  %14852 = vmatprep.mubr.msk.bf16.mxu0 %vm4876_vm3, %v18178_v41  ;;  %v18234_v22 = vld [vmem:[%s24783_s5 + $0x1a0] sm:$0xff]  }
 0x568   : > { %16894 = vmatpush3.bf16.msra.mxu1 %v18201_v40  ;;  %v18236_v40 = vld [vmem:[%s24783_s5 + $0x1a8] sm:$0xff]  }
 0x569   : > { %v5339_v51 = vpop.f32.mrb[60].mxu0  ;;  %16895 = vmatprep.subr.bf16.mxu1 %v18202_v45 }
 0x56a   : > { %v5341_v52 = vpop.f32.mrb[61].mxu0 }
 0x56b   : > { %v5342_v36 = vpop.f32.mrb[62].mxu0  ;;  %v18218_v52 = vld [vmem:[%s24782_s4 + $0x334] ss:$8 sps:$4 sm:$0xff]  }
 0x56c   : > { %v6026_v11 = vpack.c.bf16 %v5342_v36, %v5339_v51  ;;  %v5344_v5 = vpop.f32.mrb[63].mxu0  ;;  %16896 = vmatpush3.bf16.msra.mxu1 %v18203_v30  ;;  %v18240_v30 = vld [vmem:[%s24783_s5 + $0x1f0] sm:$0xff]  }
 0x56d   : > { %16921 = vmatprep.subr.bf16.mxu1 %v18219_v29  ;;  %v18213_v29 = vld [vmem:[%s24782_s4 + $0x320] ss:$8 sps:$4 sm:$0xff]   ;;  %v18242_v5 = vld [vmem:[%s24783_s5 + $0x1f8] sm:$0xff]  }
 0x56e   : > { %5554 = vmatmul.mubr.bf16.gmra.mrb[168].mxu0 %v18176_v0 }
 0x56f   : > { %14853 = vmatprep.mubr.msk.bf16.mxu0 %vm4876_vm3, %v18185_v25 }
 0x571   : > { %v5347_v59 = vpop.f32.mrb[64].mxu0 }
 0x572   : > { %v5349_v56 = vpop.f32.mrb[65].mxu0 }
 0x573   : > { %v5350_v10 = vpop.f32.mrb[66].mxu0  ;;  %v18259_v56 = vld [vmem:[%s24783_s5 + $0x240] sm:$0xff]  }
 0x574   : > { %v6027_v37 = vpack.c.bf16 %v5350_v10, %v5347_v59  ;;  %v5352_v19 = vpop.f32.mrb[67].mxu0  ;;  %v18243_v59 = vld [vmem:[%s24783_s5 + $0x1b8] sm:$0xff]  }
 0x576   : > { %5562 = vmatmul.mubr.bf16.gmra.mrb[172].mxu0 %v18183_v14 }
 0x577   : > { %14854 = vmatprep.mubr.msk.bf16.mxu0 %vm4876_vm3, %v18192_v43  ;;  %v18216_v43 = vld [vmem:[%s24782_s4 + $0x330] ss:$8 sps:$4 sm:$0xff]  }
 0x579   : > { %v21493_v21 = vpop.f32.mrb[68].mxu0 }
 0x57a   : > { %v5357_v6 = vpop.f32.mrb[69].mxu0 }
 0x57b   : > { %v21498_v3 = vpop.f32.mrb[70].mxu0 }
 0x57c   : > { %v6028_v53 = vpack.c.bf16 %v21498_v3, %v21493_v21  ;;  %v5360_v12 = vpop.f32.mrb[71].mxu0  ;;  %v18223_v3 = vld [vmem:[%s24782_s4 + $0x340] ss:$8 sps:$4 sm:$0xff]  }
 0x57e   : > { %5570 = vmatmul.mubr.bf16.gmra.mrb[176].mxu0 %v18190_v4 }
 0x57f   : > { %14855 = vmatprep.mubr.msk.bf16.mxu0 %vm4876_vm3, %v18199_v48 }
 0x581   : > { %v21506_v17 = vpop.f32.mrb[72].mxu0 }
 0x582   : > { %v5365_v35 = vpop.f32.mrb[73].mxu0 }
 0x583   : > { %v21511_v31 = vpop.f32.mrb[74].mxu0 }
 0x584   : > { %v6029_v61 = vpack.c.bf16 %v21511_v31, %v21506_v17  ;;  %v5368_v18 = vpop.f32.mrb[75].mxu0  ;;  %v18230_v31 = vld [vmem:[%s24782_s4 + $0x350] ss:$8 sps:$4 sm:$0xff]  }
 0x585   : > { %v18239_v18 = vld [vmem:[%s24782_s4 + $0x364] ss:$8 sps:$4 sm:$0xff]  }
 0x586   : > { %5578 = vmatmul.mubr.bf16.gmra.mrb[180].mxu0 %v18197_v16 }
 0x587   : > { %14856 = vmatprep.mubr.msk.bf16.mxu0 %vm4876_vm3, %v18206_v55 }
 0x589   : > { %v5371_v49 = vpop.f32.mrb[76].mxu0 }
 0x58a   : > { %v5373_v13 = vpop.f32.mrb[77].mxu0 }
 0x58b   : > { %v5374_v24 = vpop.f32.mrb[78].mxu0 }
 0x58c   : > { %v6030_v8 = vpack.c.bf16 %v5374_v24, %v5371_v49  ;;  %v5376_v7 = vpop.f32.mrb[79].mxu0  ;;  %v18237_v24 = vld [vmem:[%s24782_s4 + $0x360] ss:$8 sps:$4 sm:$0xff]  }
 0x58d   : > { %v18246_v7 = vld [vmem:[%s24782_s4 + $0x374] ss:$8 sps:$4 sm:$0xff]  }
 0x58e   : > { %5586 = vmatmul.mubr.bf16.gmra.mrb[184].mxu0 %v18204_v63  ;;  %7879 = vmatprep.mubr.bf16.mxu1 %v6030_v8 }
 0x58f   : > { %7880 = vmatmul.mubr.bf16.vlgmr.msra.gmra.mrb[28].mxu1 %v6026_v11  ;;  %14857 = vmatprep.mubr.msk.bf16.mxu0 %vm4876_vm3, %v18209_v34  ;;  %v18241_v11 = vld [vmem:[%s24783_s5 + $0x1b0] sm:$0xff]  }
 0x590   : > { %16922 = vmatpush3.bf16.msra.mxu1 %v18220_v2 }
 0x591   : > { %v5379_v50 = vpop.f32.mrb[80].mxu0  ;;  %16923 = vmatprep.subr.bf16.mxu1 %v18221_v33 }
 0x592   : > { %v5381_v38 = vpop.f32.mrb[81].mxu0 }
 0x593   : > { %v5382_v20 = vpop.f32.mrb[82].mxu0 }
 0x594   : > { %v6031_v58 = vpack.c.bf16 %v5382_v20, %v5379_v50  ;;  %v5384_v60 = vpop.f32.mrb[83].mxu0  ;;  %16924 = vmatpush3.bf16.msra.mxu1 %v18222_v46 }
 0x595   : > { %16925 = vmatprep.subr.bf16.mxu1 %v18226_v26  ;;  %v18244_v26 = vld [vmem:[%s24782_s4 + $0x370] ss:$8 sps:$4 sm:$0xff]   ;;  %v18261_v60 = vld [vmem:[%s24783_s5 + $0x248] sm:$0xff]  }
 0x596   : > { %5594 = vmatmul.mubr.bf16.gmra.mrb[188].mxu0 %v18207_v27  ;;  %7887 = vmatprep.mubr.bf16.mxu1 %v6031_v58  ;;  %v18249_v27 = vld [vmem:[%s24782_s4 + $0x384] ss:$8 sps:$4 sm:$0xff]  }
 0x597   : > { %7888 = vmatmul.mubr.bf16.gmra.mrb[32].mxu1 %v6027_v37  ;;  %14858 = vmatprep.mubr.msk.bf16.mxu0 %vm4876_vm3, %v18212_v54  ;;  %v18225_v37 = vld [vmem:[%s24782_s4 + $0x344] ss:$8 sps:$4 sm:$0xff]  }
 0x598   : > { %16926 = vmatpush3.bf16.msra.mxu1 %v18227_v39  ;;  %v18260_v58 = vld [vmem:[%s24783_s5 + $0x200] sm:$0xff]   ;;  %v18262_v39 = vld [vmem:[%s24783_s5 + $0x208] sm:$0xff]  }
 0x599   : > { %v5387_v1 = vpop.f32.mrb[84].mxu0  ;;  %16927 = vmatprep.subr.bf16.mxu1 %v18228_v57 }
 0x59a   : > { %v5389_v15 = vpop.f32.mrb[85].mxu0 }
 0x59b   : > { %v5390_v42 = vpop.f32.mrb[86].mxu0 }
 0x59c   : > { %v6032_v9 = vpack.c.bf16 %v5390_v42, %v5387_v1  ;;  %v5392_v41 = vpop.f32.mrb[87].mxu0  ;;  %16928 = vmatpush3.bf16.msra.mxu1 %v18229_v28  ;;  %v18266_v28 = vld [vmem:[%s24783_s5 + $0x250] sm:$0xff]  }
 0x59d   : > { %16929 = vmatprep.subr.bf16.mxu1 %v18233_v32  ;;  %v18247_v32 = vld [vmem:[%s24782_s4 + $0x380] ss:$8 sps:$4 sm:$0xff]   ;;  %v18268_v41 = vld [vmem:[%s24783_s5 + $0x258] sm:$0xff]  }
 0x59e   : > { %5602 = vmatmul.mubr.bf16.gmra.mrb[192].mxu0 %v18210_v62  ;;  %7895 = vmatprep.mubr.bf16.mxu1 %v6032_v9  ;;  %v18252_v62 = vld [vmem:[%s24782_s4 + $0x394] ss:$8 sps:$4 sm:$0xff]  }
 0x59f   : > { %7896 = vmatmul.mubr.bf16.gmra.mrb[36].mxu1 %v6028_v53  ;;  %14859 = vmatprep.mubr.msk.bf16.mxu0 %vm4876_vm3, %v18215_v44  ;;  %v18232_v53 = vld [vmem:[%s24782_s4 + $0x354] ss:$8 sps:$4 sm:$0xff]  }
 0x5a0   : > { %16930 = vmatpush3.bf16.msra.mxu1 %v18234_v22  ;;  %v18267_v9 = vld [vmem:[%s24783_s5 + $0x210] sm:$0xff]   ;;  %v18269_v22 = vld [vmem:[%s24783_s5 + $0x218] sm:$0xff]  }
 0x5a1   : > { %v5395_v45 = vpop.f32.mrb[88].mxu0  ;;  %16931 = vmatprep.subr.bf16.mxu1 %v18235_v23 }
 0x5a2   : > { %v5397_v51 = vpop.f32.mrb[89].mxu0 }
 0x5a3   : > { %v5398_v0 = vpop.f32.mrb[90].mxu0 }
 0x5a4   : > { %v6033_v25 = vpack.c.bf16 %v5398_v0, %v5395_v45  ;;  %v5400_v36 = vpop.f32.mrb[91].mxu0  ;;  %16932 = vmatpush3.bf16.msra.mxu1 %v18236_v40  ;;  %v18273_v40 = vld [vmem:[%s24783_s5 + $0x260] sm:$0xff]  }
 0x5a5   : > { %16933 = vmatprep.subr.bf16.mxu1 %v18240_v30  ;;  %v18250_v30 = vld [vmem:[%s24782_s4 + $0x390] ss:$8 sps:$4 sm:$0xff]   ;;  %v18275_v36 = vld [vmem:[%s24783_s5 + $0x268] sm:$0xff]  }
 0x5a6   : > { %5610 = vmatmul.mubr.bf16.gmra.mrb[196].mxu0 %v18213_v29  ;;  %7903 = vmatprep.mubr.bf16.mxu1 %v6033_v25  ;;  %v18255_v29 = vld [vmem:[%s24782_s4 + $0x3a4] ss:$8 sps:$4 sm:$0xff]  }
 0x5a7   : > { %7904 = vmatmul.mubr.bf16.gmra.mrb[40].mxu1 %v6029_v61  ;;  %14860 = vmatprep.mubr.msk.bf16.mxu0 %vm4876_vm3, %v18218_v52  ;;  %v18274_v25 = vld [vmem:[%s24783_s5 + $0x220] sm:$0xff]  }
 0x5a8   : > { %16934 = vmatpush3.bf16.msra.mxu1 %v18241_v11  ;;  %v18276_v11 = vld [vmem:[%s24783_s5 + $0x228] sm:$0xff]  }
 0x5a9   : > { %v5403_v14 = vpop.f32.mrb[92].mxu0  ;;  %16935 = vmatprep.subr.bf16.mxu1 %v18242_v5 }
 0x5aa   : > { %v5405_v10 = vpop.f32.mrb[93].mxu0 }
 0x5ab   : > { %v5406_v19 = vpop.f32.mrb[94].mxu0 }
 0x5ac   : > { %v6034_v21 = vpack.c.bf16 %v5406_v19, %v5403_v14  ;;  %v5408_v4 = vpop.f32.mrb[95].mxu0  ;;  %16936 = vmatpush3.bf16.msra.mxu1 %v18243_v59  ;;  %v18280_v59 = vld [vmem:[%s24783_s5 + $0x270] sm:$0xff]  }
 0x5ad   : > { %16961 = vmatprep.subr.bf16.mxu1 %v18259_v56  ;;  %v18253_v56 = vld [vmem:[%s24782_s4 + $0x3a0] ss:$8 sps:$4 sm:$0xff]  }
 0x5ae   : > { %5618 = vmatmul.mubr.bf16.gmra.mrb[200].mxu0 %v18216_v43 }
 0x5af   : > { %14861 = vmatprep.mubr.msk.bf16.mxu0 %vm4876_vm3, %v18225_v37  ;;  %v18258_v37 = vld [vmem:[%s24782_s4 + $0x3b4] ss:$8 sps:$4 sm:$0xff]  }
 0x5b1   : > { %v5411_v6 = vpop.f32.mrb[96].mxu0 }
 0x5b2   : > { %v5413_v48 = vpop.f32.mrb[97].mxu0 }
 0x5b3   : > { %v5414_v12 = vpop.f32.mrb[98].mxu0  ;;  %v18281_v48 = vld [vmem:[%s24783_s5 + $0x230] sm:$0xff]  }
 0x5b4   : > { %v6035_v17 = vpack.c.bf16 %v5414_v12, %v5411_v6  ;;  %v5416_v16 = vpop.f32.mrb[99].mxu0  ;;  %v18282_v12 = vld [vmem:[%s24783_s5 + $0x278] sm:$0xff]  }
 0x5b5   : > { %v18283_v16 = vld [vmem:[%s24783_s5 + $0x238] sm:$0xff]  }
 0x5b6   : > { %5626 = vmatmul.mubr.bf16.gmra.mrb[204].mxu0 %v18223_v3 }
 0x5b7   : > { %14862 = vmatprep.mubr.msk.bf16.mxu0 %vm4876_vm3, %v18232_v53 }
 0x5b9   : > { %v21612_v35 = vpop.f32.mrb[100].mxu0 }
 0x5ba   : > { %v5421_v55 = vpop.f32.mrb[101].mxu0 }
 0x5bb   : > { %v21617_v61 = vpop.f32.mrb[102].mxu0  ;;  %v18256_v55 = vld [vmem:[%s24782_s4 + $0x3b0] ss:$8 sps:$4 sm:$0xff]  }
 0x5bc   : > { %v6036_v49 = vpack.c.bf16 %v21617_v61, %v21612_v35  ;;  %v5424_v13 = vpop.f32.mrb[103].mxu0 }
 0x5be   : > { %5634 = vmatmul.mubr.bf16.gmra.mrb[208].mxu0 %v18230_v31  ;;  %v18299_v31 = vld [vmem:[%s24783_s5 + $0x2c0] sm:$0xff]  }
 0x5bf   : > { %14863 = vmatprep.mubr.msk.bf16.mxu0 %vm4876_vm3, %v18239_v18 }
 0x5c1   : > { %v21625_v63 = vpop.f32.mrb[104].mxu0 }
 0x5c2   : > { %v5429_v34 = vpop.f32.mrb[105].mxu0 }
 0x5c3   : > { %v21630_v8 = vpop.f32.mrb[106].mxu0 }
 0x5c4   : > { %v6037_v2 = vpack.c.bf16 %v21630_v8, %v21625_v63  ;;  %v5432_v33 = vpop.f32.mrb[107].mxu0 }
 0x5c6   : > { %5642 = vmatmul.mubr.bf16.gmra.mrb[212].mxu0 %v18237_v24 }
 0x5c7   : > { %14864 = vmatprep.mubr.msk.bf16.mxu0 %vm4876_vm3, %v18246_v7 }
 0x5c9   : > { %v5435_v46 = vpop.f32.mrb[108].mxu0 }
 0x5ca   : > { %v5437_v50 = vpop.f32.mrb[109].mxu0 }
 0x5cb   : > { %v5438_v38 = vpop.f32.mrb[110].mxu0  ;;  %v18263_v50 = vld [vmem:[%s24782_s4 + $0x3c0] ss:$8 sps:$4 sm:$0xff]  }
 0x5cc   : > { %v6038_v20 = vpack.c.bf16 %v5438_v38, %v5435_v46  ;;  %v5440_v54 = vpop.f32.mrb[111].mxu0 }
 0x5ce   : > { %5650 = vmatmul.mubr.bf16.gmra.mrb[216].mxu0 %v18244_v26  ;;  %7944 = vmatprep.mubr.bf16.mxu1 %v6038_v20 }
 0x5cf   : > { %7945 = vmatmul.mubr.bf16.vlgmr.msra.gmra.mrb[44].mxu1 %v6034_v21  ;;  %14865 = vmatprep.mubr.msk.bf16.mxu0 %vm4876_vm3, %v18249_v27  ;;  %v18272_v27 = vld [vmem:[%s24782_s4 + $0x3d4] ss:$8 sps:$4 sm:$0xff]  }
 0x5d0   : > { %16962 = vmatpush3.bf16.msra.mxu1 %v18260_v58 }
 0x5d1   : > { %v5443_v57 = vpop.f32.mrb[112].mxu0  ;;  %16963 = vmatprep.subr.bf16.mxu1 %v18261_v60 }
 0x5d2   : > { %v5445_v1 = vpop.f32.mrb[113].mxu0 }
 0x5d3   : > { %v5446_v15 = vpop.f32.mrb[114].mxu0 }
 0x5d4   : > { %v6039_v42 = vpack.c.bf16 %v5446_v15, %v5443_v57  ;;  %v5448_v44 = vpop.f32.mrb[115].mxu0  ;;  %16964 = vmatpush3.bf16.msra.mxu1 %v18262_v39  ;;  %v18270_v15 = vld [vmem:[%s24782_s4 + $0x3d0] ss:$8 sps:$4 sm:$0xff]  }
 0x5d5   : > { %16965 = vmatprep.subr.bf16.mxu1 %v18266_v28 }
 0x5d6   : > { %5658 = vmatmul.mubr.bf16.gmra.mrb[220].mxu0 %v18247_v32  ;;  %7952 = vmatprep.mubr.bf16.mxu1 %v6039_v42 }
 0x5d7   : > { %7953 = vmatmul.mubr.bf16.gmra.mrb[48].mxu1 %v6035_v17  ;;  %14866 = vmatprep.mubr.msk.bf16.mxu0 %vm4876_vm3, %v18252_v62 }
 0x5d8   : > { %16966 = vmatpush3.bf16.msra.mxu1 %v18267_v9  ;;  %v18279_v9 = vld [vmem:[%s24782_s4 + $0x3e4] ss:$8 sps:$4 sm:$0xff]  }
 0x5d9   : > { %v5451_v23 = vpop.f32.mrb[116].mxu0  ;;  %16967 = vmatprep.subr.bf16.mxu1 %v18268_v41 }
 0x5da   : > { %v5453_v45 = vpop.f32.mrb[117].mxu0 }
 0x5db   : > { %v5454_v51 = vpop.f32.mrb[118].mxu0 }
 0x5dc   : > { %v6040_v0 = vpack.c.bf16 %v5454_v51, %v5451_v23  ;;  %v5456_v52 = vpop.f32.mrb[119].mxu0  ;;  %16968 = vmatpush3.bf16.msra.mxu1 %v18269_v22 }
 0x5dd   : > { %16969 = vmatprep.subr.bf16.mxu1 %v18273_v40 }
 0x5de   : > { %5666 = vmatmul.mubr.bf16.gmra.mrb[224].mxu0 %v18250_v30  ;;  %7960 = vmatprep.mubr.bf16.mxu1 %v6040_v0  ;;  %v18277_v0 = vld [vmem:[%s24782_s4 + $0x3e0] ss:$8 sps:$4 sm:$0xff]  }
 0x5df   : > { %7961 = vmatmul.mubr.bf16.gmra.mrb[52].mxu1 %v6036_v49  ;;  %14867 = vmatprep.mubr.msk.bf16.mxu0 %vm4876_vm3, %v18255_v29  ;;  %v18265_v49 = vld [vmem:[%s24782_s4 + $0x3c4] ss:$8 sps:$4 sm:$0xff]  }
 0x5e0   : > { %16970 = vmatpush3.bf16.msra.mxu1 %v18274_v25 }
 0x5e1   : > { %v5459_v5 = vpop.f32.mrb[120].mxu0  ;;  %16971 = vmatprep.subr.bf16.mxu1 %v18275_v36  ;;  %v18286_v36 = vld [vmem:[%s24782_s4 + $0x3f4] ss:$8 sps:$4 sm:$0xff]  }
 0x5e2   : > { %v5461_v14 = vpop.f32.mrb[121].mxu0  ;;  %v16817_v43 = vpop.f32.mrb[252].mxu1 }
 0x5e3   : > { %v5462_v10 = vpop.f32.mrb[122].mxu0  ;;  %v16818_v19 = vpop.f32.mrb[253].mxu1 }
 0x5e4   : > { %v6041_v21 = vpack.c.bf16 %v5462_v10, %v5459_v5  ;;  %v5464_v4 = vpop.f32.mrb[123].mxu0  ;;  %v21701_v6 = vadd.f32 %v16818_v19, %v16817_v43  ;;  %v16820_v3 = vpop.f32.mrb[254].mxu1  ;;  %16972 = vmatpush3.bf16.msra.mxu1 %v18276_v11  ;;  %v18289_v10 = vld [vmem:[%s24782_s4 + $0x404] ss:$8 sps:$4 sm:$0xff]  }
 0x5e5   : > { %v16821_v53 = vpop.f32.mrb[255].mxu1  ;;  %16973 = vmatprep.subr.bf16.mxu1 %v18280_v59  ;;  %v18301_v4 = vld [vmem:[%s24783_s5 + $0x2c8] sm:$0xff]  }
 0x5e6   : > { %5674 = vmatmul.mubr.bf16.gmra.mrb[228].mxu0 %v18253_v56  ;;  %7968 = vmatprep.mubr.bf16.mxu1 %v6041_v21  ;;  %v21709_v17 = vadd.f32 %v16821_v53, %v16820_v3  ;;  %v18284_v56 = vld [vmem:[%s24782_s4 + $0x3f0] ss:$8 sps:$4 sm:$0xff]   ;;  %v18300_v21 = vld [vmem:[%s24783_s5 + $0x280] sm:$0xff]   ;;  %v18302_v3 = vld [vmem:[%s24783_s5 + $0x288] sm:$0xff]  }
 0x5e7   : > { %7969 = vmatmul.mubr.bf16.gmra.mrb[56].mxu1 %v6037_v2  ;;  %14868 = vmatprep.mubr.msk.bf16.mxu0 %vm4876_vm3, %v18258_v37  ;;  %v18306_v53 = vld [vmem:[%s24783_s5 + $0x2d0] sm:$0xff]  }
 0x5e8   : > { %16974 = vmatpush3.bf16.msra.mxu1 %v18281_v48 }
 0x5e9   : > { %v21718_v35 = vpop.f32.mrb[124].mxu0  ;;  %16975 = vmatprep.subr.bf16.mxu1 %v18282_v12 }
 0x5ea   : > { %v5469_v61 = vpop.f32.mrb[125].mxu0  ;;  %v16823_v18 = vpop.f32.mrb[0].mxu1 }
 0x5eb   : > { %v5470_v13 = vpop.f32.mrb[126].mxu0  ;;  %v16824_v63 = vpop.f32.mrb[1].mxu1 }
 0x5ec   : > { %v6042_v24 = vpack.c.bf16 %v5470_v13, %v21718_v35  ;;  %v5472_v34 = vpop.f32.mrb[127].mxu0  ;;  %v21730_v8 = vadd.f32 %v16824_v63, %v16823_v18  ;;  %v16826_v7 = vpop.f32.mrb[2].mxu1  ;;  %16976 = vmatpush3.bf16.msra.mxu1 %v18283_v16  ;;  %v18287_v16 = vld [vmem:[%s24782_s4 + $0x400] ss:$8 sps:$4 sm:$0xff]   ;;  %v18307_v18 = vld [vmem:[%s24783_s5 + $0x290] sm:$0xff]   ;;  %v18309_v13 = vld [vmem:[%s24783_s5 + $0x298] sm:$0xff]  }
 0x5ed   : > { %v16827_v2 = vpop.f32.mrb[3].mxu1  ;;  %17001 = vmatprep.subr.bf16.mxu1 %v18299_v31  ;;  %v18292_v31 = vld [vmem:[%s24782_s4 + $0x414] ss:$8 sps:$4 sm:$0xff]  }
 0x5ee   : > { %5682 = vmatmul.mubr.bf16.gmra.mrb[232].mxu0 %v18256_v55  ;;  %v21732_v33 = vadd.f32 %v16827_v2, %v16826_v7  ;;  %v18290_v7 = vld [vmem:[%s24782_s4 + $0x410] ss:$8 sps:$4 sm:$0xff]  }
 0x5ef   : > { %14869 = vmatprep.mubr.msk.bf16.mxu0 %vm4876_vm3, %v18265_v49  ;;  %v18308_v49 = vld [vmem:[%s24783_s5 + $0x2d8] sm:$0xff]  }
 0x5f1   : > { %v21735_v46 = vpop.f32.mrb[128].mxu0 }
 0x5f2   : > { %v5477_v26 = vpop.f32.mrb[129].mxu0  ;;  %v16829_v38 = vpop.f32.mrb[4].mxu1 }
 0x5f3   : > { %v21743_v20 = vpop.f32.mrb[130].mxu0  ;;  %v16830_v54 = vpop.f32.mrb[5].mxu1 }
 0x5f4   : > { %v6043_v58 = vpack.c.bf16 %v21743_v20, %v21735_v46  ;;  %v5480_v60 = vpop.f32.mrb[131].mxu0  ;;  %v21747_v39 = vadd.f32 %v16830_v54, %v16829_v38  ;;  %v16832_v57 = vpop.f32.mrb[6].mxu1  ;;  %v18295_v46 = vld [vmem:[%s24782_s4 + $0x424] ss:$8 sps:$4 sm:$0xff]   ;;  %v21842_v54 = vld [vmem:[%s24784_s6] ss:$0 sm:$0xff] }
 0x5f5   : > { %v16833_v28 = vpop.f32.mrb[7].mxu1  ;;  %v18314_v38 = vld [vmem:[%s24783_s5 + $0x2a0] sm:$0xff]   ;;  %v18316_v20 = vld [vmem:[%s24783_s5 + $0x2a8] sm:$0xff]   ;;  %v18320_v60 = vld [vmem:[%s24783_s5 + $0x2f0] sm:$0xff]  }
 0x5f6   : > { %5690 = vmatmul.mubr.bf16.gmra.mrb[236].mxu0 %v18263_v50  ;;  %v21749_v1 = vadd.f32 %v16833_v28, %v16832_v57 }
 0x5f7   : > { %14870 = vmatprep.mubr.msk.bf16.mxu0 %vm4876_vm3, %v18272_v27  ;;  %v18315_v27 = vld [vmem:[%s24783_s5 + $0x2e8] sm:$0xff]  }
 0x5f9   : > { %v21752_v32 = vpop.f32.mrb[132].mxu0 }
 0x5fa   : > { %v5485_v62 = vpop.f32.mrb[133].mxu0  ;;  %v16835_v42 = vpop.f32.mrb[8].mxu1 }
 0x5fb   : > { %v21757_v44 = vpop.f32.mrb[134].mxu0  ;;  %v16836_v41 = vpop.f32.mrb[9].mxu1 }
 0x5fc   : > { %v6044_v22 = vpack.c.bf16 %v21757_v44, %v21752_v32  ;;  %v5488_v23 = vpop.f32.mrb[135].mxu0  ;;  %v21764_v40 = vadd.f32 %v16836_v41, %v16835_v42  ;;  %v16838_v45 = vpop.f32.mrb[10].mxu1  ;;  %v18293_v32 = vld [vmem:[%s24782_s4 + $0x420] ss:$8 sps:$4 sm:$0xff]   ;;  %v18298_v42 = vld [vmem:[%s24782_s4 + $0x434] ss:$8 sps:$4 sm:$0xff]   ;;  %v7752_v44 = vadd.f32 %v21701_v6, %v21842_v54 }
 0x5fd   : > { %v16839_v30 = vpop.f32.mrb[11].mxu1 }
 0x5fe   : > { %5698 = vmatmul.mubr.bf16.gmra.mrb[240].mxu0 %v18270_v15  ;;  %v21766_v51 = vadd.f32 %v16839_v30, %v16838_v45  ;;  %v18321_v45 = vld [vmem:[%s24783_s5 + $0x2b0] sm:$0xff]  }
 0x5ff   : > { %14871 = vmatprep.mubr.msk.bf16.mxu0 %vm4876_vm3, %v18279_v9 }
 0x601   : > { %v21769_v29 = vpop.f32.mrb[136].mxu0 }
 0x602   : > { %v5493_v52 = vpop.f32.mrb[137].mxu0 }
 0x603   : > { %v21774_v25 = vpop.f32.mrb[138].mxu0  ;;  %v7755_v52 = vadd.f32 %v21709_v17, %v21842_v54  ;;  %v18339_v17 = vld [vmem:[%s24783_s5 + $0x340] sm:$0xff]  }
 0x604   : > { %v6045_v11 = vpack.c.bf16 %v21774_v25, %v21769_v29  ;;  %v5496_v5 = vpop.f32.mrb[139].mxu0  ;;  %v18296_v29 = vld [vmem:[%s24782_s4 + $0x430] ss:$8 sps:$4 sm:$0xff]  }
 0x606   : > { %5706 = vmatmul.mubr.bf16.gmra.mrb[244].mxu0 %v18277_v0  ;;  %v18322_v0 = vld [vmem:[%s24783_s5 + $0x2f8] sm:$0xff]  }
 0x607   : > { %14872 = vmatprep.mubr.msk.bf16.mxu0 %vm4876_vm3, %v18286_v36 }
 0x609   : > { %v5499_v59 = vpop.f32.mrb[140].mxu0 }
 0x60a   : > { %v5501_v14 = vpop.f32.mrb[141].mxu0 }
 0x60b   : > { %v5502_v43 = vpop.f32.mrb[142].mxu0 }
 0x60c   : > { %v6046_v37 = vpack.c.bf16 %v5502_v43, %v5499_v59  ;;  %v5504_v19 = vpop.f32.mrb[143].mxu0  ;;  %v18323_v59 = vld [vmem:[%s24783_s5 + $0x2b8] sm:$0xff]   ;;  %v18305_v43 = vld [vmem:[%s24782_s4 + $0x444] ss:$8 sps:$4 sm:$0xff]  }
 0x60e   : > { %5714 = vmatmul.mubr.bf16.gmra.mrb[248].mxu0 %v18284_v56  ;;  %8009 = vmatprep.mubr.bf16.mxu1 %v6046_v37  ;;  %v7760_v37 = vadd.f32 %v21730_v8, %v21842_v54 }
 0x60f   : > { %8010 = vmatmul.mubr.bf16.vlgmr.msra.gmra.mrb[60].mxu1 %v6042_v24  ;;  %14873 = vmatprep.mubr.msk.bf16.mxu0 %vm4876_vm3, %v18289_v10  ;;  %v18313_v24 = vld [vmem:[%s24783_s5 + $0x2e0] sm:$0xff]  }
 0x610   : > { %17002 = vmatpush3.bf16.msra.mxu1 %v18300_v21 }
 0x611   : > { %v5507_v48 = vpop.f32.mrb[144].mxu0  ;;  %17003 = vmatprep.subr.bf16.mxu1 %v18301_v4 }
 0x612   : > { %v5509_v12 = vpop.f32.mrb[145].mxu0 }
 0x613   : > { %v5510_v35 = vpop.f32.mrb[146].mxu0 }
 0x614   : > { %v6047_v55 = vpack.c.bf16 %v5510_v35, %v5507_v48  ;;  %v5512_v61 = vpop.f32.mrb[147].mxu0  ;;  %17004 = vmatpush3.bf16.msra.mxu1 %v18302_v3 }
 0x615   : > { %17005 = vmatprep.subr.bf16.mxu1 %v18306_v53  ;;  %v7763_v53 = vadd.f32 %v21732_v33, %v21842_v54  ;;  %v18312_v33 = vld [vmem:[%s24782_s4 + $0x454] ss:$8 sps:$4 sm:$0xff]  }
 0x616   : > { %5722 = vmatmul.mubr.bf16.gmra.mrb[252].mxu0 %v18287_v16  ;;  %8017 = vmatprep.mubr.bf16.mxu1 %v6047_v55  ;;  %v18303_v55 = vld [vmem:[%s24782_s4 + $0x440] ss:$8 sps:$4 sm:$0xff]  }
 0x617   : > { %8018 = vmatmul.mubr.bf16.gmra.mrb[64].mxu1 %v6043_v58  ;;  %14874 = vmatprep.mubr.msk.bf16.mxu0 %vm4876_vm3, %v18292_v31 }
 0x618   : > { %17006 = vmatpush3.bf16.msra.mxu1 %v18307_v18 }
 0x619   : > { %v5515_v63 = vpop.f32.mrb[148].mxu0  ;;  %17007 = vmatprep.subr.bf16.mxu1 %v18308_v49 }
 0x61a   : > { %v5517_v34 = vpop.f32.mrb[149].mxu0 }
 0x61b   : > { %v5518_v2 = vpop.f32.mrb[150].mxu0 }
 0x61c   : > { %v6048_v50 = vpack.c.bf16 %v5518_v2, %v5515_v63  ;;  %v5520_v26 = vpop.f32.mrb[151].mxu0  ;;  %17008 = vmatpush3.bf16.msra.mxu1 %v18309_v13  ;;  %v7768_v13 = vadd.f32 %v21747_v39, %v21842_v54 }
 0x61d   : > { %17009 = vmatprep.subr.bf16.mxu1 %v18313_v24 }
 0x61e   : > { %5730 = vmatmul.mubr.bf16.gmra.mrb[0].mxu0 %v18290_v7  ;;  %8025 = vmatprep.mubr.bf16.mxu1 %v6048_v50 }
 0x61f   : > { %8026 = vmatmul.mubr.bf16.gmra.mrb[68].mxu1 %v6044_v22  ;;  %14875 = vmatprep.mubr.msk.bf16.mxu0 %vm4876_vm3, %v18295_v46  ;;  %v7771_v46 = vadd.f32 %v21749_v1, %v21842_v54  ;;  %v18319_v1 = vld [vmem:[%s24782_s4 + $0x464] ss:$8 sps:$4 sm:$0xff]  }
 0x620   : > { %17010 = vmatpush3.bf16.msra.mxu1 %v18314_v38 }
 0x621   : > { %v5523_v58 = vpop.f32.mrb[152].mxu0  ;;  %17011 = vmatprep.subr.bf16.mxu1 %v18315_v27 }
 0x622   : > { %v5525_v57 = vpop.f32.mrb[153].mxu0  ;;  %v16857_v28 = vpop.f32.mrb[12].mxu1 }
 0x623   : > { %v5526_v15 = vpop.f32.mrb[154].mxu0  ;;  %v16858_v62 = vpop.f32.mrb[13].mxu1 }
 0x624   : > { %v6049_v9 = vpack.c.bf16 %v5526_v15, %v5523_v58  ;;  %v16859_v41 = vadd.f32 %v16858_v62, %v16857_v28  ;;  %v16860_v22 = vpop.f32.mrb[14].mxu1  ;;  %v5528_v23 = vpop.f32.mrb[155].mxu0  ;;  %17012 = vmatpush3.bf16.msra.mxu1 %v18316_v20  ;;  %v18310_v20 = vld [vmem:[%s24782_s4 + $0x450] ss:$8 sps:$4 sm:$0xff]   ;;  %v7776_v28 = vadd.f32 %v21764_v40, %v21842_v54  ;;  %v18317_v40 = vld [vmem:[%s24782_s4 + $0x460] ss:$8 sps:$4 sm:$0xff]  }
 0x625   : > { %v16861_v30 = vpop.f32.mrb[15].mxu1  ;;  %17013 = vmatprep.subr.bf16.mxu1 %v18320_v60 }
 0x626   : > { %v21863_v36 = vadd.f32 %v16859_v41, %v7752_v44  ;;  %v16862_v6 = vadd.f32 %v16861_v30, %v16860_v22  ;;  %5738 = vmatmul.mubr.bf16.gmra.mrb[4].mxu0 %v18293_v32  ;;  %8033 = vmatprep.mubr.bf16.mxu1 %v6049_v9  ;;  %v7779_v9 = vadd.f32 %v21766_v51, %v21842_v54  ;;  %v18326_v51 = vld [vmem:[%s24782_s4 + $0x474] ss:$8 sps:$4 sm:$0xff]  }
 0x627   : > { %8034 = vmatmul.mubr.bf16.gmra.mrb[72].mxu1 %v6045_v11  ;;  %14876 = vmatprep.mubr.msk.bf16.mxu0 %vm4876_vm3, %v18298_v42 }
 0x628   : > { %v21869_v5 = vadd.f32 %v16862_v6, %v7755_v52  ;;  %17014 = vmatpush3.bf16.msra.mxu1 %v18321_v45 }
 0x629   : > { %v21874_v14 = vpop.f32.mrb[156].mxu0  ;;  %17015 = vmatprep.subr.bf16.mxu1 %v18322_v0 }
 0x62a   : > { %v16863_v56 = vpop.f32.mrb[16].mxu1  ;;  %v5533_v25 = vpop.f32.mrb[157].mxu0 }
 0x62b   : > { %v16864_v11 = vpop.f32.mrb[17].mxu1  ;;  %v21885_v10 = vpop.f32.mrb[158].mxu0 }
 0x62c   : > { %v16865_v19 = vadd.f32 %v16864_v11, %v16863_v56  ;;  %v16866_v21 = vpop.f32.mrb[18].mxu1  ;;  %v6050_v4 = vpack.c.bf16 %v21885_v10, %v21874_v14  ;;  %v5536_v3 = vpop.f32.mrb[159].mxu0  ;;  %17016 = vmatpush3.bf16.msra.mxu1 %v18323_v59  ;;  %v18332_v10 = vld [vmem:[%s24782_s4 + $0x494] ss:$8 sps:$4 sm:$0xff]  }
 0x62d   : > { %v16867_v48 = vpop.f32.mrb[19].mxu1  ;;  %17041 = vmatprep.subr.bf16.mxu1 %v18339_v17  ;;  %v18324_v17 = vld [vmem:[%s24782_s4 + $0x470] ss:$8 sps:$4 sm:$0xff]  }
 0x62e   : > { %v21893_v12 = vadd.f32 %v16865_v19, %v7760_v37  ;;  %v16868_v16 = vadd.f32 %v16867_v48, %v16866_v21  ;;  %5746 = vmatmul.mubr.bf16.gmra.mrb[8].mxu0 %v18296_v29  ;;  %v18329_v29 = vld [vmem:[%s24782_s4 + $0x484] ss:$8 sps:$4 sm:$0xff]   ;;  %v18346_v3 = vld [vmem:[%s24783_s5 + $0x350] sm:$0xff]  }
 0x62f   : > { %14877 = vmatprep.mubr.msk.bf16.mxu0 %vm4876_vm3, %v18305_v43  ;;  %v18340_v43 = vld [vmem:[%s24783_s5 + $0x300] sm:$0xff]   ;;  %v18341_v37 = vld [vmem:[%s24783_s5 + $0x348] sm:$0xff]  }
 0x630   : > { %v21896_v35 = vadd.f32 %v16868_v16, %v7763_v53  ;;  %v18342_v19 = vld [vmem:[%s24783_s5 + $0x308] sm:$0xff]  }
 0x631   : > { %v21898_v8 = vpop.f32.mrb[160].mxu0  ;;  %v18327_v53 = vld [vmem:[%s24782_s4 + $0x480] ss:$8 sps:$4 sm:$0xff]  }
 0x632   : > { %v16869_v31 = vpop.f32.mrb[20].mxu1  ;;  %v5541_v61 = vpop.f32.mrb[161].mxu0 }
 0x633   : > { %v16870_v18 = vpop.f32.mrb[21].mxu1  ;;  %v21906_v49 = vpop.f32.mrb[162].mxu0  ;;  %v18349_v61 = vld [vmem:[%s24783_s5 + $0x318] sm:$0xff]  }
 0x634   : > { %v16871_v63 = vadd.f32 %v16870_v18, %v16869_v31  ;;  %v16872_v24 = vpop.f32.mrb[22].mxu1  ;;  %v6051_v34 = vpack.c.bf16 %v21906_v49, %v21898_v8  ;;  %v5544_v7 = vpop.f32.mrb[163].mxu0  ;;  %v18347_v31 = vld [vmem:[%s24783_s5 + $0x310] sm:$0xff]   ;;  %v18335_v49 = vld [vmem:[%s24782_s4 + $0x4a4] ss:$8 sps:$4 sm:$0xff]  }
 0x635   : > { %v16873_v2 = vpop.f32.mrb[23].mxu1  ;;  %v18354_v7 = vld [vmem:[%s24783_s5 + $0x320] sm:$0xff]  }
 0x636   : > { %v21914_v50 = vadd.f32 %v16871_v63, %v7768_v13  ;;  %v16874_v26 = vadd.f32 %v16873_v2, %v16872_v24  ;;  %5754 = vmatmul.mubr.bf16.gmra.mrb[12].mxu0 %v18303_v55  ;;  %v18348_v55 = vld [vmem:[%s24783_s5 + $0x358] sm:$0xff]   ;;  %v18355_v2 = vld [vmem:[%s24783_s5 + $0x368] sm:$0xff]  }
 0x637   : > { %14878 = vmatprep.mubr.msk.bf16.mxu0 %vm4876_vm3, %v18312_v33  ;;  %v18353_v33 = vld [vmem:[%s24783_s5 + $0x360] sm:$0xff]   ;;  %v18330_v63 = vld [vmem:[%s24782_s4 + $0x490] ss:$8 sps:$4 sm:$0xff]  }
 0x638   : > { %v21917_v38 = vadd.f32 %v16874_v26, %v7771_v46  ;;  %v18356_v46 = vld [vmem:[%s24783_s5 + $0x328] sm:$0xff]  }
 0x639   : > { %v21919_v27 = vpop.f32.mrb[164].mxu0 }
 0x63a   : > { %v16875_v39 = vpop.f32.mrb[24].mxu1  ;;  %v5549_v58 = vpop.f32.mrb[165].mxu0 }
 0x63b   : > { %v16876_v60 = vpop.f32.mrb[25].mxu1  ;;  %v21924_v57 = vpop.f32.mrb[166].mxu0 }
 0x63c   : > { %v16877_v32 = vadd.f32 %v16876_v60, %v16875_v39  ;;  %v16878_v15 = vpop.f32.mrb[26].mxu1  ;;  %v6052_v62 = vpack.c.bf16 %v21924_v57, %v21919_v27  ;;  %v5552_v42 = vpop.f32.mrb[167].mxu0  ;;  %v18360_v39 = vld [vmem:[%s24783_s5 + $0x370] sm:$0xff]   ;;  %v18333_v27 = vld [vmem:[%s24782_s4 + $0x4a0] ss:$8 sps:$4 sm:$0xff]  }
 0x63d   : > { %v16879_v44 = vpop.f32.mrb[27].mxu1  ;;  %v18361_v42 = vld [vmem:[%s24783_s5 + $0x330] sm:$0xff]  }
 0x63e   : > { %v21935_v41 = vadd.f32 %v16877_v32, %v7776_v28  ;;  %v16880_v22 = vadd.f32 %v16879_v44, %v16878_v15  ;;  %5762 = vmatmul.mubr.bf16.gmra.mrb[16].mxu0 %v18310_v20 }
 0x63f   : > { %14879 = vmatprep.mubr.msk.bf16.mxu0 %vm4876_vm3, %v18319_v1  ;;  %v18338_v1 = vld [vmem:[%s24782_s4 + $0x4b4] ss:$8 sps:$4 sm:$0xff]  }
 0x640   : > { %v21938_v23 = vadd.f32 %v16880_v22, %v7779_v9  ;;  %v18362_v9 = vld [vmem:[%s24783_s5 + $0x378] sm:$0xff]  }
 0x641   : > { %v21940_v45 = vpop.f32.mrb[168].mxu0 }
 0x642   : > { %v5557_v30 = vpop.f32.mrb[169].mxu0 }
 0x643   : > { %v21945_v0 = vpop.f32.mrb[170].mxu0  ;;  %v18363_v30 = vld [vmem:[%s24783_s5 + $0x338] sm:$0xff]  }
 0x644   : > { %v6053_v54 = vpack.c.bf16 %v21945_v0, %v21940_v45  ;;  %v5560_v52 = vpop.f32.mrb[171].mxu0  ;;  %v18336_v45 = vld [vmem:[%s24782_s4 + $0x4b0] ss:$8 sps:$4 sm:$0xff]  }
 0x646   : > { %5770 = vmatmul.mubr.bf16.gmra.mrb[20].mxu0 %v18317_v40 }
 0x647   : > { %14880 = vmatprep.mubr.msk.bf16.mxu0 %vm4876_vm3, %v18326_v51 }
 0x649   : > { %v5563_v6 = vpop.f32.mrb[172].mxu0 }
 0x64a   : > { %v5565_v59 = vpop.f32.mrb[173].mxu0 }
 0x64b   : > { %v5566_v56 = vpop.f32.mrb[174].mxu0  ;;  %v18345_v59 = vld [vmem:[%s24782_s4 + $0x4c4] ss:$8 sps:$4 sm:$0xff]  }
 0x64c   : > { %v6054_v25 = vpack.c.bf16 %v5566_v56, %v5563_v6  ;;  %v5568_v11 = vpop.f32.mrb[175].mxu0 }
 0x64e   : > { %5778 = vmatmul.mubr.bf16.gmra.mrb[24].mxu0 %v18324_v17  ;;  %8074 = vmatprep.mubr.bf16.mxu1 %v6054_v25 }
 0x64f   : > { %8075 = vmatmul.mubr.bf16.vlgmr.msra.gmra.mrb[76].mxu1 %v6050_v4  ;;  %14881 = vmatprep.mubr.msk.bf16.mxu0 %vm4876_vm3, %v18329_v29 }
 0x650   : > { %17042 = vmatpush3.bf16.msra.mxu1 %v18340_v43 }
 0x651   : > { %v5571_v21 = vpop.f32.mrb[176].mxu0  ;;  %17043 = vmatprep.subr.bf16.mxu1 %v18341_v37 }
 0x652   : > { %v5573_v48 = vpop.f32.mrb[177].mxu0 }
 0x653   : > { %v5574_v14 = vpop.f32.mrb[178].mxu0  ;;  %v18343_v48 = vld [vmem:[%s24782_s4 + $0x4c0] ss:$8 sps:$4 sm:$0xff]  }
 0x654   : > { %v6055_v4 = vpack.c.bf16 %v5574_v14, %v5571_v21  ;;  %v5576_v16 = vpop.f32.mrb[179].mxu0  ;;  %17044 = vmatpush3.bf16.msra.mxu1 %v18342_v19 }
 0x655   : > { %17045 = vmatprep.subr.bf16.mxu1 %v18346_v3 }
 0x656   : > { %5786 = vmatmul.mubr.bf16.gmra.mrb[28].mxu0 %v18327_v53  ;;  %8082 = vmatprep.mubr.bf16.mxu1 %v6055_v4 }
 0x657   : > { %8083 = vmatmul.mubr.bf16.gmra.mrb[80].mxu1 %v6051_v34  ;;  %14882 = vmatprep.mubr.msk.bf16.mxu0 %vm4876_vm3, %v18332_v10  ;;  %v18352_v10 = vld [vmem:[%s24782_s4 + $0x4d4] ss:$8 sps:$4 sm:$0xff]  }
 0x658   : > { %17046 = vmatpush3.bf16.msra.mxu1 %v18347_v31 }
 0x659   : > { %v5579_v18 = vpop.f32.mrb[180].mxu0  ;;  %17047 = vmatprep.subr.bf16.mxu1 %v18348_v55 }
 0x65a   : > { %v5581_v13 = vpop.f32.mrb[181].mxu0 }
 0x65b   : > { %v5582_v8 = vpop.f32.mrb[182].mxu0 }
 0x65c   : > { %v6056_v24 = vpack.c.bf16 %v5582_v8, %v5579_v18  ;;  %v5584_v34 = vpop.f32.mrb[183].mxu0  ;;  %17048 = vmatpush3.bf16.msra.mxu1 %v18349_v61  ;;  %v18350_v8 = vld [vmem:[%s24782_s4 + $0x4d0] ss:$8 sps:$4 sm:$0xff]  }
 0x65d   : > { %17049 = vmatprep.subr.bf16.mxu1 %v18353_v33 }
 0x65e   : > { %5794 = vmatmul.mubr.bf16.gmra.mrb[32].mxu0 %v18330_v63  ;;  %8090 = vmatprep.mubr.bf16.mxu1 %v6056_v24 }
 0x65f   : > { %8091 = vmatmul.mubr.bf16.gmra.mrb[84].mxu1 %v6052_v62  ;;  %14883 = vmatprep.mubr.msk.bf16.mxu0 %vm4876_vm3, %v18335_v49 }
 0x660   : > { %17050 = vmatpush3.bf16.msra.mxu1 %v18354_v7 }
 0x661   : > { %v5587_v26 = vpop.f32.mrb[184].mxu0  ;;  %17051 = vmatprep.subr.bf16.mxu1 %v18355_v2 }
 0x662   : > { %v5589_v20 = vpop.f32.mrb[185].mxu0  ;;  %v16897_v58 = vpop.f32.mrb[28].mxu1 }
 0x663   : > { %v5590_v60 = vpop.f32.mrb[186].mxu0  ;;  %v16898_v57 = vpop.f32.mrb[29].mxu1 }
 0x664   : > { %v6057_v28 = vpack.c.bf16 %v5590_v60, %v5587_v26  ;;  %v16899_v32 = vadd.f32 %v16898_v57, %v16897_v58  ;;  %v16900_v15 = vpop.f32.mrb[30].mxu1  ;;  %v5592_v62 = vpop.f32.mrb[187].mxu0  ;;  %17052 = vmatpush3.bf16.msra.mxu1 %v18356_v46  ;;  %v18357_v60 = vld [vmem:[%s24782_s4 + $0x4e0] ss:$8 sps:$4 sm:$0xff]  }
 0x665   : > { %v16901_v44 = vpop.f32.mrb[31].mxu1  ;;  %17053 = vmatprep.subr.bf16.mxu1 %v18360_v39  ;;  %v18364_v62 = vld [vmem:[%s24782_s4 + $0x4f0] ss:$8 sps:$4 sm:$0xff]  }
 0x666   : > { %v16902_v22 = vadd.f32 %v16901_v44, %v16900_v15  ;;  %5802 = vmatmul.mubr.bf16.gmra.mrb[36].mxu0 %v18333_v27  ;;  %8098 = vmatprep.mubr.bf16.mxu1 %v6057_v28  ;;  %v22032_v40 = vadd.f32 %v16899_v32, %v21863_v36  ;;  %v18379_v36 = vld [vmem:[%s24783_s5 + $0x3c0] sm:$0xff]   ;;  %v18366_v28 = vld [vmem:[%s24782_s4 + $0x4f4] ss:$8 sps:$4 sm:$0xff]  }
 0x667   : > { %8099 = vmatmul.mubr.bf16.gmra.mrb[88].mxu1 %v6053_v54  ;;  %14884 = vmatprep.mubr.msk.bf16.mxu0 %vm4876_vm3, %v18338_v1  ;;  %v18369_v44 = vld [vmem:[%s24782_s4 + $0x504] ss:$8 sps:$4 sm:$0xff]  }
 0x668   : > { %17054 = vmatpush3.bf16.msra.mxu1 %v18361_v42  ;;  %v22042_v51 = vadd.f32 %v16902_v22, %v21869_v5 }
 0x669   : > { %v22044_v52 = vpop.f32.mrb[188].mxu0  ;;  %17055 = vmatprep.subr.bf16.mxu1 %v18362_v9 }
 0x66a   : > { %v16903_v6 = vpop.f32.mrb[32].mxu1  ;;  %v5597_v0 = vpop.f32.mrb[189].mxu0 }
 0x66b   : > { %v16904_v54 = vpop.f32.mrb[33].mxu1  ;;  %v22055_v5 = vpop.f32.mrb[190].mxu0  ;;  %v18386_v0 = vld [vmem:[%s24783_s5 + $0x3d0] sm:$0xff]  }
 0x66c   : > { %v16905_v17 = vadd.f32 %v16904_v54, %v16903_v6  ;;  %v16906_v56 = vpop.f32.mrb[34].mxu1  ;;  %v6058_v29 = vpack.c.bf16 %v22055_v5, %v22044_v52  ;;  %v5600_v25 = vpop.f32.mrb[191].mxu0  ;;  %17056 = vmatpush3.bf16.msra.mxu1 %v18363_v30  ;;  %v18380_v30 = vld [vmem:[%s24783_s5 + $0x380] sm:$0xff]   ;;  %v18382_v6 = vld [vmem:[%s24783_s5 + $0x388] sm:$0xff]   ;;  %v18372_v5 = vld [vmem:[%s24782_s4 + $0x514] ss:$8 sps:$4 sm:$0xff]  }
 0x66d   : > { %v16907_v11 = vpop.f32.mrb[35].mxu1  ;;  %17081 = vmatprep.subr.bf16.mxu1 %v18379_v36  ;;  %v18381_v36 = vld [vmem:[%s24783_s5 + $0x3c8] sm:$0xff]   ;;  %v18388_v25 = vld [vmem:[%s24783_s5 + $0x3d8] sm:$0xff]  }
 0x66e   : > { %v16908_v43 = vadd.f32 %v16907_v11, %v16906_v56  ;;  %5810 = vmatmul.mubr.bf16.gmra.mrb[40].mxu0 %v18336_v45  ;;  %v22060_v37 = vadd.f32 %v16905_v17, %v21893_v12  ;;  %v18389_v11 = vld [vmem:[%s24783_s5 + $0x398] sm:$0xff]  }
 0x66f   : > { %14885 = vmatprep.mubr.msk.bf16.mxu0 %vm4876_vm3, %v18345_v59  ;;  %v18367_v59 = vld [vmem:[%s24782_s4 + $0x500] ss:$8 sps:$4 sm:$0xff]  }
 0x670   : > { %v22064_v19 = vadd.f32 %v16908_v43, %v21896_v35 }
 0x671   : > { %v22066_v21 = vpop.f32.mrb[192].mxu0 }
 0x672   : > { %v16909_v3 = vpop.f32.mrb[36].mxu1  ;;  %v5605_v53 = vpop.f32.mrb[193].mxu0 }
 0x673   : > { %v16910_v14 = vpop.f32.mrb[37].mxu1  ;;  %v22074_v12 = vpop.f32.mrb[194].mxu0  ;;  %v18370_v53 = vld [vmem:[%s24782_s4 + $0x510] ss:$8 sps:$4 sm:$0xff]  }
 0x674   : > { %v16911_v4 = vadd.f32 %v16910_v14, %v16909_v3  ;;  %v16912_v16 = vpop.f32.mrb[38].mxu1  ;;  %v6059_v35 = vpack.c.bf16 %v22074_v12, %v22066_v21  ;;  %v5608_v31 = vpop.f32.mrb[195].mxu0  ;;  %v18393_v3 = vld [vmem:[%s24783_s5 + $0x3e0] sm:$0xff]  }
 0x675   : > { %v16913_v55 = vpop.f32.mrb[39].mxu1  ;;  %v18375_v14 = vld [vmem:[%s24782_s4 + $0x524] ss:$8 sps:$4 sm:$0xff]  }
 0x676   : > { %v16914_v61 = vadd.f32 %v16913_v55, %v16912_v16  ;;  %5818 = vmatmul.mubr.bf16.gmra.mrb[44].mxu0 %v18343_v48  ;;  %v22079_v18 = vadd.f32 %v16911_v4, %v21914_v50  ;;  %v18359_v50 = vld [vmem:[%s24782_s4 + $0x4e4] ss:$8 sps:$4 sm:$0xff]   ;;  %v18400_v55 = vld [vmem:[%s24783_s5 + $0x3f0] sm:$0xff]  }
 0x677   : > { %14886 = vmatprep.mubr.msk.bf16.mxu0 %vm4876_vm3, %v18352_v10  ;;  %v18394_v4 = vld [vmem:[%s24783_s5 + $0x3a0] sm:$0xff]   ;;  %v18395_v16 = vld [vmem:[%s24783_s5 + $0x3e8] sm:$0xff]  }
 0x678   : > { %v22083_v33 = vadd.f32 %v16914_v61, %v21917_v38 }
 0x679   : > { %v22085_v13 = vpop.f32.mrb[196].mxu0 }
 0x67a   : > { %v16915_v63 = vpop.f32.mrb[40].mxu1  ;;  %v5613_v49 = vpop.f32.mrb[197].mxu0 }
 0x67b   : > { %v16916_v24 = vpop.f32.mrb[41].mxu1  ;;  %v22090_v34 = vpop.f32.mrb[198].mxu0 }
 0x67c   : > { %v16917_v7 = vadd.f32 %v16916_v24, %v16915_v63  ;;  %v16918_v2 = vpop.f32.mrb[42].mxu1  ;;  %v6060_v38 = vpack.c.bf16 %v22090_v34, %v22085_v13  ;;  %v5616_v46 = vpop.f32.mrb[199].mxu0  ;;  %v18373_v13 = vld [vmem:[%s24782_s4 + $0x520] ss:$8 sps:$4 sm:$0xff]   ;;  %v18378_v24 = vld [vmem:[%s24782_s4 + $0x534] ss:$8 sps:$4 sm:$0xff]  }
 0x67d   : > { %v16919_v26 = vpop.f32.mrb[43].mxu1 }
 0x67e   : > { %v16920_v39 = vadd.f32 %v16919_v26, %v16918_v2  ;;  %5826 = vmatmul.mubr.bf16.gmra.mrb[48].mxu0 %v18350_v8  ;;  %v22098_v20 = vadd.f32 %v16917_v7, %v21935_v41  ;;  %v18402_v26 = vld [vmem:[%s24783_s5 + $0x3f8] sm:$0xff]  }
 0x67f   : > { %14887 = vmatprep.mubr.msk.bf16.mxu0 %vm4876_vm3, %v18359_v50 }
 0x680   : > { %v22102_v58 = vadd.f32 %v16920_v39, %v21938_v23 }
 0x681   : > { %v22104_v27 = vpop.f32.mrb[200].mxu0 }
 0x682   : > { %v5621_v57 = vpop.f32.mrb[201].mxu0 }
 0x683   : > { %v22109_v1 = vpop.f32.mrb[202].mxu0 }
 0x684   : > { %v6061_v41 = vpack.c.bf16 %v22109_v1, %v22104_v27  ;;  %v5624_v32 = vpop.f32.mrb[203].mxu0  ;;  %v18376_v27 = vld [vmem:[%s24782_s4 + $0x530] ss:$8 sps:$4 sm:$0xff]  }
 0x686   : > { %5834 = vmatmul.mubr.bf16.gmra.mrb[52].mxu0 %v18357_v60 }
 0x687   : > { %14888 = vmatprep.mubr.msk.bf16.mxu0 %vm4876_vm3, %v18366_v28  ;;  %v18403_v28 = vld [vmem:[%s24783_s5 + $0x3b8] sm:$0xff]  }
 0x689   : > { %v5627_v23 = vpop.f32.mrb[204].mxu0 }
 0x68a   : > { %v5629_v15 = vpop.f32.mrb[205].mxu0 }
 0x68b   : > { %v5630_v42 = vpop.f32.mrb[206].mxu0 }
 0x68c   : > { %v6062_v9 = vpack.c.bf16 %v5630_v42, %v5627_v23  ;;  %v5632_v22 = vpop.f32.mrb[207].mxu0 }
 0x68e   : > { %5842 = vmatmul.mubr.bf16.gmra.mrb[56].mxu0 %v18364_v62  ;;  %8139 = vmatprep.mubr.bf16.mxu1 %v6062_v9 }
 0x68f   : > { %8140 = vmatmul.mubr.bf16.vlgmr.msra.gmra.mrb[92].mxu1 %v6058_v29  ;;  %14889 = vmatprep.mubr.msk.bf16.mxu0 %vm4876_vm3, %v18369_v44  ;;  %v18387_v29 = vld [vmem:[%s24783_s5 + $0x390] sm:$0xff]  }
 0x690   : > { %17082 = vmatpush3.bf16.msra.mxu1 %v18380_v30 }
 0x691   : > { %v5635_v45 = vpop.f32.mrb[208].mxu0  ;;  %17083 = vmatprep.subr.bf16.mxu1 %v18381_v36 }
 0x692   : > { %v5637_v54 = vpop.f32.mrb[209].mxu0 }
 0x693   : > { %v5638_v52 = vpop.f32.mrb[210].mxu0  ;;  %v18383_v54 = vld [vmem:[%s24782_s4 + $0x540] ss:$8 sps:$4 sm:$0xff]  }
 0x694   : > { %v6063_v17 = vpack.c.bf16 %v5638_v52, %v5635_v45  ;;  %v5640_v56 = vpop.f32.mrb[211].mxu0  ;;  %17084 = vmatpush3.bf16.msra.mxu1 %v18382_v6 }
 0x695   : > { %17085 = vmatprep.subr.bf16.mxu1 %v18386_v0 }
 0x696   : > { %5850 = vmatmul.mubr.bf16.gmra.mrb[60].mxu0 %v18367_v59  ;;  %8147 = vmatprep.mubr.bf16.mxu1 %v6063_v17 }
 0x697   : > { %8148 = vmatmul.mubr.bf16.gmra.mrb[96].mxu1 %v6059_v35  ;;  %14890 = vmatprep.mubr.msk.bf16.mxu0 %vm4876_vm3, %v18372_v5  ;;  %v18396_v35 = vld [vmem:[%s24783_s5 + $0x3a8] sm:$0xff]  }
 0x698   : > { %17086 = vmatpush3.bf16.msra.mxu1 %v18387_v29 }
 0x699   : > { %v5643_v43 = vpop.f32.mrb[212].mxu0  ;;  %17087 = vmatprep.subr.bf16.mxu1 %v18388_v25 }
 0x69a   : > { %v5645_v48 = vpop.f32.mrb[213].mxu0 }
 0x69b   : > { %v5646_v21 = vpop.f32.mrb[214].mxu0 }
 0x69c   : > { %v6064_v10 = vpack.c.bf16 %v5646_v21, %v5643_v43  ;;  %v5648_v12 = vpop.f32.mrb[215].mxu0  ;;  %17088 = vmatpush3.bf16.msra.mxu1 %v18389_v11  ;;  %v18390_v21 = vld [vmem:[%s24782_s4 + $0x550] ss:$8 sps:$4 sm:$0xff]  }
 0x69d   : > { %17089 = vmatprep.subr.bf16.mxu1 %v18393_v3 }
 0x69e   : > { %5858 = vmatmul.mubr.bf16.gmra.mrb[64].mxu0 %v18370_v53  ;;  %8155 = vmatprep.mubr.bf16.mxu1 %v6064_v10 }
 0x69f   : > { %8156 = vmatmul.mubr.bf16.gmra.mrb[100].mxu1 %v6060_v38  ;;  %14891 = vmatprep.mubr.msk.bf16.mxu0 %vm4876_vm3, %v18375_v14  ;;  %v18401_v38 = vld [vmem:[%s24783_s5 + $0x3b0] sm:$0xff]  }
 0x6a0   : > { %17090 = vmatpush3.bf16.msra.mxu1 %v18394_v4 }
 0x6a1   : > { %v5651_v31 = vpop.f32.mrb[216].mxu0  ;;  %17091 = vmatprep.subr.bf16.mxu1 %v18395_v16 }
 0x6a2   : > { %v5653_v61 = vpop.f32.mrb[217].mxu0  ;;  %v16937_v63 = vpop.f32.mrb[44].mxu1 }
 0x6a3   : > { %v5654_v8 = vpop.f32.mrb[218].mxu0  ;;  %v16938_v49 = vpop.f32.mrb[45].mxu1 }
 0x6a4   : > { %v6065_v34 = vpack.c.bf16 %v5654_v8, %v5651_v31  ;;  %v16939_v50 = vadd.f32 %v16938_v49, %v16937_v63  ;;  %v16940_v7 = vpop.f32.mrb[46].mxu1  ;;  %v5656_v2 = vpop.f32.mrb[219].mxu0  ;;  %17092 = vmatpush3.bf16.msra.mxu1 %v18396_v35  ;;  %v18397_v8 = vld [vmem:[%s24782_s4 + $0x560] ss:$8 sps:$4 sm:$0xff]  }
 0x6a5   : > { %v16941_v46 = vpop.f32.mrb[47].mxu1  ;;  %17093 = vmatprep.subr.bf16.mxu1 %v18400_v55  ;;  %v18404_v2 = vld [vmem:[%s24782_s4 + $0x570] ss:$8 sps:$4 sm:$0xff]  }
 0x6a6   : > { %v22196_v39 = vadd.f32 %v16939_v50, %v22032_v40  ;;  %v16942_v60 = vadd.f32 %v16941_v46, %v16940_v7  ;;  %5866 = vmatmul.mubr.bf16.gmra.mrb[68].mxu0 %v18373_v13  ;;  %8163 = vmatprep.mubr.bf16.mxu1 %v6065_v34  ;;  %v18419_v40 = vld [vmem:[%s24783_s5 + $0x440] sm:$0xff]  }
 0x6a7   : > { %8164 = vmatmul.mubr.bf16.gmra.mrb[104].mxu1 %v6061_v41  ;;  %14892 = vmatprep.mubr.msk.bf16.mxu0 %vm4876_vm3, %v18378_v24  ;;  %v18385_v41 = vld [vmem:[%s24782_s4 + $0x544] ss:$8 sps:$4 sm:$0xff]  }
 0x6a8   : > { %v22203_v57 = vadd.f32 %v16942_v60, %v22042_v51  ;;  %17094 = vmatpush3.bf16.msra.mxu1 %v18401_v38  ;;  %v18409_v46 = vld [vmem:[%s24782_s4 + $0x584] ss:$8 sps:$4 sm:$0xff]  }
 0x6a9   : > { %v22208_v32 = vpop.f32.mrb[220].mxu0  ;;  %17095 = vmatprep.subr.bf16.mxu1 %v18402_v26 }
 0x6aa   : > { %v16943_v23 = vpop.f32.mrb[48].mxu1  ;;  %v5661_v1 = vpop.f32.mrb[221].mxu0 }
 0x6ab   : > { %v16944_v51 = vpop.f32.mrb[49].mxu1  ;;  %v22219_v15 = vpop.f32.mrb[222].mxu0  ;;  %v18426_v1 = vld [vmem:[%s24783_s5 + $0x450] sm:$0xff]  }
 0x6ac   : > { %v16945_v62 = vadd.f32 %v16944_v51, %v16943_v23  ;;  %v16946_v42 = vpop.f32.mrb[50].mxu1  ;;  %v6066_v44 = vpack.c.bf16 %v22219_v15, %v22208_v32  ;;  %v5664_v9 = vpop.f32.mrb[223].mxu0  ;;  %17096 = vmatpush3.bf16.msra.mxu1 %v18403_v28  ;;  %v18420_v28 = vld [vmem:[%s24783_s5 + $0x400] sm:$0xff]   ;;  %v18422_v23 = vld [vmem:[%s24783_s5 + $0x408] sm:$0xff]   ;;  %v18412_v15 = vld [vmem:[%s24782_s4 + $0x594] ss:$8 sps:$4 sm:$0xff]  }
 0x6ad   : > { %v16947_v22 = vpop.f32.mrb[51].mxu1  ;;  %17121 = vmatprep.subr.bf16.mxu1 %v18419_v40  ;;  %v18421_v40 = vld [vmem:[%s24783_s5 + $0x448] sm:$0xff]   ;;  %v18428_v9 = vld [vmem:[%s24783_s5 + $0x458] sm:$0xff]  }
 0x6ae   : > { %v22224_v30 = vadd.f32 %v16945_v62, %v22060_v37  ;;  %v16948_v36 = vadd.f32 %v16947_v22, %v16946_v42  ;;  %5874 = vmatmul.mubr.bf16.gmra.mrb[72].mxu0 %v18376_v27  ;;  %v18392_v37 = vld [vmem:[%s24782_s4 + $0x554] ss:$8 sps:$4 sm:$0xff]  }
 0x6af   : > { %14893 = vmatprep.mubr.msk.bf16.mxu0 %vm4876_vm3, %v18385_v41  ;;  %v18407_v41 = vld [vmem:[%s24782_s4 + $0x580] ss:$8 sps:$4 sm:$0xff]   ;;  %v18429_v22 = vld [vmem:[%s24783_s5 + $0x418] sm:$0xff]  }
 0x6b0   : > { %v22228_v6 = vadd.f32 %v16948_v36, %v22064_v19 }
 0x6b1   : > { %v22230_v45 = vpop.f32.mrb[224].mxu0 }
 0x6b2   : > { %v16949_v0 = vpop.f32.mrb[52].mxu1  ;;  %v5669_v59 = vpop.f32.mrb[225].mxu0 }
 0x6b3   : > { %v16950_v52 = vpop.f32.mrb[53].mxu1  ;;  %v22238_v5 = vpop.f32.mrb[226].mxu0  ;;  %v18410_v59 = vld [vmem:[%s24782_s4 + $0x590] ss:$8 sps:$4 sm:$0xff]  }
 0x6b4   : > { %v16951_v17 = vadd.f32 %v16950_v52, %v16949_v0  ;;  %v16952_v56 = vpop.f32.mrb[54].mxu1  ;;  %v6067_v19 = vpack.c.bf16 %v22238_v5, %v22230_v45  ;;  %v5672_v29 = vpop.f32.mrb[227].mxu0  ;;  %v18433_v0 = vld [vmem:[%s24783_s5 + $0x460] sm:$0xff]  }
 0x6b5   : > { %v16953_v25 = vpop.f32.mrb[55].mxu1  ;;  %v18415_v52 = vld [vmem:[%s24782_s4 + $0x5a4] ss:$8 sps:$4 sm:$0xff]  }
 0x6b6   : > { %v22243_v11 = vadd.f32 %v16951_v17, %v22079_v18  ;;  %v16954_v43 = vadd.f32 %v16953_v25, %v16952_v56  ;;  %5882 = vmatmul.mubr.bf16.gmra.mrb[76].mxu0 %v18383_v54  ;;  %v18399_v18 = vld [vmem:[%s24782_s4 + $0x564] ss:$8 sps:$4 sm:$0xff]   ;;  %v18440_v25 = vld [vmem:[%s24783_s5 + $0x470] sm:$0xff]  }
 0x6b7   : > { %14894 = vmatprep.mubr.msk.bf16.mxu0 %vm4876_vm3, %v18392_v37  ;;  %v18434_v17 = vld [vmem:[%s24783_s5 + $0x420] sm:$0xff]   ;;  %v18435_v56 = vld [vmem:[%s24783_s5 + $0x468] sm:$0xff]  }
 0x6b8   : > { %v22247_v3 = vadd.f32 %v16954_v43, %v22083_v33 }
 0x6b9   : > { %v22249_v48 = vpop.f32.mrb[228].mxu0 }
 0x6ba   : > { %v16955_v53 = vpop.f32.mrb[56].mxu1  ;;  %v5677_v14 = vpop.f32.mrb[229].mxu0 }
 0x6bb   : > { %v16956_v10 = vpop.f32.mrb[57].mxu1  ;;  %v22254_v12 = vpop.f32.mrb[230].mxu0 }
 0x6bc   : > { %v16957_v4 = vadd.f32 %v16956_v10, %v16955_v53  ;;  %v16958_v16 = vpop.f32.mrb[58].mxu1  ;;  %v6068_v33 = vpack.c.bf16 %v22254_v12, %v22249_v48  ;;  %v5680_v35 = vpop.f32.mrb[231].mxu0  ;;  %v18413_v48 = vld [vmem:[%s24782_s4 + $0x5a0] ss:$8 sps:$4 sm:$0xff]   ;;  %v18418_v10 = vld [vmem:[%s24782_s4 + $0x5b4] ss:$8 sps:$4 sm:$0xff]  }
 0x6bd   : > { %v16959_v31 = vpop.f32.mrb[59].mxu1 }
 0x6be   : > { %v22262_v55 = vadd.f32 %v16957_v4, %v22098_v20  ;;  %v16960_v61 = vadd.f32 %v16959_v31, %v16958_v16  ;;  %5890 = vmatmul.mubr.bf16.gmra.mrb[80].mxu0 %v18390_v21  ;;  %v18406_v20 = vld [vmem:[%s24782_s4 + $0x574] ss:$8 sps:$4 sm:$0xff]  }
 0x6bf   : > { %14895 = vmatprep.mubr.msk.bf16.mxu0 %vm4876_vm3, %v18399_v18  ;;  %v18442_v31 = vld [vmem:[%s24783_s5 + $0x478] sm:$0xff]  }
 0x6c0   : > { %v22266_v63 = vadd.f32 %v16960_v61, %v22102_v58 }
 0x6c1   : > { %v22268_v13 = vpop.f32.mrb[232].mxu0 }
 0x6c2   : > { %v5685_v49 = vpop.f32.mrb[233].mxu0 }
 0x6c3   : > { %v22273_v24 = vpop.f32.mrb[234].mxu0 }
 0x6c4   : > { %v6069_v34 = vpack.c.bf16 %v22273_v24, %v22268_v13  ;;  %v5688_v50 = vpop.f32.mrb[235].mxu0  ;;  %v18416_v13 = vld [vmem:[%s24782_s4 + $0x5b0] ss:$8 sps:$4 sm:$0xff]  }
 0x6c6   : > { %5898 = vmatmul.mubr.bf16.gmra.mrb[84].mxu0 %v18397_v8 }
 0x6c7   : > { %14896 = vmatprep.mubr.msk.bf16.mxu0 %vm4876_vm3, %v18406_v20  ;;  %v18443_v20 = vld [vmem:[%s24783_s5 + $0x438] sm:$0xff]  }
 0x6c9   : > { %v5691_v58 = vpop.f32.mrb[236].mxu0 }
 0x6ca   : > { %v5693_v7 = vpop.f32.mrb[237].mxu0 }
 0x6cb   : > { %v5694_v38 = vpop.f32.mrb[238].mxu0 }
 0x6cc   : > { %v6070_v26 = vpack.c.bf16 %v5694_v38, %v5691_v58  ;;  %v5696_v60 = vpop.f32.mrb[239].mxu0 }
 0x6ce   : > { %5906 = vmatmul.mubr.bf16.gmra.mrb[88].mxu0 %v18404_v2  ;;  %8204 = vmatprep.mubr.bf16.mxu1 %v6070_v26 }
 0x6cf   : > { %8205 = vmatmul.mubr.bf16.vlgmr.msra.gmra.mrb[108].mxu1 %v6066_v44  ;;  %14897 = vmatprep.mubr.msk.bf16.mxu0 %vm4876_vm3, %v18409_v46  ;;  %v18427_v44 = vld [vmem:[%s24783_s5 + $0x410] sm:$0xff]  }
 0x6d0   : > { %17122 = vmatpush3.bf16.msra.mxu1 %v18420_v28 }
 0x6d1   : > { %v5699_v27 = vpop.f32.mrb[240].mxu0  ;;  %17123 = vmatprep.subr.bf16.mxu1 %v18421_v40 }
 0x6d2   : > { %v5701_v51 = vpop.f32.mrb[241].mxu0 }
 0x6d3   : > { %v5702_v32 = vpop.f32.mrb[242].mxu0  ;;  %v18423_v51 = vld [vmem:[%s24782_s4 + $0x5c0] ss:$8 sps:$4 sm:$0xff]  }
 0x6d4   : > { %v6071_v62 = vpack.c.bf16 %v5702_v32, %v5699_v27  ;;  %v5704_v42 = vpop.f32.mrb[243].mxu0  ;;  %17124 = vmatpush3.bf16.msra.mxu1 %v18422_v23 }
 0x6d5   : > { %17125 = vmatprep.subr.bf16.mxu1 %v18426_v1 }
 0x6d6   : > { %5914 = vmatmul.mubr.bf16.gmra.mrb[92].mxu0 %v18407_v41  ;;  %8212 = vmatprep.mubr.bf16.mxu1 %v6071_v62 }
 0x6d7   : > { %8213 = vmatmul.mubr.bf16.gmra.mrb[112].mxu1 %v6067_v19  ;;  %14898 = vmatprep.mubr.msk.bf16.mxu0 %vm4876_vm3, %v18412_v15  ;;  %v18436_v19 = vld [vmem:[%s24783_s5 + $0x428] sm:$0xff]  }
 0x6d8   : > { %17126 = vmatpush3.bf16.msra.mxu1 %v18427_v44 }
 0x6d9   : > { %v5707_v36 = vpop.f32.mrb[244].mxu0  ;;  %17127 = vmatprep.subr.bf16.mxu1 %v18428_v9 }
 0x6da   : > { %v5709_v54 = vpop.f32.mrb[245].mxu0 }
 0x6db   : > { %v5710_v45 = vpop.f32.mrb[246].mxu0 }
 0x6dc   : > { %v6072_v37 = vpack.c.bf16 %v5710_v45, %v5707_v36  ;;  %v5712_v5 = vpop.f32.mrb[247].mxu0  ;;  %17128 = vmatpush3.bf16.msra.mxu1 %v18429_v22  ;;  %v18430_v45 = vld [vmem:[%s24782_s4 + $0x5d0] ss:$8 sps:$4 sm:$0xff]  }
 0x6dd   : > { %17129 = vmatprep.subr.bf16.mxu1 %v18433_v0 }
 0x6de   : > { %5922 = vmatmul.mubr.bf16.gmra.mrb[96].mxu0 %v18410_v59  ;;  %8220 = vmatprep.mubr.bf16.mxu1 %v6072_v37 }
 0x6df   : > { %8221 = vmatmul.mubr.bf16.gmra.mrb[116].mxu1 %v6068_v33  ;;  %14899 = vmatprep.mubr.msk.bf16.mxu0 %vm4876_vm3, %v18415_v52  ;;  %v18441_v33 = vld [vmem:[%s24783_s5 + $0x430] sm:$0xff]  }
 0x6e0   : > { %17130 = vmatpush3.bf16.msra.mxu1 %v18434_v17 }
 0x6e1   : > { %v5715_v29 = vpop.f32.mrb[248].mxu0  ;;  %17131 = vmatprep.subr.bf16.mxu1 %v18435_v56 }
 0x6e2   : > { %v5717_v43 = vpop.f32.mrb[249].mxu0  ;;  %v16977_v53 = vpop.f32.mrb[60].mxu1 }
 0x6e3   : > { %v5718_v21 = vpop.f32.mrb[250].mxu0  ;;  %v16978_v14 = vpop.f32.mrb[61].mxu1 }
 0x6e4   : > { %v6073_v12 = vpack.c.bf16 %v5718_v21, %v5715_v29  ;;  %v16979_v18 = vadd.f32 %v16978_v14, %v16977_v53  ;;  %v16980_v4 = vpop.f32.mrb[62].mxu1  ;;  %v5720_v16 = vpop.f32.mrb[251].mxu0  ;;  %17132 = vmatpush3.bf16.msra.mxu1 %v18436_v19  ;;  %v18437_v21 = vld [vmem:[%s24782_s4 + $0x5e0] ss:$8 sps:$4 sm:$0xff]  }
 0x6e5   : > { %v16981_v35 = vpop.f32.mrb[63].mxu1  ;;  %17133 = vmatprep.subr.bf16.mxu1 %v18440_v25  ;;  %v18444_v16 = vld [vmem:[%s24782_s4 + $0x5f0] ss:$8 sps:$4 sm:$0xff]  }
 0x6e6   : > { %v22360_v61 = vadd.f32 %v16979_v18, %v22196_v39  ;;  %v16982_v8 = vadd.f32 %v16981_v35, %v16980_v4  ;;  %5930 = vmatmul.mubr.bf16.gmra.mrb[100].mxu0 %v18413_v48  ;;  %8228 = vmatprep.mubr.bf16.mxu1 %v6073_v12  ;;  %v18459_v39 = vld [vmem:[%s24783_s5 + $0x4c0] sm:$0xff]  }
 0x6e7   : > { %8229 = vmatmul.mubr.bf16.gmra.mrb[120].mxu1 %v6069_v34  ;;  %14900 = vmatprep.mubr.msk.bf16.mxu0 %vm4876_vm3, %v18418_v10  ;;  %v18425_v34 = vld [vmem:[%s24782_s4 + $0x5c4] ss:$8 sps:$4 sm:$0xff]  }
 0x6e8   : > { %v22367_v49 = vadd.f32 %v16982_v8, %v22203_v57  ;;  %17134 = vmatpush3.bf16.msra.mxu1 %v18441_v33  ;;  %v18449_v35 = vld [vmem:[%s24782_s4 + $0x604] ss:$8 sps:$4 sm:$0xff]  }
 0x6e9   : > { %v22372_v50 = vpop.f32.mrb[252].mxu0  ;;  %17135 = vmatprep.subr.bf16.mxu1 %v18442_v31 }
 0x6ea   : > { %v16983_v58 = vpop.f32.mrb[64].mxu1  ;;  %v5725_v24 = vpop.f32.mrb[253].mxu0 }
 0x6eb   : > { %v16984_v57 = vpop.f32.mrb[65].mxu1  ;;  %v22383_v7 = vpop.f32.mrb[254].mxu0  ;;  %v18463_v24 = vld [vmem:[%s24783_s5 + $0x4d0] sm:$0xff]  }
 0x6ec   : > { %v16985_v2 = vadd.f32 %v16984_v57, %v16983_v58  ;;  %v16986_v38 = vpop.f32.mrb[66].mxu1  ;;  %v6074_v46 = vpack.c.bf16 %v22383_v7, %v22372_v50  ;;  %v5728_v26 = vpop.f32.mrb[255].mxu0  ;;  %17136 = vmatpush3.bf16.msra.mxu1 %v18443_v20  ;;  %v18460_v20 = vld [vmem:[%s24783_s5 + $0x480] sm:$0xff]   ;;  %v18462_v58 = vld [vmem:[%s24783_s5 + $0x488] sm:$0xff]   ;;  %v18452_v7 = vld [vmem:[%s24782_s4 + $0x614] ss:$8 sps:$4 sm:$0xff]  }
 0x6ed   : > { %v16987_v60 = vpop.f32.mrb[67].mxu1  ;;  %17161 = vmatprep.subr.bf16.mxu1 %v18459_v39  ;;  %v18461_v39 = vld [vmem:[%s24783_s5 + $0x4c8] sm:$0xff]   ;;  %v18465_v26 = vld [vmem:[%s24783_s5 + $0x4d8] sm:$0xff]  }
 0x6ee   : > { %v22388_v28 = vadd.f32 %v16985_v2, %v22224_v30  ;;  %v16988_v40 = vadd.f32 %v16987_v60, %v16986_v38  ;;  %5938 = vmatmul.mubr.bf16.gmra.mrb[104].mxu0 %v18416_v13  ;;  %v18432_v30 = vld [vmem:[%s24782_s4 + $0x5d4] ss:$8 sps:$4 sm:$0xff]  }
 0x6ef   : > { %14901 = vmatprep.mubr.msk.bf16.mxu0 %vm4876_vm3, %v18425_v34  ;;  %v18447_v34 = vld [vmem:[%s24782_s4 + $0x600] ss:$8 sps:$4 sm:$0xff]   ;;  %v18466_v60 = vld [vmem:[%s24783_s5 + $0x498] sm:$0xff]  }
 0x6f0   : > { %v22392_v23 = vadd.f32 %v16988_v40, %v22228_v6 }
 0x6f1   : > { %v22394_v27 = vpop.f32.mrb[0].mxu0 }
 0x6f2   : > { %v16989_v1 = vpop.f32.mrb[68].mxu1  ;;  %v5733_v41 = vpop.f32.mrb[1].mxu0 }
 0x6f3   : > { %v16990_v32 = vpop.f32.mrb[69].mxu1  ;;  %v22402_v15 = vpop.f32.mrb[2].mxu0  ;;  %v18450_v41 = vld [vmem:[%s24782_s4 + $0x610] ss:$8 sps:$4 sm:$0xff]  }
 0x6f4   : > { %v16991_v62 = vadd.f32 %v16990_v32, %v16989_v1  ;;  %v16992_v42 = vpop.f32.mrb[70].mxu1  ;;  %v6075_v6 = vpack.c.bf16 %v22402_v15, %v22394_v27  ;;  %v5736_v44 = vpop.f32.mrb[3].mxu0  ;;  %v18467_v1 = vld [vmem:[%s24783_s5 + $0x4e0] sm:$0xff]  }
 0x6f5   : > { %v16993_v9 = vpop.f32.mrb[71].mxu1  ;;  %v18455_v32 = vld [vmem:[%s24782_s4 + $0x624] ss:$8 sps:$4 sm:$0xff]  }
 0x6f6   : > { %v22407_v22 = vadd.f32 %v16991_v62, %v22243_v11  ;;  %v16994_v36 = vadd.f32 %v16993_v9, %v16992_v42  ;;  %5946 = vmatmul.mubr.bf16.gmra.mrb[108].mxu0 %v18423_v51  ;;  %v18439_v11 = vld [vmem:[%s24782_s4 + $0x5e4] ss:$8 sps:$4 sm:$0xff]   ;;  %v18471_v9 = vld [vmem:[%s24783_s5 + $0x4f0] sm:$0xff]  }
 0x6f7   : > { %14902 = vmatprep.mubr.msk.bf16.mxu0 %vm4876_vm3, %v18432_v30  ;;  %v18468_v62 = vld [vmem:[%s24783_s5 + $0x4a0] sm:$0xff]   ;;  %v18469_v42 = vld [vmem:[%s24783_s5 + $0x4e8] sm:$0xff]  }
 0x6f8   : > { %v22411_v0 = vadd.f32 %v16994_v36, %v22247_v3 }
 0x6f9   : > { %v22413_v54 = vpop.f32.mrb[4].mxu0 }
 0x6fa   : > { %v16995_v59 = vpop.f32.mrb[72].mxu1  ;;  %v5741_v52 = vpop.f32.mrb[5].mxu0 }
 0x6fb   : > { %v16996_v37 = vpop.f32.mrb[73].mxu1  ;;  %v22418_v5 = vpop.f32.mrb[6].mxu0 }
 0x6fc   : > { %v16997_v17 = vadd.f32 %v16996_v37, %v16995_v59  ;;  %v16998_v56 = vpop.f32.mrb[74].mxu1  ;;  %v6076_v3 = vpack.c.bf16 %v22418_v5, %v22413_v54  ;;  %v5744_v19 = vpop.f32.mrb[7].mxu0  ;;  %v18453_v54 = vld [vmem:[%s24782_s4 + $0x620] ss:$8 sps:$4 sm:$0xff]   ;;  %v18458_v37 = vld [vmem:[%s24782_s4 + $0x634] ss:$8 sps:$4 sm:$0xff]  }
 0x6fd   : > { %v16999_v29 = vpop.f32.mrb[75].mxu1 }
 0x6fe   : > { %v22426_v25 = vadd.f32 %v16997_v17, %v22262_v55  ;;  %v17000_v43 = vadd.f32 %v16999_v29, %v16998_v56  ;;  %5954 = vmatmul.mubr.bf16.gmra.mrb[112].mxu0 %v18430_v45  ;;  %v18446_v55 = vld [vmem:[%s24782_s4 + $0x5f4] ss:$8 sps:$4 sm:$0xff]  }
 0x6ff   : > { %14903 = vmatprep.mubr.msk.bf16.mxu0 %vm4876_vm3, %v18439_v11  ;;  %v18473_v29 = vld [vmem:[%s24783_s5 + $0x4f8] sm:$0xff]  }
 0x700   : > { %v22430_v53 = vadd.f32 %v17000_v43, %v22266_v63 }
 0x701   : > { %v22432_v48 = vpop.f32.mrb[8].mxu0 }
 0x702   : > { %v5749_v14 = vpop.f32.mrb[9].mxu0 }
 0x703   : > { %v22437_v10 = vpop.f32.mrb[10].mxu0 }
 0x704   : > { %v6077_v12 = vpack.c.bf16 %v22437_v10, %v22432_v48  ;;  %v5752_v18 = vpop.f32.mrb[11].mxu0  ;;  %v18456_v48 = vld [vmem:[%s24782_s4 + $0x630] ss:$8 sps:$4 sm:$0xff]  }
 0x706   : > { %5962 = vmatmul.mubr.bf16.gmra.mrb[116].mxu0 %v18437_v21 }
 0x707   : > { %14904 = vmatprep.mubr.msk.bf16.mxu0 %vm4876_vm3, %v18446_v55  ;;  %v18474_v55 = vld [vmem:[%s24783_s5 + $0x4b8] sm:$0xff]  }
 0x709   : > { %v5755_v63 = vpop.f32.mrb[12].mxu0 }
 0x70a   : > { %v5757_v4 = vpop.f32.mrb[13].mxu0 }
 0x70b   : > { %v5758_v33 = vpop.f32.mrb[14].mxu0 }
 0x70c   : > { %v6078_v31 = vpack.c.bf16 %v5758_v33, %v5755_v63  ;;  %v5760_v8 = vpop.f32.mrb[15].mxu0 }
 0x70e   : > { %5970 = vmatmul.mubr.bf16.gmra.mrb[120].mxu0 %v18444_v16  ;;  %8269 = vmatprep.mubr.bf16.mxu1 %v6078_v31 }
 0x70f   : > { %8270 = vmatmul.mubr.bf16.vlgmr.msra.gmra.mrb[124].mxu1 %v6074_v46  ;;  %14905 = vmatprep.mubr.msk.bf16.mxu0 %vm4876_vm3, %v18449_v35  ;;  %v18464_v46 = vld [vmem:[%s24783_s5 + $0x490] sm:$0xff]  }
 0x710   : > { %17162 = vmatpush3.bf16.msra.mxu1 %v18460_v20 }
 0x711   : > { %v5763_v13 = vpop.f32.mrb[16].mxu0  ;;  %17163 = vmatprep.subr.bf16.mxu1 %v18461_v39 }
 0x712   : > { %v5765_v57 = vpop.f32.mrb[17].mxu0 }
 0x713   : > { %v5766_v50 = vpop.f32.mrb[18].mxu0 }
 0x714   : > { %v6079_v2 = vpack.c.bf16 %v5766_v50, %v5763_v13  ;;  %v5768_v38 = vpop.f32.mrb[19].mxu0  ;;  %17164 = vmatpush3.bf16.msra.mxu1 %v18462_v58 }
 0x715   : > { %17165 = vmatprep.subr.bf16.mxu1 %v18463_v24 }
 0x716   : > { %5978 = vmatmul.mubr.bf16.gmra.mrb[124].mxu0 %v18447_v34  ;;  %8277 = vmatprep.mubr.bf16.mxu1 %v6079_v2 }
 0x717   : > { %8278 = vmatmul.mubr.bf16.gmra.mrb[128].mxu1 %v6075_v6  ;;  %14906 = vmatprep.mubr.msk.bf16.mxu0 %vm4876_vm3, %v18452_v7  ;;  %v18470_v6 = vld [vmem:[%s24783_s5 + $0x4a8] sm:$0xff]  }
 0x718   : > { %17166 = vmatpush3.bf16.msra.mxu1 %v18464_v46 }
 0x719   : > { %v5771_v40 = vpop.f32.mrb[20].mxu0  ;;  %17167 = vmatprep.subr.bf16.mxu1 %v18465_v26 }
 0x71a   : > { %v5773_v51 = vpop.f32.mrb[21].mxu0 }
 0x71b   : > { %v5774_v27 = vpop.f32.mrb[22].mxu0 }
 0x71c   : > { %v6080_v30 = vpack.c.bf16 %v5774_v27, %v5771_v40  ;;  %v5776_v15 = vpop.f32.mrb[23].mxu0  ;;  %17168 = vmatpush3.bf16.msra.mxu1 %v18466_v60 }
 0x71d   : > { %17169 = vmatprep.subr.bf16.mxu1 %v18467_v1 }
 0x71e   : > { %5986 = vmatmul.mubr.bf16.gmra.mrb[128].mxu0 %v18450_v41  ;;  %8285 = vmatprep.mubr.bf16.mxu1 %v6080_v30 }
 0x71f   : > { %8286 = vmatmul.mubr.bf16.gmra.mrb[132].mxu1 %v6076_v3  ;;  %14907 = vmatprep.mubr.msk.bf16.mxu0 %vm4876_vm3, %v18455_v32  ;;  %v18472_v3 = vld [vmem:[%s24783_s5 + $0x4b0] sm:$0xff]  }
 0x720   : > { %17170 = vmatpush3.bf16.msra.mxu1 %v18468_v62 }
 0x721   : > { %v5779_v44 = vpop.f32.mrb[24].mxu0  ;;  %17171 = vmatprep.subr.bf16.mxu1 %v18469_v42 }
 0x722   : > { %v5781_v36 = vpop.f32.mrb[25].mxu0  ;;  %v17017_v59 = vpop.f32.mrb[76].mxu1 }
 0x723   : > { %v5782_v45 = vpop.f32.mrb[26].mxu0  ;;  %v17018_v52 = vpop.f32.mrb[77].mxu1 }
 0x724   : > { %v6081_v5 = vpack.c.bf16 %v5782_v45, %v5779_v44  ;;  %v17019_v11 = vadd.f32 %v17018_v52, %v17017_v59  ;;  %v17020_v17 = vpop.f32.mrb[78].mxu1  ;;  %v5784_v56 = vpop.f32.mrb[27].mxu0  ;;  %17172 = vmatpush3.bf16.msra.mxu1 %v18470_v6 }
 0x725   : > { %v17021_v19 = vpop.f32.mrb[79].mxu1  ;;  %17173 = vmatprep.subr.bf16.mxu1 %v18471_v9  ;;  %v18479_v56 = vld [vmem:[%s24783_s5 + $0x550] sm:$0xff]  }
 0x726   : > { %v22524_v43 = vadd.f32 %v17019_v11, %v22360_v61  ;;  %v17022_v21 = vadd.f32 %v17021_v19, %v17020_v17  ;;  %5994 = vmatmul.mubr.bf16.gmra.mrb[132].mxu0 %v18453_v54  ;;  %8293 = vmatprep.mubr.bf16.mxu1 %v6081_v5  ;;  %v18475_v61 = vld [vmem:[%s24783_s5 + $0x540] sm:$0xff]   ;;  %v18478_v11 = vld [vmem:[%s24783_s5 + $0x508] sm:$0xff]  }
 0x727   : > { %8294 = vmatmul.mubr.bf16.gmra.mrb[136].mxu1 %v6077_v12  ;;  %14908 = vmatprep.mubr.msk.bf16.mxu0 %vm4876_vm3, %v18458_v37 }
 0x728   : > { %v22531_v14 = vadd.f32 %v17022_v21, %v22367_v49  ;;  %17174 = vmatpush3.bf16.msra.mxu1 %v18472_v3 }
 0x729   : > { %v5787_v18 = vpop.f32.mrb[28].mxu0  ;;  %17175 = vmatprep.subr.bf16.mxu1 %v18473_v29 }
 0x72a   : > { %v17023_v63 = vpop.f32.mrb[80].mxu1  ;;  %v5789_v10 = vpop.f32.mrb[29].mxu0 }
 0x72b   : > { %v17024_v12 = vpop.f32.mrb[81].mxu1  ;;  %v5790_v49 = vpop.f32.mrb[30].mxu0 }
 0x72c   : > { %v17025_v4 = vadd.f32 %v17024_v12, %v17023_v63  ;;  %v17026_v16 = vpop.f32.mrb[82].mxu1  ;;  %v6082_v33 = vpack.c.bf16 %v5790_v49, %v5787_v18  ;;  %v5792_v35 = vpop.f32.mrb[31].mxu0  ;;  %17176 = vmatpush3.bf16.msra.mxu1 %v18474_v55  ;;  %v18480_v55 = vld [vmem:[%s24783_s5 + $0x510] sm:$0xff]   ;;  %v18481_v18 = vld [vmem:[%s24783_s5 + $0x558] sm:$0xff]  }
 0x72d   : > { %v17027_v31 = vpop.f32.mrb[83].mxu1  ;;  %17201 = vmatprep.subr.bf16.mxu1 %v18475_v61  ;;  %v18482_v61 = vld [vmem:[%s24783_s5 + $0x518] sm:$0xff]   ;;  %v18486_v35 = vld [vmem:[%s24783_s5 + $0x528] sm:$0xff]  }
 0x72e   : > { %v22543_v8 = vadd.f32 %v17025_v4, %v22388_v28  ;;  %v17028_v20 = vadd.f32 %v17027_v31, %v17026_v16  ;;  %6002 = vmatmul.mubr.bf16.gmra.mrb[136].mxu0 %v18456_v48  ;;  %v18483_v48 = vld [vmem:[%s24783_s5 + $0x560] sm:$0xff]  }
 0x72f   : > { %10551 = vmatprep.mubr.bf16.mxu0 %v24857_v47  ;;  %v18484_v16 = vld [vmem:[%s24783_s5 + $0x520] sm:$0xff]  }
 0x730   : > { %v22547_v39 = vadd.f32 %v17028_v20, %v22392_v23  ;;  %v18487_v20 = vld [vmem:[%s24783_s5 + $0x570] sm:$0xff]  }
 0x731   : > { %v5795_v58 = vpop.f32.mrb[32].mxu0 }
 0x732   : > { %v17029_v13 = vpop.f32.mrb[84].mxu1  ;;  %v5797_v24 = vpop.f32.mrb[33].mxu0 }
 0x733   : > { %v17030_v57 = vpop.f32.mrb[85].mxu1  ;;  %v5798_v34 = vpop.f32.mrb[34].mxu0 }
 0x734   : > { %v17031_v50 = vadd.f32 %v17030_v57, %v17029_v13  ;;  %v17032_v7 = vpop.f32.mrb[86].mxu1  ;;  %v6083_v2 = vpack.c.bf16 %v5798_v34, %v5795_v58  ;;  %v5800_v38 = vpop.f32.mrb[35].mxu0 }
 0x735   : > { %v17033_v46 = vpop.f32.mrb[87].mxu1  ;;  %v18488_v38 = vld [vmem:[%s24783_s5 + $0x530] sm:$0xff]  }
 0x736   : > { %v22550_v28 = vadd.f32 %v17031_v50, %v22407_v22  ;;  %v17034_v26 = vadd.f32 %v17033_v46, %v17032_v7 }
 0x738   : > { %v22553_v60 = vadd.f32 %v17034_v26, %v22411_v0  ;;  %v18489_v26 = vld [vmem:[%s24783_s5 + $0x578] sm:$0xff]  }
 0x739   : > { %v5803_v40 = vpop.f32.mrb[36].mxu0 }
 0x73a   : > { %v17035_v23 = vpop.f32.mrb[88].mxu1  ;;  %v5805_v1 = vpop.f32.mrb[37].mxu0 }
 0x73b   : > { %v17036_v51 = vpop.f32.mrb[89].mxu1  ;;  %v5806_v41 = vpop.f32.mrb[38].mxu0 }
 0x73c   : > { %v17037_v27 = vadd.f32 %v17036_v51, %v17035_v23  ;;  %v17038_v32 = vpop.f32.mrb[90].mxu1  ;;  %v6084_v30 = vpack.c.bf16 %v5806_v41, %v5803_v40  ;;  %v5808_v15 = vpop.f32.mrb[39].mxu0  ;;  %v18490_v51 = vld [vmem:[%s24783_s5 + $0x538] sm:$0xff]  }
 0x73d   : > { %v17039_v62 = vpop.f32.mrb[91].mxu1 }
 0x73e   : > { %v22556_v42 = vadd.f32 %v17037_v27, %v22426_v25  ;;  %v17040_v6 = vadd.f32 %v17039_v62, %v17038_v32  ;;  %v18476_v25 = vld [vmem:[%s24783_s5 + $0x500] sm:$0xff]  }
 0x73f   : > { %v18491_v27 = vld [vmem:[%s24783_s5 + $0x5c0] sm:$0xff]  }
 0x740   : > { %v22559_v22 = vadd.f32 %v17040_v6, %v22430_v53  ;;  %v18477_v53 = vld [vmem:[%s24783_s5 + $0x548] sm:$0xff]  }
 0x741   : > { %v22561_v44 = vpop.f32.mrb[40].mxu0 }
 0x742   : > { %v5813_v0 = vpop.f32.mrb[41].mxu0 }
 0x743   : > { %v22563_v9 = vpop.f32.mrb[42].mxu0 }
 0x744   : > { %v6085_v36 = vpack.c.bf16 %v22563_v9, %v22561_v44  ;;  %v5816_v59 = vpop.f32.mrb[43].mxu0 }
 0x749   : > { %v5819_v54 = vpop.f32.mrb[44].mxu0 }
 0x74a   : > { %v5821_v45 = vpop.f32.mrb[45].mxu0 }
 0x74b   : > { %v5822_v52 = vpop.f32.mrb[46].mxu0 }
 0x74c   : > { %v6086_v37 = vpack.c.bf16 %v5822_v52, %v5819_v54  ;;  %v5824_v5 = vpop.f32.mrb[47].mxu0 }
 0x74e   : > { %8334 = vmatprep.mubr.bf16.mxu1 %v6086_v37 }
 0x74f   : > { %8335 = vmatmul.mubr.bf16.vlgmr.msra.gmra.mrb[140].mxu1 %v6082_v33  ;;  %v18485_v33 = vld [vmem:[%s24783_s5 + $0x568] sm:$0xff]  }
 0x750   : > { %17202 = vmatpush3.bf16.msra.mxu1 %v18476_v25 }
 0x751   : > { %v5827_v17 = vpop.f32.mrb[48].mxu0  ;;  %17203 = vmatprep.subr.bf16.mxu1 %v18477_v53 }
 0x752   : > { %v5829_v3 = vpop.f32.mrb[49].mxu0 }
 0x753   : > { %v5830_v19 = vpop.f32.mrb[50].mxu0 }
 0x754   : > { %v6087_v29 = vpack.c.bf16 %v5830_v19, %v5827_v17  ;;  %v5832_v21 = vpop.f32.mrb[51].mxu0  ;;  %17204 = vmatpush3.bf16.msra.mxu1 %v18478_v11 }
 0x755   : > { %17205 = vmatprep.subr.bf16.mxu1 %v18479_v56 }
 0x756   : > { %8342 = vmatprep.mubr.bf16.mxu1 %v6087_v29 }
 0x757   : > { %8343 = vmatmul.mubr.bf16.gmra.mrb[144].mxu1 %v6083_v2 }
 0x758   : > { %17206 = vmatpush3.bf16.msra.mxu1 %v18480_v55 }
 0x759   : > { %v5835_v63 = vpop.f32.mrb[52].mxu0  ;;  %17207 = vmatprep.subr.bf16.mxu1 %v18481_v18 }
 0x75a   : > { %v5837_v10 = vpop.f32.mrb[53].mxu0 }
 0x75b   : > { %v5838_v12 = vpop.f32.mrb[54].mxu0 }
 0x75c   : > { %v6088_v49 = vpack.c.bf16 %v5838_v12, %v5835_v63  ;;  %v5840_v4 = vpop.f32.mrb[55].mxu0  ;;  %17208 = vmatpush3.bf16.msra.mxu1 %v18482_v61 }
 0x75d   : > { %17209 = vmatprep.subr.bf16.mxu1 %v18483_v48 }
 0x75e   : > { %8350 = vmatprep.mubr.bf16.mxu1 %v6088_v49 }
 0x75f   : > { %8351 = vmatmul.mubr.bf16.gmra.mrb[148].mxu1 %v6084_v30 }
 0x760   : > { %17210 = vmatpush3.bf16.msra.mxu1 %v18484_v16 }
 0x761   : > { %v5843_v31 = vpop.f32.mrb[56].mxu0  ;;  %17211 = vmatprep.subr.bf16.mxu1 %v18485_v33 }
 0x762   : > { %v5845_v58 = vpop.f32.mrb[57].mxu0  ;;  %v17057_v13 = vpop.f32.mrb[92].mxu1 }
 0x763   : > { %v5846_v24 = vpop.f32.mrb[58].mxu0  ;;  %v17058_v57 = vpop.f32.mrb[93].mxu1 }
 0x764   : > { %v6089_v34 = vpack.c.bf16 %v5846_v24, %v5843_v31  ;;  %v17059_v50 = vadd.f32 %v17058_v57, %v17057_v13  ;;  %v17060_v7 = vpop.f32.mrb[94].mxu1  ;;  %v5848_v2 = vpop.f32.mrb[59].mxu0  ;;  %17212 = vmatpush3.bf16.msra.mxu1 %v18486_v35 }
 0x765   : > { %v17061_v46 = vpop.f32.mrb[95].mxu1  ;;  %17213 = vmatprep.subr.bf16.mxu1 %v18487_v20 }
 0x766   : > { %v22610_v40 = vadd.f32 %v17059_v50, %v22524_v43  ;;  %v17062_v23 = vadd.f32 %v17061_v46, %v17060_v7  ;;  %8358 = vmatprep.mubr.bf16.mxu1 %v6089_v34  ;;  %v18494_v34 = vld [vmem:[%s24783_s5 + $0x588] sm:$0xff]   ;;  %v18495_v7 = vld [vmem:[%s24783_s5 + $0x5d0] sm:$0xff]  }
 0x767   : > { %8359 = vmatmul.mubr.bf16.gmra.mrb[152].mxu1 %v6085_v36 }
 0x768   : > { %v22613_v1 = vadd.f32 %v17062_v23, %v22531_v14  ;;  %17214 = vmatpush3.bf16.msra.mxu1 %v18488_v38  ;;  %v18496_v23 = vld [vmem:[%s24783_s5 + $0x590] sm:$0xff]  }
 0x769   : > { %v5851_v41 = vpop.f32.mrb[60].mxu0  ;;  %17215 = vmatprep.subr.bf16.mxu1 %v18489_v26 }
 0x76a   : > { %v17063_v32 = vpop.f32.mrb[96].mxu1  ;;  %v5853_v43 = vpop.f32.mrb[61].mxu0 }
 0x76b   : > { %v17064_v30 = vpop.f32.mrb[97].mxu1  ;;  %v5854_v15 = vpop.f32.mrb[62].mxu0 }
 0x76c   : > { %v17065_v62 = vadd.f32 %v17064_v30, %v17063_v32  ;;  %v17066_v6 = vpop.f32.mrb[98].mxu1  ;;  %v6090_v44 = vpack.c.bf16 %v5854_v15, %v5851_v41  ;;  %v5856_v14 = vpop.f32.mrb[63].mxu0  ;;  %17216 = vmatpush3.bf16.msra.mxu1 %v18490_v51  ;;  %v18497_v51 = vld [vmem:[%s24783_s5 + $0x5d8] sm:$0xff]   ;;  %v18499_v32 = vld [vmem:[%s24783_s5 + $0x5e0] sm:$0xff]  }
 0x76d   : > { %v17067_v0 = vpop.f32.mrb[99].mxu1  ;;  %17241 = vmatprep.subr.bf16.mxu1 %v18491_v27  ;;  %v18498_v41 = vld [vmem:[%s24783_s5 + $0x598] sm:$0xff]   ;;  %v18502_v14 = vld [vmem:[%s24783_s5 + $0x5a8] sm:$0xff]  }
 0x76e   : > { %v22622_v9 = vadd.f32 %v17065_v62, %v22543_v8  ;;  %v17068_v36 = vadd.f32 %v17067_v0, %v17066_v6  ;;  %v18500_v6 = vld [vmem:[%s24783_s5 + $0x5a0] sm:$0xff]  }
 0x770   : > { %v22625_v59 = vadd.f32 %v17068_v36, %v22547_v39  ;;  %v18503_v36 = vld [vmem:[%s24783_s5 + $0x5f0] sm:$0xff]  }
 0x771   : > { %v5859_v54 = vpop.f32.mrb[64].mxu0 }
 0x772   : > { %v17069_v45 = vpop.f32.mrb[100].mxu1  ;;  %v5861_v52 = vpop.f32.mrb[65].mxu0 }
 0x773   : > { %v17070_v37 = vpop.f32.mrb[101].mxu1  ;;  %v5862_v5 = vpop.f32.mrb[66].mxu0 }
 0x774   : > { %v17071_v25 = vadd.f32 %v17070_v37, %v17069_v45  ;;  %v17072_v53 = vpop.f32.mrb[102].mxu1  ;;  %v6091_v11 = vpack.c.bf16 %v5862_v5, %v5859_v54  ;;  %v5864_v17 = vpop.f32.mrb[67].mxu0 }
 0x775   : > { %v17073_v56 = vpop.f32.mrb[103].mxu1  ;;  %v18504_v17 = vld [vmem:[%s24783_s5 + $0x5b0] sm:$0xff]  }
 0x776   : > { %v22628_v3 = vadd.f32 %v17071_v25, %v22550_v28  ;;  %v17074_v19 = vadd.f32 %v17073_v56, %v17072_v53 }
 0x778   : > { %v22631_v8 = vadd.f32 %v17074_v19, %v22553_v60  ;;  %v18505_v19 = vld [vmem:[%s24783_s5 + $0x5f8] sm:$0xff]  }
 0x779   : > { %v5867_v29 = vpop.f32.mrb[68].mxu0 }
 0x77a   : > { %v17075_v39 = vpop.f32.mrb[104].mxu1  ;;  %v5869_v21 = vpop.f32.mrb[69].mxu0 }
 0x77b   : > { %v17076_v55 = vpop.f32.mrb[105].mxu1  ;;  %v5870_v18 = vpop.f32.mrb[70].mxu0 }
 0x77c   : > { %v17077_v61 = vadd.f32 %v17076_v55, %v17075_v39  ;;  %v17078_v63 = vpop.f32.mrb[106].mxu1  ;;  %v6092_v48 = vpack.c.bf16 %v5870_v18, %v5867_v29  ;;  %v5872_v10 = vpop.f32.mrb[71].mxu0  ;;  %v18506_v55 = vld [vmem:[%s24783_s5 + $0x5b8] sm:$0xff]  }
 0x77d   : > { %v17079_v12 = vpop.f32.mrb[107].mxu1 }
 0x77e   : > { %v22634_v49 = vadd.f32 %v17077_v61, %v22556_v42  ;;  %v17080_v4 = vadd.f32 %v17079_v12, %v17078_v63  ;;  %v18492_v42 = vld [vmem:[%s24783_s5 + $0x580] sm:$0xff]  }
 0x77f   : > { %v18507_v61 = vld [vmem:[%s24783_s5 + $0x600] sm:$0xff]  }
 0x780   : > { %v22637_v28 = vadd.f32 %v17080_v4, %v22559_v22  ;;  %v18493_v22 = vld [vmem:[%s24783_s5 + $0x5c8] sm:$0xff]  }
 0x781   : > { %v22639_v16 = vpop.f32.mrb[72].mxu0 }
 0x782   : > { %v5877_v60 = vpop.f32.mrb[73].mxu0 }
 0x783   : > { %v22641_v33 = vpop.f32.mrb[74].mxu0 }
 0x784   : > { %v6093_v35 = vpack.c.bf16 %v22641_v33, %v22639_v16  ;;  %v5880_v31 = vpop.f32.mrb[75].mxu0 }
 0x789   : > { %v5883_v20 = vpop.f32.mrb[76].mxu0 }
 0x78a   : > { %v5885_v58 = vpop.f32.mrb[77].mxu0 }
 0x78b   : > { %v5886_v13 = vpop.f32.mrb[78].mxu0 }
 0x78c   : > { %v6094_v24 = vpack.c.bf16 %v5886_v13, %v5883_v20  ;;  %v5888_v57 = vpop.f32.mrb[79].mxu0 }
 0x78e   : > { %8399 = vmatprep.mubr.bf16.mxu1 %v6094_v24 }
 0x78f   : > { %8400 = vmatmul.mubr.bf16.vlgmr.msra.gmra.mrb[156].mxu1 %v6090_v44  ;;  %v18501_v44 = vld [vmem:[%s24783_s5 + $0x5e8] sm:$0xff]  }
 0x790   : > { %17242 = vmatpush3.bf16.msra.mxu1 %v18492_v42 }
 0x791   : > { %v5891_v50 = vpop.f32.mrb[80].mxu0  ;;  %17243 = vmatprep.subr.bf16.mxu1 %v18493_v22 }
 0x792   : > { %v5893_v2 = vpop.f32.mrb[81].mxu0 }
 0x793   : > { %v5894_v38 = vpop.f32.mrb[82].mxu0 }
 0x794   : > { %v6095_v46 = vpack.c.bf16 %v5894_v38, %v5891_v50  ;;  %v5896_v26 = vpop.f32.mrb[83].mxu0  ;;  %17244 = vmatpush3.bf16.msra.mxu1 %v18494_v34 }
 0x795   : > { %17245 = vmatprep.subr.bf16.mxu1 %v18495_v7 }
 0x796   : > { %8407 = vmatprep.mubr.bf16.mxu1 %v6095_v46 }
 0x797   : > { %8408 = vmatmul.mubr.bf16.gmra.mrb[160].mxu1 %v6091_v11 }
 0x798   : > { %17246 = vmatpush3.bf16.msra.mxu1 %v18496_v23 }
 0x799   : > { %v5899_v27 = vpop.f32.mrb[84].mxu0  ;;  %17247 = vmatprep.subr.bf16.mxu1 %v18497_v51 }
 0x79a   : > { %v5901_v43 = vpop.f32.mrb[85].mxu0 }
 0x79b   : > { %v5902_v30 = vpop.f32.mrb[86].mxu0 }
 0x79c   : > { %v6096_v15 = vpack.c.bf16 %v5902_v30, %v5899_v27  ;;  %v5904_v62 = vpop.f32.mrb[87].mxu0  ;;  %17248 = vmatpush3.bf16.msra.mxu1 %v18498_v41 }
 0x79d   : > { %17249 = vmatprep.subr.bf16.mxu1 %v18499_v32 }
 0x79e   : > { %8415 = vmatprep.mubr.bf16.mxu1 %v6096_v15 }
 0x79f   : > { %8416 = vmatmul.mubr.bf16.gmra.mrb[164].mxu1 %v6092_v48 }
 0x7a0   : > { %17250 = vmatpush3.bf16.msra.mxu1 %v18500_v6  ;;  %v18517_v6 = vld [vmem:[%s24786_s8 + $0x504] ss:$16 sps:$4 sm:$0xff]  }
 0x7a1   : > { %v5907_v0 = vpop.f32.mrb[88].mxu0  ;;  %17251 = vmatprep.subr.bf16.mxu1 %v18501_v44  ;;  %10519 = vmatprep.subr.bf16.mxu0 %v18517_v6 }
 0x7a2   : > { %v5909_v54 = vpop.f32.mrb[89].mxu0  ;;  %v17097_v45 = vpop.f32.mrb[108].mxu1 }
 0x7a3   : > { %v5910_v52 = vpop.f32.mrb[90].mxu0  ;;  %v17098_v37 = vpop.f32.mrb[109].mxu1 }
 0x7a4   : > { %v6097_v5 = vpack.c.bf16 %v5910_v52, %v5907_v0  ;;  %v17099_v25 = vadd.f32 %v17098_v37, %v17097_v45  ;;  %v17100_v53 = vpop.f32.mrb[110].mxu1  ;;  %v5912_v11 = vpop.f32.mrb[91].mxu0  ;;  %17252 = vmatpush3.bf16.msra.mxu1 %v18502_v14 }
 0x7a5   : > { %v17101_v56 = vpop.f32.mrb[111].mxu1  ;;  %17253 = vmatprep.subr.bf16.mxu1 %v18503_v36 }
 0x7a6   : > { %v22688_v29 = vadd.f32 %v17099_v25, %v22610_v40  ;;  %v17102_v39 = vadd.f32 %v17101_v56, %v17100_v53  ;;  %8423 = vmatprep.mubr.bf16.mxu1 %v6097_v5  ;;  %v18508_v5 = vld [vmem:[%s24783_s5 + $0x608] sm:$0xff]   ;;  %v18509_v53 = vld [vmem:[%s24783_s5 + $0x610] sm:$0xff]  }
 0x7a7   : > { %8424 = vmatmul.mubr.bf16.gmra.mrb[168].mxu1 %v6093_v35 }
 0x7a8   : > { %v22691_v21 = vadd.f32 %v17102_v39, %v22613_v1  ;;  %17254 = vmatpush3.bf16.msra.mxu1 %v18504_v17  ;;  %v18510_v39 = vld [vmem:[%s24783_s5 + $0x618] sm:$0xff]  }
 0x7a9   : > { %v5915_v18 = vpop.f32.mrb[92].mxu0  ;;  %17255 = vmatprep.subr.bf16.mxu1 %v18505_v19 }
 0x7aa   : > { %v17103_v63 = vpop.f32.mrb[112].mxu1  ;;  %v5917_v40 = vpop.f32.mrb[93].mxu0 }
 0x7ab   : > { %v17104_v48 = vpop.f32.mrb[113].mxu1  ;;  %v5918_v10 = vpop.f32.mrb[94].mxu0 }
 0x7ac   : > { %v17105_v12 = vadd.f32 %v17104_v48, %v17103_v63  ;;  %v17106_v4 = vpop.f32.mrb[114].mxu1  ;;  %v6098_v16 = vpack.c.bf16 %v5918_v10, %v5915_v18  ;;  %v5920_v1 = vpop.f32.mrb[95].mxu0  ;;  %17256 = vmatpush3.bf16.msra.mxu1 %v18506_v55  ;;  %v18511_v18 = vld [vmem:[%s24783_s5 + $0x620] sm:$0xff]   ;;  %v18512_v10 = vld [vmem:[%s24783_s5 + $0x628] sm:$0xff]  }
 0x7ad   : > { %v17107_v60 = vpop.f32.mrb[115].mxu1  ;;  %17609 = vmatprep.subr.bf16.mxu1 %v18507_v61 }
 0x7ae   : > { %v22700_v33 = vadd.f32 %v17105_v12, %v22622_v9  ;;  %v17108_v35 = vadd.f32 %v17107_v60, %v17106_v4  ;;  %v18513_v4 = vld [vmem:[%s24783_s5 + $0x630] sm:$0xff]  }
 0x7b0   : > { %v22703_v31 = vadd.f32 %v17108_v35, %v22625_v59 }
 0x7b1   : > { %v5923_v20 = vpop.f32.mrb[96].mxu0 }
 0x7b2   : > { %v17109_v58 = vpop.f32.mrb[116].mxu1  ;;  %v5925_v13 = vpop.f32.mrb[97].mxu0 }
 0x7b3   : > { %v17110_v24 = vpop.f32.mrb[117].mxu1  ;;  %v5926_v57 = vpop.f32.mrb[98].mxu0 }
 0x7b4   : > { %v17111_v42 = vadd.f32 %v17110_v24, %v17109_v58  ;;  %v17112_v22 = vpop.f32.mrb[118].mxu1  ;;  %v6099_v34 = vpack.c.bf16 %v5926_v57, %v5923_v20  ;;  %v5928_v50 = vpop.f32.mrb[99].mxu0 }
 0x7b5   : > { %v17113_v7 = vpop.f32.mrb[119].mxu1 }
 0x7b6   : > { %v22706_v2 = vadd.f32 %v17111_v42, %v22628_v3  ;;  %v17114_v38 = vadd.f32 %v17113_v7, %v17112_v22  ;;  %v18514_v42 = vld [vmem:[%s24783_s5 + $0x638] sm:$0xff]  }
 0x7b8   : > { %v22709_v9 = vadd.f32 %v17114_v38, %v22631_v8  ;;  %v18515_v8 = vld [vmem:[%s24786_s8 + $0x500] ss:$16 sps:$4 sm:$0xff]  }
 0x7b9   : > { %v5931_v46 = vpop.f32.mrb[100].mxu0  ;;  %10520 = vmatpush1.bf16.msra.mxu0 %v18515_v8 }
 0x7ba   : > { %v17115_v59 = vpop.f32.mrb[120].mxu1  ;;  %v5933_v26 = vpop.f32.mrb[101].mxu0 }
 0x7bb   : > { %v17116_v23 = vpop.f32.mrb[121].mxu1  ;;  %v5934_v51 = vpop.f32.mrb[102].mxu0 }
 0x7bc   : > { %v17117_v41 = vadd.f32 %v17116_v23, %v17115_v59  ;;  %v17118_v27 = vpop.f32.mrb[122].mxu1  ;;  %v6100_v32 = vpack.c.bf16 %v5934_v51, %v5931_v46  ;;  %v5936_v43 = vpop.f32.mrb[103].mxu0 }
 0x7bd   : > { %v17119_v30 = vpop.f32.mrb[123].mxu1 }
 0x7be   : > { %v22712_v15 = vadd.f32 %v17117_v41, %v22634_v49  ;;  %v17120_v62 = vadd.f32 %v17119_v30, %v17118_v27 }
 0x7c0   : > { %v22715_v3 = vadd.f32 %v17120_v62, %v22637_v28 }
 0x7c1   : > { %v5939_v44 = vpop.f32.mrb[104].mxu0 }
 0x7c2   : > { %v5941_v14 = vpop.f32.mrb[105].mxu0 }
 0x7c3   : > { %v5942_v0 = vpop.f32.mrb[106].mxu0 }
 0x7c4   : > { %v6101_v36 = vpack.c.bf16 %v5942_v0, %v5939_v44  ;;  %v5944_v49 = vpop.f32.mrb[107].mxu0 }
 0x7c9   : > { %v5947_v54 = vpop.f32.mrb[108].mxu0 }
 0x7ca   : > { %v5949_v45 = vpop.f32.mrb[109].mxu0 }
 0x7cb   : > { %v5950_v52 = vpop.f32.mrb[110].mxu0 }
 0x7cc   : > { %v6102_v28 = vpack.c.bf16 %v5950_v52, %v5947_v54  ;;  %v5952_v37 = vpop.f32.mrb[111].mxu0 }
 0x7ce   : > { %8464 = vmatprep.mubr.bf16.mxu1 %v6102_v28 }
 0x7cf   : > { %8465 = vmatmul.mubr.bf16.vlgmr.msra.gmra.mrb[172].mxu1 %v6098_v16 }
 0x7d0   : > { %17610 = vmatpush3.bf16.msra.mxu1 %v18507_v61 }
 0x7d1   : > { %v5955_v25 = vpop.f32.mrb[112].mxu0  ;;  %17611 = vmatprep.subr.bf16.mxu1 %v18508_v5 }
 0x7d2   : > { %v5957_v11 = vpop.f32.mrb[113].mxu0 }
 0x7d3   : > { %v5958_v17 = vpop.f32.mrb[114].mxu0 }
 0x7d4   : > { %v6103_v56 = vpack.c.bf16 %v5958_v17, %v5955_v25  ;;  %v5960_v19 = vpop.f32.mrb[115].mxu0  ;;  %17612 = vmatpush3.bf16.msra.mxu1 %v18508_v5 }
 0x7d5   : > { %17613 = vmatprep.subr.bf16.mxu1 %v18509_v53 }
 0x7d6   : > { %8472 = vmatprep.mubr.bf16.mxu1 %v6103_v56 }
 0x7d7   : > { %8473 = vmatmul.mubr.bf16.gmra.mrb[176].mxu1 %v6099_v34 }
 0x7d8   : > { %17614 = vmatpush3.bf16.msra.mxu1 %v18509_v53 }
 0x7d9   : > { %v5963_v55 = vpop.f32.mrb[116].mxu0  ;;  %17615 = vmatprep.subr.bf16.mxu1 %v18510_v39 }
 0x7da   : > { %v5965_v61 = vpop.f32.mrb[117].mxu0 }
 0x7db   : > { %v5966_v63 = vpop.f32.mrb[118].mxu0 }
 0x7dc   : > { %v6104_v40 = vpack.c.bf16 %v5966_v63, %v5963_v55  ;;  %v5968_v48 = vpop.f32.mrb[119].mxu0  ;;  %17616 = vmatpush3.bf16.msra.mxu1 %v18510_v39 }
 0x7dd   : > { %17617 = vmatprep.subr.bf16.mxu1 %v18511_v18 }
 0x7de   : > { %8480 = vmatprep.mubr.bf16.mxu1 %v6104_v40 }
 0x7df   : > { %8481 = vmatmul.mubr.bf16.gmra.mrb[180].mxu1 %v6100_v32 }
 0x7e0   : > { %17618 = vmatpush3.bf16.msra.mxu1 %v18511_v18 }
 0x7e1   : > { %v5971_v12 = vpop.f32.mrb[120].mxu0  ;;  %17619 = vmatprep.subr.bf16.mxu1 %v18512_v10 }
 0x7e2   : > { %v5973_v16 = vpop.f32.mrb[121].mxu0  ;;  %v17137_v1 = vpop.f32.mrb[124].mxu1 }
 0x7e3   : > { %v5974_v60 = vpop.f32.mrb[122].mxu0  ;;  %v17138_v35 = vpop.f32.mrb[125].mxu1 }
 0x7e4   : > { %v6105_v20 = vpack.c.bf16 %v5974_v60, %v5971_v12  ;;  %v17139_v58 = vadd.f32 %v17138_v35, %v17137_v1  ;;  %v17140_v13 = vpop.f32.mrb[126].mxu1  ;;  %17620 = vmatpush3.bf16.msra.mxu1 %v18512_v10  ;;  %v5976_v24 = vpop.f32.mrb[123].mxu0 }
 0x7e5   : > { %v17141_v57 = vpop.f32.mrb[127].mxu1  ;;  %17621 = vmatprep.subr.bf16.mxu1 %v18513_v4 }
 0x7e6   : > { %v22745_v22 = vadd.f32 %v17139_v58, %v22688_v29  ;;  %v17142_v34 = vadd.f32 %v17141_v57, %v17140_v13  ;;  %8488 = vmatprep.mubr.bf16.mxu1 %v6105_v20  ;;  %v24901_v29 = vmov 0.0  }
 0x7e7   : > { %8489 = vmatmul.mubr.bf16.gmra.mrb[184].mxu1 %v6101_v36 }
 0x7e8   : > { %v8275_v50 = vadd.f32 %v17142_v34, %v22691_v21  ;;  %17622 = vmatpush3.bf16.msra.mxu1 %v18513_v4 }
 0x7e9   : > { %v5979_v7 = vpop.f32.mrb[124].mxu0  ;;  %17623 = vmatprep.subr.bf16.mxu1 %v18514_v42 }
 0x7ea   : > { %v17143_v38 = vpop.f32.mrb[128].mxu1  ;;  %v5981_v46 = vpop.f32.mrb[125].mxu0 }
 0x7eb   : > { %v17144_v59 = vpop.f32.mrb[129].mxu1  ;;  %v5982_v26 = vpop.f32.mrb[126].mxu0 }
 0x7ec   : > { %v17145_v23 = vadd.f32 %v17144_v59, %v17143_v38  ;;  %v17146_v51 = vpop.f32.mrb[130].mxu1  ;;  %v6106_v41 = vpack.c.bf16 %v5982_v26, %v5979_v7  ;;  %v5984_v27 = vpop.f32.mrb[127].mxu0  ;;  %17624 = vmatpush3.bf16.msra.mxu1 %v18514_v42 }
 0x7ed   : > { %v17147_v32 = vpop.f32.mrb[131].mxu1  ;;  %17633 = vmatprep.subr.bf16.mxu1 %v24901_v29 }
 0x7ee   : > { %v8280_v43 = vadd.f32 %v17145_v23, %v22700_v33  ;;  %v17148_v30 = vadd.f32 %v17147_v32, %v17146_v51  ;;  %17625 = vmatprep.mubr.bf16.mxu1 %v6106_v41 }
 0x7f0   : > { %v8283_v21 = vadd.f32 %v17148_v30, %v22703_v31 }
 0x7f1   : > { %v5987_v62 = vpop.f32.mrb[128].mxu0 }
 0x7f2   : > { %v5989_v8 = vpop.f32.mrb[129].mxu0  ;;  %v17149_v6 = vpop.f32.mrb[132].mxu1 }
 0x7f3   : > { %v5990_v44 = vpop.f32.mrb[130].mxu0  ;;  %v17150_v14 = vpop.f32.mrb[133].mxu1 }
 0x7f4   : > { %v6107_v0 = vpack.c.bf16 %v5990_v44, %v5987_v62  ;;  %v17151_v36 = vadd.f32 %v17150_v14, %v17149_v6  ;;  %v17152_v49 = vpop.f32.mrb[134].mxu1  ;;  %v5992_v54 = vpop.f32.mrb[131].mxu0 }
 0x7f5   : > { %v17153_v45 = vpop.f32.mrb[135].mxu1 }
 0x7f6   : > { %v8288_v52 = vadd.f32 %v17151_v36, %v22706_v2  ;;  %v17154_v28 = vadd.f32 %v17153_v45, %v17152_v49  ;;  %17626 = vmatmul.mubr.bf16.vlgmr.msra.gmra.mrb[188].mxu1 %v6107_v0 }
 0x7f8   : > { %v8291_v33 = vadd.f32 %v17154_v28, %v22709_v9 }
 0x7f9   : > { %v5995_v37 = vpop.f32.mrb[132].mxu0 }
 0x7fa   : > { %v17155_v5 = vpop.f32.mrb[136].mxu1  ;;  %v5997_v25 = vpop.f32.mrb[133].mxu0 }
 0x7fb   : > { %v17156_v31 = vpop.f32.mrb[137].mxu1  ;;  %v5998_v53 = vpop.f32.mrb[134].mxu0 }
 0x7fc   : > { %v17157_v11 = vadd.f32 %v17156_v31, %v17155_v5  ;;  %v17158_v17 = vpop.f32.mrb[138].mxu1  ;;  %v6108_v56 = vpack.c.bf16 %v5998_v53, %v5995_v37  ;;  %v6000_v19 = vpop.f32.mrb[135].mxu0 }
 0x7fd   : > { %v17159_v39 = vpop.f32.mrb[139].mxu1 }
 0x7fe   : > { %v8296_v55 = vadd.f32 %v17157_v11, %v22712_v15  ;;  %v17160_v18 = vadd.f32 %v17159_v39, %v17158_v17  ;;  %17629 = vmatprep.mubr.bf16.mxu1 %v6108_v56 }
 0x800   : > { %v8299_v2 = vadd.f32 %v17160_v18, %v22715_v3 }
 0x801   : > { %v6003_v61 = vpop.f32.mrb[136].mxu0 }
 0x802   : > { %v6005_v63 = vpop.f32.mrb[137].mxu0 }
 0x803   : > { %v6006_v40 = vpop.f32.mrb[138].mxu0 }
 0x804   : > { %v6109_v9 = vpack.c.bf16 %v6006_v40, %v6003_v61  ;;  %v6008_v48 = vpop.f32.mrb[139].mxu0 }
 0x806   : > { %17630 = vmatmul.mubr.bf16.gmra.mrb[192].mxu1 %v6109_v9 }
 0x807   : > { %17641 = vmatprep.mubr.msk.bf16.mxu1 %vm19389_vm1, %v24901_v29 }
 0x822   : > { %v17177_v10 = vpop.f32.mrb[140].mxu1 }
 0x823   : > { %v17178_v12 = vpop.f32.mrb[141].mxu1 }
 0x824   : > { %v17179_v4 = vadd.f32 %v17178_v12, %v17177_v10  ;;  %v17180_v16 = vpop.f32.mrb[142].mxu1 }
 0x825   : > { %v17181_v1 = vpop.f32.mrb[143].mxu1 }
 0x826   : > { %v8337_v15 = vadd.f32 %v17179_v4, %v22745_v22  ;;  %v17182_v60 = vadd.f32 %v17181_v1, %v17180_v16  ;;  %v18525_v1 = vld [vmem:[%s24786_s8 + $0x540] ss:$16 sps:$4 sm:$0xff]  }
 0x828   : > { %v8340_v35 = vadd.f32 %v17182_v60, %v8275_v50  ;;  %v18530_v60 = vld [vmem:[%s24786_s8 + $0x564] ss:$16 sps:$4 sm:$0xff]  }
 0x82a   : > { %v17183_v20 = vpop.f32.mrb[144].mxu1 }
 0x82b   : > { %v17184_v3 = vpop.f32.mrb[145].mxu1 }
 0x82c   : > { %v17185_v58 = vadd.f32 %v17184_v3, %v17183_v20  ;;  %v17186_v13 = vpop.f32.mrb[146].mxu1 }
 0x82d   : > { %v17187_v24 = vpop.f32.mrb[147].mxu1 }
 0x82e   : > { %v8345_v57 = vadd.f32 %v17185_v58, %v8280_v43  ;;  %v17188_v42 = vadd.f32 %v17187_v24, %v17186_v13  ;;  %v18518_v43 = vld [vmem:[%s24786_s8 + $0x520] ss:$16 sps:$4 sm:$0xff]  }
 0x830   : > { %v8348_v34 = vadd.f32 %v17188_v42, %v8283_v21  ;;  %v18520_v21 = vld [vmem:[%s24786_s8 + $0x524] ss:$16 sps:$4 sm:$0xff]  }
 0x831   : > { %10521 = vmatprep.subr.bf16.mxu0 %v18520_v21 }
 0x832   : > { %v17189_v7 = vpop.f32.mrb[148].mxu1  ;;  %10522 = vmatpush1.bf16.msra.mxu0 %v18518_v43 }
 0x833   : > { %v17190_v38 = vpop.f32.mrb[149].mxu1 }
 0x834   : > { %v17191_v46 = vadd.f32 %v17190_v38, %v17189_v7  ;;  %v17192_v59 = vpop.f32.mrb[150].mxu1 }
 0x835   : > { %v17193_v26 = vpop.f32.mrb[151].mxu1 }
 0x836   : > { %v8353_v23 = vadd.f32 %v17191_v46, %v8288_v52  ;;  %v17194_v51 = vadd.f32 %v17193_v26, %v17192_v59 }
 0x838   : > { %v8356_v41 = vadd.f32 %v17194_v51, %v8291_v33 }
 0x83a   : > { %v17195_v27 = vpop.f32.mrb[152].mxu1 }
 0x83b   : > { %v17196_v22 = vpop.f32.mrb[153].mxu1 }
 0x83c   : > { %v17197_v32 = vadd.f32 %v17196_v22, %v17195_v27  ;;  %v17198_v50 = vpop.f32.mrb[154].mxu1 }
 0x83d   : > { %v17199_v30 = vpop.f32.mrb[155].mxu1 }
 0x83e   : > { %v8361_v62 = vadd.f32 %v17197_v32, %v8296_v55  ;;  %v17200_v8 = vadd.f32 %v17199_v30, %v17198_v50 }
 0x840   : > { %v8364_v6 = vadd.f32 %v17200_v8, %v8299_v2 }
 0x862   : > { %v17217_v44 = vpop.f32.mrb[156].mxu1 }
 0x863   : > { %v17218_v14 = vpop.f32.mrb[157].mxu1 }
 0x864   : > { %v17219_v0 = vadd.f32 %v17218_v14, %v17217_v44  ;;  %v17220_v36 = vpop.f32.mrb[158].mxu1 }
 0x865   : > { %v17221_v49 = vpop.f32.mrb[159].mxu1 }
 0x866   : > { %v8402_v54 = vadd.f32 %v17219_v0, %v8337_v15  ;;  %v17222_v45 = vadd.f32 %v17221_v49, %v17220_v36  ;;  %v18527_v15 = vld [vmem:[%s24786_s8 + $0x544] ss:$16 sps:$4 sm:$0xff]  }
 0x867   : > { %10523 = vmatprep.subr.bf16.mxu0 %v18527_v15 }
 0x868   : > { %v8405_v52 = vadd.f32 %v17222_v45, %v8340_v35  ;;  %10524 = vmatpush1.bf16.msra.mxu0 %v18525_v1  ;;  %v18528_v35 = vld [vmem:[%s24786_s8 + $0x560] ss:$16 sps:$4 sm:$0xff]  }
 0x869   : > { %10525 = vmatprep.subr.bf16.mxu0 %v18530_v60  ;;  %v18521_v60 = vld [vmem:[%s24785_s7] sm:$0xff]  }
 0x86a   : > { %v17223_v28 = vpop.f32.mrb[160].mxu1 }
 0x86b   : > { %v17224_v33 = vpop.f32.mrb[161].mxu1 }
 0x86c   : > { %v17225_v37 = vadd.f32 %v17224_v33, %v17223_v28  ;;  %v17226_v5 = vpop.f32.mrb[162].mxu1  ;;  %10526 = vmatpush1.bf16.msra.mxu0 %v18528_v35  ;;  %v18522_v35 = vld [vmem:[%s24785_s7 + $0x8] sm:$0xff]  }
 0x86d   : > { %v17227_v25 = vpop.f32.mrb[163].mxu1 }
 0x86e   : > { %v8410_v31 = vadd.f32 %v17225_v37, %v8345_v57  ;;  %v17228_v53 = vadd.f32 %v17227_v25, %v17226_v5 }
 0x870   : > { %v8413_v11 = vadd.f32 %v17228_v53, %v8348_v34 }
 0x872   : > { %v17229_v17 = vpop.f32.mrb[164].mxu1 }
 0x873   : > { %v17230_v56 = vpop.f32.mrb[165].mxu1 }
 0x874   : > { %v17231_v19 = vadd.f32 %v17230_v56, %v17229_v17  ;;  %v17232_v39 = vpop.f32.mrb[166].mxu1 }
 0x875   : > { %v17233_v55 = vpop.f32.mrb[167].mxu1 }
 0x876   : > { %v8418_v18 = vadd.f32 %v17231_v19, %v8353_v23  ;;  %v17234_v2 = vadd.f32 %v17233_v55, %v17232_v39 }
 0x878   : > { %v8421_v61 = vadd.f32 %v17234_v2, %v8356_v41 }
 0x87a   : > { %v17235_v63 = vpop.f32.mrb[168].mxu1 }
 0x87b   : > { %v17236_v40 = vpop.f32.mrb[169].mxu1 }
 0x87c   : > { %v17237_v9 = vadd.f32 %v17236_v40, %v17235_v63  ;;  %v17238_v48 = vpop.f32.mrb[170].mxu1 }
 0x87d   : > { %v17239_v10 = vpop.f32.mrb[171].mxu1 }
 0x87e   : > { %v8426_v12 = vadd.f32 %v17237_v9, %v8361_v62  ;;  %v17240_v4 = vadd.f32 %v17239_v10, %v17238_v48 }
 0x880   : > { %v8429_v16 = vadd.f32 %v17240_v4, %v8364_v6 }
 0x8a2   : > { %v17257_v20 = vpop.f32.mrb[172].mxu1 }
 0x8a3   : > { %v17258_v3 = vpop.f32.mrb[173].mxu1 }
 0x8a4   : > { %v17259_v58 = vadd.f32 %v17258_v3, %v17257_v20  ;;  %v17260_v13 = vpop.f32.mrb[174].mxu1  ;;  %v18523_v20 = vld [vmem:[%s24785_s7 + $0x10] sm:$0xff]  }
 0x8a5   : > { %v17261_v24 = vpop.f32.mrb[175].mxu1  ;;  %v18533_v3 = vld [vmem:[%s24786_s8 + $0x4] ss:$16 sps:$4 sm:$0xff]  }
 0x8a6   : > { %v17262_v57 = vadd.f32 %v17261_v24, %v17260_v13  ;;  %v8467_v42 = vadd.f32 %v17259_v58, %v8402_v54  ;;  %v18524_v58 = vld [vmem:[%s24785_s7 + $0x18] sm:$0xff]   ;;  %v18531_v13 = vld [vmem:[%s24786_s8] ss:$16 sps:$4 sm:$0xff]   ;;  %v18536_v24 = vld [vmem:[%s24786_s8 + $0x24] ss:$16 sps:$4 sm:$0xff]  }
 0x8a8   : > { %v8470_v34 = vadd.f32 %v17262_v57, %v8405_v52  ;;  %v18539_v57 = vld [vmem:[%s24786_s8 + $0x44] ss:$16 sps:$4 sm:$0xff]  }
 0x8aa   : > { %v17263_v7 = vpop.f32.mrb[176].mxu1 }
 0x8ab   : > { %v17264_v38 = vpop.f32.mrb[177].mxu1 }
 0x8ac   : > { %v17265_v46 = vadd.f32 %v17264_v38, %v17263_v7  ;;  %v17266_v59 = vpop.f32.mrb[178].mxu1  ;;  %v18542_v7 = vld [vmem:[%s24786_s8 + $0x64] ss:$16 sps:$4 sm:$0xff]   ;;  %v18543_v38 = vld [vmem:[%s24786_s8 + $0x80] ss:$16 sps:$4 sm:$0xff]  }
 0x8ad   : > { %v17267_v26 = vpop.f32.mrb[179].mxu1 }
 0x8ae   : > { %v17268_v23 = vadd.f32 %v17267_v26, %v17266_v59  ;;  %v8475_v51 = vadd.f32 %v17265_v46, %v8410_v31  ;;  %v18545_v46 = vld [vmem:[%s24786_s8 + $0x84] ss:$16 sps:$4 sm:$0xff]   ;;  %v18546_v59 = vld [vmem:[%s24786_s8 + $0xa0] ss:$16 sps:$4 sm:$0xff]  }
 0x8af   : > { %v18548_v26 = vld [vmem:[%s24786_s8 + $0xa4] ss:$16 sps:$4 sm:$0xff]  }
 0x8b0   : > { %v8478_v41 = vadd.f32 %v17268_v23, %v8413_v11  ;;  %v18549_v23 = vld [vmem:[%s24786_s8 + $0x580] ss:$16 sps:$4 sm:$0xff]  }
 0x8b2   : > { %v17269_v27 = vpop.f32.mrb[180].mxu1 }
 0x8b3   : > { %v17270_v22 = vpop.f32.mrb[181].mxu1 }
 0x8b4   : > { %v17271_v32 = vadd.f32 %v17270_v22, %v17269_v27  ;;  %v17272_v50 = vpop.f32.mrb[182].mxu1  ;;  %v18557_v27 = vld [vmem:[%s24786_s8 + $0x5a4] ss:$16 sps:$4 sm:$0xff]   ;;  %v18552_v22 = vld [vmem:[%s24786_s8 + $0xc0] ss:$16 sps:$4 sm:$0xff]  }
 0x8b5   : > { %v17273_v30 = vpop.f32.mrb[183].mxu1 }
 0x8b6   : > { %v17274_v62 = vadd.f32 %v17273_v30, %v17272_v50  ;;  %v8483_v8 = vadd.f32 %v17271_v32, %v8418_v18  ;;  %v18555_v32 = vld [vmem:[%s24786_s8 + $0x5a0] ss:$16 sps:$4 sm:$0xff]   ;;  %v18560_v50 = vld [vmem:[%s24786_s8 + $0xe4] ss:$16 sps:$4 sm:$0xff]  }
 0x8b7   : > { %v18563_v30 = vld [vmem:[%s24786_s8 + $0x5c4] ss:$16 sps:$4 sm:$0xff]  }
 0x8b8   : > { %v8486_v43 = vadd.f32 %v17274_v62, %v8421_v61  ;;  %v18558_v62 = vld [vmem:[%s24786_s8 + $0xe0] ss:$16 sps:$4 sm:$0xff]  }
 0x8ba   : > { %v17275_v21 = vpop.f32.mrb[184].mxu1 }
 0x8bb   : > { %v17276_v6 = vpop.f32.mrb[185].mxu1 }
 0x8bc   : > { %v17277_v44 = vadd.f32 %v17276_v6, %v17275_v21  ;;  %v17278_v14 = vpop.f32.mrb[186].mxu1  ;;  %v18569_v21 = vld [vmem:[%s24786_s8 + $0x5e4] ss:$16 sps:$4 sm:$0xff]   ;;  %v18567_v6 = vld [vmem:[%s24786_s8 + $0x5e0] ss:$16 sps:$4 sm:$0xff]  }
 0x8bd   : > { %v17279_v0 = vpop.f32.mrb[187].mxu1 }
 0x8be   : > { %v17280_v36 = vadd.f32 %v17279_v0, %v17278_v14  ;;  %v8491_v49 = vadd.f32 %v17277_v44, %v8426_v12  ;;  %v18575_v44 = vld [vmem:[%s24786_s8 + $0x604] ss:$16 sps:$4 sm:$0xff]  }
 0x8c0   : > { %v8494_v54 = vadd.f32 %v17280_v36, %v8429_v16 }
 0x8c9   : > { %v17627_v45 = vpop.f32.mrb[188].mxu1 }
 0x8ca   : > { %v8540_v52 = vadd.f32 %v17627_v45, %v8475_v51  ;;  %v8531_v28 = vpop.f32.mrb[189].mxu1  ;;  %v18551_v51 = vld [vmem:[%s24786_s8 + $0x584] ss:$16 sps:$4 sm:$0xff]  }
 0x8cb   : > { %v8532_v33 = vadd.f32 %v8531_v28, %v8467_v42  ;;  %v17628_v37 = vpop.f32.mrb[190].mxu1  ;;  %v18537_v42 = vld [vmem:[%s24786_s8 + $0x40] ss:$16 sps:$4 sm:$0xff]   ;;  %10527 = vmatprep.subr.bf16.mxu0 %v18551_v51  ;;  %v18611_v51 = vld [vmem:[%s24786_s8 + $0x6c4] ss:$16 sps:$4 sm:$0xff]  }
 0x8cc   : > { %v8543_v5 = vadd.f32 %v17628_v37, %v8478_v41  ;;  %v8534_v25 = vpop.f32.mrb[191].mxu1  ;;  %v8564_v53 = vmax.f32 %v8540_v52, 0.0  ;;  %10528 = vmatpush1.bf16.msra.mxu0 %v18549_v23  ;;  %v18554_v41 = vld [vmem:[%s24786_s8 + $0xc4] ss:$16 sps:$4 sm:$0xff]   ;;  %v18608_v23 = vld [vmem:[%s24786_s8 + $0xec] ss:$16 sps:$4 sm:$0xff]  }
 0x8cd   : > { %v8535_v31 = vadd.f32 %v8534_v25, %v8470_v34  ;;  %v8562_v17 = vmax.f32 %v8532_v33, 0.0  ;;  %v18540_v34 = vld [vmem:[%s24786_s8 + $0x60] ss:$16 sps:$4 sm:$0xff]   ;;  %10529 = vmatprep.subr.bf16.mxu0 %v18557_v27 }
 0x8ce   : > { %v8565_v11 = vmax.f32 %v8543_v5, 0.0  ;;  %v18609_v27 = vld [vmem:[%s24786_s8 + $0x6c0] ss:$16 sps:$4 sm:$0xff]  }
 0x8cf   : > { %v8563_v56 = vmax.f32 %v8535_v31, 0.0 }
 0x8d0   : > { %v8571_v19 = vpack.c.bf16 %v8565_v11, %v8564_v53  ;;  %10530 = vmatpush1.bf16.msra.mxu0 %v18555_v32  ;;  %v18617_v32 = vld [vmem:[%s24786_s8 + $0x6e4] ss:$16 sps:$4 sm:$0xff]  }
 0x8d1   : > { %v8570_v39 = vpack.c.bf16 %v8563_v56, %v8562_v17  ;;  %10531 = vmatprep.subr.bf16.mxu0 %v18563_v30  ;;  %v18615_v30 = vld [vmem:[%s24786_s8 + $0x6e0] ss:$16 sps:$4 sm:$0xff]  }
 0x8d3   : > { %17634 = vmatpush3.bf16.msra.mxu1 %v8570_v39 }
 0x8d4   : > { %17635 = vmatprep.subr.bf16.mxu1 %v24901_v29 }
 0x8d7   : > { %17636 = vmatpush3.bf16.msra.mxu1 %v8571_v19 }
 0x8d8   : > { %17637 = vmatprep.subr.bf16.mxu1 %v24901_v29 }
 0x8d9   : > { %v17631_v55 = vpop.f32.mrb[192].mxu1 }
 0x8da   : > { %v8556_v18 = vadd.f32 %v17631_v55, %v8491_v49  ;;  %v8547_v2 = vpop.f32.mrb[193].mxu1 }
 0x8db   : > { %v8548_v61 = vadd.f32 %v8547_v2, %v8483_v8  ;;  %v17632_v63 = vpop.f32.mrb[194].mxu1  ;;  %v18561_v8 = vld [vmem:[%s24786_s8 + $0x5c0] ss:$16 sps:$4 sm:$0xff]  }
 0x8dc   : > { %v8559_v40 = vadd.f32 %v17632_v63, %v8494_v54  ;;  %v8550_v9 = vpop.f32.mrb[195].mxu1  ;;  %v8568_v10 = vmax.f32 %v8556_v18, 0.0  ;;  %10532 = vmatpush1.bf16.msra.mxu0 %v18561_v8  ;;  %v18623_v8 = vld [vmem:[%s24786_s8 + $0x704] ss:$16 sps:$4 sm:$0xff]  }
 0x8dd   : > { %v8551_v48 = vadd.f32 %v8550_v9, %v8486_v43  ;;  %v8566_v4 = vmax.f32 %v8548_v61, 0.0  ;;  %v18566_v43 = vld [vmem:[%s24786_s8 + $0xc] ss:$16 sps:$4 sm:$0xff]   ;;  %10533 = vmatprep.subr.bf16.mxu0 %v18569_v21  ;;  %v18564_v61 = vld [vmem:[%s24786_s8 + $0x8] ss:$16 sps:$4 sm:$0xff]  }
 0x8de   : > { %v8569_v12 = vmax.f32 %v8559_v40, 0.0  ;;  %v18572_v40 = vld [vmem:[%s24786_s8 + $0x2c] ss:$16 sps:$4 sm:$0xff]   ;;  %v18621_v21 = vld [vmem:[%s24786_s8 + $0x700] ss:$16 sps:$4 sm:$0xff]  }
 0x8df   : > { %v8567_v16 = vmax.f32 %v8551_v48, 0.0  ;;  %v18570_v48 = vld [vmem:[%s24786_s8 + $0x28] ss:$16 sps:$4 sm:$0xff]  }
 0x8e0   : > { %v8573_v1 = vpack.c.bf16 %v8569_v12, %v8568_v10  ;;  %10534 = vmatpush1.bf16.msra.mxu0 %v18567_v6  ;;  %v18573_v10 = vld [vmem:[%s24786_s8 + $0x600] ss:$16 sps:$4 sm:$0xff]  }
 0x8e1   : > { %v8572_v15 = vpack.c.bf16 %v8567_v16, %v8566_v4  ;;  %10826 = vmatprep.subr.bf16.mxu0 %v18575_v44  ;;  %v18578_v4 = vld [vmem:[%s24786_s8 + $0x4c] ss:$16 sps:$4 sm:$0xff]   ;;  %v18581_v16 = vld [vmem:[%s24786_s8 + $0x624] ss:$16 sps:$4 sm:$0xff]  }
 0x8e2   : > { %v18626_v44 = vld [vmem:[%s24786_s8 + $0x144] ss:$16 sps:$4 sm:$0xff]  }
 0x8e3   : > { %17638 = vmatpush3.bf16.msra.mxu1 %v8572_v15 }
 0x8e4   : > { %17639 = vmatprep.subr.bf16.mxu1 %v24901_v29 }
 0x8e7   : > { %17640 = vmatpush3.bf16.msra.mxu1 %v8573_v1 }
 0x8e8   : > { %17645 = vmatprep.subr.bf16.mxu1 %v24901_v29 }
 0x8ea   : > { %17642 = vmatmul.mubr.msk.bf16.vlgmr.msra.gmra.mrb[196].mxu1 %vm1504_vm2, %v18521_v60  ;;  %v18584_v60 = vld [vmem:[%s24786_s8 + $0x6c] ss:$16 sps:$4 sm:$0xff]  }
 0x8eb   : > { %17646 = vmatpush3.bf16.msra.mxu1 %v8570_v39  ;;  %17653 = vmatprep.mubr.msk.bf16.mxu1 %vm19389_vm1, %v24901_v29 }
 0x8ec   : > { %17647 = vmatprep.subr.bf16.mxu1 %v24901_v29 }
 0x8ef   : > { %17648 = vmatpush3.bf16.msra.mxu1 %v8571_v19 }
 0x8f0   : > { %17649 = vmatprep.subr.bf16.mxu1 %v24901_v29 }
 0x8f3   : > { %17650 = vmatpush3.bf16.msra.mxu1 %v8572_v15 }
 0x8f4   : > { %17651 = vmatprep.subr.bf16.mxu1 %v24901_v29 }
 0x8f7   : > { %17652 = vmatpush3.bf16.msra.mxu1 %v8573_v1 }
 0x8f8   : > { %17657 = vmatprep.subr.bf16.mxu1 %v24901_v29 }
 0x8fa   : > { %17654 = vmatmul.mubr.msk.bf16.vlgmr.msra.gmra.mrb[200].mxu1 %vm1504_vm2, %v18522_v35  ;;  %v18587_v35 = vld [vmem:[%s24786_s8 + $0x644] ss:$16 sps:$4 sm:$0xff]  }
 0x8fb   : > { %17658 = vmatpush3.bf16.msra.mxu1 %v8570_v39  ;;  %17665 = vmatprep.mubr.msk.bf16.mxu1 %vm19389_vm1, %v24901_v29 }
 0x8fc   : > { %17659 = vmatprep.subr.bf16.mxu1 %v24901_v29 }
 0x8ff   : > { %17660 = vmatpush3.bf16.msra.mxu1 %v8571_v19 }
 0x900   : > { %17661 = vmatprep.subr.bf16.mxu1 %v24901_v29 }
 0x903   : > { %17662 = vmatpush3.bf16.msra.mxu1 %v8572_v15 }
 0x904   : > { %17663 = vmatprep.subr.bf16.mxu1 %v24901_v29 }
 0x907   : > { %17664 = vmatpush3.bf16.msra.mxu1 %v8573_v1 }
 0x908   : > { %17669 = vmatprep.subr.bf16.mxu1 %v24901_v29 }
 0x90a   : > { %17666 = vmatmul.mubr.msk.bf16.vlgmr.msra.gmra.mrb[204].mxu1 %vm1504_vm2, %v18523_v20  ;;  %v18582_v20 = vld [vmem:[%s24786_s8 + $0x68] ss:$16 sps:$4 sm:$0xff]  }
 0x90b   : > { %17670 = vmatpush3.bf16.msra.mxu1 %v8570_v39  ;;  %17677 = vmatprep.mubr.msk.bf16.mxu1 %vm19389_vm1, %v24901_v29 }
 0x90c   : > { %17671 = vmatprep.subr.bf16.mxu1 %v24901_v29 }
 0x90f   : > { %17672 = vmatpush3.bf16.msra.mxu1 %v8571_v19 }
 0x910   : > { %17673 = vmatprep.subr.bf16.mxu1 %v24901_v29 }
 0x913   : > { %17674 = vmatpush3.bf16.msra.mxu1 %v8572_v15  ;;  %v18579_v15 = vld [vmem:[%s24786_s8 + $0x620] ss:$16 sps:$4 sm:$0xff]  }
 0x914   : > { %17675 = vmatprep.subr.bf16.mxu1 %v24901_v29  ;;  %v18534_v29 = vld [vmem:[%s24786_s8 + $0x20] ss:$16 sps:$4 sm:$0xff]  }
 0x917   : > { %17676 = vmatpush3.bf16.msra.mxu1 %v8573_v1  ;;  %v18576_v1 = vld [vmem:[%s24786_s8 + $0x48] ss:$16 sps:$4 sm:$0xff]  }
 0x918   : > { %8981 = vmatprep.subr.bf16.mxu1 %v18533_v3  ;;  %v18585_v3 = vld [vmem:[%s24786_s8 + $0x640] ss:$16 sps:$4 sm:$0xff]  }
 0x91a   : > { %17678 = vmatmul.mubr.msk.bf16.vlgmr.msra.gmra.mrb[208].mxu1 %vm1504_vm2, %v18524_v58  ;;  %v18590_v58 = vld [vmem:[%s24786_s8 + $0x8c] ss:$16 sps:$4 sm:$0xff]  }
 0x91b   : > { %8982 = vmatpush1.bf16.msra.mxu1 %v18531_v13  ;;  %9013 = vmatprep.mubr.bf16.mxu1 %v24857_v47  ;;  %v18593_v13 = vld [vmem:[%s24786_s8 + $0x664] ss:$16 sps:$4 sm:$0xff]  }
 0x91c   : > { %8983 = vmatprep.subr.bf16.mxu1 %v18536_v24  ;;  %v18588_v24 = vld [vmem:[%s24786_s8 + $0x88] ss:$16 sps:$4 sm:$0xff]  }
 0x91f   : > { %8984 = vmatpush1.bf16.msra.mxu1 %v18534_v29  ;;  %v18591_v29 = vld [vmem:[%s24786_s8 + $0x660] ss:$16 sps:$4 sm:$0xff]  }
 0x920   : > { %8985 = vmatprep.subr.bf16.mxu1 %v18539_v57  ;;  %v18596_v57 = vld [vmem:[%s24786_s8 + $0xac] ss:$16 sps:$4 sm:$0xff]  }
 0x923   : > { %8986 = vmatpush1.bf16.msra.mxu1 %v18537_v42  ;;  %v18599_v42 = vld [vmem:[%s24786_s8 + $0x684] ss:$16 sps:$4 sm:$0xff]  }
 0x924   : > { %8987 = vmatprep.subr.bf16.mxu1 %v18542_v7  ;;  %v18597_v7 = vld [vmem:[%s24786_s8 + $0x680] ss:$16 sps:$4 sm:$0xff]  }
 0x927   : > { %8988 = vmatpush1.bf16.msra.mxu1 %v18540_v34  ;;  %v18594_v34 = vld [vmem:[%s24786_s8 + $0xa8] ss:$16 sps:$4 sm:$0xff]  }
 0x928   : > { %8989 = vmatprep.subr.bf16.mxu1 %v18545_v46  ;;  %v18605_v46 = vld [vmem:[%s24786_s8 + $0x6a4] ss:$16 sps:$4 sm:$0xff]  }
 0x92b   : > { %8990 = vmatpush1.bf16.msra.mxu1 %v18543_v38  ;;  %v18602_v38 = vld [vmem:[%s24786_s8 + $0xcc] ss:$16 sps:$4 sm:$0xff]  }
 0x92c   : > { %8991 = vmatprep.subr.bf16.mxu1 %v18548_v26  ;;  %v18603_v26 = vld [vmem:[%s24786_s8 + $0x6a0] ss:$16 sps:$4 sm:$0xff]  }
 0x92f   : > { %8992 = vmatpush1.bf16.msra.mxu1 %v18546_v59  ;;  %v18600_v59 = vld [vmem:[%s24786_s8 + $0xc8] ss:$16 sps:$4 sm:$0xff]  }
 0x930   : > { %8993 = vmatprep.subr.bf16.mxu1 %v18554_v41  ;;  %v18606_v41 = vld [vmem:[%s24786_s8 + $0xe8] ss:$16 sps:$4 sm:$0xff]  }
 0x933   : > { %8994 = vmatpush1.bf16.msra.mxu1 %v18552_v22  ;;  %v18614_v22 = vld [vmem:[%s24786_s8 + $0x104] ss:$16 sps:$4 sm:$0xff]  }
 0x934   : > { %8995 = vmatprep.subr.bf16.mxu1 %v18560_v50  ;;  %v18612_v50 = vld [vmem:[%s24786_s8 + $0x100] ss:$16 sps:$4 sm:$0xff]  }
 0x937   : > { %8996 = vmatpush1.bf16.msra.mxu1 %v18558_v62  ;;  %v18620_v62 = vld [vmem:[%s24786_s8 + $0x124] ss:$16 sps:$4 sm:$0xff]  }
 0x938   : > { %9022 = vmatprep.subr.bf16.mxu1 %v18566_v43  ;;  %v18618_v43 = vld [vmem:[%s24786_s8 + $0x120] ss:$16 sps:$4 sm:$0xff]  }
 0x9bd   : > { %v8618_v14 = vpop.f32.mrb[196].mxu1 }
 0x9be   : > { %v17643_v0 = vpop.f32.mrb[197].mxu1 }
 0x9bf   : > { %v8621_v36 = vpop.f32.mrb[198].mxu1  ;;  %v18624_v0 = vld [vmem:[%s24786_s8 + $0x140] ss:$16 sps:$4 sm:$0xff]  }
 0x9c0   : > { %v17644_v49 = vpop.f32.mrb[199].mxu1 }
 0x9c1   : > { %v18632_v49 = vld [vmem:[%s24786_s8 + $0x164] ss:$16 sps:$4 sm:$0xff]  }
 0x9cd   : > { %v8670_v54 = vpop.f32.mrb[200].mxu1 }
 0x9ce   : > { %v8781_v45 = vmax.f32 %v8618_v14, %v8670_v54  ;;  %v17655_v52 = vpop.f32.mrb[201].mxu1  ;;  %v18629_v14 = vld [vmem:[%s24786_s8 + $0x724] ss:$16 sps:$4 sm:$0xff]  }
 0x9cf   : > { %v8673_v28 = vpop.f32.mrb[202].mxu1  ;;  %v18635_v54 = vld [vmem:[%s24786_s8 + $0x744] ss:$16 sps:$4 sm:$0xff]   ;;  %v18633_v52 = vld [vmem:[%s24786_s8 + $0x740] ss:$16 sps:$4 sm:$0xff]  }
 0x9d0   : > { %v8782_v33 = vmax.f32 %v8621_v36, %v8673_v28  ;;  %v17656_v37 = vpop.f32.mrb[203].mxu1  ;;  %v18627_v36 = vld [vmem:[%s24786_s8 + $0x720] ss:$16 sps:$4 sm:$0xff]   ;;  %v18638_v28 = vld [vmem:[%s24786_s8 + $0x184] ss:$16 sps:$4 sm:$0xff]  }
 0x9d1   : > { %v18636_v37 = vld [vmem:[%s24786_s8 + $0x180] ss:$16 sps:$4 sm:$0xff]  }
 0x9dd   : > { %v8722_v5 = vpop.f32.mrb[204].mxu1 }
 0x9de   : > { %v17667_v25 = vpop.f32.mrb[205].mxu1 }
 0x9df   : > { %v8725_v31 = vpop.f32.mrb[206].mxu1  ;;  %v18644_v25 = vld [vmem:[%s24786_s8 + $0x1a4] ss:$16 sps:$4 sm:$0xff]  }
 0x9e0   : > { %v17668_v53 = vpop.f32.mrb[207].mxu1 }
 0x9e1   : > { %v18642_v53 = vld [vmem:[%s24786_s8 + $0x1a0] ss:$16 sps:$4 sm:$0xff]  }
 0x9ed   : > { %v8774_v11 = vpop.f32.mrb[208].mxu1 }
 0x9ee   : > { %v8783_v17 = vmax.f32 %v8722_v5, %v8774_v11  ;;  %v17679_v56 = vpop.f32.mrb[209].mxu1  ;;  %v18639_v5 = vld [vmem:[%s24786_s8 + $0x760] ss:$16 sps:$4 sm:$0xff]  }
 0x9ef   : > { %v8777_v19 = vpop.f32.mrb[210].mxu1  ;;  %v18645_v11 = vld [vmem:[%s24786_s8 + $0x780] ss:$16 sps:$4 sm:$0xff]   ;;  %v18653_v56 = vld [vmem:[%s24786_s8 + $0x7a4] ss:$16 sps:$4 sm:$0xff]  }
 0x9f0   : > { %v8785_v39 = vmax.f32 %v8781_v45, %v8783_v17  ;;  %v8784_v55 = vmax.f32 %v8725_v31, %v8777_v19  ;;  %v17680_v18 = vpop.f32.mrb[211].mxu1  ;;  %v18630_v45 = vld [vmem:[%s24786_s8 + $0x160] ss:$16 sps:$4 sm:$0xff]   ;;  %v18647_v31 = vld [vmem:[%s24786_s8 + $0x784] ss:$16 sps:$4 sm:$0xff]  }
 0x9f1   : > { %v18650_v17 = vld [vmem:[%s24786_s8 + $0x1c4] ss:$16 sps:$4 sm:$0xff]   ;;  %v18648_v19 = vld [vmem:[%s24786_s8 + $0x1c0] ss:$16 sps:$4 sm:$0xff]  }
 0x9f2   : > { %v8786_v2 = vmax.f32 %v8782_v33, %v8784_v55  ;;  %v18641_v33 = vld [vmem:[%s24786_s8 + $0x764] ss:$16 sps:$4 sm:$0xff]  }
 0x9f3   : > { %v18656_v55 = vld [vmem:[%s24786_s8 + $0x1e4] ss:$16 sps:$4 sm:$0xff]  }
 0x9f4   : > { %v22895_v63 = vpack.c.bf16 %v8786_v2, %v8785_v39  ;;  %v18651_v39 = vld [vmem:[%s24786_s8 + $0x7a0] ss:$16 sps:$4 sm:$0xff]   ;;  %v18659_v18 = vld [vmem:[%s24786_s8 + $0x7c4] ss:$16 sps:$4 sm:$0xff]  }
 0x9f5   : > { %v18654_v2 = vld [vmem:[%s24786_s8 + $0x1e0] ss:$16 sps:$4 sm:$0xff]  }
 0x9f6   : > { %v22901_v9 = vshrl.u32 %v22895_v63, 16  ;;  %9014 = vmatmul.mubr.bf16.vlgmr.msra.gmra.mrb[212].mxu1 %v22895_v63  ;;  %v10664_v6 = vrot.slane %v22895_v63, 3 }
 0x9f7   : > { %9023 = vmatpush1.bf16.msra.mxu1 %v18564_v61  ;;  %9054 = vmatprep.mubr.bf16.mxu1 %v24857_v47  ;;  %v18657_v61 = vld [vmem:[%s24786_s8 + $0x7c0] ss:$16 sps:$4 sm:$0xff]  }
 0x9f8   : > { %9024 = vmatprep.subr.bf16.mxu1 %v18572_v40  ;;  %v10357_v12 = vrot.slane %v22901_v9, 2  ;;  %v18662_v40 = vld [vmem:[%s24786_s8 + $0x10c] ss:$16 sps:$4 sm:$0xff]  }
 0x9fa   : > { %10552 = vmatmul.mubr.bf16.vlgmr.msra.gmra.mrb[140].mxu0 %v10357_v12 }
 0x9fb   : > { %9025 = vmatpush1.bf16.msra.mxu1 %v18570_v48  ;;  %10827 = vmatpush1.bf16.msra.mxu0 %v18573_v10  ;;  %v18665_v48 = vld [vmem:[%s24786_s8 + $0x7e4] ss:$16 sps:$4 sm:$0xff]   ;;  %v18660_v10 = vld [vmem:[%s24786_s8 + $0x108] ss:$16 sps:$4 sm:$0xff]  }
 0x9fc   : > { %9026 = vmatprep.subr.bf16.mxu1 %v18578_v4  ;;  %10828 = vmatprep.subr.bf16.mxu0 %v18581_v16  ;;  %v18663_v4 = vld [vmem:[%s24786_s8 + $0x7e0] ss:$16 sps:$4 sm:$0xff]   ;;  %v18668_v16 = vld [vmem:[%s24786_s8 + $0x12c] ss:$16 sps:$4 sm:$0xff]  }
 0x9fd   : > { %10858 = vmatprep.mubr.bf16.mxu0 %v24857_v47 }
 0x9ff   : > { %9027 = vmatpush1.bf16.msra.mxu1 %v18576_v1  ;;  %10829 = vmatpush1.bf16.msra.mxu0 %v18579_v15  ;;  %v18671_v1 = vld [vmem:[%s24786_s8 + $0x804] ss:$16 sps:$4 sm:$0xff]   ;;  %v18666_v15 = vld [vmem:[%s24786_s8 + $0x128] ss:$16 sps:$4 sm:$0xff]  }
 0xa00   : > { %9028 = vmatprep.subr.bf16.mxu1 %v18584_v60  ;;  %10830 = vmatprep.subr.bf16.mxu0 %v18587_v35  ;;  %v18669_v60 = vld [vmem:[%s24786_s8 + $0x800] ss:$16 sps:$4 sm:$0xff]   ;;  %v10971_v35 = vrot.slane %v22901_v9, 3 }
 0xa03   : > { %9029 = vmatpush1.bf16.msra.mxu1 %v18582_v20  ;;  %10831 = vmatpush1.bf16.msra.mxu0 %v18585_v3  ;;  %v18674_v20 = vld [vmem:[%s24786_s8 + $0x14c] ss:$16 sps:$4 sm:$0xff]   ;;  %v18677_v3 = vld [vmem:[%s24786_s8 + $0x824] ss:$16 sps:$4 sm:$0xff]  }
 0xa04   : > { %9030 = vmatprep.subr.bf16.mxu1 %v18590_v58  ;;  %10832 = vmatprep.subr.bf16.mxu0 %v18593_v13  ;;  %v18672_v58 = vld [vmem:[%s24786_s8 + $0x148] ss:$16 sps:$4 sm:$0xff]   ;;  %v18675_v13 = vld [vmem:[%s24786_s8 + $0x820] ss:$16 sps:$4 sm:$0xff]  }
 0xa07   : > { %9031 = vmatpush1.bf16.msra.mxu1 %v18588_v24  ;;  %10833 = vmatpush1.bf16.msra.mxu0 %v18591_v29  ;;  %v18680_v24 = vld [vmem:[%s24786_s8 + $0x16c] ss:$16 sps:$4 sm:$0xff]   ;;  %v18683_v29 = vld [vmem:[%s24786_s8 + $0x844] ss:$16 sps:$4 sm:$0xff]  }
 0xa08   : > { %9032 = vmatprep.subr.bf16.mxu1 %v18596_v57  ;;  %10834 = vmatprep.subr.bf16.mxu0 %v18599_v42  ;;  %v18678_v57 = vld [vmem:[%s24786_s8 + $0x168] ss:$16 sps:$4 sm:$0xff]   ;;  %v18681_v42 = vld [vmem:[%s24786_s8 + $0x840] ss:$16 sps:$4 sm:$0xff]  }
 0xa0b   : > { %9033 = vmatpush1.bf16.msra.mxu1 %v18594_v34  ;;  %10835 = vmatpush1.bf16.msra.mxu0 %v18597_v7  ;;  %v18686_v34 = vld [vmem:[%s24786_s8 + $0x18c] ss:$16 sps:$4 sm:$0xff]   ;;  %v18689_v7 = vld [vmem:[%s24786_s8 + $0x864] ss:$16 sps:$4 sm:$0xff]  }
 0xa0c   : > { %9034 = vmatprep.subr.bf16.mxu1 %v18602_v38  ;;  %10836 = vmatprep.subr.bf16.mxu0 %v18605_v46  ;;  %v18684_v38 = vld [vmem:[%s24786_s8 + $0x188] ss:$16 sps:$4 sm:$0xff]   ;;  %v18687_v46 = vld [vmem:[%s24786_s8 + $0x860] ss:$16 sps:$4 sm:$0xff]  }
 0xa0f   : > { %9035 = vmatpush1.bf16.msra.mxu1 %v18600_v59  ;;  %10837 = vmatpush1.bf16.msra.mxu0 %v18603_v26  ;;  %v18692_v59 = vld [vmem:[%s24786_s8 + $0x1ac] ss:$16 sps:$4 sm:$0xff]   ;;  %v18695_v26 = vld [vmem:[%s24786_s8 + $0x884] ss:$16 sps:$4 sm:$0xff]  }
 0xa10   : > { %9036 = vmatprep.subr.bf16.mxu1 %v18608_v23  ;;  %10838 = vmatprep.subr.bf16.mxu0 %v18611_v51  ;;  %v18690_v23 = vld [vmem:[%s24786_s8 + $0x1a8] ss:$16 sps:$4 sm:$0xff]   ;;  %v18693_v51 = vld [vmem:[%s24786_s8 + $0x880] ss:$16 sps:$4 sm:$0xff]  }
 0xa13   : > { %9037 = vmatpush1.bf16.msra.mxu1 %v18606_v41  ;;  %10839 = vmatpush1.bf16.msra.mxu0 %v18609_v27  ;;  %v18698_v41 = vld [vmem:[%s24786_s8 + $0x1cc] ss:$16 sps:$4 sm:$0xff]   ;;  %v18701_v27 = vld [vmem:[%s24786_s8 + $0x8a4] ss:$16 sps:$4 sm:$0xff]  }
 0xa14   : > { %9290 = vmatprep.subr.bf16.mxu1 %v18614_v22  ;;  %10840 = vmatprep.subr.bf16.mxu0 %v18617_v32  ;;  %v18696_v22 = vld [vmem:[%s24786_s8 + $0x1c8] ss:$16 sps:$4 sm:$0xff]   ;;  %v18699_v32 = vld [vmem:[%s24786_s8 + $0x8a0] ss:$16 sps:$4 sm:$0xff]  }
 0xa16   : > { %9055 = vmatmul.mubr.bf16.vlgmr.msra.gmra.mrb[216].mxu1 %v22895_v63 }
 0xa17   : > { %9291 = vmatpush1.bf16.msra.mxu1 %v18612_v50  ;;  %10841 = vmatpush1.bf16.msra.mxu0 %v18615_v30  ;;  %v18704_v50 = vld [vmem:[%s24786_s8 + $0x1ec] ss:$16 sps:$4 sm:$0xff]   ;;  %v18707_v30 = vld [vmem:[%s24786_s8 + $0x8c4] ss:$16 sps:$4 sm:$0xff]  }
 0xa18   : > { %9292 = vmatprep.subr.bf16.mxu1 %v18620_v62  ;;  %11133 = vmatprep.subr.bf16.mxu0 %v18623_v8  ;;  %v18702_v62 = vld [vmem:[%s24786_s8 + $0x1e8] ss:$16 sps:$4 sm:$0xff]   ;;  %v18705_v8 = vld [vmem:[%s24786_s8 + $0x8c0] ss:$16 sps:$4 sm:$0xff]  }
 0xa19   : > { %9322 = vmatprep.mubr.bf16.mxu1 %v24857_v47 }
 0xa1a   : > { %10859 = vmatmul.mubr.bf16.vlgmr.msra.gmra.mrb[144].mxu0 %v10664_v6 }
 0xa1b   : > { %9293 = vmatpush1.bf16.msra.mxu1 %v18618_v43  ;;  %11134 = vmatpush1.bf16.msra.mxu0 %v18621_v21  ;;  %v18710_v43 = vld [vmem:[%s24786_s8 + $0x204] ss:$16 sps:$4 sm:$0xff]  }
 0xa1c   : > { %9294 = vmatprep.subr.bf16.mxu1 %v18626_v44  ;;  %11135 = vmatprep.subr.bf16.mxu0 %v18629_v14  ;;  %v18713_v21 = vld [vmem:[%s24786_s8 + $0x8e4] ss:$16 sps:$4 sm:$0xff]   ;;  %v18708_v44 = vld [vmem:[%s24786_s8 + $0x200] ss:$16 sps:$4 sm:$0xff]  }
 0xa1d   : > { %11165 = vmatprep.mubr.bf16.mxu0 %v24857_v47  ;;  %v18711_v14 = vld [vmem:[%s24786_s8 + $0x8e0] ss:$16 sps:$4 sm:$0xff]  }
 0xa1f   : > { %9295 = vmatpush1.bf16.msra.mxu1 %v18624_v0  ;;  %11136 = vmatpush1.bf16.msra.mxu0 %v18627_v36  ;;  %v18716_v0 = vld [vmem:[%s24786_s8 + $0x224] ss:$16 sps:$4 sm:$0xff]  }
 0xa20   : > { %9296 = vmatprep.subr.bf16.mxu1 %v18632_v49  ;;  %11137 = vmatprep.subr.bf16.mxu0 %v18635_v54  ;;  %v18719_v36 = vld [vmem:[%s24786_s8 + $0x904] ss:$16 sps:$4 sm:$0xff]   ;;  %v18714_v49 = vld [vmem:[%s24786_s8 + $0x220] ss:$16 sps:$4 sm:$0xff]  }
 0xa21   : > { %v18717_v54 = vld [vmem:[%s24786_s8 + $0x900] ss:$16 sps:$4 sm:$0xff]  }
 0xa23   : > { %9297 = vmatpush1.bf16.msra.mxu1 %v18630_v45  ;;  %11138 = vmatpush1.bf16.msra.mxu0 %v18633_v52  ;;  %v11278_v45 = vrot.slane %v22895_v63, 4  ;;  %v18722_v52 = vld [vmem:[%s24786_s8 + $0x244] ss:$16 sps:$4 sm:$0xff]  }
 0xa24   : > { %9298 = vmatprep.subr.bf16.mxu1 %v18638_v28  ;;  %11139 = vmatprep.subr.bf16.mxu0 %v18641_v33  ;;  %v18725_v28 = vld [vmem:[%s24786_s8 + $0x924] ss:$16 sps:$4 sm:$0xff]   ;;  %v18720_v33 = vld [vmem:[%s24786_s8 + $0x240] ss:$16 sps:$4 sm:$0xff]  }
 0xa27   : > { %9299 = vmatpush1.bf16.msra.mxu1 %v18636_v37  ;;  %11140 = vmatpush1.bf16.msra.mxu0 %v18639_v5  ;;  %v18723_v37 = vld [vmem:[%s24786_s8 + $0x920] ss:$16 sps:$4 sm:$0xff]   ;;  %v18728_v5 = vld [vmem:[%s24786_s8 + $0x264] ss:$16 sps:$4 sm:$0xff]  }
 0xa28   : > { %9300 = vmatprep.subr.bf16.mxu1 %v18644_v25  ;;  %11141 = vmatprep.subr.bf16.mxu0 %v18647_v31  ;;  %v18731_v25 = vld [vmem:[%s24786_s8 + $0x944] ss:$16 sps:$4 sm:$0xff]   ;;  %v18726_v31 = vld [vmem:[%s24786_s8 + $0x260] ss:$16 sps:$4 sm:$0xff]  }
 0xa2b   : > { %9301 = vmatpush1.bf16.msra.mxu1 %v18642_v53  ;;  %11142 = vmatpush1.bf16.msra.mxu0 %v18645_v11  ;;  %v18729_v53 = vld [vmem:[%s24786_s8 + $0x940] ss:$16 sps:$4 sm:$0xff]   ;;  %v18734_v11 = vld [vmem:[%s24786_s8 + $0x284] ss:$16 sps:$4 sm:$0xff]  }
 0xa2c   : > { %9302 = vmatprep.subr.bf16.mxu1 %v18650_v17  ;;  %11143 = vmatprep.subr.bf16.mxu0 %v18653_v56  ;;  %v18737_v17 = vld [vmem:[%s24786_s8 + $0x964] ss:$16 sps:$4 sm:$0xff]   ;;  %v18732_v56 = vld [vmem:[%s24786_s8 + $0x280] ss:$16 sps:$4 sm:$0xff]  }
 0xa2f   : > { %9303 = vmatpush1.bf16.msra.mxu1 %v18648_v19  ;;  %11144 = vmatpush1.bf16.msra.mxu0 %v18651_v39  ;;  %v18735_v19 = vld [vmem:[%s24786_s8 + $0x960] ss:$16 sps:$4 sm:$0xff]   ;;  %v18740_v39 = vld [vmem:[%s24786_s8 + $0x2a4] ss:$16 sps:$4 sm:$0xff]  }
 0xa30   : > { %9304 = vmatprep.subr.bf16.mxu1 %v18656_v55  ;;  %11145 = vmatprep.subr.bf16.mxu0 %v18659_v18  ;;  %v18743_v55 = vld [vmem:[%s24786_s8 + $0x984] ss:$16 sps:$4 sm:$0xff]   ;;  %v18738_v18 = vld [vmem:[%s24786_s8 + $0x2a0] ss:$16 sps:$4 sm:$0xff]  }
 0xa33   : > { %9305 = vmatpush1.bf16.msra.mxu1 %v18654_v2  ;;  %11146 = vmatpush1.bf16.msra.mxu0 %v18657_v61  ;;  %v18741_v2 = vld [vmem:[%s24786_s8 + $0x980] ss:$16 sps:$4 sm:$0xff]   ;;  %v18746_v61 = vld [vmem:[%s24786_s8 + $0x2c4] ss:$16 sps:$4 sm:$0xff]  }
 0xa34   : > { %9331 = vmatprep.subr.bf16.mxu1 %v18662_v40  ;;  %11147 = vmatprep.subr.bf16.mxu0 %v18665_v48  ;;  %v18749_v40 = vld [vmem:[%s24786_s8 + $0x9a4] ss:$16 sps:$4 sm:$0xff]   ;;  %v18744_v48 = vld [vmem:[%s24786_s8 + $0x2c0] ss:$16 sps:$4 sm:$0xff]  }
 0xa36   : > { %9323 = vmatmul.mubr.bf16.vlgmr.msra.gmra.mrb[220].mxu1 %v22901_v9 }
 0xa37   : > { %9332 = vmatpush1.bf16.msra.mxu1 %v18660_v10  ;;  %11148 = vmatpush1.bf16.msra.mxu0 %v18663_v4  ;;  %v18747_v10 = vld [vmem:[%s24786_s8 + $0x9a0] ss:$16 sps:$4 sm:$0xff]   ;;  %v18752_v4 = vld [vmem:[%s24786_s8 + $0x2e4] ss:$16 sps:$4 sm:$0xff]  }
 0xa38   : > { %9333 = vmatprep.subr.bf16.mxu1 %v18668_v16  ;;  %11440 = vmatprep.subr.bf16.mxu0 %v18671_v1  ;;  %v18755_v16 = vld [vmem:[%s24786_s8 + $0x9c4] ss:$16 sps:$4 sm:$0xff]   ;;  %v18750_v1 = vld [vmem:[%s24786_s8 + $0x2e0] ss:$16 sps:$4 sm:$0xff]  }
 0xa39   : > { %9363 = vmatprep.mubr.bf16.mxu1 %v24857_v47 }
 0xa3a   : > { %11166 = vmatmul.mubr.bf16.vlgmr.msra.gmra.mrb[148].mxu0 %v10971_v35 }
 0xa3b   : > { %9334 = vmatpush1.bf16.msra.mxu1 %v18666_v15  ;;  %11441 = vmatpush1.bf16.msra.mxu0 %v18669_v60  ;;  %v18753_v15 = vld [vmem:[%s24786_s8 + $0x9c0] ss:$16 sps:$4 sm:$0xff]   ;;  %v18758_v60 = vld [vmem:[%s24786_s8 + $0x20c] ss:$16 sps:$4 sm:$0xff]  }
 0xa3c   : > { %9335 = vmatprep.subr.bf16.mxu1 %v18674_v20  ;;  %11442 = vmatprep.subr.bf16.mxu0 %v18677_v3  ;;  %v18761_v20 = vld [vmem:[%s24786_s8 + $0x9e4] ss:$16 sps:$4 sm:$0xff]   ;;  %v18756_v3 = vld [vmem:[%s24786_s8 + $0x208] ss:$16 sps:$4 sm:$0xff]  }
 0xa3d   : > { %11472 = vmatprep.mubr.bf16.mxu0 %v24857_v47 }
 0xa3f   : > { %9336 = vmatpush1.bf16.msra.mxu1 %v18672_v58  ;;  %11443 = vmatpush1.bf16.msra.mxu0 %v18675_v13  ;;  %v18759_v58 = vld [vmem:[%s24786_s8 + $0x9e0] ss:$16 sps:$4 sm:$0xff]   ;;  %v9436_v13 = vrot.slane %v22895_v63, 1 }
 0xa40   : > { %9337 = vmatprep.subr.bf16.mxu1 %v18680_v24  ;;  %11444 = vmatprep.subr.bf16.mxu0 %v18683_v29  ;;  %v18764_v24 = vld [vmem:[%s24786_s8 + $0x22c] ss:$16 sps:$4 sm:$0xff]   ;;  %v18767_v29 = vld [vmem:[%s24786_s8 + $0xa04] ss:$16 sps:$4 sm:$0xff]  }
 0xa43   : > { %9338 = vmatpush1.bf16.msra.mxu1 %v18678_v57  ;;  %11445 = vmatpush1.bf16.msra.mxu0 %v18681_v42  ;;  %v18762_v57 = vld [vmem:[%s24786_s8 + $0x228] ss:$16 sps:$4 sm:$0xff]   ;;  %v18765_v42 = vld [vmem:[%s24786_s8 + $0xa00] ss:$16 sps:$4 sm:$0xff]  }
 0xa44   : > { %9339 = vmatprep.subr.bf16.mxu1 %v18686_v34  ;;  %11446 = vmatprep.subr.bf16.mxu0 %v18689_v7  ;;  %v11585_v34 = vrot.slane %v22901_v9, 4  ;;  %v18770_v7 = vld [vmem:[%s24786_s8 + $0x24c] ss:$16 sps:$4 sm:$0xff]  }
 0xa47   : > { %9340 = vmatpush1.bf16.msra.mxu1 %v18684_v38  ;;  %11447 = vmatpush1.bf16.msra.mxu0 %v18687_v46  ;;  %v18773_v38 = vld [vmem:[%s24786_s8 + $0xa24] ss:$16 sps:$4 sm:$0xff]   ;;  %v18768_v46 = vld [vmem:[%s24786_s8 + $0x248] ss:$16 sps:$4 sm:$0xff]  }
 0xa48   : > { %9341 = vmatprep.subr.bf16.mxu1 %v18692_v59  ;;  %11448 = vmatprep.subr.bf16.mxu0 %v18695_v26  ;;  %v18771_v59 = vld [vmem:[%s24786_s8 + $0xa20] ss:$16 sps:$4 sm:$0xff]   ;;  %v18776_v26 = vld [vmem:[%s24786_s8 + $0x26c] ss:$16 sps:$4 sm:$0xff]  }
 0xa4b   : > { %9342 = vmatpush1.bf16.msra.mxu1 %v18690_v23  ;;  %11449 = vmatpush1.bf16.msra.mxu0 %v18693_v51  ;;  %v18779_v23 = vld [vmem:[%s24786_s8 + $0xa44] ss:$16 sps:$4 sm:$0xff]   ;;  %v18774_v51 = vld [vmem:[%s24786_s8 + $0x268] ss:$16 sps:$4 sm:$0xff]  }
 0xa4c   : > { %9343 = vmatprep.subr.bf16.mxu1 %v18698_v41  ;;  %11450 = vmatprep.subr.bf16.mxu0 %v18701_v27  ;;  %v18777_v41 = vld [vmem:[%s24786_s8 + $0xa40] ss:$16 sps:$4 sm:$0xff]   ;;  %v18782_v27 = vld [vmem:[%s24786_s8 + $0x28c] ss:$16 sps:$4 sm:$0xff]  }
 0xa4f   : > { %9344 = vmatpush1.bf16.msra.mxu1 %v18696_v22  ;;  %11451 = vmatpush1.bf16.msra.mxu0 %v18699_v32  ;;  %v18785_v22 = vld [vmem:[%s24786_s8 + $0xa64] ss:$16 sps:$4 sm:$0xff]   ;;  %v18780_v32 = vld [vmem:[%s24786_s8 + $0x288] ss:$16 sps:$4 sm:$0xff]  }
 0xa50   : > { %9345 = vmatprep.subr.bf16.mxu1 %v18704_v50  ;;  %11452 = vmatprep.subr.bf16.mxu0 %v18707_v30  ;;  %v18783_v50 = vld [vmem:[%s24786_s8 + $0xa60] ss:$16 sps:$4 sm:$0xff]   ;;  %v18788_v30 = vld [vmem:[%s24786_s8 + $0x2ac] ss:$16 sps:$4 sm:$0xff]  }
 0xa53   : > { %9346 = vmatpush1.bf16.msra.mxu1 %v18702_v62  ;;  %11453 = vmatpush1.bf16.msra.mxu0 %v18705_v8  ;;  %v18791_v62 = vld [vmem:[%s24786_s8 + $0xa84] ss:$16 sps:$4 sm:$0xff]   ;;  %v18786_v8 = vld [vmem:[%s24786_s8 + $0x2a8] ss:$16 sps:$4 sm:$0xff]  }
 0xa54   : > { %9598 = vmatprep.subr.bf16.mxu1 %v18710_v43  ;;  %11454 = vmatprep.subr.bf16.mxu0 %v18713_v21  ;;  %v18789_v43 = vld [vmem:[%s24786_s8 + $0xa80] ss:$16 sps:$4 sm:$0xff]   ;;  %v18794_v21 = vld [vmem:[%s24786_s8 + $0x2cc] ss:$16 sps:$4 sm:$0xff]  }
 0xa56   : > { %9364 = vmatmul.mubr.bf16.vlgmr.msra.gmra.mrb[224].mxu1 %v22901_v9 }
 0xa57   : > { %9599 = vmatpush1.bf16.msra.mxu1 %v18708_v44  ;;  %11455 = vmatpush1.bf16.msra.mxu0 %v18711_v14  ;;  %v18797_v44 = vld [vmem:[%s24786_s8 + $0xaa4] ss:$16 sps:$4 sm:$0xff]   ;;  %v18792_v14 = vld [vmem:[%s24786_s8 + $0x2c8] ss:$16 sps:$4 sm:$0xff]  }
 0xa58   : > { %9600 = vmatprep.subr.bf16.mxu1 %v18716_v0  ;;  %11747 = vmatprep.subr.bf16.mxu0 %v18719_v36  ;;  %v18795_v0 = vld [vmem:[%s24786_s8 + $0xaa0] ss:$16 sps:$4 sm:$0xff]   ;;  %v18800_v36 = vld [vmem:[%s24786_s8 + $0x2ec] ss:$16 sps:$4 sm:$0xff]  }
 0xa59   : > { %9630 = vmatprep.mubr.bf16.mxu1 %v24857_v47 }
 0xa5a   : > { %11473 = vmatmul.mubr.bf16.vlgmr.msra.gmra.mrb[152].mxu0 %v11278_v45 }
 0xa5b   : > { %9601 = vmatpush1.bf16.msra.mxu1 %v18714_v49  ;;  %11748 = vmatpush1.bf16.msra.mxu0 %v18717_v54  ;;  %v18803_v49 = vld [vmem:[%s24786_s8 + $0xac4] ss:$16 sps:$4 sm:$0xff]   ;;  %v18798_v54 = vld [vmem:[%s24786_s8 + $0x2e8] ss:$16 sps:$4 sm:$0xff]  }
 0xa5c   : > { %9602 = vmatprep.subr.bf16.mxu1 %v18722_v52  ;;  %11749 = vmatprep.subr.bf16.mxu0 %v18725_v28  ;;  %v18801_v52 = vld [vmem:[%s24786_s8 + $0xac0] ss:$16 sps:$4 sm:$0xff]   ;;  %v18806_v28 = vld [vmem:[%s24786_s8 + $0x304] ss:$16 sps:$4 sm:$0xff]  }
 0xa5d   : > { %11779 = vmatprep.mubr.bf16.mxu0 %v24857_v47 }
 0xa5f   : > { %9603 = vmatpush1.bf16.msra.mxu1 %v18720_v33  ;;  %11750 = vmatpush1.bf16.msra.mxu0 %v18723_v37  ;;  %v18809_v33 = vld [vmem:[%s24786_s8 + $0xae4] ss:$16 sps:$4 sm:$0xff]   ;;  %v18804_v37 = vld [vmem:[%s24786_s8 + $0x300] ss:$16 sps:$4 sm:$0xff]  }
 0xa60   : > { %9604 = vmatprep.subr.bf16.mxu1 %v18728_v5  ;;  %11751 = vmatprep.subr.bf16.mxu0 %v18731_v25  ;;  %v18807_v5 = vld [vmem:[%s24786_s8 + $0xae0] ss:$16 sps:$4 sm:$0xff]   ;;  %v18812_v25 = vld [vmem:[%s24786_s8 + $0x324] ss:$16 sps:$4 sm:$0xff]  }
 0xa63   : > { %9605 = vmatpush1.bf16.msra.mxu1 %v18726_v31  ;;  %11752 = vmatpush1.bf16.msra.mxu0 %v18729_v53  ;;  %v18815_v31 = vld [vmem:[%s24786_s8 + $0xb04] ss:$16 sps:$4 sm:$0xff]   ;;  %v18810_v53 = vld [vmem:[%s24786_s8 + $0x320] ss:$16 sps:$4 sm:$0xff]  }
 0xa64   : > { %9606 = vmatprep.subr.bf16.mxu1 %v18734_v11  ;;  %11753 = vmatprep.subr.bf16.mxu0 %v18737_v17  ;;  %v18813_v11 = vld [vmem:[%s24786_s8 + $0xb00] ss:$16 sps:$4 sm:$0xff]   ;;  %v11892_v17 = vrot.slane %v22895_v63, 5 }
 0xa67   : > { %9607 = vmatpush1.bf16.msra.mxu1 %v18732_v56  ;;  %11754 = vmatpush1.bf16.msra.mxu0 %v18735_v19  ;;  %v18818_v56 = vld [vmem:[%s24786_s8 + $0x344] ss:$16 sps:$4 sm:$0xff]  }
 0xa68   : > { %9608 = vmatprep.subr.bf16.mxu1 %v18740_v39  ;;  %11755 = vmatprep.subr.bf16.mxu0 %v18743_v55  ;;  %v18821_v19 = vld [vmem:[%s24786_s8 + $0xb24] ss:$16 sps:$4 sm:$0xff]   ;;  %v18816_v39 = vld [vmem:[%s24786_s8 + $0x340] ss:$16 sps:$4 sm:$0xff]  }
 0xa69   : > { %v18819_v55 = vld [vmem:[%s24786_s8 + $0xb20] ss:$16 sps:$4 sm:$0xff]  }
 0xa6b   : > { %9609 = vmatpush1.bf16.msra.mxu1 %v18738_v18  ;;  %11756 = vmatpush1.bf16.msra.mxu0 %v18741_v2  ;;  %v18824_v18 = vld [vmem:[%s24786_s8 + $0x364] ss:$16 sps:$4 sm:$0xff]  }
 0xa6c   : > { %9610 = vmatprep.subr.bf16.mxu1 %v18746_v61  ;;  %11757 = vmatprep.subr.bf16.mxu0 %v18749_v40  ;;  %v18827_v2 = vld [vmem:[%s24786_s8 + $0xb44] ss:$16 sps:$4 sm:$0xff]   ;;  %v18822_v61 = vld [vmem:[%s24786_s8 + $0x360] ss:$16 sps:$4 sm:$0xff]  }
 0xa6d   : > { %v18825_v40 = vld [vmem:[%s24786_s8 + $0xb40] ss:$16 sps:$4 sm:$0xff]  }
 0xa6f   : > { %9611 = vmatpush1.bf16.msra.mxu1 %v18744_v48  ;;  %11758 = vmatpush1.bf16.msra.mxu0 %v18747_v10  ;;  %v18830_v48 = vld [vmem:[%s24786_s8 + $0x384] ss:$16 sps:$4 sm:$0xff]  }
 0xa70   : > { %9612 = vmatprep.subr.bf16.mxu1 %v18752_v4  ;;  %11759 = vmatprep.subr.bf16.mxu0 %v18755_v16  ;;  %v18833_v10 = vld [vmem:[%s24786_s8 + $0xb64] ss:$16 sps:$4 sm:$0xff]   ;;  %v18828_v4 = vld [vmem:[%s24786_s8 + $0x380] ss:$16 sps:$4 sm:$0xff]  }
 0xa71   : > { %v18831_v16 = vld [vmem:[%s24786_s8 + $0xb60] ss:$16 sps:$4 sm:$0xff]  }
 0xa73   : > { %9613 = vmatpush1.bf16.msra.mxu1 %v18750_v1  ;;  %11760 = vmatpush1.bf16.msra.mxu0 %v18753_v15  ;;  %v18836_v1 = vld [vmem:[%s24786_s8 + $0x3a4] ss:$16 sps:$4 sm:$0xff]  }
 0xa74   : > { %9639 = vmatprep.subr.bf16.mxu1 %v18758_v60  ;;  %11761 = vmatprep.subr.bf16.mxu0 %v18761_v20  ;;  %v18839_v15 = vld [vmem:[%s24786_s8 + $0xb84] ss:$16 sps:$4 sm:$0xff]   ;;  %v18834_v60 = vld [vmem:[%s24786_s8 + $0x3a0] ss:$16 sps:$4 sm:$0xff]  }
 0xa75   : > { %v18837_v20 = vld [vmem:[%s24786_s8 + $0xb80] ss:$16 sps:$4 sm:$0xff]  }
 0xa76   : > { %9631 = vmatmul.mubr.bf16.vlgmr.msra.gmra.mrb[228].mxu1 %v9436_v13 }
 0xa77   : > { %9640 = vmatpush1.bf16.msra.mxu1 %v18756_v3  ;;  %11762 = vmatpush1.bf16.msra.mxu0 %v18759_v58  ;;  %v18842_v3 = vld [vmem:[%s24786_s8 + $0x3c4] ss:$16 sps:$4 sm:$0xff]  }
 0xa78   : > { %9641 = vmatprep.subr.bf16.mxu1 %v18764_v24  ;;  %12054 = vmatprep.subr.bf16.mxu0 %v18767_v29  ;;  %v18845_v58 = vld [vmem:[%s24786_s8 + $0xba4] ss:$16 sps:$4 sm:$0xff]   ;;  %v18843_v24 = vld [vmem:[%s24786_s8 + $0xba0] ss:$16 sps:$4 sm:$0xff]  }
 0xa79   : > { %9671 = vmatprep.mubr.bf16.mxu1 %v24857_v47  ;;  %v18848_v29 = vld [vmem:[%s24786_s8 + $0x3e4] ss:$16 sps:$4 sm:$0xff]  }
 0xa7a   : > { %11780 = vmatmul.mubr.bf16.vlgmr.msra.gmra.mrb[156].mxu0 %v11585_v34 }
 0xa7b   : > { %9642 = vmatpush1.bf16.msra.mxu1 %v18762_v57  ;;  %12055 = vmatpush1.bf16.msra.mxu0 %v18765_v42  ;;  %v18851_v57 = vld [vmem:[%s24786_s8 + $0xbc4] ss:$16 sps:$4 sm:$0xff]   ;;  %v18846_v42 = vld [vmem:[%s24786_s8 + $0x3e0] ss:$16 sps:$4 sm:$0xff]  }
 0xa7c   : > { %9643 = vmatprep.subr.bf16.mxu1 %v18770_v7  ;;  %12056 = vmatprep.subr.bf16.mxu0 %v18773_v38  ;;  %v18849_v7 = vld [vmem:[%s24786_s8 + $0xbc0] ss:$16 sps:$4 sm:$0xff]   ;;  %v18854_v38 = vld [vmem:[%s24786_s8 + $0x30c] ss:$16 sps:$4 sm:$0xff]  }
 0xa7d   : > { %12086 = vmatprep.mubr.bf16.mxu0 %v24857_v47 }
 0xa7f   : > { %9644 = vmatpush1.bf16.msra.mxu1 %v18768_v46  ;;  %12057 = vmatpush1.bf16.msra.mxu0 %v18771_v59  ;;  %v18857_v46 = vld [vmem:[%s24786_s8 + $0xbe4] ss:$16 sps:$4 sm:$0xff]   ;;  %v18852_v59 = vld [vmem:[%s24786_s8 + $0x308] ss:$16 sps:$4 sm:$0xff]  }
 0xa80   : > { %9645 = vmatprep.subr.bf16.mxu1 %v18776_v26  ;;  %12058 = vmatprep.subr.bf16.mxu0 %v18779_v23  ;;  %v18855_v26 = vld [vmem:[%s24786_s8 + $0xbe0] ss:$16 sps:$4 sm:$0xff]   ;;  %v9743_v23 = vrot.slane %v22901_v9, 1 }
 0xa83   : > { %9646 = vmatpush1.bf16.msra.mxu1 %v18774_v51  ;;  %12059 = vmatpush1.bf16.msra.mxu0 %v18777_v41  ;;  %v18860_v51 = vld [vmem:[%s24786_s8 + $0x32c] ss:$16 sps:$4 sm:$0xff]   ;;  %v18863_v41 = vld [vmem:[%s24786_s8 + $0xc04] ss:$16 sps:$4 sm:$0xff]  }
 0xa84   : > { %9647 = vmatprep.subr.bf16.mxu1 %v18782_v27  ;;  %12060 = vmatprep.subr.bf16.mxu0 %v18785_v22  ;;  %v18858_v27 = vld [vmem:[%s24786_s8 + $0x328] ss:$16 sps:$4 sm:$0xff]   ;;  %v18861_v22 = vld [vmem:[%s24786_s8 + $0xc00] ss:$16 sps:$4 sm:$0xff]  }
 0xa87   : > { %9648 = vmatpush1.bf16.msra.mxu1 %v18780_v32  ;;  %12061 = vmatpush1.bf16.msra.mxu0 %v18783_v50  ;;  %v12199_v32 = vrot.slane %v22901_v9, 5  ;;  %v18866_v50 = vld [vmem:[%s24786_s8 + $0x34c] ss:$16 sps:$4 sm:$0xff]  }
 0xa88   : > { %9649 = vmatprep.subr.bf16.mxu1 %v18788_v30  ;;  %12062 = vmatprep.subr.bf16.mxu0 %v18791_v62  ;;  %v18869_v30 = vld [vmem:[%s24786_s8 + $0xc24] ss:$16 sps:$4 sm:$0xff]   ;;  %v18864_v62 = vld [vmem:[%s24786_s8 + $0x348] ss:$16 sps:$4 sm:$0xff]  }
 0xa8b   : > { %9650 = vmatpush1.bf16.msra.mxu1 %v18786_v8  ;;  %12063 = vmatpush1.bf16.msra.mxu0 %v18789_v43  ;;  %v18867_v8 = vld [vmem:[%s24786_s8 + $0xc20] ss:$16 sps:$4 sm:$0xff]   ;;  %v18872_v43 = vld [vmem:[%s24786_s8 + $0x36c] ss:$16 sps:$4 sm:$0xff]  }
 0xa8c   : > { %9651 = vmatprep.subr.bf16.mxu1 %v18794_v21  ;;  %12064 = vmatprep.subr.bf16.mxu0 %v18797_v44  ;;  %v18875_v21 = vld [vmem:[%s24786_s8 + $0xc44] ss:$16 sps:$4 sm:$0xff]   ;;  %v18870_v44 = vld [vmem:[%s24786_s8 + $0x368] ss:$16 sps:$4 sm:$0xff]  }
 0xa8f   : > { %9652 = vmatpush1.bf16.msra.mxu1 %v18792_v14  ;;  %12065 = vmatpush1.bf16.msra.mxu0 %v18795_v0  ;;  %v18873_v14 = vld [vmem:[%s24786_s8 + $0xc40] ss:$16 sps:$4 sm:$0xff]   ;;  %v18878_v0 = vld [vmem:[%s24786_s8 + $0x38c] ss:$16 sps:$4 sm:$0xff]  }
 0xa90   : > { %9653 = vmatprep.subr.bf16.mxu1 %v18800_v36  ;;  %12066 = vmatprep.subr.bf16.mxu0 %v18803_v49  ;;  %v18881_v36 = vld [vmem:[%s24786_s8 + $0xc64] ss:$16 sps:$4 sm:$0xff]   ;;  %v18876_v49 = vld [vmem:[%s24786_s8 + $0x388] ss:$16 sps:$4 sm:$0xff]  }
 0xa93   : > { %9654 = vmatpush1.bf16.msra.mxu1 %v18798_v54  ;;  %12067 = vmatpush1.bf16.msra.mxu0 %v18801_v52  ;;  %v18879_v54 = vld [vmem:[%s24786_s8 + $0xc60] ss:$16 sps:$4 sm:$0xff]   ;;  %v18884_v52 = vld [vmem:[%s24786_s8 + $0x3ac] ss:$16 sps:$4 sm:$0xff]  }
 0xa94   : > { %9905 = vmatprep.subr.bf16.mxu1 %v18806_v28  ;;  %12068 = vmatprep.subr.bf16.mxu0 %v18809_v33  ;;  %v18887_v28 = vld [vmem:[%s24786_s8 + $0xc84] ss:$16 sps:$4 sm:$0xff]   ;;  %v18882_v33 = vld [vmem:[%s24786_s8 + $0x3a8] ss:$16 sps:$4 sm:$0xff]  }
 0xa96   : > { %9672 = vmatmul.mubr.bf16.vlgmr.msra.gmra.mrb[232].mxu1 %v9436_v13  ;;  %v18840_v13 = vld [vmem:[%s24786_s8 + $0x3c0] ss:$16 sps:$4 sm:$0xff]  }
 0xa97   : > { %9906 = vmatpush1.bf16.msra.mxu1 %v18804_v37  ;;  %12069 = vmatpush1.bf16.msra.mxu0 %v18807_v5  ;;  %v18885_v37 = vld [vmem:[%s24786_s8 + $0xc80] ss:$16 sps:$4 sm:$0xff]   ;;  %v18890_v5 = vld [vmem:[%s24786_s8 + $0x3cc] ss:$16 sps:$4 sm:$0xff]  }
 0xa98   : > { %9907 = vmatprep.subr.bf16.mxu1 %v18812_v25  ;;  %12361 = vmatprep.subr.bf16.mxu0 %v18815_v31  ;;  %v18893_v25 = vld [vmem:[%s24786_s8 + $0xca4] ss:$16 sps:$4 sm:$0xff]  }
 0xa99   : > { %9937 = vmatprep.mubr.bf16.mxu1 %v24857_v47 }
 0xa9a   : > { %12087 = vmatmul.mubr.bf16.vlgmr.msra.gmra.mrb[160].mxu0 %v11892_v17 }
 0xa9b   : > { %9908 = vmatpush1.bf16.msra.mxu1 %v18810_v53  ;;  %12362 = vmatpush1.bf16.msra.mxu0 %v18813_v11  ;;  %v18888_v11 = vld [vmem:[%s24786_s8 + $0x3c8] ss:$16 sps:$4 sm:$0xff]  }
 0xa9c   : > { %9909 = vmatprep.subr.bf16.mxu1 %v18818_v56  ;;  %12363 = vmatprep.subr.bf16.mxu0 %v18821_v19  ;;  %v18891_v56 = vld [vmem:[%s24786_s8 + $0xca0] ss:$16 sps:$4 sm:$0xff]  }
 0xa9d   : > { %12393 = vmatprep.mubr.bf16.mxu0 %v24857_v47 }
 0xa9f   : > { %9910 = vmatpush1.bf16.msra.mxu1 %v18816_v39  ;;  %12364 = vmatpush1.bf16.msra.mxu0 %v18819_v55  ;;  %v18896_v55 = vld [vmem:[%s24786_s8 + $0x3ec] ss:$16 sps:$4 sm:$0xff]  }
 0xaa0   : > { %9911 = vmatprep.subr.bf16.mxu1 %v18824_v18  ;;  %12365 = vmatprep.subr.bf16.mxu0 %v18827_v2  ;;  %v18899_v18 = vld [vmem:[%s24786_s8 + $0xcc4] ss:$16 sps:$4 sm:$0xff]  }
 0xaa3   : > { %9912 = vmatpush1.bf16.msra.mxu1 %v18822_v61  ;;  %12366 = vmatpush1.bf16.msra.mxu0 %v18825_v40 }
 0xaa4   : > { %9913 = vmatprep.subr.bf16.mxu1 %v18830_v48  ;;  %12367 = vmatprep.subr.bf16.mxu0 %v18833_v10  ;;  %v18894_v48 = vld [vmem:[%s24786_s8 + $0x3e8] ss:$16 sps:$4 sm:$0xff]   ;;  %v18897_v10 = vld [vmem:[%s24786_s8 + $0xcc0] ss:$16 sps:$4 sm:$0xff]  }
 0xaa7   : > { %9914 = vmatpush1.bf16.msra.mxu1 %v18828_v4  ;;  %12368 = vmatpush1.bf16.msra.mxu0 %v18831_v16 }
 0xaa8   : > { %9915 = vmatprep.subr.bf16.mxu1 %v18836_v1  ;;  %12369 = vmatprep.subr.bf16.mxu0 %v18839_v15  ;;  %v18902_v1 = vld [vmem:[%s24786_s8 + $0x404] ss:$16 sps:$4 sm:$0xff]  }
 0xaa9   : > { %v18905_v15 = vld [vmem:[%s24786_s8 + $0xce4] ss:$16 sps:$4 sm:$0xff]  }
 0xaab   : > { %9916 = vmatpush1.bf16.msra.mxu1 %v18834_v60  ;;  %12370 = vmatpush1.bf16.msra.mxu0 %v18837_v20  ;;  %v18900_v20 = vld [vmem:[%s24786_s8 + $0x400] ss:$16 sps:$4 sm:$0xff]  }
 0xaac   : > { %9917 = vmatprep.subr.bf16.mxu1 %v18842_v3  ;;  %12371 = vmatprep.subr.bf16.mxu0 %v18845_v58  ;;  %v18903_v3 = vld [vmem:[%s24786_s8 + $0xce0] ss:$16 sps:$4 sm:$0xff]   ;;  %v18908_v58 = vld [vmem:[%s24786_s8 + $0x424] ss:$16 sps:$4 sm:$0xff]  }
 0xaaf   : > { %9918 = vmatpush1.bf16.msra.mxu1 %v18840_v13  ;;  %12372 = vmatpush1.bf16.msra.mxu0 %v18843_v24  ;;  %v18911_v13 = vld [vmem:[%s24786_s8 + $0xd04] ss:$16 sps:$4 sm:$0xff]   ;;  %v18906_v24 = vld [vmem:[%s24786_s8 + $0x420] ss:$16 sps:$4 sm:$0xff]  }
 0xab0   : > { %9919 = vmatprep.subr.bf16.mxu1 %v18848_v29  ;;  %12373 = vmatprep.subr.bf16.mxu0 %v18851_v57  ;;  %v18909_v29 = vld [vmem:[%s24786_s8 + $0xd00] ss:$16 sps:$4 sm:$0xff]   ;;  %v12506_v57 = vrot.slane %v22895_v63, 6 }
 0xab3   : > { %9920 = vmatpush1.bf16.msra.mxu1 %v18846_v42  ;;  %12374 = vmatpush1.bf16.msra.mxu0 %v18849_v7  ;;  %v18914_v42 = vld [vmem:[%s24786_s8 + $0x444] ss:$16 sps:$4 sm:$0xff]  }
 0xab4   : > { %9946 = vmatprep.subr.bf16.mxu1 %v18854_v38  ;;  %12375 = vmatprep.subr.bf16.mxu0 %v18857_v46  ;;  %v18917_v7 = vld [vmem:[%s24786_s8 + $0xd24] ss:$16 sps:$4 sm:$0xff]   ;;  %v18912_v38 = vld [vmem:[%s24786_s8 + $0x440] ss:$16 sps:$4 sm:$0xff]  }
 0xab5   : > { %v18915_v46 = vld [vmem:[%s24786_s8 + $0xd20] ss:$16 sps:$4 sm:$0xff]  }
 0xab6   : > { %9938 = vmatmul.mubr.bf16.vlgmr.msra.gmra.mrb[236].mxu1 %v9743_v23 }
 0xab7   : > { %9947 = vmatpush1.bf16.msra.mxu1 %v18852_v59  ;;  %12376 = vmatpush1.bf16.msra.mxu0 %v18855_v26  ;;  %v18920_v59 = vld [vmem:[%s24786_s8 + $0x464] ss:$16 sps:$4 sm:$0xff]  }
 0xab8   : > { %9948 = vmatprep.subr.bf16.mxu1 %v18860_v51  ;;  %12668 = vmatprep.subr.bf16.mxu0 %v18863_v41  ;;  %v18923_v26 = vld [vmem:[%s24786_s8 + $0xd44] ss:$16 sps:$4 sm:$0xff]   ;;  %v18921_v51 = vld [vmem:[%s24786_s8 + $0xd40] ss:$16 sps:$4 sm:$0xff]  }
 0xab9   : > { %9978 = vmatprep.mubr.bf16.mxu1 %v24857_v47  ;;  %v18926_v41 = vld [vmem:[%s24786_s8 + $0x484] ss:$16 sps:$4 sm:$0xff]  }
 0xaba   : > { %12394 = vmatmul.mubr.bf16.vlgmr.msra.gmra.mrb[164].mxu0 %v12199_v32 }
 0xabb   : > { %9949 = vmatpush1.bf16.msra.mxu1 %v18858_v27  ;;  %12669 = vmatpush1.bf16.msra.mxu0 %v18861_v22  ;;  %v18929_v27 = vld [vmem:[%s24786_s8 + $0xd64] ss:$16 sps:$4 sm:$0xff]   ;;  %v19391_v22 = vmov 1966171168  }
 0xabc   : > { %9950 = vmatprep.subr.bf16.mxu1 %v18866_v50  ;;  %12670 = vmatprep.subr.bf16.mxu0 %v18869_v30  ;;  %v9070_v50 = vunpack.c.l.s4 %v19391_v22  ;;  %v9072_v30 = vlaneseq  ;;  %v18969_v22 = vld [vmem:[%s24786_s8 + $0xe40] ss:$16 sps:$4 sm:$0xff]  }
 0xabd   : > { %12700 = vmatprep.mubr.bf16.mxu0 %v24857_v47 }
 0xabf   : > { %9951 = vmatpush1.bf16.msra.mxu1 %v18864_v62  ;;  %12671 = vmatpush1.bf16.msra.mxu0 %v18867_v8  ;;  %v18924_v62 = vld [vmem:[%s24786_s8 + $0x480] ss:$16 sps:$4 sm:$0xff]  }
 0xac0   : > { %9952 = vmatprep.subr.bf16.mxu1 %v18872_v43  ;;  %12672 = vmatprep.subr.bf16.mxu0 %v18875_v21  ;;  %v18927_v8 = vld [vmem:[%s24786_s8 + $0xd60] ss:$16 sps:$4 sm:$0xff]   ;;  %v18932_v43 = vld [vmem:[%s24786_s8 + $0x4a4] ss:$16 sps:$4 sm:$0xff]  }
 0xac1   : > { %v18935_v21 = vld [vmem:[%s24786_s8 + $0xd84] ss:$16 sps:$4 sm:$0xff]  }
 0xac3   : > { %9953 = vmatpush1.bf16.msra.mxu1 %v18870_v44  ;;  %12673 = vmatpush1.bf16.msra.mxu0 %v18873_v14  ;;  %v9071_v44 = vunpack.c.0.s8 %v9070_v50  ;;  %v23690_v14 = vshrl.u32 %v9072_v30, 7  ;;  %v18974_v50 = vld [vmem:[%s24786_s8 + $0x48c] ss:$16 sps:$4 sm:$0xff]  }
 0xac4   : > { %9954 = vmatprep.subr.bf16.mxu1 %v18878_v0  ;;  %12674 = vmatprep.subr.bf16.mxu0 %v18881_v36  ;;  %v18930_v0 = vld [vmem:[%s24786_s8 + $0x4a0] ss:$16 sps:$4 sm:$0xff]  }
 0xac5   : > { %v18933_v36 = vld [vmem:[%s24786_s8 + $0xd80] ss:$16 sps:$4 sm:$0xff]  }
 0xac7   : > { %9955 = vmatpush1.bf16.msra.mxu1 %v18876_v49  ;;  %12675 = vmatpush1.bf16.msra.mxu0 %v18879_v54  ;;  %v18938_v49 = vld [vmem:[%s24786_s8 + $0x4c4] ss:$16 sps:$4 sm:$0xff]  }
 0xac8   : > { %9956 = vmatprep.subr.bf16.mxu1 %v18884_v52  ;;  %12676 = vmatprep.subr.bf16.mxu0 %v18887_v28  ;;  %v18941_v54 = vld [vmem:[%s24786_s8 + $0xda4] ss:$16 sps:$4 sm:$0xff]   ;;  %v23705_v52 = vsub.s32 %v9071_v44, %v23690_v14 }
 0xac9   : > { %v23586_v31 = vpop.f32.mrb[212].mxu1  ;;  %v18983_v44 = vld [vmem:[%s24786_s8 + $0xe84] ss:$16 sps:$4 sm:$0xff]  }
 0xaca   : > { %v23588_v53 = vpop.f32.mrb[213].mxu1 }
 0xacb   : > { %9957 = vmatpush1.bf16.msra.mxu1 %v18882_v33  ;;  %12677 = vmatpush1.bf16.msra.mxu0 %v18885_v37  ;;  %v9067_v19 = vcombine.low %v23586_v31, %v23588_v53  ;;  %v9019_v39 = vpop.f32.mrb[214].mxu1  ;;  %v18942_v31 = vld [vmem:[%s24786_s8 + $0x4e0] ss:$16 sps:$4 sm:$0xff]  }
 0xacc   : > { %9958 = vmatprep.subr.bf16.mxu1 %v18890_v5  ;;  %12678 = vmatprep.subr.bf16.mxu0 %v18893_v25  ;;  %v9020_v2 = vpop.f32.mrb[215].mxu1  ;;  %v18936_v25 = vld [vmem:[%s24786_s8 + $0x4c0] ss:$16 sps:$4 sm:$0xff]   ;;  %v18944_v39 = vld [vmem:[%s24786_s8 + $0x4e4] ss:$16 sps:$4 sm:$0xff]  }
 0xacd   : > { %v23604_v61 = vpop.f32.mrb[140].mxu0  ;;  %v18945_v53 = vld [vmem:[%s24786_s8 + $0xdc0] ss:$16 sps:$4 sm:$0xff]  }
 0xace   : > { %v23606_v40 = vpop.f32.mrb[141].mxu0 }
 0xacf   : > { %9959 = vmatpush1.bf16.msra.mxu1 %v18888_v11  ;;  %12679 = vmatpush1.bf16.msra.mxu0 %v18891_v56  ;;  %v10605_v4 = vcombine.low %v23604_v61, %v23606_v40  ;;  %v10557_v16 = vpop.f32.mrb[142].mxu0  ;;  %v18939_v11 = vld [vmem:[%s24786_s8 + $0xda0] ss:$16 sps:$4 sm:$0xff]   ;;  %v19217_v61 = vld [vmem:[%s24786_s8 + $0xd0c] ss:$16 sps:$4 sm:$0xff]  }
 0xad0   : > { %9960 = vmatprep.subr.bf16.mxu1 %v18896_v55  ;;  %12680 = vmatprep.subr.bf16.mxu0 %v18899_v18  ;;  %v10558_v60 = vpop.f32.mrb[143].mxu0  ;;  %v18947_v55 = vld [vmem:[%s24786_s8 + $0xdc4] ss:$16 sps:$4 sm:$0xff]   ;;  %v23723_v18 = vrot.slane %v9067_v19, %v23705_v52 }
 0xad1   : > { %v18950_v60 = vld [vmem:[%s24786_s8 + $0x40c] ss:$16 sps:$4 sm:$0xff]  }
 0xad3   : > { %9961 = vmatpush1.bf16.msra.mxu1 %v18894_v48  ;;  %12681 = vmatpush1.bf16.msra.mxu0 %v18897_v10 }
 0xad4   : > { %10212 = vmatprep.subr.bf16.mxu1 %v18902_v1  ;;  %12682 = vmatprep.subr.bf16.mxu0 %v18905_v15 }
 0xad6   : > { %9979 = vmatmul.mubr.bf16.vlgmr.msra.gmra.mrb[240].mxu1 %v9743_v23  ;;  %v18918_v23 = vld [vmem:[%s24786_s8 + $0x460] ss:$16 sps:$4 sm:$0xff]  }
 0xad7   : > { %10213 = vmatpush1.bf16.msra.mxu1 %v18900_v20  ;;  %12683 = vmatpush1.bf16.msra.mxu0 %v18903_v3  ;;  %v18953_v20 = vld [vmem:[%s24786_s8 + $0xde4] ss:$16 sps:$4 sm:$0xff]   ;;  %v18948_v3 = vld [vmem:[%s24786_s8 + $0x408] ss:$16 sps:$4 sm:$0xff]  }
 0xad8   : > { %10214 = vmatprep.subr.bf16.mxu1 %v18908_v58  ;;  %12975 = vmatprep.subr.bf16.mxu0 %v18911_v13  ;;  %v18951_v58 = vld [vmem:[%s24786_s8 + $0xde0] ss:$16 sps:$4 sm:$0xff]   ;;  %v10050_v13 = vrot.slane %v22895_v63, 2 }
 0xad9   : > { %10244 = vmatprep.mubr.bf16.mxu1 %v24857_v47 }
 0xada   : > { %12701 = vmatmul.mubr.bf16.vlgmr.msra.gmra.mrb[168].mxu0 %v12506_v57 }
 0xadb   : > { %10215 = vmatpush1.bf16.msra.mxu1 %v18906_v24  ;;  %12976 = vmatpush1.bf16.msra.mxu0 %v18909_v29  ;;  %v18956_v24 = vld [vmem:[%s24786_s8 + $0x42c] ss:$16 sps:$4 sm:$0xff]   ;;  %v18959_v29 = vld [vmem:[%s24786_s8 + $0xe04] ss:$16 sps:$4 sm:$0xff]  }
 0xadc   : > { %10216 = vmatprep.subr.bf16.mxu1 %v18914_v42  ;;  %12977 = vmatprep.subr.bf16.mxu0 %v18917_v7  ;;  %v18954_v42 = vld [vmem:[%s24786_s8 + $0x428] ss:$16 sps:$4 sm:$0xff]   ;;  %v18957_v7 = vld [vmem:[%s24786_s8 + $0xe00] ss:$16 sps:$4 sm:$0xff]  }
 0xadd   : > { %13007 = vmatprep.mubr.bf16.mxu0 %v24857_v47 }
 0xadf   : > { %10217 = vmatpush1.bf16.msra.mxu1 %v18912_v38  ;;  %12978 = vmatpush1.bf16.msra.mxu0 %v18915_v46  ;;  %v12813_v38 = vrot.slane %v22901_v9, 6  ;;  %v18962_v46 = vld [vmem:[%s24786_s8 + $0x44c] ss:$16 sps:$4 sm:$0xff]  }
 0xae0   : > { %10218 = vmatprep.subr.bf16.mxu1 %v18920_v59  ;;  %12979 = vmatprep.subr.bf16.mxu0 %v18923_v26  ;;  %v18965_v59 = vld [vmem:[%s24786_s8 + $0xe24] ss:$16 sps:$4 sm:$0xff]   ;;  %v18960_v26 = vld [vmem:[%s24786_s8 + $0x448] ss:$16 sps:$4 sm:$0xff]  }
 0xae3   : > { %10219 = vmatpush1.bf16.msra.mxu1 %v18918_v23  ;;  %12980 = vmatpush1.bf16.msra.mxu0 %v18921_v51  ;;  %v18963_v23 = vld [vmem:[%s24786_s8 + $0xe20] ss:$16 sps:$4 sm:$0xff]   ;;  %v18968_v51 = vld [vmem:[%s24786_s8 + $0x46c] ss:$16 sps:$4 sm:$0xff]  }
 0xae4   : > { %10220 = vmatprep.subr.bf16.mxu1 %v18926_v41  ;;  %12981 = vmatprep.subr.bf16.mxu0 %v18929_v27  ;;  %v18971_v41 = vld [vmem:[%s24786_s8 + $0xe44] ss:$16 sps:$4 sm:$0xff]   ;;  %v18966_v27 = vld [vmem:[%s24786_s8 + $0x468] ss:$16 sps:$4 sm:$0xff]  }
 0xae7   : > { %10221 = vmatpush1.bf16.msra.mxu1 %v18924_v62  ;;  %12982 = vmatpush1.bf16.msra.mxu0 %v18927_v8  ;;  %v18977_v62 = vld [vmem:[%s24786_s8 + $0xe64] ss:$16 sps:$4 sm:$0xff]   ;;  %v18972_v8 = vld [vmem:[%s24786_s8 + $0x488] ss:$16 sps:$4 sm:$0xff]  }
 0xae8   : > { %10222 = vmatprep.subr.bf16.mxu1 %v18932_v43  ;;  %12983 = vmatprep.subr.bf16.mxu0 %v18935_v21  ;;  %v18975_v43 = vld [vmem:[%s24786_s8 + $0xe60] ss:$16 sps:$4 sm:$0xff]   ;;  %v18980_v21 = vld [vmem:[%s24786_s8 + $0x4ac] ss:$16 sps:$4 sm:$0xff]  }
 0xae9   : > { %v9056_v28 = vpop.f32.mrb[216].mxu1 }
 0xaea   : > { %v9058_v33 = vpop.f32.mrb[217].mxu1 }
 0xaeb   : > { %v9068_v37 = vcombine.low %v9056_v28, %v9058_v33  ;;  %v9060_v5 = vpop.f32.mrb[218].mxu1  ;;  %10223 = vmatpush1.bf16.msra.mxu1 %v18930_v0  ;;  %12984 = vmatpush1.bf16.msra.mxu0 %v18933_v36  ;;  %v18978_v0 = vld [vmem:[%s24786_s8 + $0x4a8] ss:$16 sps:$4 sm:$0xff]   ;;  %v18981_v36 = vld [vmem:[%s24786_s8 + $0xe80] ss:$16 sps:$4 sm:$0xff]  }
 0xaec   : > { %v9061_v56 = vpop.f32.mrb[219].mxu1  ;;  %10224 = vmatprep.subr.bf16.mxu1 %v18938_v49  ;;  %12985 = vmatprep.subr.bf16.mxu0 %v18941_v54  ;;  %v18986_v49 = vld [vmem:[%s24786_s8 + $0x4cc] ss:$16 sps:$4 sm:$0xff]   ;;  %v18989_v54 = vld [vmem:[%s24786_s8 + $0xea4] ss:$16 sps:$4 sm:$0xff]  }
 0xaed   : > { %v23726_v2 = vrot.slane %v9068_v37, %v23705_v52  ;;  %v23728_v48 = vpop.f32.mrb[144].mxu0 }
 0xaee   : > { %v23730_v10 = vpop.f32.mrb[145].mxu0 }
 0xaef   : > { %v9083_v16 = vcombine.low %v23723_v18, %v23726_v2  ;;  %v10912_v1 = vcombine.low %v23728_v48, %v23730_v10  ;;  %10225 = vmatpush1.bf16.msra.mxu1 %v18936_v25  ;;  %v10864_v15 = vpop.f32.mrb[146].mxu0  ;;  %12986 = vmatpush1.bf16.msra.mxu0 %v18939_v11  ;;  %v18984_v25 = vld [vmem:[%s24786_s8 + $0x4c8] ss:$16 sps:$4 sm:$0xff]   ;;  %v18987_v11 = vld [vmem:[%s24786_s8 + $0xea0] ss:$16 sps:$4 sm:$0xff]  }
 0xaf0   : > { %v10865_v19 = vpop.f32.mrb[147].mxu0  ;;  %10226 = vmatprep.subr.bf16.mxu1 %v18944_v39  ;;  %12987 = vmatprep.subr.bf16.mxu0 %v18947_v55  ;;  %v18992_v39 = vld [vmem:[%s24786_s8 + $0x4ec] ss:$16 sps:$4 sm:$0xff]   ;;  %v18995_v55 = vld [vmem:[%s24786_s8 + $0xec4] ss:$16 sps:$4 sm:$0xff]  }
 0xaf1   : > { %v19239_v48 = vld [vmem:[%s24786_s8 + $0xe08] ss:$16 sps:$4 sm:$0xff]   ;;  %v19244_v10 = vld [vmem:[%s24786_s8 + $0xe2c] ss:$16 sps:$4 sm:$0xff]  }
 0xaf3   : > { %10227 = vmatpush1.bf16.msra.mxu1 %v18942_v31  ;;  %12988 = vmatpush1.bf16.msra.mxu0 %v18945_v53 }
 0xaf4   : > { %10253 = vmatprep.subr.bf16.mxu1 %v18950_v60  ;;  %12989 = vmatprep.subr.bf16.mxu0 %v18953_v20  ;;  %v18990_v60 = vld [vmem:[%s24786_s8 + $0x4e8] ss:$16 sps:$4 sm:$0xff]   ;;  %v18993_v20 = vld [vmem:[%s24786_s8 + $0xec0] ss:$16 sps:$4 sm:$0xff]  }
 0xaf6   : > { %10245 = vmatmul.mubr.bf16.vlgmr.msra.gmra.mrb[244].mxu1 %v10050_v13 }
 0xaf7   : > { %10254 = vmatpush1.bf16.msra.mxu1 %v18948_v3  ;;  %12990 = vmatpush1.bf16.msra.mxu0 %v18951_v58  ;;  %v18998_v58 = vld [vmem:[%s24786_s8 + $0x50c] ss:$16 sps:$4 sm:$0xff]  }
 0xaf8   : > { %10255 = vmatprep.subr.bf16.mxu1 %v18956_v24  ;;  %13282 = vmatprep.subr.bf16.mxu0 %v18959_v29  ;;  %v19001_v24 = vld [vmem:[%s24786_s8 + $0xee4] ss:$16 sps:$4 sm:$0xff]   ;;  %v18996_v29 = vld [vmem:[%s24786_s8 + $0x508] ss:$16 sps:$4 sm:$0xff]  }
 0xaf9   : > { %10285 = vmatprep.mubr.bf16.mxu1 %v24857_v47 }
 0xafa   : > { %13008 = vmatmul.mubr.bf16.vlgmr.msra.gmra.mrb[172].mxu0 %v12813_v38 }
 0xafb   : > { %10256 = vmatpush1.bf16.msra.mxu1 %v18954_v42  ;;  %13283 = vmatpush1.bf16.msra.mxu0 %v18957_v7  ;;  %v18999_v42 = vld [vmem:[%s24786_s8 + $0xee0] ss:$16 sps:$4 sm:$0xff]   ;;  %v19004_v7 = vld [vmem:[%s24786_s8 + $0x52c] ss:$16 sps:$4 sm:$0xff]  }
 0xafc   : > { %10257 = vmatprep.subr.bf16.mxu1 %v18962_v46  ;;  %13284 = vmatprep.subr.bf16.mxu0 %v18965_v59  ;;  %v19007_v46 = vld [vmem:[%s24786_s8 + $0xf04] ss:$16 sps:$4 sm:$0xff]   ;;  %v19002_v59 = vld [vmem:[%s24786_s8 + $0x528] ss:$16 sps:$4 sm:$0xff]  }
 0xafd   : > { %13314 = vmatprep.mubr.bf16.mxu0 %v24857_v47 }
 0xaff   : > { %10258 = vmatpush1.bf16.msra.mxu1 %v18960_v26  ;;  %13285 = vmatpush1.bf16.msra.mxu0 %v18963_v23  ;;  %v19005_v26 = vld [vmem:[%s24786_s8 + $0xf00] ss:$16 sps:$4 sm:$0xff]   ;;  %v13120_v23 = vrot.slane %v22895_v63, 7  ;;  %v19274_v63 = vld [vmem:[%s24786_s8 + $0xf6c] ss:$16 sps:$4 sm:$0xff]  }
 0xb00   : > { %10259 = vmatprep.subr.bf16.mxu1 %v18968_v51  ;;  %13286 = vmatprep.subr.bf16.mxu0 %v18971_v41  ;;  %v19010_v51 = vld [vmem:[%s24786_s8 + $0x54c] ss:$16 sps:$4 sm:$0xff]   ;;  %v19008_v41 = vld [vmem:[%s24786_s8 + $0x548] ss:$16 sps:$4 sm:$0xff]  }
 0xb03   : > { %10260 = vmatpush1.bf16.msra.mxu1 %v18966_v27  ;;  %13287 = vmatpush1.bf16.msra.mxu0 %v18969_v22  ;;  %v19011_v27 = vld [vmem:[%s24786_s8 + $0xf20] ss:$16 sps:$4 sm:$0xff]   ;;  %v19016_v22 = vld [vmem:[%s24786_s8 + $0x56c] ss:$16 sps:$4 sm:$0xff]  }
 0xb04   : > { %10261 = vmatprep.subr.bf16.mxu1 %v18974_v50  ;;  %13288 = vmatprep.subr.bf16.mxu0 %v18977_v62  ;;  %v19019_v50 = vld [vmem:[%s24786_s8 + $0xf44] ss:$16 sps:$4 sm:$0xff]   ;;  %v19014_v62 = vld [vmem:[%s24786_s8 + $0x568] ss:$16 sps:$4 sm:$0xff]  }
 0xb07   : > { %10262 = vmatpush1.bf16.msra.mxu1 %v18972_v8  ;;  %13289 = vmatpush1.bf16.msra.mxu0 %v18975_v43  ;;  %v19017_v8 = vld [vmem:[%s24786_s8 + $0xf40] ss:$16 sps:$4 sm:$0xff]   ;;  %v19022_v43 = vld [vmem:[%s24786_s8 + $0x58c] ss:$16 sps:$4 sm:$0xff]  }
 0xb08   : > { %10263 = vmatprep.subr.bf16.mxu1 %v18980_v21  ;;  %13290 = vmatprep.subr.bf16.mxu0 %v18983_v44  ;;  %v19025_v21 = vld [vmem:[%s24786_s8 + $0xf64] ss:$16 sps:$4 sm:$0xff]   ;;  %v19020_v44 = vld [vmem:[%s24786_s8 + $0x588] ss:$16 sps:$4 sm:$0xff]  }
 0xb09   : > { %v23828_v28 = vpop.f32.mrb[220].mxu1 }
 0xb0a   : > { %v23830_v33 = vpop.f32.mrb[221].mxu1 }
 0xb0b   : > { %v9376_v37 = vcombine.low %v23828_v28, %v23830_v33  ;;  %v9328_v5 = vpop.f32.mrb[222].mxu1  ;;  %10264 = vmatpush1.bf16.msra.mxu1 %v18978_v0  ;;  %13291 = vmatpush1.bf16.msra.mxu0 %v18981_v36  ;;  %v19023_v0 = vld [vmem:[%s24786_s8 + $0xf60] ss:$16 sps:$4 sm:$0xff]   ;;  %v19028_v36 = vld [vmem:[%s24786_s8 + $0x5ac] ss:$16 sps:$4 sm:$0xff]  }
 0xb0c   : > { %v9329_v56 = vpop.f32.mrb[223].mxu1  ;;  %10265 = vmatprep.subr.bf16.mxu1 %v18986_v49  ;;  %13292 = vmatprep.subr.bf16.mxu0 %v18989_v54  ;;  %v19031_v49 = vld [vmem:[%s24786_s8 + $0xf84] ss:$16 sps:$4 sm:$0xff]   ;;  %v19026_v54 = vld [vmem:[%s24786_s8 + $0x5a8] ss:$16 sps:$4 sm:$0xff]  }
 0xb0d   : > { %v23846_v15 = vpop.f32.mrb[148].mxu0  ;;  %v19029_v5 = vld [vmem:[%s24786_s8 + $0xf80] ss:$16 sps:$4 sm:$0xff]  }
 0xb0e   : > { %v23848_v31 = vpop.f32.mrb[149].mxu0  ;;  %v19041_v28 = vld [vmem:[%s24786_s8 + $0xfc0] ss:$16 sps:$4 sm:$0xff]  }
 0xb0f   : > { %v11219_v53 = vcombine.low %v23846_v15, %v23848_v31  ;;  %10266 = vmatpush1.bf16.msra.mxu1 %v18984_v25  ;;  %v11171_v19 = vpop.f32.mrb[150].mxu0  ;;  %13293 = vmatpush1.bf16.msra.mxu0 %v18987_v11  ;;  %v19034_v25 = vld [vmem:[%s24786_s8 + $0x5cc] ss:$16 sps:$4 sm:$0xff]   ;;  %v19037_v11 = vld [vmem:[%s24786_s8 + $0xfa4] ss:$16 sps:$4 sm:$0xff]  }
 0xb10   : > { %v11172_v3 = vpop.f32.mrb[151].mxu0  ;;  %10267 = vmatprep.subr.bf16.mxu1 %v18992_v39  ;;  %13294 = vmatprep.subr.bf16.mxu0 %v18995_v55  ;;  %v19263_v15 = vld [vmem:[%s24786_s8 + $0xf08] ss:$16 sps:$4 sm:$0xff]   ;;  %v19268_v31 = vld [vmem:[%s24786_s8 + $0xf2c] ss:$16 sps:$4 sm:$0xff]  }
 0xb13   : > { %10268 = vmatpush1.bf16.msra.mxu1 %v18990_v60  ;;  %13295 = vmatpush1.bf16.msra.mxu0 %v18993_v20  ;;  %v19032_v60 = vld [vmem:[%s24786_s8 + $0x5c8] ss:$16 sps:$4 sm:$0xff]   ;;  %v19035_v20 = vld [vmem:[%s24786_s8 + $0xfa0] ss:$16 sps:$4 sm:$0xff]  }
 0xb14   : > { %10560 = vmatprep.subr.bf16.mxu1 %v18998_v58  ;;  %13296 = vmatprep.subr.bf16.mxu0 %v19001_v24  ;;  %v19040_v58 = vld [vmem:[%s24786_s8 + $0x5ec] ss:$16 sps:$4 sm:$0xff]   ;;  %v19043_v24 = vld [vmem:[%s24786_s8 + $0xfc4] ss:$16 sps:$4 sm:$0xff]  }
 0xb16   : > { %10286 = vmatmul.mubr.bf16.vlgmr.msra.gmra.mrb[248].mxu1 %v10050_v13  ;;  %v19013_v13 = vld [vmem:[%s24786_s8 + $0xf24] ss:$16 sps:$4 sm:$0xff]  }
 0xb17   : > { %10561 = vmatpush1.bf16.msra.mxu1 %v18996_v29  ;;  %13297 = vmatpush1.bf16.msra.mxu0 %v18999_v42  ;;  %v9090_v29 = vrot.slane %v9083_v16, %v23705_v52  ;;  %v9384_v42 = vrot.slane %v9376_v37, %v23705_v52  ;;  %v19038_v16 = vld [vmem:[%s24786_s8 + $0x5e8] ss:$16 sps:$4 sm:$0xff]   ;;  %v19046_v37 = vld [vmem:[%s24786_s8 + $0x60c] ss:$16 sps:$4 sm:$0xff]  }
 0xb18   : > { %10562 = vmatprep.subr.bf16.mxu1 %v19004_v7  ;;  %13589 = vmatprep.subr.bf16.mxu0 %v19007_v46 }
 0xb19   : > { %10592 = vmatprep.mubr.bf16.mxu1 %v24857_v47 }
 0xb1a   : > { %13315 = vmatmul.mubr.bf16.vlgmr.msra.gmra.mrb[176].mxu0 %v13120_v23 }
 0xb1b   : > { %10563 = vmatpush1.bf16.msra.mxu1 %v19002_v59  ;;  %13590 = vmatpush1.bf16.msra.mxu0 %v19005_v26  ;;  %v8788_v59 = vld [vmem:[%s24787_s9] sm:$0xf] }
 0xb1c   : > { %10564 = vmatprep.subr.bf16.mxu1 %v19010_v51  ;;  %13591 = vmatprep.subr.bf16.mxu0 %v19013_v13  ;;  %v19049_v13 = vld [vmem:[%s24786_s8 + $0xfe4] ss:$16 sps:$4 sm:$0xff]  }
 0xb1d   : > { %13621 = vmatprep.mubr.bf16.mxu0 %v24857_v47 }
 0xb1f   : > { %10565 = vmatpush1.bf16.msra.mxu1 %v19008_v41  ;;  %13592 = vmatpush1.bf16.msra.mxu0 %v19011_v27  ;;  %v9092_v41 = vadd.f32 %v9090_v29, %v8788_v59 }
 0xb20   : > { %10566 = vmatprep.subr.bf16.mxu1 %v19016_v22  ;;  %13593 = vmatprep.subr.bf16.mxu0 %v19019_v50  ;;  %v19044_v50 = vld [vmem:[%s24786_s8 + $0x608] ss:$16 sps:$4 sm:$0xff]  }
 0xb23   : > { %10567 = vmatpush1.bf16.msra.mxu1 %v19014_v62  ;;  %13594 = vmatpush1.bf16.msra.mxu0 %v19017_v8  ;;  %v19047_v62 = vld [vmem:[%s24786_s8 + $0xfe0] ss:$16 sps:$4 sm:$0xff]   ;;  %v19052_v8 = vld [vmem:[%s24786_s8 + $0x62c] ss:$16 sps:$4 sm:$0xff]  }
 0xb24   : > { %10568 = vmatprep.subr.bf16.mxu1 %v19022_v43  ;;  %13595 = vmatprep.subr.bf16.mxu0 %v19025_v21  ;;  %v19050_v43 = vld [vmem:[%s24786_s8 + $0x628] ss:$16 sps:$4 sm:$0xff]   ;;  %v13427_v21 = vrot.slane %v22901_v9, 7 }
 0xb27   : > { %10569 = vmatpush1.bf16.msra.mxu1 %v19020_v44  ;;  %13596 = vmatpush1.bf16.msra.mxu0 %v19023_v0  ;;  %v19055_v44 = vld [vmem:[%s24786_s8 + $0x64c] ss:$16 sps:$4 sm:$0xff]  }
 0xb28   : > { %10570 = vmatprep.subr.bf16.mxu1 %v19028_v36  ;;  %13597 = vmatprep.subr.bf16.mxu0 %v19031_v49  ;;  %v19058_v0 = vld [vmem:[%s24786_s8 + $0x66c] ss:$16 sps:$4 sm:$0xff]   ;;  %v19056_v36 = vld [vmem:[%s24786_s8 + $0x668] ss:$16 sps:$4 sm:$0xff]  }
 0xb29   : > { %v9365_v56 = vpop.f32.mrb[224].mxu1  ;;  %v19061_v49 = vld [vmem:[%s24786_s8 + $0x68c] ss:$16 sps:$4 sm:$0xff]  }
 0xb2a   : > { %v9367_v39 = vpop.f32.mrb[225].mxu1 }
 0xb2b   : > { %v9377_v55 = vcombine.low %v9365_v56, %v9367_v39  ;;  %v9369_v19 = vpop.f32.mrb[226].mxu1  ;;  %10571 = vmatpush1.bf16.msra.mxu1 %v19026_v54  ;;  %13598 = vmatpush1.bf16.msra.mxu0 %v19029_v5  ;;  %v19059_v54 = vld [vmem:[%s24786_s8 + $0x688] ss:$16 sps:$4 sm:$0xff]   ;;  %v19064_v5 = vld [vmem:[%s24786_s8 + $0x6ac] ss:$16 sps:$4 sm:$0xff]  }
 0xb2c   : > { %v9370_v3 = vpop.f32.mrb[227].mxu1  ;;  %10572 = vmatprep.subr.bf16.mxu1 %v19034_v25  ;;  %13599 = vmatprep.subr.bf16.mxu0 %v19037_v11  ;;  %v19062_v25 = vld [vmem:[%s24786_s8 + $0x6a8] ss:$16 sps:$4 sm:$0xff]   ;;  %v19067_v11 = vld [vmem:[%s24786_s8 + $0x6cc] ss:$16 sps:$4 sm:$0xff]  }
 0xb2d   : > { %v9391_v7 = vrot.slane %v9377_v55, %v23705_v52  ;;  %v23964_v46 = vpop.f32.mrb[152].mxu0  ;;  %v19070_v3 = vld [vmem:[%s24786_s8 + $0x6ec] ss:$16 sps:$4 sm:$0xff]  }
 0xb2e   : > { %v23969_v26 = vpop.f32.mrb[153].mxu0 }
 0xb2f   : > { %v9392_v51 = vcombine.low %v9384_v42, %v9391_v7  ;;  %v11526_v18 = vcombine.low %v23964_v46, %v23969_v26  ;;  %10573 = vmatpush1.bf16.msra.mxu1 %v19032_v60  ;;  %v11478_v2 = vpop.f32.mrb[154].mxu0  ;;  %13600 = vmatpush1.bf16.msra.mxu0 %v19035_v20  ;;  %v19065_v60 = vld [vmem:[%s24786_s8 + $0x6c8] ss:$16 sps:$4 sm:$0xff]  }
 0xb30   : > { %v11479_v33 = vpop.f32.mrb[155].mxu0  ;;  %10574 = vmatprep.subr.bf16.mxu1 %v19040_v58  ;;  %13601 = vmatprep.subr.bf16.mxu0 %v19043_v24  ;;  %v19068_v7 = vld [vmem:[%s24786_s8 + $0x6e8] ss:$16 sps:$4 sm:$0xff]  }
 0xb31   : > { %v9399_v27 = vrot.slane %v9392_v51, %v23705_v52  ;;  %v19073_v51 = vld [vmem:[%s24786_s8 + $0x70c] ss:$16 sps:$4 sm:$0xff]   ;;  %v19071_v2 = vld [vmem:[%s24786_s8 + $0x708] ss:$16 sps:$4 sm:$0xff]  }
 0xb32   : > { %v19079_v33 = vld [vmem:[%s24786_s8 + $0x74c] ss:$16 sps:$4 sm:$0xff]  }
 0xb33   : > { %v23986_v22 = vadd.f32 %v9399_v27, %v9092_v41  ;;  %10575 = vmatpush1.bf16.msra.mxu1 %v19038_v16  ;;  %13602 = vmatpush1.bf16.msra.mxu0 %v19041_v28  ;;  %v19076_v16 = vld [vmem:[%s24786_s8 + $0x72c] ss:$16 sps:$4 sm:$0xff]   ;;  %v19074_v28 = vld [vmem:[%s24786_s8 + $0x728] ss:$16 sps:$4 sm:$0xff]  }
 0xb34   : > { %10867 = vmatprep.subr.bf16.mxu1 %v19046_v37  ;;  %13603 = vmatprep.subr.bf16.mxu0 %v19049_v13  ;;  %v19077_v37 = vld [vmem:[%s24786_s8 + $0x748] ss:$16 sps:$4 sm:$0xff]   ;;  %v19085_v41 = vld [vmem:[%s24786_s8 + $0x78c] ss:$16 sps:$4 sm:$0xff]  }
 0xb35   : > { %v19080_v13 = vld [vmem:[%s24786_s8 + $0x768] ss:$16 sps:$4 sm:$0xff]  }
 0xb36   : > { %10593 = vmatmul.mubr.bf16.vlgmr.msra.gmra.mrb[252].mxu1 %v10357_v12  ;;  %v19053_v12 = vld [vmem:[%s24786_s8 + $0x648] ss:$16 sps:$4 sm:$0xff]  }
 0xb37   : > { %10868 = vmatpush1.bf16.msra.mxu1 %v19044_v50  ;;  %13604 = vmatpush1.bf16.msra.mxu0 %v19047_v62  ;;  %v19083_v27 = vld [vmem:[%s24786_s8 + $0x788] ss:$16 sps:$4 sm:$0xff]   ;;  %v19088_v50 = vld [vmem:[%s24786_s8 + $0x7ac] ss:$16 sps:$4 sm:$0xff]  }
 0xb38   : > { %10869 = vmatprep.subr.bf16.mxu1 %v19052_v8  ;;  %10899 = vmatprep.mubr.bf16.mxu1 %v24857_v47  ;;  %v19086_v62 = vld [vmem:[%s24786_s8 + $0x7a8] ss:$16 sps:$4 sm:$0xff]   ;;  %v19091_v8 = vld [vmem:[%s24786_s8 + $0x7cc] ss:$16 sps:$4 sm:$0xff]  }
 0xb3a   : > { %13622 = vmatmul.mubr.bf16.vlgmr.msra.gmra.mrb[180].mxu0 %v13427_v21 }
 0xb3b   : > { %10870 = vmatpush1.bf16.msra.mxu1 %v19050_v43 }
 0xb3c   : > { %10871 = vmatprep.subr.bf16.mxu1 %v19055_v44 }
 0xb3f   : > { %10872 = vmatpush1.bf16.msra.mxu1 %v19053_v12 }
 0xb40   : > { %10873 = vmatprep.subr.bf16.mxu1 %v19058_v0 }
 0xb43   : > { %10874 = vmatpush1.bf16.msra.mxu1 %v19056_v36  ;;  %v19089_v36 = vld [vmem:[%s24786_s8 + $0x7c8] ss:$16 sps:$4 sm:$0xff]  }
 0xb44   : > { %10875 = vmatprep.subr.bf16.mxu1 %v19061_v49 }
 0xb47   : > { %10876 = vmatpush1.bf16.msra.mxu1 %v19059_v54  ;;  %v19094_v54 = vld [vmem:[%s24786_s8 + $0x7ec] ss:$16 sps:$4 sm:$0xff]  }
 0xb48   : > { %10877 = vmatprep.subr.bf16.mxu1 %v19064_v5 }
 0xb49   : > { %v9632_v56 = vpop.f32.mrb[228].mxu1 }
 0xb4a   : > { %v9634_v39 = vpop.f32.mrb[229].mxu1 }
 0xb4b   : > { %v9684_v55 = vcombine.low %v9632_v56, %v9634_v39  ;;  %v9636_v19 = vpop.f32.mrb[230].mxu1  ;;  %10878 = vmatpush1.bf16.msra.mxu1 %v19062_v25 }
 0xb4c   : > { %v9637_v20 = vpop.f32.mrb[231].mxu1  ;;  %10879 = vmatprep.subr.bf16.mxu1 %v19067_v11 }
 0xb4d   : > { %v24039_v58 = vpop.f32.mrb[156].mxu0  ;;  %v9692_v5 = vrot.slane %v9684_v55, %v23705_v52  ;;  %v19092_v20 = vld [vmem:[%s24786_s8 + $0x7e8] ss:$16 sps:$4 sm:$0xff]   ;;  %v19097_v55 = vld [vmem:[%s24786_s8 + $0x80c] ss:$16 sps:$4 sm:$0xff]  }
 0xb4e   : > { %v24041_v24 = vpop.f32.mrb[157].mxu0 }
 0xb4f   : > { %v11833_v29 = vcombine.low %v24039_v58, %v24041_v24  ;;  %10880 = vmatpush1.bf16.msra.mxu1 %v19065_v60  ;;  %v11785_v42 = vpop.f32.mrb[158].mxu0 }
 0xb50   : > { %v11786_v59 = vpop.f32.mrb[159].mxu0  ;;  %10881 = vmatprep.subr.bf16.mxu1 %v19070_v3 }
 0xb51   : > { %v19095_v59 = vld [vmem:[%s24786_s8 + $0x808] ss:$16 sps:$4 sm:$0xff]  }
 0xb53   : > { %10882 = vmatpush1.bf16.msra.mxu1 %v19068_v7 }
 0xb54   : > { %11174 = vmatprep.subr.bf16.mxu1 %v19073_v51  ;;  %v19100_v51 = vld [vmem:[%s24786_s8 + $0x82c] ss:$16 sps:$4 sm:$0xff]  }
 0xb56   : > { %10900 = vmatmul.mubr.bf16.vlgmr.msra.gmra.mrb[0].mxu1 %v10664_v6  ;;  %v19082_v6 = vld [vmem:[%s24786_s8 + $0x76c] ss:$16 sps:$4 sm:$0xff]  }
 0xb57   : > { %11175 = vmatpush1.bf16.msra.mxu1 %v19071_v2  ;;  %11206 = vmatprep.mubr.bf16.mxu1 %v24857_v47  ;;  %v19098_v2 = vld [vmem:[%s24786_s8 + $0x828] ss:$16 sps:$4 sm:$0xff]  }
 0xb58   : > { %11176 = vmatprep.subr.bf16.mxu1 %v19076_v16  ;;  %v19101_v16 = vld [vmem:[%s24786_s8 + $0x848] ss:$16 sps:$4 sm:$0xff]  }
 0xb5b   : > { %11177 = vmatpush1.bf16.msra.mxu1 %v19074_v28  ;;  %v19104_v28 = vld [vmem:[%s24786_s8 + $0x868] ss:$16 sps:$4 sm:$0xff]  }
 0xb5c   : > { %11178 = vmatprep.subr.bf16.mxu1 %v19079_v33  ;;  %v19109_v33 = vld [vmem:[%s24786_s8 + $0x88c] ss:$16 sps:$4 sm:$0xff]  }
 0xb5f   : > { %11179 = vmatpush1.bf16.msra.mxu1 %v19077_v37  ;;  %v19107_v37 = vld [vmem:[%s24786_s8 + $0x888] ss:$16 sps:$4 sm:$0xff]  }
 0xb60   : > { %11180 = vmatprep.subr.bf16.mxu1 %v19082_v6  ;;  %v19112_v6 = vld [vmem:[%s24786_s8 + $0x8ac] ss:$16 sps:$4 sm:$0xff]  }
 0xb63   : > { %11181 = vmatpush1.bf16.msra.mxu1 %v19080_v13  ;;  %v19110_v13 = vld [vmem:[%s24786_s8 + $0x8a8] ss:$16 sps:$4 sm:$0xff]  }
 0xb64   : > { %11182 = vmatprep.subr.bf16.mxu1 %v19085_v41  ;;  %v19115_v41 = vld [vmem:[%s24786_s8 + $0x8cc] ss:$16 sps:$4 sm:$0xff]  }
 0xb67   : > { %11183 = vmatpush1.bf16.msra.mxu1 %v19083_v27 }
 0xb68   : > { %11184 = vmatprep.subr.bf16.mxu1 %v19088_v50 }
 0xb69   : > { %v9673_v43 = vpop.f32.mrb[232].mxu1 }
 0xb6a   : > { %v9675_v44 = vpop.f32.mrb[233].mxu1 }
 0xb6b   : > { %v9685_v12 = vcombine.low %v9673_v43, %v9675_v44  ;;  %v9677_v0 = vpop.f32.mrb[234].mxu1  ;;  %11185 = vmatpush1.bf16.msra.mxu1 %v19086_v62  ;;  %v19113_v43 = vld [vmem:[%s24786_s8 + $0x8c8] ss:$16 sps:$4 sm:$0xff]  }
 0xb6c   : > { %v9678_v49 = vpop.f32.mrb[235].mxu1  ;;  %11186 = vmatprep.subr.bf16.mxu1 %v19091_v8 }
 0xb6d   : > { %v9699_v25 = vrot.slane %v9685_v12, %v23705_v52  ;;  %v24098_v11 = vpop.f32.mrb[160].mxu0  ;;  %v19118_v12 = vld [vmem:[%s24786_s8 + $0x8ec] ss:$16 sps:$4 sm:$0xff]  }
 0xb6e   : > { %v24100_v56 = vpop.f32.mrb[161].mxu0 }
 0xb6f   : > { %v9700_v39 = vcombine.low %v9692_v5, %v9699_v25  ;;  %v12140_v19 = vcombine.low %v24098_v11, %v24100_v56  ;;  %11187 = vmatpush1.bf16.msra.mxu1 %v19089_v36  ;;  %v12092_v60 = vpop.f32.mrb[162].mxu0  ;;  %v19116_v5 = vld [vmem:[%s24786_s8 + $0x8e8] ss:$16 sps:$4 sm:$0xff]   ;;  %v19290_v11 = vld [vmem:[%s24788_s10 + $0x80] sm:$0xff]  }
 0xb70   : > { %v12093_v3 = vpop.f32.mrb[163].mxu0  ;;  %11188 = vmatprep.subr.bf16.mxu1 %v19094_v54  ;;  %v19119_v60 = vld [vmem:[%s24786_s8 + $0x908] ss:$16 sps:$4 sm:$0xff]  }
 0xb71   : > { %v9707_v42 = vrot.slane %v9700_v39, %v23705_v52  ;;  %v19121_v39 = vld [vmem:[%s24786_s8 + $0x90c] ss:$16 sps:$4 sm:$0xff]   ;;  %v19122_v3 = vld [vmem:[%s24786_s8 + $0x928] ss:$16 sps:$4 sm:$0xff]  }
 0xb72   : > { %v19291_v56 = vld [vmem:[%s24788_s10 + $0x48] sm:$0xff]  }
 0xb73   : > { %v24112_v7 = vadd.f32 %v9707_v42, %v23986_v22  ;;  %11189 = vmatpush1.bf16.msra.mxu1 %v19092_v20  ;;  %v19103_v22 = vld [vmem:[%s24786_s8 + $0x84c] ss:$16 sps:$4 sm:$0xff]   ;;  %v19125_v42 = vld [vmem:[%s24786_s8 + $0x948] ss:$16 sps:$4 sm:$0xff]  }
 0xb74   : > { %11481 = vmatprep.subr.bf16.mxu1 %v19097_v55  ;;  %v19124_v20 = vld [vmem:[%s24786_s8 + $0x92c] ss:$16 sps:$4 sm:$0xff]  }
 0xb75   : > { %v19127_v55 = vld [vmem:[%s24786_s8 + $0x94c] ss:$16 sps:$4 sm:$0xff]  }
 0xb76   : > { %11207 = vmatmul.mubr.bf16.vlgmr.msra.gmra.mrb[4].mxu1 %v10971_v35  ;;  %v19106_v35 = vld [vmem:[%s24786_s8 + $0x86c] ss:$16 sps:$4 sm:$0xff]  }
 0xb77   : > { %11482 = vmatpush1.bf16.msra.mxu1 %v19095_v59  ;;  %11513 = vmatprep.mubr.bf16.mxu1 %v24857_v47  ;;  %v19128_v59 = vld [vmem:[%s24786_s8 + $0x968] ss:$16 sps:$4 sm:$0xff]  }
 0xb78   : > { %11483 = vmatprep.subr.bf16.mxu1 %v19100_v51  ;;  %v19133_v51 = vld [vmem:[%s24786_s8 + $0x98c] ss:$16 sps:$4 sm:$0xff]  }
 0xb7b   : > { %11484 = vmatpush1.bf16.msra.mxu1 %v19098_v2  ;;  %v19131_v2 = vld [vmem:[%s24786_s8 + $0x988] ss:$16 sps:$4 sm:$0xff]  }
 0xb7c   : > { %11485 = vmatprep.subr.bf16.mxu1 %v19103_v22  ;;  %v19136_v22 = vld [vmem:[%s24786_s8 + $0x9ac] ss:$16 sps:$4 sm:$0xff]  }
 0xb7f   : > { %11486 = vmatpush1.bf16.msra.mxu1 %v19101_v16  ;;  %v19134_v16 = vld [vmem:[%s24786_s8 + $0x9a8] ss:$16 sps:$4 sm:$0xff]  }
 0xb80   : > { %11487 = vmatprep.subr.bf16.mxu1 %v19106_v35  ;;  %v19139_v35 = vld [vmem:[%s24786_s8 + $0x9cc] ss:$16 sps:$4 sm:$0xff]  }
 0xb83   : > { %11488 = vmatpush1.bf16.msra.mxu1 %v19104_v28 }
 0xb84   : > { %11489 = vmatprep.subr.bf16.mxu1 %v19109_v33 }
 0xb87   : > { %11490 = vmatpush1.bf16.msra.mxu1 %v19107_v37 }
 0xb88   : > { %11491 = vmatprep.subr.bf16.mxu1 %v19112_v6 }
 0xb89   : > { %v9939_v27 = vpop.f32.mrb[236].mxu1 }
 0xb8a   : > { %v9941_v50 = vpop.f32.mrb[237].mxu1 }
 0xb8b   : > { %v9991_v62 = vcombine.low %v9939_v27, %v9941_v50  ;;  %v9943_v8 = vpop.f32.mrb[238].mxu1  ;;  %11492 = vmatpush1.bf16.msra.mxu1 %v19110_v13  ;;  %v19137_v13 = vld [vmem:[%s24786_s8 + $0x9c8] ss:$16 sps:$4 sm:$0xff]   ;;  %v19142_v27 = vld [vmem:[%s24786_s8 + $0x9ec] ss:$16 sps:$4 sm:$0xff]  }
 0xb8c   : > { %v9944_v44 = vpop.f32.mrb[239].mxu1  ;;  %11493 = vmatprep.subr.bf16.mxu1 %v19115_v41 }
 0xb8d   : > { %v24159_v0 = vpop.f32.mrb[164].mxu0  ;;  %v9999_v50 = vrot.slane %v9991_v62, %v23705_v52  ;;  %v19145_v62 = vld [vmem:[%s24786_s8 + $0xa0c] ss:$16 sps:$4 sm:$0xff]  }
 0xb8e   : > { %v24161_v36 = vpop.f32.mrb[165].mxu0 }
 0xb8f   : > { %v12447_v49 = vcombine.low %v24159_v0, %v24161_v36  ;;  %11494 = vmatpush1.bf16.msra.mxu1 %v19113_v43  ;;  %v12399_v54 = vpop.f32.mrb[166].mxu0  ;;  %v19307_v0 = vld [vmem:[%s24788_s10 + $0x68] sm:$0xff]  }
 0xb90   : > { %v12400_v25 = vpop.f32.mrb[167].mxu0  ;;  %11495 = vmatprep.subr.bf16.mxu1 %v19118_v12  ;;  %v19308_v36 = vld [vmem:[%s24788_s10 + $0xe8] sm:$0xff]  }
 0xb91   : > { %v19140_v25 = vld [vmem:[%s24786_s8 + $0x9e8] ss:$16 sps:$4 sm:$0xff]  }
 0xb93   : > { %11496 = vmatpush1.bf16.msra.mxu1 %v19116_v5 }
 0xb94   : > { %11788 = vmatprep.subr.bf16.mxu1 %v19121_v39 }
 0xb96   : > { %11514 = vmatmul.mubr.bf16.vlgmr.msra.gmra.mrb[8].mxu1 %v11278_v45  ;;  %v19130_v45 = vld [vmem:[%s24786_s8 + $0x96c] ss:$16 sps:$4 sm:$0xff]  }
 0xb97   : > { %11789 = vmatpush1.bf16.msra.mxu1 %v19119_v60  ;;  %11820 = vmatprep.mubr.bf16.mxu1 %v24857_v47 }
 0xb98   : > { %11790 = vmatprep.subr.bf16.mxu1 %v19124_v20 }
 0xb9b   : > { %11791 = vmatpush1.bf16.msra.mxu1 %v19122_v3  ;;  %v19143_v3 = vld [vmem:[%s24786_s8 + $0xa08] ss:$16 sps:$4 sm:$0xff]  }
 0xb9c   : > { %11792 = vmatprep.subr.bf16.mxu1 %v19127_v55  ;;  %v19148_v55 = vld [vmem:[%s24786_s8 + $0xa2c] ss:$16 sps:$4 sm:$0xff]  }
 0xb9f   : > { %11793 = vmatpush1.bf16.msra.mxu1 %v19125_v42  ;;  %v19146_v42 = vld [vmem:[%s24786_s8 + $0xa28] ss:$16 sps:$4 sm:$0xff]  }
 0xba0   : > { %11794 = vmatprep.subr.bf16.mxu1 %v19130_v45  ;;  %v19149_v45 = vld [vmem:[%s24786_s8 + $0xa48] ss:$16 sps:$4 sm:$0xff]  }
 0xba3   : > { %11795 = vmatpush1.bf16.msra.mxu1 %v19128_v59  ;;  %v19152_v59 = vld [vmem:[%s24786_s8 + $0xa68] ss:$16 sps:$4 sm:$0xff]  }
 0xba4   : > { %11796 = vmatprep.subr.bf16.mxu1 %v19133_v51  ;;  %v19157_v51 = vld [vmem:[%s24786_s8 + $0xa8c] ss:$16 sps:$4 sm:$0xff]  }
 0xba7   : > { %11797 = vmatpush1.bf16.msra.mxu1 %v19131_v2  ;;  %v19155_v2 = vld [vmem:[%s24786_s8 + $0xa88] ss:$16 sps:$4 sm:$0xff]  }
 0xba8   : > { %11798 = vmatprep.subr.bf16.mxu1 %v19136_v22  ;;  %v19160_v22 = vld [vmem:[%s24786_s8 + $0xaac] ss:$16 sps:$4 sm:$0xff]  }
 0xba9   : > { %v9980_v28 = vpop.f32.mrb[240].mxu1 }
 0xbaa   : > { %v9982_v33 = vpop.f32.mrb[241].mxu1 }
 0xbab   : > { %v9992_v37 = vcombine.low %v9980_v28, %v9982_v33  ;;  %v9984_v6 = vpop.f32.mrb[242].mxu1  ;;  %11799 = vmatpush1.bf16.msra.mxu1 %v19134_v16  ;;  %v19158_v16 = vld [vmem:[%s24786_s8 + $0xaa8] ss:$16 sps:$4 sm:$0xff]  }
 0xbac   : > { %v9985_v41 = vpop.f32.mrb[243].mxu1  ;;  %11800 = vmatprep.subr.bf16.mxu1 %v19139_v35  ;;  %v19163_v35 = vld [vmem:[%s24786_s8 + $0xacc] ss:$16 sps:$4 sm:$0xff]  }
 0xbad   : > { %v10006_v8 = vrot.slane %v9992_v37, %v23705_v52  ;;  %v24218_v43 = vpop.f32.mrb[168].mxu0 }
 0xbae   : > { %v24220_v44 = vpop.f32.mrb[169].mxu0 }
 0xbaf   : > { %v10007_v12 = vcombine.low %v9999_v50, %v10006_v8  ;;  %v12754_v54 = vcombine.low %v24218_v43, %v24220_v44  ;;  %11801 = vmatpush1.bf16.msra.mxu1 %v19137_v13  ;;  %v12706_v5 = vpop.f32.mrb[170].mxu0  ;;  %v19161_v13 = vld [vmem:[%s24786_s8 + $0xac8] ss:$16 sps:$4 sm:$0xff]  }
 0xbb0   : > { %v12707_v39 = vpop.f32.mrb[171].mxu0  ;;  %11802 = vmatprep.subr.bf16.mxu1 %v19142_v27  ;;  %v19166_v27 = vld [vmem:[%s24786_s8 + $0xaec] ss:$16 sps:$4 sm:$0xff]  }
 0xbb1   : > { %v10014_v60 = vrot.slane %v10007_v12, %v23705_v52 }
 0xbb3   : > { %v24232_v20 = vadd.f32 %v10014_v60, %v24112_v7  ;;  %11803 = vmatpush1.bf16.msra.mxu1 %v19140_v25  ;;  %v19151_v7 = vld [vmem:[%s24786_s8 + $0xa4c] ss:$16 sps:$4 sm:$0xff]   ;;  %v19164_v25 = vld [vmem:[%s24786_s8 + $0xae8] ss:$16 sps:$4 sm:$0xff]  }
 0xbb4   : > { %12095 = vmatprep.subr.bf16.mxu1 %v19145_v62  ;;  %v19169_v62 = vld [vmem:[%s24786_s8 + $0xb0c] ss:$16 sps:$4 sm:$0xff]   ;;  %v19167_v60 = vld [vmem:[%s24786_s8 + $0xb08] ss:$16 sps:$4 sm:$0xff]  }
 0xbb6   : > { %11821 = vmatmul.mubr.bf16.vlgmr.msra.gmra.mrb[12].mxu1 %v11585_v34  ;;  %v19154_v34 = vld [vmem:[%s24786_s8 + $0xa6c] ss:$16 sps:$4 sm:$0xff]  }
 0xbb7   : > { %12096 = vmatpush1.bf16.msra.mxu1 %v19143_v3  ;;  %12127 = vmatprep.mubr.bf16.mxu1 %v24857_v47  ;;  %v19172_v3 = vld [vmem:[%s24786_s8 + $0xb2c] ss:$16 sps:$4 sm:$0xff]  }
 0xbb8   : > { %12097 = vmatprep.subr.bf16.mxu1 %v19148_v55  ;;  %v19170_v55 = vld [vmem:[%s24786_s8 + $0xb28] ss:$16 sps:$4 sm:$0xff]  }
 0xbbb   : > { %12098 = vmatpush1.bf16.msra.mxu1 %v19146_v42  ;;  %v19175_v42 = vld [vmem:[%s24786_s8 + $0xb4c] ss:$16 sps:$4 sm:$0xff]  }
 0xbbc   : > { %12099 = vmatprep.subr.bf16.mxu1 %v19151_v7  ;;  %v19173_v7 = vld [vmem:[%s24786_s8 + $0xb48] ss:$16 sps:$4 sm:$0xff]  }
 0xbbf   : > { %12100 = vmatpush1.bf16.msra.mxu1 %v19149_v45  ;;  %v19176_v45 = vld [vmem:[%s24786_s8 + $0xb68] ss:$16 sps:$4 sm:$0xff]  }
 0xbc0   : > { %12101 = vmatprep.subr.bf16.mxu1 %v19154_v34  ;;  %v19181_v34 = vld [vmem:[%s24786_s8 + $0xb8c] ss:$16 sps:$4 sm:$0xff]  }
 0xbc3   : > { %12102 = vmatpush1.bf16.msra.mxu1 %v19152_v59  ;;  %v19179_v59 = vld [vmem:[%s24786_s8 + $0xb88] ss:$16 sps:$4 sm:$0xff]  }
 0xbc4   : > { %12103 = vmatprep.subr.bf16.mxu1 %v19157_v51  ;;  %v19184_v51 = vld [vmem:[%s24786_s8 + $0xbac] ss:$16 sps:$4 sm:$0xff]  }
 0xbc7   : > { %12104 = vmatpush1.bf16.msra.mxu1 %v19155_v2  ;;  %v19182_v2 = vld [vmem:[%s24786_s8 + $0xba8] ss:$16 sps:$4 sm:$0xff]  }
 0xbc8   : > { %12105 = vmatprep.subr.bf16.mxu1 %v19160_v22  ;;  %v19187_v22 = vld [vmem:[%s24786_s8 + $0xbcc] ss:$16 sps:$4 sm:$0xff]  }
 0xbc9   : > { %v10246_v28 = vpop.f32.mrb[244].mxu1 }
 0xbca   : > { %v10248_v33 = vpop.f32.mrb[245].mxu1 }
 0xbcb   : > { %v10298_v37 = vcombine.low %v10246_v28, %v10248_v33  ;;  %v10250_v6 = vpop.f32.mrb[246].mxu1  ;;  %12106 = vmatpush1.bf16.msra.mxu1 %v19158_v16 }
 0xbcc   : > { %v10251_v41 = vpop.f32.mrb[247].mxu1  ;;  %12107 = vmatprep.subr.bf16.mxu1 %v19163_v35  ;;  %v19185_v6 = vld [vmem:[%s24786_s8 + $0xbc8] ss:$16 sps:$4 sm:$0xff]  }
 0xbcd   : > { %v24279_v50 = vpop.f32.mrb[172].mxu0  ;;  %v19190_v41 = vld [vmem:[%s24786_s8 + $0xbec] ss:$16 sps:$4 sm:$0xff]  }
 0xbce   : > { %v24281_v8 = vpop.f32.mrb[173].mxu0 }
 0xbcf   : > { %v13061_v12 = vcombine.low %v24279_v50, %v24281_v8  ;;  %12108 = vmatpush1.bf16.msra.mxu1 %v19161_v13  ;;  %v13013_v5 = vpop.f32.mrb[174].mxu0 }
 0xbd0   : > { %v13014_v39 = vpop.f32.mrb[175].mxu0  ;;  %12109 = vmatprep.subr.bf16.mxu1 %v19166_v27  ;;  %v10306_v27 = vrot.slane %v10298_v37, %v23705_v52  ;;  %v19193_v37 = vld [vmem:[%s24786_s8 + $0xc0c] ss:$16 sps:$4 sm:$0xff]  }
 0xbd3   : > { %12110 = vmatpush1.bf16.msra.mxu1 %v19164_v25 }
 0xbd4   : > { %12402 = vmatprep.subr.bf16.mxu1 %v19169_v62 }
 0xbd6   : > { %12128 = vmatmul.mubr.bf16.vlgmr.msra.gmra.mrb[16].mxu1 %v11892_v17  ;;  %v19178_v17 = vld [vmem:[%s24786_s8 + $0xb6c] ss:$16 sps:$4 sm:$0xff]  }
 0xbd7   : > { %12403 = vmatpush1.bf16.msra.mxu1 %v19167_v60  ;;  %12434 = vmatprep.mubr.bf16.mxu1 %v24857_v47 }
 0xbd8   : > { %12404 = vmatprep.subr.bf16.mxu1 %v19172_v3 }
 0xbdb   : > { %12405 = vmatpush1.bf16.msra.mxu1 %v19170_v55  ;;  %v19188_v55 = vld [vmem:[%s24786_s8 + $0xbe8] ss:$16 sps:$4 sm:$0xff]  }
 0xbdc   : > { %12406 = vmatprep.subr.bf16.mxu1 %v19175_v42 }
 0xbdf   : > { %12407 = vmatpush1.bf16.msra.mxu1 %v19173_v7 }
 0xbe0   : > { %12408 = vmatprep.subr.bf16.mxu1 %v19178_v17 }
 0xbe3   : > { %12409 = vmatpush1.bf16.msra.mxu1 %v19176_v45  ;;  %v19191_v45 = vld [vmem:[%s24786_s8 + $0xc08] ss:$16 sps:$4 sm:$0xff]  }
 0xbe4   : > { %12410 = vmatprep.subr.bf16.mxu1 %v19181_v34  ;;  %v19196_v34 = vld [vmem:[%s24786_s8 + $0xc2c] ss:$16 sps:$4 sm:$0xff]  }
 0xbe7   : > { %12411 = vmatpush1.bf16.msra.mxu1 %v19179_v59  ;;  %v19194_v59 = vld [vmem:[%s24786_s8 + $0xc28] ss:$16 sps:$4 sm:$0xff]  }
 0xbe8   : > { %12412 = vmatprep.subr.bf16.mxu1 %v19184_v51  ;;  %v19197_v51 = vld [vmem:[%s24786_s8 + $0xc48] ss:$16 sps:$4 sm:$0xff]  }
 0xbe9   : > { %v10287_v16 = vpop.f32.mrb[248].mxu1 }
 0xbea   : > { %v10289_v35 = vpop.f32.mrb[249].mxu1 }
 0xbeb   : > { %v10299_v28 = vcombine.low %v10287_v16, %v10289_v35  ;;  %v10291_v33 = vpop.f32.mrb[250].mxu1  ;;  %12413 = vmatpush1.bf16.msra.mxu1 %v19182_v2  ;;  %v19200_v2 = vld [vmem:[%s24786_s8 + $0xc68] ss:$16 sps:$4 sm:$0xff]   ;;  %v19208_v35 = vld [vmem:[%s24786_s8 + $0xcac] ss:$16 sps:$4 sm:$0xff]  }
 0xbec   : > { %v10292_v13 = vpop.f32.mrb[251].mxu1  ;;  %12414 = vmatprep.subr.bf16.mxu1 %v19187_v22  ;;  %v19205_v22 = vld [vmem:[%s24786_s8 + $0xc8c] ss:$16 sps:$4 sm:$0xff]   ;;  %v19203_v16 = vld [vmem:[%s24786_s8 + $0xc88] ss:$16 sps:$4 sm:$0xff]  }
 0xbed   : > { %v10313_v5 = vrot.slane %v10299_v28, %v23705_v52  ;;  %v24338_v25 = vpop.f32.mrb[176].mxu0  ;;  %v19206_v28 = vld [vmem:[%s24786_s8 + $0xca8] ss:$16 sps:$4 sm:$0xff]   ;;  %v19211_v33 = vld [vmem:[%s24786_s8 + $0xccc] ss:$16 sps:$4 sm:$0xff]  }
 0xbee   : > { %v24340_v39 = vpop.f32.mrb[177].mxu0 }
 0xbef   : > { %v10314_v62 = vcombine.low %v10306_v27, %v10313_v5  ;;  %v13368_v60 = vcombine.low %v24338_v25, %v24340_v39  ;;  %12415 = vmatpush1.bf16.msra.mxu1 %v19185_v6  ;;  %v13320_v3 = vpop.f32.mrb[178].mxu0  ;;  %v19209_v5 = vld [vmem:[%s24786_s8 + $0xcc8] ss:$16 sps:$4 sm:$0xff]  }
 0xbf0   : > { %v13321_v42 = vpop.f32.mrb[179].mxu0  ;;  %12416 = vmatprep.subr.bf16.mxu1 %v19190_v41  ;;  %v19214_v3 = vld [vmem:[%s24786_s8 + $0xcec] ss:$16 sps:$4 sm:$0xff]  }
 0xbf1   : > { %v10321_v7 = vrot.slane %v10314_v62, %v23705_v52 }
 0xbf3   : > { %v10323_v17 = vadd.f32 %v10321_v7, %v24232_v20  ;;  %12417 = vmatpush1.bf16.msra.mxu1 %v19188_v55  ;;  %v19199_v20 = vld [vmem:[%s24786_s8 + $0xc4c] ss:$16 sps:$4 sm:$0xff]   ;;  %v10613_v55 = vrot.slane %v10605_v4, %v23705_v52 }
 0xbf4   : > { %12709 = vmatprep.subr.bf16.mxu1 %v19193_v37 }
 0xbf6   : > { %12435 = vmatmul.mubr.bf16.vlgmr.msra.gmra.mrb[20].mxu1 %v12199_v32  ;;  %v19202_v32 = vld [vmem:[%s24786_s8 + $0xc6c] ss:$16 sps:$4 sm:$0xff]  }
 0xbf7   : > { %12710 = vmatpush1.bf16.msra.mxu1 %v19191_v45  ;;  %12741 = vmatprep.mubr.bf16.mxu1 %v24857_v47 }
 0xbf8   : > { %12711 = vmatprep.subr.bf16.mxu1 %v19196_v34 }
 0xbfb   : > { %12712 = vmatpush1.bf16.msra.mxu1 %v19194_v59 }
 0xbfc   : > { %12713 = vmatprep.subr.bf16.mxu1 %v19199_v20  ;;  %v19212_v20 = vld [vmem:[%s24786_s8 + $0xce8] ss:$16 sps:$4 sm:$0xff]  }
 0xbff   : > { %12714 = vmatpush1.bf16.msra.mxu1 %v19197_v51 }
 0xc00   : > { %12715 = vmatprep.subr.bf16.mxu1 %v19202_v32  ;;  %v19215_v32 = vld [vmem:[%s24786_s8 + $0xd08] ss:$16 sps:$4 sm:$0xff]  }
 0xc03   : > { %12716 = vmatpush1.bf16.msra.mxu1 %v19200_v2  ;;  %v19220_v2 = vld [vmem:[%s24786_s8 + $0xd2c] ss:$16 sps:$4 sm:$0xff]  }
 0xc04   : > { %12717 = vmatprep.subr.bf16.mxu1 %v19205_v22  ;;  %v19218_v22 = vld [vmem:[%s24786_s8 + $0xd28] ss:$16 sps:$4 sm:$0xff]  }
 0xc07   : > { %12718 = vmatpush1.bf16.msra.mxu1 %v19203_v16  ;;  %v19221_v16 = vld [vmem:[%s24786_s8 + $0xd48] ss:$16 sps:$4 sm:$0xff]  }
 0xc08   : > { %12719 = vmatprep.subr.bf16.mxu1 %v19208_v35  ;;  %v19224_v35 = vld [vmem:[%s24786_s8 + $0xd68] ss:$16 sps:$4 sm:$0xff]  }
 0xc09   : > { %v10594_v6 = vpop.f32.mrb[252].mxu1 }
 0xc0a   : > { %v10596_v13 = vpop.f32.mrb[253].mxu1 }
 0xc0b   : > { %v10606_v41 = vcombine.low %v10594_v6, %v10596_v13  ;;  %v10598_v27 = vpop.f32.mrb[254].mxu1  ;;  %12720 = vmatpush1.bf16.msra.mxu1 %v19206_v28  ;;  %v19229_v28 = vld [vmem:[%s24786_s8 + $0xd8c] ss:$16 sps:$4 sm:$0xff]   ;;  %v19230_v13 = vld [vmem:[%s24786_s8 + $0xda8] ss:$16 sps:$4 sm:$0xff]  }
 0xc0c   : > { %v10599_v62 = vpop.f32.mrb[255].mxu1  ;;  %12721 = vmatprep.subr.bf16.mxu1 %v19211_v33  ;;  %v19227_v33 = vld [vmem:[%s24786_s8 + $0xd88] ss:$16 sps:$4 sm:$0xff]   ;;  %v19232_v6 = vld [vmem:[%s24786_s8 + $0xdac] ss:$16 sps:$4 sm:$0xff]  }
 0xc0d   : > { %v10620_v42 = vrot.slane %v10606_v41, %v23705_v52  ;;  %v24402_v37 = vpop.f32.mrb[180].mxu0  ;;  %v19235_v41 = vld [vmem:[%s24786_s8 + $0xdcc] ss:$16 sps:$4 sm:$0xff]  }
 0xc0e   : > { %v24404_v7 = vpop.f32.mrb[181].mxu0 }
 0xc0f   : > { %v10621_v45 = vcombine.low %v10613_v55, %v10620_v42  ;;  %v13675_v34 = vcombine.low %v24402_v37, %v24404_v7  ;;  %12722 = vmatpush1.bf16.msra.mxu1 %v19209_v5  ;;  %v13627_v59 = vpop.f32.mrb[182].mxu0  ;;  %v19233_v55 = vld [vmem:[%s24786_s8 + $0xdc8] ss:$16 sps:$4 sm:$0xff]  }
 0xc10   : > { %v13628_v51 = vpop.f32.mrb[183].mxu0  ;;  %12723 = vmatprep.subr.bf16.mxu1 %v19214_v3  ;;  %v10920_v59 = vrot.slane %v10912_v1, %v23705_v52  ;;  %v19242_v1 = vld [vmem:[%s24786_s8 + $0xe28] ss:$16 sps:$4 sm:$0xff]  }
 0xc11   : > { %v10628_v40 = vrot.slane %v10621_v45, %v23705_v52  ;;  %v19238_v45 = vld [vmem:[%s24786_s8 + $0xdec] ss:$16 sps:$4 sm:$0xff]  }
 0xc13   : > { %v10630_v4 = vadd.f32 %v10628_v40, %v10323_v17  ;;  %12724 = vmatpush1.bf16.msra.mxu1 %v19212_v20  ;;  %v19223_v17 = vld [vmem:[%s24786_s8 + $0xd4c] ss:$16 sps:$4 sm:$0xff]  }
 0xc14   : > { %13016 = vmatprep.subr.bf16.mxu1 %v19217_v61  ;;  %v19236_v61 = vld [vmem:[%s24786_s8 + $0xde8] ss:$16 sps:$4 sm:$0xff]   ;;  %v19241_v40 = vld [vmem:[%s24786_s8 + $0xe0c] ss:$16 sps:$4 sm:$0xff]  }
 0xc16   : > { %12742 = vmatmul.mubr.bf16.vlgmr.msra.gmra.mrb[24].mxu1 %v12506_v57  ;;  %v19226_v57 = vld [vmem:[%s24786_s8 + $0xd6c] ss:$16 sps:$4 sm:$0xff]  }
 0xc17   : > { %13017 = vmatpush1.bf16.msra.mxu1 %v19215_v32  ;;  %13048 = vmatprep.mubr.bf16.mxu1 %v24857_v47 }
 0xc18   : > { %13018 = vmatprep.subr.bf16.mxu1 %v19220_v2 }
 0xc1b   : > { %13019 = vmatpush1.bf16.msra.mxu1 %v19218_v22  ;;  %v19245_v22 = vld [vmem:[%s24786_s8 + $0xe48] ss:$16 sps:$4 sm:$0xff]  }
 0xc1c   : > { %13020 = vmatprep.subr.bf16.mxu1 %v19223_v17  ;;  %v19248_v17 = vld [vmem:[%s24786_s8 + $0xe68] ss:$16 sps:$4 sm:$0xff]  }
 0xc1f   : > { %13021 = vmatpush1.bf16.msra.mxu1 %v19221_v16  ;;  %v19253_v16 = vld [vmem:[%s24786_s8 + $0xe8c] ss:$16 sps:$4 sm:$0xff]  }
 0xc20   : > { %13022 = vmatprep.subr.bf16.mxu1 %v19226_v57  ;;  %v19251_v57 = vld [vmem:[%s24786_s8 + $0xe88] ss:$16 sps:$4 sm:$0xff]  }
 0xc23   : > { %13023 = vmatpush1.bf16.msra.mxu1 %v19224_v35  ;;  %v19256_v35 = vld [vmem:[%s24786_s8 + $0xeac] ss:$16 sps:$4 sm:$0xff]  }
 0xc24   : > { %13024 = vmatprep.subr.bf16.mxu1 %v19229_v28  ;;  %v19254_v28 = vld [vmem:[%s24786_s8 + $0xea8] ss:$16 sps:$4 sm:$0xff]  }
 0xc27   : > { %13025 = vmatpush1.bf16.msra.mxu1 %v19227_v33  ;;  %v19259_v33 = vld [vmem:[%s24786_s8 + $0xecc] ss:$16 sps:$4 sm:$0xff]  }
 0xc28   : > { %13026 = vmatprep.subr.bf16.mxu1 %v19232_v6 }
 0xc29   : > { %v10901_v27 = vpop.f32.mrb[0].mxu1 }
 0xc2a   : > { %v10903_v5 = vpop.f32.mrb[1].mxu1 }
 0xc2b   : > { %v10913_v62 = vcombine.low %v10901_v27, %v10903_v5  ;;  %v10905_v3 = vpop.f32.mrb[2].mxu1  ;;  %13027 = vmatpush1.bf16.msra.mxu1 %v19230_v13  ;;  %v19257_v5 = vld [vmem:[%s24786_s8 + $0xec8] ss:$16 sps:$4 sm:$0xff]  }
 0xc2c   : > { %v10906_v42 = vpop.f32.mrb[3].mxu1  ;;  %13028 = vmatprep.subr.bf16.mxu1 %v19235_v41  ;;  %v19262_v3 = vld [vmem:[%s24786_s8 + $0xeec] ss:$16 sps:$4 sm:$0xff]  }
 0xc2d   : > { %v10927_v20 = vrot.slane %v10913_v62, %v23705_v52 }
 0xc2f   : > { %v10928_v51 = vcombine.low %v10920_v59, %v10927_v20  ;;  %13029 = vmatpush1.bf16.msra.mxu1 %v19233_v55  ;;  %v11227_v55 = vrot.slane %v11219_v53, %v23705_v52  ;;  %v19260_v59 = vld [vmem:[%s24786_s8 + $0xee8] ss:$16 sps:$4 sm:$0xff]   ;;  %v19265_v20 = vld [vmem:[%s24786_s8 + $0xf0c] ss:$16 sps:$4 sm:$0xff]  }
 0xc30   : > { %13030 = vmatprep.subr.bf16.mxu1 %v19238_v45  ;;  %v19266_v53 = vld [vmem:[%s24786_s8 + $0xf28] ss:$16 sps:$4 sm:$0xff]  }
 0xc31   : > { %v10935_v32 = vrot.slane %v10928_v51, %v23705_v52 }
 0xc33   : > { %v10937_v2 = vadd.f32 %v10935_v32, %v10630_v4  ;;  %13031 = vmatpush1.bf16.msra.mxu1 %v19236_v61  ;;  %v19247_v4 = vld [vmem:[%s24786_s8 + $0xe4c] ss:$16 sps:$4 sm:$0xff]   ;;  %v19269_v32 = vld [vmem:[%s24786_s8 + $0xf48] ss:$16 sps:$4 sm:$0xff]  }
 0xc34   : > { %13323 = vmatprep.subr.bf16.mxu1 %v19241_v40  ;;  %v19271_v40 = vld [vmem:[%s24786_s8 + $0xf4c] ss:$16 sps:$4 sm:$0xff]  }
 0xc36   : > { %13049 = vmatmul.mubr.bf16.vlgmr.msra.gmra.mrb[28].mxu1 %v12813_v38  ;;  %v19250_v38 = vld [vmem:[%s24786_s8 + $0xe6c] ss:$16 sps:$4 sm:$0xff]  }
 0xc37   : > { %13324 = vmatpush1.bf16.msra.mxu1 %v19239_v48  ;;  %13355 = vmatprep.mubr.bf16.mxu1 %v24857_v47  ;;  %v19280_v48 = vld [vmem:[%s24786_s8 + $0xfac] ss:$16 sps:$4 sm:$0xff]  }
 0xc38   : > { %13325 = vmatprep.subr.bf16.mxu1 %v19244_v10  ;;  %v19278_v10 = vld [vmem:[%s24786_s8 + $0xfa8] ss:$16 sps:$4 sm:$0xff]  }
 0xc3b   : > { %13326 = vmatpush1.bf16.msra.mxu1 %v19242_v1  ;;  %v19283_v1 = vld [vmem:[%s24786_s8 + $0xfcc] ss:$16 sps:$4 sm:$0xff]  }
 0xc3c   : > { %13327 = vmatprep.subr.bf16.mxu1 %v19247_v4 }
 0xc3f   : > { %13328 = vmatpush1.bf16.msra.mxu1 %v19245_v22 }
 0xc40   : > { %13329 = vmatprep.subr.bf16.mxu1 %v19250_v38 }
 0xc43   : > { %13330 = vmatpush1.bf16.msra.mxu1 %v19248_v17 }
 0xc44   : > { %13331 = vmatprep.subr.bf16.mxu1 %v19253_v16  ;;  %v19281_v16 = vld [vmem:[%s24786_s8 + $0xfc8] ss:$16 sps:$4 sm:$0xff]  }
 0xc47   : > { %13332 = vmatpush1.bf16.msra.mxu1 %v19251_v57 }
 0xc48   : > { %13333 = vmatprep.subr.bf16.mxu1 %v19256_v35  ;;  %v19286_v35 = vld [vmem:[%s24786_s8 + $0xfec] ss:$16 sps:$4 sm:$0xff]  }
 0xc49   : > { %v11208_v6 = vpop.f32.mrb[4].mxu1 }
 0xc4a   : > { %v11210_v13 = vpop.f32.mrb[5].mxu1 }
 0xc4b   : > { %v11220_v41 = vcombine.low %v11208_v6, %v11210_v13  ;;  %v11212_v27 = vpop.f32.mrb[6].mxu1  ;;  %13334 = vmatpush1.bf16.msra.mxu1 %v19254_v28  ;;  %v11534_v28 = vrot.slane %v11526_v18, %v23705_v52  ;;  %v19284_v13 = vld [vmem:[%s24786_s8 + $0xfe8] ss:$16 sps:$4 sm:$0xff]  }
 0xc4c   : > { %v11213_v62 = vpop.f32.mrb[7].mxu1  ;;  %13335 = vmatprep.subr.bf16.mxu1 %v19259_v33 }
 0xc4d   : > { %v11234_v42 = vrot.slane %v11220_v41, %v23705_v52 }
 0xc4f   : > { %v11235_v45 = vcombine.low %v11227_v55, %v11234_v42  ;;  %13336 = vmatpush1.bf16.msra.mxu1 %v19257_v5 }
 0xc50   : > { %13337 = vmatprep.subr.bf16.mxu1 %v19262_v3  ;;  %v11841_v3 = vrot.slane %v11833_v29, %v23705_v52 }
 0xc51   : > { %v11242_v51 = vrot.slane %v11235_v45, %v23705_v52 }
 0xc53   : > { %v11244_v61 = vadd.f32 %v11242_v51, %v10937_v2  ;;  %13338 = vmatpush1.bf16.msra.mxu1 %v19260_v59  ;;  %v19275_v2 = vld [vmem:[%s24786_s8 + $0xf88] ss:$16 sps:$4 sm:$0xff]  }
 0xc54   : > { %13630 = vmatprep.subr.bf16.mxu1 %v19265_v20 }
 0xc56   : > { %13356 = vmatmul.mubr.bf16.vlgmr.msra.gmra.mrb[32].mxu1 %v13120_v23  ;;  %v19277_v23 = vld [vmem:[%s24786_s8 + $0xf8c] ss:$16 sps:$4 sm:$0xff]  }
 0xc57   : > { %13631 = vmatpush1.bf16.msra.mxu1 %v19263_v15  ;;  %13662 = vmatprep.mubr.bf16.mxu1 %v24857_v47  ;;  %v19272_v47 = vld [vmem:[%s24786_s8 + $0xf68] ss:$16 sps:$4 sm:$0xff]   ;;  %v12148_v15 = vrot.slane %v12140_v19, %v23705_v52 }
 0xc58   : > { %13632 = vmatprep.subr.bf16.mxu1 %v19268_v31  ;;  %v19292_v19 = vld [vmem:[%s24788_s10 + $0xc8] sm:$0xff]  }
 0xc5b   : > { %13633 = vmatpush1.bf16.msra.mxu1 %v19266_v53  ;;  %v19287_v53 = vld [vmem:[%s24788_s10 + $0x40] sm:$0xff]  }
 0xc5c   : > { %13634 = vmatprep.subr.bf16.mxu1 %v19271_v40  ;;  %v19288_v40 = vld [vmem:[%s24788_s10 + $0xc0] sm:$0xff]   ;;  %17313 = vmatprep.subr.bf16.mxu0 %v19287_v53 }
 0xc5f   : > { %13635 = vmatpush1.bf16.msra.mxu1 %v19269_v32  ;;  %v19289_v32 = vld [vmem:[%s24788_s10] sm:$0xff]  }
 0xc60   : > { %13636 = vmatprep.subr.bf16.mxu1 %v19274_v63  ;;  %17314 = vmatpush3.bf16.msra.mxu0 %v19289_v32  ;;  %v19293_v63 = vld [vmem:[%s24788_s10 + $0x8] sm:$0xff]  }
 0xc61   : > { %17315 = vmatprep.subr.bf16.mxu0 %v19291_v56 }
 0xc63   : > { %13637 = vmatpush1.bf16.msra.mxu1 %v19272_v47  ;;  %v19294_v47 = vld [vmem:[%s24788_s10 + $0x88] sm:$0xff]  }
 0xc64   : > { %13638 = vmatprep.subr.bf16.mxu1 %v19277_v23  ;;  %v19295_v23 = vld [vmem:[%s24788_s10 + $0x50] sm:$0xff]   ;;  %17316 = vmatpush3.bf16.msra.mxu0 %v19293_v63 }
 0xc65   : > { %17317 = vmatprep.subr.bf16.mxu0 %v19295_v23  ;;  %v13069_v23 = vrot.slane %v13061_v12, %v23705_v52 }
 0xc67   : > { %13639 = vmatpush1.bf16.msra.mxu1 %v19275_v2  ;;  %v19296_v2 = vld [vmem:[%s24788_s10 + $0xd0] sm:$0xff]  }
 0xc68   : > { %13640 = vmatprep.subr.bf16.mxu1 %v19280_v48  ;;  %v19297_v48 = vld [vmem:[%s24788_s10 + $0x10] sm:$0xff]  }
 0xc69   : > { %v11515_v4 = vpop.f32.mrb[8].mxu1  ;;  %17318 = vmatpush3.bf16.msra.mxu0 %v19297_v48 }
 0xc6a   : > { %v11517_v22 = vpop.f32.mrb[9].mxu1 }
 0xc6b   : > { %v11527_v38 = vcombine.low %v11515_v4, %v11517_v22  ;;  %v11519_v17 = vpop.f32.mrb[10].mxu1  ;;  %13641 = vmatpush1.bf16.msra.mxu1 %v19278_v10  ;;  %v19298_v10 = vld [vmem:[%s24788_s10 + $0x90] sm:$0xff]   ;;  %v19300_v4 = vld [vmem:[%s24788_s10 + $0xd8] sm:$0xff]  }
 0xc6c   : > { %v11520_v57 = vpop.f32.mrb[11].mxu1  ;;  %13642 = vmatprep.subr.bf16.mxu1 %v19283_v1  ;;  %v19299_v1 = vld [vmem:[%s24788_s10 + $0x58] sm:$0xff]  }
 0xc6d   : > { %v11541_v33 = vrot.slane %v11527_v38, %v23705_v52  ;;  %17319 = vmatprep.subr.bf16.mxu0 %v19299_v1  ;;  %v19301_v38 = vld [vmem:[%s24788_s10 + $0x18] sm:$0xff]  }
 0xc6e   : > { %v19302_v17 = vld [vmem:[%s24788_s10 + $0x98] sm:$0xff]   ;;  %17320 = vmatpush3.bf16.msra.mxu0 %v19301_v38  ;;  %v13376_v38 = vrot.slane %v13368_v60, %v23705_v52  ;;  %v13705_v60 = vsub.s32 0, %v23690_v14 }
 0xc6f   : > { %v11542_v6 = vcombine.low %v11534_v28, %v11541_v33  ;;  %13643 = vmatpush1.bf16.msra.mxu1 %v19281_v16  ;;  %v19303_v33 = vld [vmem:[%s24788_s10 + $0x60] sm:$0xff]  }
 0xc70   : > { %13644 = vmatprep.subr.bf16.mxu1 %v19286_v35  ;;  %17321 = vmatprep.subr.bf16.mxu0 %v19303_v33 }
 0xc71   : > { %v11549_v41 = vrot.slane %v11542_v6, %v23705_v52  ;;  %v19304_v6 = vld [vmem:[%s24788_s10 + $0xe0] sm:$0xff]  }
 0xc73   : > { %v11551_v27 = vadd.f32 %v11549_v41, %v11244_v61  ;;  %13645 = vmatpush1.bf16.msra.mxu1 %v19284_v13  ;;  %v12455_v13 = vrot.slane %v12447_v49, %v23705_v52 }
 0xc74   : > { %17335 = vmatprep.subr.bf16.mxu1 %v19288_v40 }
 0xc76   : > { %13663 = vmatmul.mubr.bf16.vlgmr.msra.gmra.mrb[36].mxu1 %v13427_v21 }
 0xc77   : > { %17336 = vmatpush3.bf16.msra.mxu1 %v19290_v11 }
 0xc78   : > { %17337 = vmatprep.subr.bf16.mxu1 %v19292_v19 }
 0xc7b   : > { %17338 = vmatpush3.bf16.msra.mxu1 %v19294_v47 }
 0xc7c   : > { %17339 = vmatprep.subr.bf16.mxu1 %v19296_v2 }
 0xc7f   : > { %17340 = vmatpush3.bf16.msra.mxu1 %v19298_v10 }
 0xc80   : > { %17341 = vmatprep.subr.bf16.mxu1 %v19300_v4 }
 0xc83   : > { %17342 = vmatpush3.bf16.msra.mxu1 %v19302_v17 }
 0xc84   : > { %17343 = vmatprep.subr.bf16.mxu1 %v19304_v6  ;;  %v13683_v6 = vrot.slane %v13675_v34, %v23705_v52 }
 0xc89   : > { %v11822_v5 = vpop.f32.mrb[12].mxu1 }
 0xc8a   : > { %v11824_v62 = vpop.f32.mrb[13].mxu1 }
 0xc8b   : > { %v11834_v46 = vcombine.low %v11822_v5, %v11824_v62  ;;  %v11826_v26 = vpop.f32.mrb[14].mxu1  ;;  %v19306_v5 = vld [vmem:[%s24788_s10 + $0xa0] sm:$0xff]  }
 0xc8c   : > { %v11827_v18 = vpop.f32.mrb[15].mxu1  ;;  %17344 = vmatpush3.bf16.msra.mxu1 %v19306_v5  ;;  %v19310_v26 = vld [vmem:[%s24788_s10 + $0xa8] sm:$0xff]   ;;  %v13709_v5 = vsub.s32 1, %v23690_v14 }
 0xc8d   : > { %v11848_v55 = vrot.slane %v11834_v46, %v23705_v52  ;;  %v19309_v46 = vld [vmem:[%s24788_s10 + $0x28] sm:$0xff]   ;;  %17345 = vmatprep.subr.bf16.mxu1 %v19308_v36 }
 0xc8f   : > { %v11849_v42 = vcombine.low %v11841_v3, %v11848_v55  ;;  %v19311_v3 = vld [vmem:[%s24788_s10 + $0x70] sm:$0xff]  }
 0xc90   : > { %17346 = vmatpush3.bf16.msra.mxu1 %v19310_v26  ;;  %v19312_v55 = vld [vmem:[%s24788_s10 + $0xf0] sm:$0xff]  }
 0xc91   : > { %v11856_v45 = vrot.slane %v11849_v42, %v23705_v52  ;;  %v19313_v42 = vld [vmem:[%s24788_s10 + $0x30] sm:$0xff]   ;;  %17347 = vmatprep.subr.bf16.mxu1 %v19312_v55  ;;  %v13791_v55 = vld [vmem:[%s24789_s11] sm:$0x1] }
 0xc93   : > { %v11858_v59 = vadd.f32 %v11856_v45, %v11551_v27  ;;  %v19305_v27 = vld [vmem:[%s24788_s10 + $0x20] sm:$0xff]   ;;  %v19314_v45 = vld [vmem:[%s24788_s10 + $0xb0] sm:$0xff]  }
 0xc94   : > { %17322 = vmatpush3.bf16.msra.mxu0 %v19305_v27  ;;  %17348 = vmatpush3.bf16.msra.mxu1 %v19314_v45  ;;  %v13713_v27 = vsub.s32 2, %v23690_v14  ;;  %v14065_v45 = vand.u32 127, %v9072_v30 }
 0xc95   : > { %17323 = vmatprep.subr.bf16.mxu0 %v19307_v0 }
 0xc96   : > { %vm14066_vm4 = vcmp.lt.s32.totalorder %v14065_v45, 10 }
 0xc98   : > { %17324 = vmatpush3.bf16.msra.mxu0 %v19309_v46 }
 0xc99   : > { %17325 = vmatprep.subr.bf16.mxu0 %v19311_v3 }
 0xc9c   : > { %17326 = vmatpush3.bf16.msra.mxu0 %v19313_v42 }
 0xca9   : > { %v12129_v20 = vpop.f32.mrb[16].mxu1 }
 0xcaa   : > { %v12131_v51 = vpop.f32.mrb[17].mxu1 }
 0xcab   : > { %v12141_v9 = vcombine.low %v12129_v20, %v12131_v51  ;;  %v12133_v21 = vpop.f32.mrb[18].mxu1  ;;  %v19316_v20 = vld [vmem:[%s24788_s10 + $0xf8] sm:$0xff]  }
 0xcac   : > { %v12134_v61 = vpop.f32.mrb[19].mxu1  ;;  %v19317_v51 = vld [vmem:[%s24788_s10 + $0x38] sm:$0xff]   ;;  %17349 = vmatprep.subr.bf16.mxu1 %v19316_v20 }
 0xcad   : > { %v12155_v31 = vrot.slane %v12141_v9, %v23705_v52  ;;  %v19318_v9 = vld [vmem:[%s24788_s10 + $0xb8] sm:$0xff]  }
 0xcae   : > { %17350 = vmatpush3.bf16.msra.mxu1 %v19318_v9 }
 0xcaf   : > { %v12156_v58 = vcombine.low %v12148_v15, %v12155_v31 }
 0xcb1   : > { %v12163_v24 = vrot.slane %v12156_v58, %v23705_v52 }
 0xcb3   : > { %v12165_v29 = vadd.f32 %v12163_v24, %v11858_v59  ;;  %v19315_v59 = vld [vmem:[%s24788_s10 + $0x78] sm:$0xff]   ;;  %v12762_v24 = vrot.slane %v12754_v54, %v23705_v52 }
 0xcb4   : > { %17327 = vmatprep.subr.bf16.mxu0 %v19315_v59 }
 0xcb5   : > { %17328 = vmatpush3.bf16.msra.mxu0 %v19317_v51 }
 0xcc9   : > { %v12436_v22 = vpop.f32.mrb[20].mxu1 }
 0xcca   : > { %v12438_v16 = vpop.f32.mrb[21].mxu1 }
 0xccb   : > { %v12448_v57 = vcombine.low %v12436_v22, %v12438_v16  ;;  %v12440_v35 = vpop.f32.mrb[22].mxu1 }
 0xccc   : > { %v12441_v28 = vpop.f32.mrb[23].mxu1 }
 0xccd   : > { %v12462_v41 = vrot.slane %v12448_v57, %v23705_v52 }
 0xccf   : > { %v12463_v62 = vcombine.low %v12455_v13, %v12462_v41 }
 0xcd1   : > { %v12470_v49 = vrot.slane %v12463_v62, %v23705_v52  ;;  %v13717_v62 = vsub.s32 3, %v23690_v14 }
 0xcd3   : > { %v12472_v18 = vadd.f32 %v12470_v49, %v12165_v29 }
 0xce9   : > { %v12743_v21 = vpop.f32.mrb[24].mxu1 }
 0xcea   : > { %v12745_v61 = vpop.f32.mrb[25].mxu1 }
 0xceb   : > { %v12755_v15 = vcombine.low %v12743_v21, %v12745_v61  ;;  %v12747_v31 = vpop.f32.mrb[26].mxu1 }
 0xcec   : > { %v12748_v58 = vpop.f32.mrb[27].mxu1 }
 0xced   : > { %v12769_v29 = vrot.slane %v12755_v15, %v23705_v52 }
 0xcef   : > { %v12770_v53 = vcombine.low %v12762_v24, %v12769_v29 }
 0xcf1   : > { %v12777_v40 = vrot.slane %v12770_v53, %v23705_v52 }
 0xcf3   : > { %v12779_v32 = vadd.f32 %v12777_v40, %v12472_v18 }
 0xd09   : > { %v13050_v11 = vpop.f32.mrb[28].mxu1 }
 0xd0a   : > { %v13052_v56 = vpop.f32.mrb[29].mxu1 }
 0xd0b   : > { %v13062_v19 = vcombine.low %v13050_v11, %v13052_v56  ;;  %v13054_v63 = vpop.f32.mrb[30].mxu1 }
 0xd0c   : > { %v13055_v47 = vpop.f32.mrb[31].mxu1 }
 0xd0d   : > { %v13076_v2 = vrot.slane %v13062_v19, %v23705_v52 }
 0xd0f   : > { %v13077_v43 = vcombine.low %v13069_v23, %v13076_v2 }
 0xd11   : > { %v13084_v44 = vrot.slane %v13077_v43, %v23705_v52 }
 0xd13   : > { %v13086_v54 = vadd.f32 %v13084_v44, %v12779_v32 }
 0xd29   : > { %v13357_v48 = vpop.f32.mrb[32].mxu1 }
 0xd2a   : > { %v13359_v10 = vpop.f32.mrb[33].mxu1 }
 0xd2b   : > { %v13369_v1 = vcombine.low %v13357_v48, %v13359_v10  ;;  %v13361_v4 = vpop.f32.mrb[34].mxu1 }
 0xd2c   : > { %v13362_v22 = vpop.f32.mrb[35].mxu1 }
 0xd2d   : > { %v13383_v17 = vrot.slane %v13369_v1, %v23705_v52 }
 0xd2f   : > { %v13384_v50 = vcombine.low %v13376_v38, %v13383_v17 }
 0xd31   : > { %v13391_v8 = vrot.slane %v13384_v50, %v23705_v52 }
 0xd33   : > { %v13393_v12 = vadd.f32 %v13391_v8, %v13086_v54 }
 0xd49   : > { %v13664_v16 = vpop.f32.mrb[36].mxu1 }
 0xd4a   : > { %v13666_v57 = vpop.f32.mrb[37].mxu1 }
 0xd4b   : > { %v13676_v35 = vcombine.low %v13664_v16, %v13666_v57  ;;  %v13668_v28 = vpop.f32.mrb[38].mxu1 }
 0xd4c   : > { %v13669_v33 = vpop.f32.mrb[39].mxu1 }
 0xd4d   : > { %v13690_v13 = vrot.slane %v13676_v35, %v23705_v52 }
 0xd4f   : > { %v13691_v25 = vcombine.low %v13683_v6, %v13690_v13 }
 0xd51   : > { %v13698_v39 = vrot.slane %v13691_v25, %v23705_v52 }
 0xd53   : > { %v13700_v41 = vadd.f32 %v13698_v39, %v13393_v12 }
 0xd55   : > { %v13701_v0 = vmax.f32 %v13700_v41, 0.0 }
 0xd57   : > { %v13706_v36 = vrot.slane %v13701_v0, %v13705_v60  ;;  %v13714_v49 = vrot.slane %v13701_v0, %v13713_v27  ;;  %v13710_v46 = vrot.slane %v13701_v0, %v13709_v5  ;;  %v13718_v37 = vrot.slane %v13701_v0, %v13717_v62 }
 0xd59   : > { %v13723_v7 = vpack.c.bf16 %v13706_v36, %v13706_v36  ;;  %v13725_v34 = vpack.c.bf16 %v13714_v49, %v13714_v49  ;;  %v13724_v26 = vpack.c.bf16 %v13710_v46, %v13710_v46  ;;  %v13726_v18 = vpack.c.bf16 %v13718_v37, %v13718_v37 }
 0xd5b   : > { %14016 = vmatprep.mubr.bf16.mxu0 %v13724_v26  ;;  %14056 = vmatprep.mubr.bf16.mxu1 %v13726_v18 }
 0xd5c   : > { %14017 = vmatmul.mubr.bf16.vlgmr.msra.gmra.mrb[184].mxu0 %v13723_v7  ;;  %14057 = vmatmul.mubr.bf16.vlgmr.msra.gmra.mrb[40].mxu1 %v13725_v34 }
 0xe2f   : > { %v17329_v52 = vpop.f32.mrb[184].mxu0  ;;  %v17351_v3 = vpop.f32.mrb[40].mxu1 }
 0xe30   : > { %v17330_v14 = vpop.f32.mrb[185].mxu0  ;;  %v17352_v42 = vpop.f32.mrb[41].mxu1 }
 0xe31   : > { %v17331_v59 = vadd.f32 %v17330_v14, %v17329_v52  ;;  %v17353_v20 = vadd.f32 %v17352_v42, %v17351_v3  ;;  %v17332_v51 = vpop.f32.mrb[186].mxu0  ;;  %v17354_v9 = vpop.f32.mrb[42].mxu1 }
 0xe32   : > { %v17333_v21 = vpop.f32.mrb[187].mxu0  ;;  %v17355_v61 = vpop.f32.mrb[43].mxu1 }
 0xe33   : > { %v14019_v15 = vadd.f32 %v17331_v59, %v13791_v55 }
 0xe35   : > { %v14059_v31 = vadd.f32 %v17353_v20, %v14019_v15 }
 0xe37   : > { %v14067_v58 = vsel %vm14066_vm4, %v14059_v31, -1e+30 }
 0xe38   : > { %v14069_v24 = vsel %vm14068_vm5, %v14067_v58, -inf }
 0xe39   : > { %14070 = vmax.xlane.f32.xlu0 %v14069_v24 }
 0xec6   : > { %v14071_v29 = vpop.xlane.xlu0 %14070 }
 0xec7   : > { %v14072_v53 = vsub.f32 %v14067_v58, %v14071_v29 }
 0xec9   : > { %v14073_v40 = vmul.f32 1.442695, %v14072_v53 }
 0xecb   : > { %19319 = vpow2.f32 %v14073_v40 }
 0xed5   : > { %v19320_v30 = vpop.eup %19319 }
 0xed6   : > { %v14075_v32 = vsel %vm14066_vm4, %v19320_v30, 0.0 }
 0xed7   : > { %v14076_v11 = vsel %vm14068_vm5, %v14075_v32, 0.0 }
 0xed8   : > { %14077 = vadd.xlane.f32.xlu0 %v14076_v11 }
 0xf65   : > { %v14078_v56 = vpop.xlane.xlu0 %14077 }
 0xf66   : > { %19321 = vlog2.f32 %v14078_v56 }
 0xf70   : > { %v19322_v19 = vpop.eup %19321 }
 0xf71   : > { %v14080_v63 = vmul.f32 0.6931472, %v19322_v19 }
 0xf73   : > { %v14081_v47 = vsub.f32 %v14072_v53, %v14080_v63 }
 0xf75   : > { %14082 = vst [vmem:[%s405_s17] sm:$0x1] %v14081_v47 }
 0xf76   : > { %19337 = shalt.err (!%p19334_p3)
}
 0xf77   : > { %s19338_s16 = scalar_lea.hbm %s24736_s0, 16  ;;  %s19342_s17 = scalar_lea.hbm %s24790_s12, 32 }
 0xf78   : > { %p19339_p4 = scmp.ne.s32.totalorder %s24736_s0, %s19338_s16  ;;  %p19343_p9 = scmp.lt.u32.totalorder %s24736_s0, %s24790_s12 }
 0xf79   : > { %p19344_p10 = scmp.lt.u32.totalorder %s19342_s17, %s19338_s16  ;;  %p19346_p12 = scmp.lt.u32.totalorder %s19338_s16, %s24736_s0 }
 0xf7a   : > { %p19340_p7 = pnand %p19339_p4, %p19496_p5 }
 0xf7b   : > { %p19345_p11 = por %p19344_p10, %p19343_p9 }
 0xf7c   : > { %p19341_p8 = pneg %p19340_p7 }
 0xf7d   : > { %p19347_p13 = por %p19346_p12, %p19345_p11 }
 0xf7f   : > { %p19348_p0 = pnand %p19347_p13, %p19341_p8 }
 0xf81   : > { %19351 = shalt.err (!%p19348_p0)
}
 0xf82   : > { %17682 = dma.vmem_to_hbm [thread:$0]  (%p19496_p5), %s24738_s18, 16, %s24736_s0, %s14084_s26  }
 0xf83 PF: > { %p17688_p1 = scmp.ge.s32.totalorder %s19386_s24, 2  ;;  %s14108_s28 = sand.u32 1, %s19374_s21  }
 0xf84   : > { %s14109_s25 = scalar_lea.sflag [#allocation3], %s14108_s28 }
 0xf85   : > { %p17685_p2 = pnand %p17688_p1, %p19500_p6 }
 0xf87   : > { %19369 = dma.done.wait (!%p17685_p2), %s14109_s25, 16  }
 0xf88   : > { %19371 = vsyncadd (!%p17685_p2), %s14109_s25, 4294967280  ;;  %p22_p3 = scmp.ge.s32.totalorder %s19483_s27, 4   ;;  %s24902_s21 = smov %s19378_s22 }
 0xf89   : > { %s24903_s22 = smov %s19382_s23  ;;  %s24904_s23 = smov %s19494_s30 }
 0xf8a   : > { %s24905_s24 = smov %s19483_s27  ;;  %24 = sbr.rel (!%p22_p3) target bundleno = 7 (0x7), region = 124 }
 0xf91   :  { %14113 = vsyncpa [#allocation3], 1 }
 0xf92   :  { %14115 = vsyncpa [#allocation3 + $0x1], 1 }

</bundles_post_ra>
